<compile_context>
chip_gen: v5e
topology: v5e:2x2
jax: 0.10.0
libtpu: 0.0.40
codegen_flags: <defaults>
</compile_context>

<pallas_src>
import functools

import jax
import jax.numpy as jnp
from jax.experimental import pallas as pl
from jax.experimental.pallas import tpu as pltpu


# ----------------------------------------------------------------------------
# In-kernel helpers (operate on traced values + VMEM scratch refs)
# ----------------------------------------------------------------------------
def _reflect_pad_store(pad_ref, x, pad):
    """Write reflection-padded `x` (H, W, C) into pad_ref ((H+2p, W+2p, C)).

    Matches nn.ReflectionPad2d: out[p-1-t] = x[1+t], out[p+H+t] = x[H-2-t];
    columns are reflected from the row-padded tensor (so corners are correct).
    All writes are static-index ref stores (no value concats).
    """
    H, W, _ = x.shape
    # interior
    pad_ref[pad:pad + H, pad:pad + W, :] = x
    # top / bottom border rows (interior columns), reflected from x
    for t in range(pad):
        pad_ref[pad - 1 - t:pad - t, pad:pad + W, :] = x[1 + t:2 + t]
        pad_ref[pad + H + t:pad + H + t + 1, pad:pad + W, :] = x[H - 2 - t:H - 1 - t]
    # left / right border columns (all rows incl. corners), reflected from the
    # row-padded scratch itself
    for t in range(pad):
        pad_ref[:, pad - 1 - t:pad - t, :] = pad_ref[:, pad + 1 + t:pad + 2 + t, :]
        pad_ref[:, pad + W + t:pad + W + t + 1, :] = \
            pad_ref[:, pad + W - 2 - t:pad + W - 1 - t, :]


def _conv2d_reflect(pad_ref, x, w_row, K):
    """Reflection-pad + valid stride-1 KxK conv.

    pad_ref: VMEM scratch (H+2p, W+2p, Cin) bf16 (overwritten here)
    x:       (H, W, Cin) bf16 value
    w_row:   callable kh -> (KW*Cin, Cout) bf16 value (im2col-row weights)
    returns  (H, W, Cout) f32 value.
    """
    H, W, _ = x.shape
    pad = (K - 1) // 2
    _reflect_pad_store(pad_ref, x, pad)
    xp = pad_ref[...]                                        # (H+2p, W+2p, C)
    # Hoisted KW fold: ONE lane-axis concat per conv.  The kh loop below only
    # takes leading-axis row slices of xs, which never cross (8,128) tiles.
    xs = jnp.concatenate([xp[:, kw:kw + W, :] for kw in range(K)], axis=-1)
    acc = None
    for kh in range(K):
        part = jnp.einsum('hwk,ko->hwo', xs[kh:kh + H], w_row(kh),
                          preferred_element_type=jnp.float32)
        acc = part if acc is None else acc + part
    return acc


# ----------------------------------------------------------------------------
# Kernel 1: fused chain of all ResBlks (grid = (batch, resblk))
# ----------------------------------------------------------------------------
def _resblk_chain_kernel(x_ref, w_ref, o_ref, xacc_ref, pad_ref):
    # x_ref : (1, H, W, C)            bf16 (initial activation)
    # w_ref : (1, 2, KS, KS*C, C)     bf16 (this block's two conv weights)
    # o_ref : (1, H, W, C)            bf16 (final activation)
    # xacc  : (H, W, C)               f32  carry across the resblk grid axis
    # pad   : (H+2p, W+2p, C)         bf16 reflection-pad scratch (reused)
    r = pl.program_id(1)
    ks = w_ref.shape[2]

    @pl.when(r == 0)
    def _():
        xacc_ref[...] = x_ref[0].astype(jnp.float32)

    x_bf = xacc_ref[...].astype(jnp.bfloat16)
    # cba_1: reflect-pad + conv + ReLU
    y = _conv2d_reflect(pad_ref, x_bf, lambda kh: w_ref[0, 0, kh], ks)
    y = jnp.maximum(y, 0.0).astype(jnp.bfloat16)
    # cba_2: reflect-pad + conv (no activation) + fused residual add
    z = _conv2d_reflect(pad_ref, y, lambda kh: w_ref[0, 1, kh], ks)
    xacc_ref[...] = z + xacc_ref[...]

    # Output block index is constant across r, so the block stays VMEM-resident
    # and is written back to HBM only after the last resblk (canonical
    # accumulator pattern; intentional, not relying on per-iteration writeback).
    @pl.when(r == pl.num_programs(1) - 1)
    def _():
        o_ref[0] = xacc_ref[...].astype(o_ref.dtype)


def resblk_chain(x_nhwc, w_stack):
    """x_nhwc: (N, H, W, C) bf16; w_stack: (R, 2, KS, KS*C, C) bf16."""
    N, H, W, C = x_nhwc.shape
    R, _, ks, kc, _ = w_stack.shape
    pad = (ks - 1) // 2
    Hp, Wp = H + 2 * pad, W + 2 * pad
    act = H * W * C
    # VMEM budget: double-buffered bf16 in/out blocks + weights, f32 carry,
    # bf16 pad scratch, im2col fold + f32 accumulator temporaries, 2x headroom.
    need = (2 * act * 2 + 2 * act * 2 + 2 * (2 * ks * kc * C) * 2
            + act * 4 + Hp * Wp * C * 2 + Hp * W * kc * 2 + 3 * act * 4)
    vmem_limit = int(min(max(2 * need, 32 << 20), 100 << 20))
    flops = 2 * N * R * 2 * H * W * ks * ks * C * C
    bytes_accessed = 2 * N * act * 2 + R * 2 * ks * kc * C * 2

    return pl.pallas_call(
        _resblk_chain_kernel,
        out_shape=jax.ShapeDtypeStruct((N, H, W, C), jnp.bfloat16),
        grid_spec=pltpu.PrefetchScalarGridSpec(
            num_scalar_prefetch=0,
            grid=(N, R),
            in_specs=[
                pl.BlockSpec((1, H, W, C), lambda n, r: (n, 0, 0, 0)),
                pl.BlockSpec((1, 2, ks, kc, C), lambda n, r: (r, 0, 0, 0, 0)),
            ],
            out_specs=pl.BlockSpec((1, H, W, C), lambda n, r: (n, 0, 0, 0)),
            scratch_shapes=[
                pltpu.VMEM((H, W, C), jnp.float32),        # residual carry
                pltpu.VMEM((Hp, Wp, C), jnp.bfloat16),     # reflection pad
            ],
        ),
        compiler_params=pltpu.CompilerParams(
            dimension_semantics=("parallel", "arbitrary"),
            vmem_limit_bytes=vmem_limit),
        cost_estimate=pl.CostEstimate(
            flops=int(flops), transcendentals=0,
            bytes_accessed=int(bytes_accessed)),
    )(x_nhwc, w_stack)


# ----------------------------------------------------------------------------
# Kernel 2: fused decoder head (cba_1: 3x3 ReLU  +  cba_2: 7x7 no-act)
# ----------------------------------------------------------------------------
def _head_kernel(x_ref, w1_ref, w2_ref, o_ref, pad1_ref, pad2_ref):
    # x_ref : (1, H, W, 64) bf16   (already 2x-upsampled)
    # w1_ref: (3, 3*64, 32) bf16
    # w2_ref: (7, 7*32, Cp) bf16   (Cout zero-padded to 8 lanes)
    # o_ref : (1, H, W, Cp) f32
    k1 = w1_ref.shape[0]
    k2 = w2_ref.shape[0]
    x = x_ref[0]
    y = _conv2d_reflect(pad1_ref, x, lambda kh: w1_ref[kh], k1)
    y = jnp.maximum(y, 0.0).astype(jnp.bfloat16)
    z = _conv2d_reflect(pad2_ref, y, lambda kh: w2_ref[kh], k2)
    o_ref[0] = z.astype(o_ref.dtype)


def decoder_head(x_nhwc, w1, w2):
    N, H, W, C = x_nhwc.shape
    k1, _, cmid = w1.shape
    k2, _, cout_p = w2.shape
    p1, p2 = (k1 - 1) // 2, (k2 - 1) // 2
    need = (2 * H * W * C * 2 + 2 * H * W * cout_p * 4
            + (H + 2 * p1) * (W + 2 * p1) * C * 2
            + (H + 2 * p2) * (W + 2 * p2) * cmid * 2
            + (H + 2 * p1) * W * k1 * C * 2
            + (H + 2 * p2) * W * k2 * cmid * 2
            + 3 * H * W * max(cmid, cout_p) * 4)
    vmem_limit = int(min(max(2 * need, 32 << 20), 100 << 20))
    flops = 2 * N * H * W * (k1 * k1 * C * cmid + k2 * k2 * cmid * cout_p)
    bytes_accessed = N * H * W * (C * 2 + cout_p * 4) + int(w1.size + w2.size) * 2

    return pl.pallas_call(
        _head_kernel,
        out_shape=jax.ShapeDtypeStruct((N, H, W, cout_p), jnp.float32),
        grid_spec=pltpu.PrefetchScalarGridSpec(
            num_scalar_prefetch=0,
            grid=(N,),
            in_specs=[
                pl.BlockSpec((1, H, W, C), lambda n: (n, 0, 0, 0)),
                pl.BlockSpec(w1.shape, lambda n: (0, 0, 0)),
                pl.BlockSpec(w2.shape, lambda n: (0, 0, 0)),
            ],
            out_specs=pl.BlockSpec((1, H, W, cout_p), lambda n: (n, 0, 0, 0)),
            scratch_shapes=[
                pltpu.VMEM((H + 2 * p1, W + 2 * p1, C), jnp.bfloat16),
                pltpu.VMEM((H + 2 * p2, W + 2 * p2, cmid), jnp.bfloat16),
            ],
        ),
        compiler_params=pltpu.CompilerParams(
            dimension_semantics=("parallel",),
            vmem_limit_bytes=vmem_limit),
        cost_estimate=pl.CostEstimate(
            flops=int(flops), transcendentals=0,
            bytes_accessed=int(bytes_accessed)),
    )(x_nhwc, w1, w2)


# ----------------------------------------------------------------------------
# XLA-side glue (data movement only): upsample / resize / concat / transpose
# ----------------------------------------------------------------------------
def _upsample_nearest_2x(x_nhwc):
    return jnp.repeat(jnp.repeat(x_nhwc, 2, axis=1), 2, axis=2)


def _nearest_resize(x_nhwc, out_h, out_w):
    # F.interpolate(mode='nearest') index rule: src = floor(dst * in / out)
    N, H, W, C = x_nhwc.shape
    hi = (jnp.arange(out_h) * H // out_h).astype(jnp.int32)
    wi = (jnp.arange(out_w) * W // out_w).astype(jnp.int32)
    return x_nhwc[:, hi][:, :, wi]


def torch_conv_to_im2col_rows(w_oihw):
    """Convert a PyTorch Conv2d weight (Cout, Cin, KH, KW) to the kernels'
    im2col-row layout (KH, KW*Cin, Cout)."""
    cout, cin, kh, kw = w_oihw.shape
    return jnp.transpose(w_oihw, (2, 3, 1, 0)).reshape(kh, kw * cin, cout)


# ----------------------------------------------------------------------------
# Params (deterministic He-style init, matching the PyTorch layer shapes;
# Conv2d(..., bias=None) in the reference => no biases anywhere).
# NOTE: real PyTorch weights must go through torch_conv_to_im2col_rows().
# ----------------------------------------------------------------------------
def init_decoder_params(key, dim_out=3, num_resblk=9):
    def conv_w(k, kh, kw, cin, cout):
        scale = (2.0 / (kh * kw * cin)) ** 0.5
        return jax.random.normal(k, (kh, kw, cin, cout), jnp.float32) * scale

    keys = jax.random.split(key, 2 * num_resblk + 2)
    w1s, w2s = [], []
    for i in range(num_resblk):
        w1s.append(conv_w(keys[2 * i], 3, 3, 64, 64))      # ResBlk.cba_1 (ReLU)
        w2s.append(conv_w(keys[2 * i + 1], 3, 3, 64, 64))  # ResBlk.cba_2
    # Stack to (R, 2, KH, KW*Cin, Cout), im2col-row layout, bf16.
    resblk_w = jnp.stack([jnp.stack(w1s), jnp.stack(w2s)], axis=1)
    resblk_w = resblk_w.reshape(num_resblk, 2, 3, 3 * 64, 64).astype(jnp.bfloat16)

    cba1_w = conv_w(keys[-2], 3, 3, 64, 32)
    cba1_w = cba1_w.reshape(3, 3 * 64, 32).astype(jnp.bfloat16)

    cba2_w = conv_w(keys[-1], 7, 7, 32, dim_out)
    cout_p = max(8, dim_out)                       # pad Cout 3 -> 8 for the store
    cba2_w = jnp.pad(cba2_w, ((0, 0), (0, 0), (0, 0), (0, cout_p - dim_out)))
    cba2_w = cba2_w.reshape(7, 7 * 32, cout_p).astype(jnp.bfloat16)

    return {'resblk_w': resblk_w, 'cba1_w': cba1_w, 'cba2_w': cba2_w}


# ----------------------------------------------------------------------------
# Full Decoder forward (matches the PyTorch module semantics)
# ----------------------------------------------------------------------------
def decoder_forward(params, texture_nchw, motion_nchw,
                    texture_downsample=True, dim_out=3):
    # NCHW (PyTorch) -> NHWC (kernel layout)
    texture = jnp.transpose(texture_nchw, (0, 2, 3, 1))
    motion = jnp.transpose(motion_nchw, (0, 2, 3, 1))

    if texture_downsample:
        texture = _upsample_nearest_2x(texture)           # UpsamplingNearest2d(2)
    if texture.shape != motion.shape:
        texture = _nearest_resize(texture, motion.shape[1], motion.shape[2])

    x = jnp.concatenate([texture, motion], axis=-1)       # channel cat -> 64
    assert x.shape[1] > 1 and x.shape[2] > 1, "reflection pad=1 needs dims > 1"
    x = x.astype(jnp.bfloat16)

    x = resblk_chain(x, params['resblk_w'])               # fused 9x ResBlk
    x = _upsample_nearest_2x(x)                           # Decoder.up
    assert x.shape[1] > 3 and x.shape[2] > 3, "reflection pad=3 needs dims > 3"
    out = decoder_head(x, params['cba1_w'], params['cba2_w'])   # cba_1 + cba_2
    out = out[..., :dim_out]                              # drop Cout padding

    return jnp.transpose(out, (0, 3, 1, 2))               # back to NCHW, f32


if __name__ == "__main__":
    key = jax.random.PRNGKey(0)
    k_t, k_m, k_p = jax.random.split(key, 3)

    # texture at half resolution (texture_downsample=True), motion at full res.
    texture = jax.random.normal(k_t, (2, 32, 4, 4), jnp.float32)   # NCHW
    motion = jax.random.normal(k_m, (2, 32, 8, 8), jnp.float32)    # NCHW

    params = init_decoder_params(k_p, dim_out=3, num_resblk=9)

    fwd = jax.jit(functools.partial(decoder_forward,
                                    texture_downsample=True, dim_out=3))
    out = fwd(params, texture, motion)
    jax.block_until_ready(out)

    assert out.shape == (2, 3, 16, 16), out.shape
    print("KERNEL_OK")
</pallas_src>

<mosaic_0001>
module attributes {stable_mosaic.version = 11 : i64} {
  func.func @_resblk_chain_kernel(%arg0: i32, %arg1: i32, %arg2: memref<1x8x8x64xbf16, #tpu.memory_space<vmem>>, %arg3: memref<1x2x3x192x64xbf16, #tpu.memory_space<vmem>>, %arg4: memref<1x8x8x64xbf16, #tpu.memory_space<vmem>>, %arg5: memref<8x8x64xf32, #tpu.memory_space<vmem>>, %arg6: memref<10x10x64xbf16, #tpu.memory_space<vmem>>) attributes {dimension_semantics = [#tpu.dimension_semantics<parallel>, #tpu.dimension_semantics<arbitrary>], iteration_bounds = array<i64: 2, 9>, scalar_prefetch = 0 : i64, scratch_operands = 2 : i64, tpu.core_type = #tpu.core_type<tc>, window_params = [{transform_indices = @transform_0, window_bounds = array<i64: 1, 8, 8, 64>}, {transform_indices = @transform_1, window_bounds = array<i64: 1, 2, 3, 192, 64>}, {transform_indices = @transform_2, window_bounds = array<i64: 1, 8, 8, 64>}]} {
    %c0_i32 = arith.constant 0 : i32
    %0 = arith.cmpi eq, %arg1, %c0_i32 : i32
    %1 = arith.extui %0 : i1 to i32
    %c0_i32_0 = arith.constant 0 : i32
    %2 = arith.cmpi ne, %1, %c0_i32_0 : i32
    scf.if %2 {
      %c0_90 = arith.constant 0 : index
      %c0_91 = arith.constant 0 : index
      %c0_92 = arith.constant 0 : index
      %c0_93 = arith.constant 0 : index
      %70 = vector.load %arg2[%c0_90, %c0_91, %c0_92, %c0_93] : memref<1x8x8x64xbf16, #tpu.memory_space<vmem>>, vector<1x8x8x64xbf16>
      %71 = vector.shape_cast %70 : vector<1x8x8x64xbf16> to vector<8x8x64xbf16>
      %72 = arith.extf %71 : vector<8x8x64xbf16> to vector<8x8x64xf32>
      %c0_94 = arith.constant 0 : index
      %c0_95 = arith.constant 0 : index
      %c0_96 = arith.constant 0 : index
      %73 = vector.load %arg5[%c0_94, %c0_95, %c0_96] : memref<8x8x64xf32, #tpu.memory_space<vmem>>, vector<8x8x64xf32>
      tpu.vector_store %arg5[%c0_94, %c0_95, %c0_96], %72 {strides = array<i32>} : memref<8x8x64xf32, #tpu.memory_space<vmem>>, vector<8x8x64xf32>,
    } else {
    }
    %c0 = arith.constant 0 : index
    %c0_1 = arith.constant 0 : index
    %c0_2 = arith.constant 0 : index
    %3 = vector.load %arg5[%c0, %c0_1, %c0_2] : memref<8x8x64xf32, #tpu.memory_space<vmem>>, vector<8x8x64xf32>
    %4 = arith.truncf %3 : vector<8x8x64xf32> to vector<8x8x64xbf16>
    %c1 = arith.constant 1 : index
    %c1_3 = arith.constant 1 : index
    %c0_4 = arith.constant 0 : index
    %5 = vector.load %arg6[%c1, %c1_3, %c0_4] : memref<10x10x64xbf16, #tpu.memory_space<vmem>>, vector<8x8x64xbf16>
    tpu.vector_store %arg6[%c1, %c1_3, %c0_4], %4 {strides = array<i32>} : memref<10x10x64xbf16, #tpu.memory_space<vmem>>, vector<8x8x64xbf16>,
    %6 = vector.extract_strided_slice %4 {offsets = [1, 0, 0], sizes = [1, 8, 64], strides = [1, 1, 1]} : vector<8x8x64xbf16> to vector<1x8x64xbf16>
    %c0_5 = arith.constant 0 : index
    %c1_6 = arith.constant 1 : index
    %c0_7 = arith.constant 0 : index
    %7 = vector.load %arg6[%c0_5, %c1_6, %c0_7] : memref<10x10x64xbf16, #tpu.memory_space<vmem>>, vector<1x8x64xbf16>
    tpu.vector_store %arg6[%c0_5, %c1_6, %c0_7], %6 {strides = array<i32>} : memref<10x10x64xbf16, #tpu.memory_space<vmem>>, vector<1x8x64xbf16>,
    %8 = vector.extract_strided_slice %4 {offsets = [6, 0, 0], sizes = [1, 8, 64], strides = [1, 1, 1]} : vector<8x8x64xbf16> to vector<1x8x64xbf16>
    %c9 = arith.constant 9 : index
    %c1_8 = arith.constant 1 : index
    %c0_9 = arith.constant 0 : index
    %9 = vector.load %arg6[%c9, %c1_8, %c0_9] : memref<10x10x64xbf16, #tpu.memory_space<vmem>>, vector<1x8x64xbf16>
    tpu.vector_store %arg6[%c9, %c1_8, %c0_9], %8 {strides = array<i32>} : memref<10x10x64xbf16, #tpu.memory_space<vmem>>, vector<1x8x64xbf16>,
    %c0_10 = arith.constant 0 : index
    %c2 = arith.constant 2 : index
    %c0_11 = arith.constant 0 : index
    %10 = vector.load %arg6[%c0_10, %c2, %c0_11] : memref<10x10x64xbf16, #tpu.memory_space<vmem>>, vector<10x1x64xbf16>
    %c0_12 = arith.constant 0 : index
    %c0_13 = arith.constant 0 : index
    %c0_14 = arith.constant 0 : index
    %11 = vector.load %arg6[%c0_12, %c0_13, %c0_14] : memref<10x10x64xbf16, #tpu.memory_space<vmem>>, vector<10x1x64xbf16>
    tpu.vector_store %arg6[%c0_12, %c0_13, %c0_14], %10 {strides = array<i32>} : memref<10x10x64xbf16, #tpu.memory_space<vmem>>, vector<10x1x64xbf16>,
    %c0_15 = arith.constant 0 : index
    %c7 = arith.constant 7 : index
    %c0_16 = arith.constant 0 : index
    %12 = vector.load %arg6[%c0_15, %c7, %c0_16] : memref<10x10x64xbf16, #tpu.memory_space<vmem>>, vector<10x1x64xbf16>
    %c0_17 = arith.constant 0 : index
    %c9_18 = arith.constant 9 : index
    %c0_19 = arith.constant 0 : index
    %13 = vector.load %arg6[%c0_17, %c9_18, %c0_19] : memref<10x10x64xbf16, #tpu.memory_space<vmem>>, vector<10x1x64xbf16>
    tpu.vector_store %arg6[%c0_17, %c9_18, %c0_19], %12 {strides = array<i32>} : memref<10x10x64xbf16, #tpu.memory_space<vmem>>, vector<10x1x64xbf16>,
    %c0_20 = arith.constant 0 : index
    %c0_21 = arith.constant 0 : index
    %c0_22 = arith.constant 0 : index
    %14 = vector.load %arg6[%c0_20, %c0_21, %c0_22] : memref<10x10x64xbf16, #tpu.memory_space<vmem>>, vector<10x10x64xbf16>
    %15 = vector.extract_strided_slice %14 {offsets = [0, 0, 0], sizes = [10, 8, 64], strides = [1, 1, 1]} : vector<10x10x64xbf16> to vector<10x8x64xbf16>
    %16 = vector.extract_strided_slice %14 {offsets = [0, 1, 0], sizes = [10, 8, 64], strides = [1, 1, 1]} : vector<10x10x64xbf16> to vector<10x8x64xbf16>
    %17 = vector.extract_strided_slice %14 {offsets = [0, 2, 0], sizes = [10, 8, 64], strides = [1, 1, 1]} : vector<10x10x64xbf16> to vector<10x8x64xbf16>
    %18 = tpu.concatenate %15, %16, %17 in 2 : vector<10x8x64xbf16>, vector<10x8x64xbf16>, vector<10x8x64xbf16> -> vector<10x8x192xbf16>
    %19 = vector.extract_strided_slice %18 {offsets = [0, 0, 0], sizes = [8, 8, 192], strides = [1, 1, 1]} : vector<10x8x192xbf16> to vector<8x8x192xbf16>
    %c0_23 = arith.constant 0 : index
    %c0_24 = arith.constant 0 : index
    %c0_25 = arith.constant 0 : index
    %c0_26 = arith.constant 0 : index
    %c0_27 = arith.constant 0 : index
    %20 = vector.load %arg3[%c0_23, %c0_24, %c0_25, %c0_26, %c0_27] : memref<1x2x3x192x64xbf16, #tpu.memory_space<vmem>>, vector<1x1x1x192x64xbf16>
    %21 = vector.shape_cast %20 : vector<1x1x1x192x64xbf16> to vector<192x64xbf16>
    "tpu.trace_start"() <{level = 10 : i32, message = "hwk,ko->hwo"}> : () -> ()
    %cst = arith.constant dense<0.000000e+00> : vector<8x8x64xf32>
    %22 = tpu.matmul %19, %21, %cst {dimension_numbers = #tpu.dot_dimension_numbers<[2], [0], [0, 1], [1], [0, 0, 0, 1, 1, 1], [], []>} : vector<8x8x192xbf16>, vector<192x64xbf16>, vector<8x8x64xf32> -> vector<8x8x64xf32>
    "tpu.trace_stop"() : () -> ()
    %23 = vector.extract_strided_slice %18 {offsets = [1, 0, 0], sizes = [8, 8, 192], strides = [1, 1, 1]} : vector<10x8x192xbf16> to vector<8x8x192xbf16>
    %c0_28 = arith.constant 0 : index
    %c0_29 = arith.constant 0 : index
    %c1_30 = arith.constant 1 : index
    %c0_31 = arith.constant 0 : index
    %c0_32 = arith.constant 0 : index
    %24 = vector.load %arg3[%c0_28, %c0_29, %c1_30, %c0_31, %c0_32] : memref<1x2x3x192x64xbf16, #tpu.memory_space<vmem>>, vector<1x1x1x192x64xbf16>
    %25 = vector.shape_cast %24 : vector<1x1x1x192x64xbf16> to vector<192x64xbf16>
    "tpu.trace_start"() <{level = 10 : i32, message = "hwk,ko->hwo"}> : () -> ()
    %cst_33 = arith.constant dense<0.000000e+00> : vector<8x8x64xf32>
    %26 = tpu.matmul %23, %25, %cst_33 {dimension_numbers = #tpu.dot_dimension_numbers<[2], [0], [0, 1], [1], [0, 0, 0, 1, 1, 1], [], []>} : vector<8x8x192xbf16>, vector<192x64xbf16>, vector<8x8x64xf32> -> vector<8x8x64xf32>
    "tpu.trace_stop"() : () -> ()
    %27 = arith.addf %22, %26 : vector<8x8x64xf32>
    %28 = vector.extract_strided_slice %18 {offsets = [2, 0, 0], sizes = [8, 8, 192], strides = [1, 1, 1]} : vector<10x8x192xbf16> to vector<8x8x192xbf16>
    %c0_34 = arith.constant 0 : index
    %c0_35 = arith.constant 0 : index
    %c2_36 = arith.constant 2 : index
    %c0_37 = arith.constant 0 : index
    %c0_38 = arith.constant 0 : index
    %29 = vector.load %arg3[%c0_34, %c0_35, %c2_36, %c0_37, %c0_38] : memref<1x2x3x192x64xbf16, #tpu.memory_space<vmem>>, vector<1x1x1x192x64xbf16>
    %30 = vector.shape_cast %29 : vector<1x1x1x192x64xbf16> to vector<192x64xbf16>
    "tpu.trace_start"() <{level = 10 : i32, message = "hwk,ko->hwo"}> : () -> ()
    %cst_39 = arith.constant dense<0.000000e+00> : vector<8x8x64xf32>
    %31 = tpu.matmul %28, %30, %cst_39 {dimension_numbers = #tpu.dot_dimension_numbers<[2], [0], [0, 1], [1], [0, 0, 0, 1, 1, 1], [], []>} : vector<8x8x192xbf16>, vector<192x64xbf16>, vector<8x8x64xf32> -> vector<8x8x64xf32>
    "tpu.trace_stop"() : () -> ()
    %32 = arith.addf %27, %31 : vector<8x8x64xf32>
    %cst_40 = arith.constant 0.000000e+00 : f32
    %33 = vector.broadcast %cst_40 : f32 to vector<8x8x64xf32>
    %34 = arith.maximumf %32, %33 : vector<8x8x64xf32>
    %35 = arith.truncf %34 : vector<8x8x64xf32> to vector<8x8x64xbf16>
    %c1_41 = arith.constant 1 : index
    %c1_42 = arith.constant 1 : index
    %c0_43 = arith.constant 0 : index
    %36 = vector.load %arg6[%c1_41, %c1_42, %c0_43] : memref<10x10x64xbf16, #tpu.memory_space<vmem>>, vector<8x8x64xbf16>
    tpu.vector_store %arg6[%c1_41, %c1_42, %c0_43], %35 {strides = array<i32>} : memref<10x10x64xbf16, #tpu.memory_space<vmem>>, vector<8x8x64xbf16>,
    %37 = vector.extract_strided_slice %35 {offsets = [1, 0, 0], sizes = [1, 8, 64], strides = [1, 1, 1]} : vector<8x8x64xbf16> to vector<1x8x64xbf16>
    %c0_44 = arith.constant 0 : index
    %c1_45 = arith.constant 1 : index
    %c0_46 = arith.constant 0 : index
    %38 = vector.load %arg6[%c0_44, %c1_45, %c0_46] : memref<10x10x64xbf16, #tpu.memory_space<vmem>>, vector<1x8x64xbf16>
    tpu.vector_store %arg6[%c0_44, %c1_45, %c0_46], %37 {strides = array<i32>} : memref<10x10x64xbf16, #tpu.memory_space<vmem>>, vector<1x8x64xbf16>,
    %39 = vector.extract_strided_slice %35 {offsets = [6, 0, 0], sizes = [1, 8, 64], strides = [1, 1, 1]} : vector<8x8x64xbf16> to vector<1x8x64xbf16>
    %c9_47 = arith.constant 9 : index
    %c1_48 = arith.constant 1 : index
    %c0_49 = arith.constant 0 : index
    %40 = vector.load %arg6[%c9_47, %c1_48, %c0_49] : memref<10x10x64xbf16, #tpu.memory_space<vmem>>, vector<1x8x64xbf16>
    tpu.vector_store %arg6[%c9_47, %c1_48, %c0_49], %39 {strides = array<i32>} : memref<10x10x64xbf16, #tpu.memory_space<vmem>>, vector<1x8x64xbf16>,
    %c0_50 = arith.constant 0 : index
    %c2_51 = arith.constant 2 : index
    %c0_52 = arith.constant 0 : index
    %41 = vector.load %arg6[%c0_50, %c2_51, %c0_52] : memref<10x10x64xbf16, #tpu.memory_space<vmem>>, vector<10x1x64xbf16>
    %c0_53 = arith.constant 0 : index
    %c0_54 = arith.constant 0 : index
    %c0_55 = arith.constant 0 : index
    %42 = vector.load %arg6[%c0_53, %c0_54, %c0_55] : memref<10x10x64xbf16, #tpu.memory_space<vmem>>, vector<10x1x64xbf16>
    tpu.vector_store %arg6[%c0_53, %c0_54, %c0_55], %41 {strides = array<i32>} : memref<10x10x64xbf16, #tpu.memory_space<vmem>>, vector<10x1x64xbf16>,
    %c0_56 = arith.constant 0 : index
    %c7_57 = arith.constant 7 : index
    %c0_58 = arith.constant 0 : index
    %43 = vector.load %arg6[%c0_56, %c7_57, %c0_58] : memref<10x10x64xbf16, #tpu.memory_space<vmem>>, vector<10x1x64xbf16>
    %c0_59 = arith.constant 0 : index
    %c9_60 = arith.constant 9 : index
    %c0_61 = arith.constant 0 : index
    %44 = vector.load %arg6[%c0_59, %c9_60, %c0_61] : memref<10x10x64xbf16, #tpu.memory_space<vmem>>, vector<10x1x64xbf16>
    tpu.vector_store %arg6[%c0_59, %c9_60, %c0_61], %43 {strides = array<i32>} : memref<10x10x64xbf16, #tpu.memory_space<vmem>>, vector<10x1x64xbf16>,
    %c0_62 = arith.constant 0 : index
    %c0_63 = arith.constant 0 : index
    %c0_64 = arith.constant 0 : index
    %45 = vector.load %arg6[%c0_62, %c0_63, %c0_64] : memref<10x10x64xbf16, #tpu.memory_space<vmem>>, vector<10x10x64xbf16>
    %46 = vector.extract_strided_slice %45 {offsets = [0, 0, 0], sizes = [10, 8, 64], strides = [1, 1, 1]} : vector<10x10x64xbf16> to vector<10x8x64xbf16>
    %47 = vector.extract_strided_slice %45 {offsets = [0, 1, 0], sizes = [10, 8, 64], strides = [1, 1, 1]} : vector<10x10x64xbf16> to vector<10x8x64xbf16>
    %48 = vector.extract_strided_slice %45 {offsets = [0, 2, 0], sizes = [10, 8, 64], strides = [1, 1, 1]} : vector<10x10x64xbf16> to vector<10x8x64xbf16>
    %49 = tpu.concatenate %46, %47, %48 in 2 : vector<10x8x64xbf16>, vector<10x8x64xbf16>, vector<10x8x64xbf16> -> vector<10x8x192xbf16>
    %50 = vector.extract_strided_slice %49 {offsets = [0, 0, 0], sizes = [8, 8, 192], strides = [1, 1, 1]} : vector<10x8x192xbf16> to vector<8x8x192xbf16>
    %c0_65 = arith.constant 0 : index
    %c1_66 = arith.constant 1 : index
    %c0_67 = arith.constant 0 : index
    %c0_68 = arith.constant 0 : index
    %c0_69 = arith.constant 0 : index
    %51 = vector.load %arg3[%c0_65, %c1_66, %c0_67, %c0_68, %c0_69] : memref<1x2x3x192x64xbf16, #tpu.memory_space<vmem>>, vector<1x1x1x192x64xbf16>
    %52 = vector.shape_cast %51 : vector<1x1x1x192x64xbf16> to vector<192x64xbf16>
    "tpu.trace_start"() <{level = 10 : i32, message = "hwk,ko->hwo"}> : () -> ()
    %cst_70 = arith.constant dense<0.000000e+00> : vector<8x8x64xf32>
    %53 = tpu.matmul %50, %52, %cst_70 {dimension_numbers = #tpu.dot_dimension_numbers<[2], [0], [0, 1], [1], [0, 0, 0, 1, 1, 1], [], []>} : vector<8x8x192xbf16>, vector<192x64xbf16>, vector<8x8x64xf32> -> vector<8x8x64xf32>
    "tpu.trace_stop"() : () -> ()
    %54 = vector.extract_strided_slice %49 {offsets = [1, 0, 0], sizes = [8, 8, 192], strides = [1, 1, 1]} : vector<10x8x192xbf16> to vector<8x8x192xbf16>
    %c0_71 = arith.constant 0 : index
    %c1_72 = arith.constant 1 : index
    %c1_73 = arith.constant 1 : index
    %c0_74 = arith.constant 0 : index
    %c0_75 = arith.constant 0 : index
    %55 = vector.load %arg3[%c0_71, %c1_72, %c1_73, %c0_74, %c0_75] : memref<1x2x3x192x64xbf16, #tpu.memory_space<vmem>>, vector<1x1x1x192x64xbf16>
    %56 = vector.shape_cast %55 : vector<1x1x1x192x64xbf16> to vector<192x64xbf16>
    "tpu.trace_start"() <{level = 10 : i32, message = "hwk,ko->hwo"}> : () -> ()
    %cst_76 = arith.constant dense<0.000000e+00> : vector<8x8x64xf32>
    %57 = tpu.matmul %54, %56, %cst_76 {dimension_numbers = #tpu.dot_dimension_numbers<[2], [0], [0, 1], [1], [0, 0, 0, 1, 1, 1], [], []>} : vector<8x8x192xbf16>, vector<192x64xbf16>, vector<8x8x64xf32> -> vector<8x8x64xf32>
    "tpu.trace_stop"() : () -> ()
    %58 = arith.addf %53, %57 : vector<8x8x64xf32>
    %59 = vector.extract_strided_slice %49 {offsets = [2, 0, 0], sizes = [8, 8, 192], strides = [1, 1, 1]} : vector<10x8x192xbf16> to vector<8x8x192xbf16>
    %c0_77 = arith.constant 0 : index
    %c1_78 = arith.constant 1 : index
    %c2_79 = arith.constant 2 : index
    %c0_80 = arith.constant 0 : index
    %c0_81 = arith.constant 0 : index
    %60 = vector.load %arg3[%c0_77, %c1_78, %c2_79, %c0_80, %c0_81] : memref<1x2x3x192x64xbf16, #tpu.memory_space<vmem>>, vector<1x1x1x192x64xbf16>
    %61 = vector.shape_cast %60 : vector<1x1x1x192x64xbf16> to vector<192x64xbf16>
    "tpu.trace_start"() <{level = 10 : i32, message = "hwk,ko->hwo"}> : () -> ()
    %cst_82 = arith.constant dense<0.000000e+00> : vector<8x8x64xf32>
    %62 = tpu.matmul %59, %61, %cst_82 {dimension_numbers = #tpu.dot_dimension_numbers<[2], [0], [0, 1], [1], [0, 0, 0, 1, 1, 1], [], []>} : vector<8x8x192xbf16>, vector<192x64xbf16>, vector<8x8x64xf32> -> vector<8x8x64xf32>
    "tpu.trace_stop"() : () -> ()
    %63 = arith.addf %58, %62 : vector<8x8x64xf32>
    %c0_83 = arith.constant 0 : index
    %c0_84 = arith.constant 0 : index
    %c0_85 = arith.constant 0 : index
    %64 = vector.load %arg5[%c0_83, %c0_84, %c0_85] : memref<8x8x64xf32, #tpu.memory_space<vmem>>, vector<8x8x64xf32>
    %65 = arith.addf %63, %64 : vector<8x8x64xf32>
    %c0_86 = arith.constant 0 : index
    %c0_87 = arith.constant 0 : index
    %c0_88 = arith.constant 0 : index
    %66 = vector.load %arg5[%c0_86, %c0_87, %c0_88] : memref<8x8x64xf32, #tpu.memory_space<vmem>>, vector<8x8x64xf32>
    tpu.vector_store %arg5[%c0_86, %c0_87, %c0_88], %65 {strides = array<i32>} : memref<8x8x64xf32, #tpu.memory_space<vmem>>, vector<8x8x64xf32>,
    %c8_i32 = arith.constant 8 : i32
    %67 = arith.cmpi eq, %arg1, %c8_i32 : i32
    %68 = arith.extui %67 : i1 to i32
    %c0_i32_89 = arith.constant 0 : i32
    %69 = arith.cmpi ne, %68, %c0_i32_89 : i32
    scf.if %69 {
      %c0_90 = arith.constant 0 : index
      %c0_91 = arith.constant 0 : index
      %c0_92 = arith.constant 0 : index
      %70 = vector.load %arg5[%c0_90, %c0_91, %c0_92] : memref<8x8x64xf32, #tpu.memory_space<vmem>>, vector<8x8x64xf32>
      %71 = arith.truncf %70 : vector<8x8x64xf32> to vector<8x8x64xbf16>
      %c0_93 = arith.constant 0 : index
      %c0_94 = arith.constant 0 : index
      %c0_95 = arith.constant 0 : index
      %c0_96 = arith.constant 0 : index
      %72 = vector.load %arg4[%c0_93, %c0_94, %c0_95, %c0_96] : memref<1x8x8x64xbf16, #tpu.memory_space<vmem>>, vector<1x8x8x64xbf16>
      %73 = vector.shape_cast %72 : vector<1x8x8x64xbf16> to vector<8x8x64xbf16>
      %74 = vector.shape_cast %71 : vector<8x8x64xbf16> to vector<1x8x8x64xbf16>
      tpu.vector_store %arg4[%c0_93, %c0_94, %c0_95, %c0_96], %74 {strides = array<i32>} : memref<1x8x8x64xbf16, #tpu.memory_space<vmem>>, vector<1x8x8x64xbf16>,
    } else {
    }
    return
  }
  func.func @transform_0(%arg0: i32, %arg1: i32) -> (i32, i32, i32, i32) {
    %c0_i32 = arith.constant 0 : i32
    %c0_i32_0 = arith.constant 0 : i32
    %c0_i32_1 = arith.constant 0 : i32
    %c0_i32_2 = arith.constant 0 : i32
    return %arg0, %c0_i32, %c0_i32_0, %c0_i32_1 : i32, i32, i32, i32
  }
  func.func @transform_1(%arg0: i32, %arg1: i32) -> (i32, i32, i32, i32, i32) {
    %c0_i32 = arith.constant 0 : i32
    %c0_i32_0 = arith.constant 0 : i32
    %c0_i32_1 = arith.constant 0 : i32
    %c0_i32_2 = arith.constant 0 : i32
    %c0_i32_3 = arith.constant 0 : i32
    return %arg1, %c0_i32, %c0_i32_0, %c0_i32_1, %c0_i32_2 : i32, i32, i32, i32, i32
  }
  func.func @transform_2(%arg0: i32, %arg1: i32) -> (i32, i32, i32, i32) {
    %c0_i32 = arith.constant 0 : i32
    %c0_i32_0 = arith.constant 0 : i32
    %c0_i32_1 = arith.constant 0 : i32
    %c0_i32_2 = arith.constant 0 : i32
    return %arg0, %c0_i32, %c0_i32_0, %c0_i32_1 : i32, i32, i32, i32
  }
}

module attributes {stable_mosaic.version = 11 : i64} {
  func.func @_head_kernel(%arg0: i32, %arg1: memref<1x16x16x64xbf16, #tpu.memory_space<vmem>>, %arg2: memref<3x192x32xbf16, #tpu.memory_space<vmem>>, %arg3: memref<7x224x8xbf16, #tpu.memory_space<vmem>>, %arg4: memref<1x16x16x8xf32, #tpu.memory_space<vmem>>, %arg5: memref<18x18x64xbf16, #tpu.memory_space<vmem>>, %arg6: memref<22x22x32xbf16, #tpu.memory_space<vmem>>) attributes {dimension_semantics = [#tpu.dimension_semantics<parallel>], iteration_bounds = array<i64: 2>, scalar_prefetch = 0 : i64, scratch_operands = 2 : i64, tpu.core_type = #tpu.core_type<tc>, window_params = [{transform_indices = @transform_0, window_bounds = array<i64: 1, 16, 16, 64>}, {pipeline_mode = #tpu.pipeline_mode<synchronous>, transform_indices = @transform_1, window_bounds = array<i64: 3, 192, 32>}, {pipeline_mode = #tpu.pipeline_mode<synchronous>, transform_indices = @transform_2, window_bounds = array<i64: 7, 224, 8>}, {transform_indices = @transform_3, window_bounds = array<i64: 1, 16, 16, 8>}]} {
    %c0 = arith.constant 0 : index
    %c0_0 = arith.constant 0 : index
    %c0_1 = arith.constant 0 : index
    %c0_2 = arith.constant 0 : index
    %0 = vector.load %arg1[%c0, %c0_0, %c0_1, %c0_2] : memref<1x16x16x64xbf16, #tpu.memory_space<vmem>>, vector<1x16x16x64xbf16>
    %1 = vector.shape_cast %0 : vector<1x16x16x64xbf16> to vector<16x16x64xbf16>
    %c1 = arith.constant 1 : index
    %c1_3 = arith.constant 1 : index
    %c0_4 = arith.constant 0 : index
    %2 = vector.load %arg5[%c1, %c1_3, %c0_4] : memref<18x18x64xbf16, #tpu.memory_space<vmem>>, vector<16x16x64xbf16>
    tpu.vector_store %arg5[%c1, %c1_3, %c0_4], %1 {strides = array<i32>} : memref<18x18x64xbf16, #tpu.memory_space<vmem>>, vector<16x16x64xbf16>,
    %3 = vector.extract_strided_slice %1 {offsets = [1, 0, 0], sizes = [1, 16, 64], strides = [1, 1, 1]} : vector<16x16x64xbf16> to vector<1x16x64xbf16>
    %c0_5 = arith.constant 0 : index
    %c1_6 = arith.constant 1 : index
    %c0_7 = arith.constant 0 : index
    %4 = vector.load %arg5[%c0_5, %c1_6, %c0_7] : memref<18x18x64xbf16, #tpu.memory_space<vmem>>, vector<1x16x64xbf16>
    tpu.vector_store %arg5[%c0_5, %c1_6, %c0_7], %3 {strides = array<i32>} : memref<18x18x64xbf16, #tpu.memory_space<vmem>>, vector<1x16x64xbf16>,
    %5 = vector.extract_strided_slice %1 {offsets = [14, 0, 0], sizes = [1, 16, 64], strides = [1, 1, 1]} : vector<16x16x64xbf16> to vector<1x16x64xbf16>
    %c17 = arith.constant 17 : index
    %c1_8 = arith.constant 1 : index
    %c0_9 = arith.constant 0 : index
    %6 = vector.load %arg5[%c17, %c1_8, %c0_9] : memref<18x18x64xbf16, #tpu.memory_space<vmem>>, vector<1x16x64xbf16>
    tpu.vector_store %arg5[%c17, %c1_8, %c0_9], %5 {strides = array<i32>} : memref<18x18x64xbf16, #tpu.memory_space<vmem>>, vector<1x16x64xbf16>,
    %c0_10 = arith.constant 0 : index
    %c2 = arith.constant 2 : index
    %c0_11 = arith.constant 0 : index
    %7 = vector.load %arg5[%c0_10, %c2, %c0_11] : memref<18x18x64xbf16, #tpu.memory_space<vmem>>, vector<18x1x64xbf16>
    %c0_12 = arith.constant 0 : index
    %c0_13 = arith.constant 0 : index
    %c0_14 = arith.constant 0 : index
    %8 = vector.load %arg5[%c0_12, %c0_13, %c0_14] : memref<18x18x64xbf16, #tpu.memory_space<vmem>>, vector<18x1x64xbf16>
    tpu.vector_store %arg5[%c0_12, %c0_13, %c0_14], %7 {strides = array<i32>} : memref<18x18x64xbf16, #tpu.memory_space<vmem>>, vector<18x1x64xbf16>,
    %c0_15 = arith.constant 0 : index
    %c15 = arith.constant 15 : index
    %c0_16 = arith.constant 0 : index
    %9 = vector.load %arg5[%c0_15, %c15, %c0_16] : memref<18x18x64xbf16, #tpu.memory_space<vmem>>, vector<18x1x64xbf16>
    %c0_17 = arith.constant 0 : index
    %c17_18 = arith.constant 17 : index
    %c0_19 = arith.constant 0 : index
    %10 = vector.load %arg5[%c0_17, %c17_18, %c0_19] : memref<18x18x64xbf16, #tpu.memory_space<vmem>>, vector<18x1x64xbf16>
    tpu.vector_store %arg5[%c0_17, %c17_18, %c0_19], %9 {strides = array<i32>} : memref<18x18x64xbf16, #tpu.memory_space<vmem>>, vector<18x1x64xbf16>,
    %c0_20 = arith.constant 0 : index
    %c0_21 = arith.constant 0 : index
    %c0_22 = arith.constant 0 : index
    %11 = vector.load %arg5[%c0_20, %c0_21, %c0_22] : memref<18x18x64xbf16, #tpu.memory_space<vmem>>, vector<18x18x64xbf16>
    %12 = vector.extract_strided_slice %11 {offsets = [0, 0, 0], sizes = [18, 16, 64], strides = [1, 1, 1]} : vector<18x18x64xbf16> to vector<18x16x64xbf16>
    %13 = vector.extract_strided_slice %11 {offsets = [0, 1, 0], sizes = [18, 16, 64], strides = [1, 1, 1]} : vector<18x18x64xbf16> to vector<18x16x64xbf16>
    %14 = vector.extract_strided_slice %11 {offsets = [0, 2, 0], sizes = [18, 16, 64], strides = [1, 1, 1]} : vector<18x18x64xbf16> to vector<18x16x64xbf16>
    %15 = tpu.concatenate %12, %13, %14 in 2 : vector<18x16x64xbf16>, vector<18x16x64xbf16>, vector<18x16x64xbf16> -> vector<18x16x192xbf16>
    %16 = vector.extract_strided_slice %15 {offsets = [0, 0, 0], sizes = [16, 16, 192], strides = [1, 1, 1]} : vector<18x16x192xbf16> to vector<16x16x192xbf16>
    %c0_23 = arith.constant 0 : index
    %c0_24 = arith.constant 0 : index
    %c0_25 = arith.constant 0 : index
    %17 = vector.load %arg2[%c0_23, %c0_24, %c0_25] : memref<3x192x32xbf16, #tpu.memory_space<vmem>>, vector<1x192x32xbf16>
    %18 = vector.shape_cast %17 : vector<1x192x32xbf16> to vector<192x32xbf16>
    "tpu.trace_start"() <{level = 10 : i32, message = "hwk,ko->hwo"}> : () -> ()
    %cst = arith.constant dense<0.000000e+00> : vector<16x16x32xf32>
    %19 = tpu.matmul %16, %18, %cst {dimension_numbers = #tpu.dot_dimension_numbers<[2], [0], [0, 1], [1], [0, 0, 0, 1, 1, 1], [], []>} : vector<16x16x192xbf16>, vector<192x32xbf16>, vector<16x16x32xf32> -> vector<16x16x32xf32>
    "tpu.trace_stop"() : () -> ()
    %20 = vector.extract_strided_slice %15 {offsets = [1, 0, 0], sizes = [16, 16, 192], strides = [1, 1, 1]} : vector<18x16x192xbf16> to vector<16x16x192xbf16>
    %c1_26 = arith.constant 1 : index
    %c0_27 = arith.constant 0 : index
    %c0_28 = arith.constant 0 : index
    %21 = vector.load %arg2[%c1_26, %c0_27, %c0_28] : memref<3x192x32xbf16, #tpu.memory_space<vmem>>, vector<1x192x32xbf16>
    %22 = vector.shape_cast %21 : vector<1x192x32xbf16> to vector<192x32xbf16>
    "tpu.trace_start"() <{level = 10 : i32, message = "hwk,ko->hwo"}> : () -> ()
    %cst_29 = arith.constant dense<0.000000e+00> : vector<16x16x32xf32>
    %23 = tpu.matmul %20, %22, %cst_29 {dimension_numbers = #tpu.dot_dimension_numbers<[2], [0], [0, 1], [1], [0, 0, 0, 1, 1, 1], [], []>} : vector<16x16x192xbf16>, vector<192x32xbf16>, vector<16x16x32xf32> -> vector<16x16x32xf32>
    "tpu.trace_stop"() : () -> ()
    %24 = arith.addf %19, %23 : vector<16x16x32xf32>
    %25 = vector.extract_strided_slice %15 {offsets = [2, 0, 0], sizes = [16, 16, 192], strides = [1, 1, 1]} : vector<18x16x192xbf16> to vector<16x16x192xbf16>
    %c2_30 = arith.constant 2 : index
    %c0_31 = arith.constant 0 : index
    %c0_32 = arith.constant 0 : index
    %26 = vector.load %arg2[%c2_30, %c0_31, %c0_32] : memref<3x192x32xbf16, #tpu.memory_space<vmem>>, vector<1x192x32xbf16>
    %27 = vector.shape_cast %26 : vector<1x192x32xbf16> to vector<192x32xbf16>
    "tpu.trace_start"() <{level = 10 : i32, message = "hwk,ko->hwo"}> : () -> ()
    %cst_33 = arith.constant dense<0.000000e+00> : vector<16x16x32xf32>
    %28 = tpu.matmul %25, %27, %cst_33 {dimension_numbers = #tpu.dot_dimension_numbers<[2], [0], [0, 1], [1], [0, 0, 0, 1, 1, 1], [], []>} : vector<16x16x192xbf16>, vector<192x32xbf16>, vector<16x16x32xf32> -> vector<16x16x32xf32>
    "tpu.trace_stop"() : () -> ()
    %29 = arith.addf %24, %28 : vector<16x16x32xf32>
    %cst_34 = arith.constant 0.000000e+00 : f32
    %30 = vector.broadcast %cst_34 : f32 to vector<16x16x32xf32>
    %31 = arith.maximumf %29, %30 : vector<16x16x32xf32>
    %32 = arith.truncf %31 : vector<16x16x32xf32> to vector<16x16x32xbf16>
    %c3 = arith.constant 3 : index
    %c3_35 = arith.constant 3 : index
    %c0_36 = arith.constant 0 : index
    %33 = vector.load %arg6[%c3, %c3_35, %c0_36] : memref<22x22x32xbf16, #tpu.memory_space<vmem>>, vector<16x16x32xbf16>
    tpu.vector_store %arg6[%c3, %c3_35, %c0_36], %32 {strides = array<i32>} : memref<22x22x32xbf16, #tpu.memory_space<vmem>>, vector<16x16x32xbf16>,
    %34 = vector.extract_strided_slice %32 {offsets = [1, 0, 0], sizes = [1, 16, 32], strides = [1, 1, 1]} : vector<16x16x32xbf16> to vector<1x16x32xbf16>
    %c2_37 = arith.constant 2 : index
    %c3_38 = arith.constant 3 : index
    %c0_39 = arith.constant 0 : index
    %35 = vector.load %arg6[%c2_37, %c3_38, %c0_39] : memref<22x22x32xbf16, #tpu.memory_space<vmem>>, vector<1x16x32xbf16>
    tpu.vector_store %arg6[%c2_37, %c3_38, %c0_39], %34 {strides = array<i32>} : memref<22x22x32xbf16, #tpu.memory_space<vmem>>, vector<1x16x32xbf16>,
    %36 = vector.extract_strided_slice %32 {offsets = [14, 0, 0], sizes = [1, 16, 32], strides = [1, 1, 1]} : vector<16x16x32xbf16> to vector<1x16x32xbf16>
    %c19 = arith.constant 19 : index
    %c3_40 = arith.constant 3 : index
    %c0_41 = arith.constant 0 : index
    %37 = vector.load %arg6[%c19, %c3_40, %c0_41] : memref<22x22x32xbf16, #tpu.memory_space<vmem>>, vector<1x16x32xbf16>
    tpu.vector_store %arg6[%c19, %c3_40, %c0_41], %36 {strides = array<i32>} : memref<22x22x32xbf16, #tpu.memory_space<vmem>>, vector<1x16x32xbf16>,
    %38 = vector.extract_strided_slice %32 {offsets = [2, 0, 0], sizes = [1, 16, 32], strides = [1, 1, 1]} : vector<16x16x32xbf16> to vector<1x16x32xbf16>
    %c1_42 = arith.constant 1 : index
    %c3_43 = arith.constant 3 : index
    %c0_44 = arith.constant 0 : index
    %39 = vector.load %arg6[%c1_42, %c3_43, %c0_44] : memref<22x22x32xbf16, #tpu.memory_space<vmem>>, vector<1x16x32xbf16>
    tpu.vector_store %arg6[%c1_42, %c3_43, %c0_44], %38 {strides = array<i32>} : memref<22x22x32xbf16, #tpu.memory_space<vmem>>, vector<1x16x32xbf16>,
    %40 = vector.extract_strided_slice %32 {offsets = [13, 0, 0], sizes = [1, 16, 32], strides = [1, 1, 1]} : vector<16x16x32xbf16> to vector<1x16x32xbf16>
    %c20 = arith.constant 20 : index
    %c3_45 = arith.constant 3 : index
    %c0_46 = arith.constant 0 : index
    %41 = vector.load %arg6[%c20, %c3_45, %c0_46] : memref<22x22x32xbf16, #tpu.memory_space<vmem>>, vector<1x16x32xbf16>
    tpu.vector_store %arg6[%c20, %c3_45, %c0_46], %40 {strides = array<i32>} : memref<22x22x32xbf16, #tpu.memory_space<vmem>>, vector<1x16x32xbf16>,
    %42 = vector.extract_strided_slice %32 {offsets = [3, 0, 0], sizes = [1, 16, 32], strides = [1, 1, 1]} : vector<16x16x32xbf16> to vector<1x16x32xbf16>
    %c0_47 = arith.constant 0 : index
    %c3_48 = arith.constant 3 : index
    %c0_49 = arith.constant 0 : index
    %43 = vector.load %arg6[%c0_47, %c3_48, %c0_49] : memref<22x22x32xbf16, #tpu.memory_space<vmem>>, vector<1x16x32xbf16>
    tpu.vector_store %arg6[%c0_47, %c3_48, %c0_49], %42 {strides = array<i32>} : memref<22x22x32xbf16, #tpu.memory_space<vmem>>, vector<1x16x32xbf16>,
    %44 = vector.extract_strided_slice %32 {offsets = [12, 0, 0], sizes = [1, 16, 32], strides = [1, 1, 1]} : vector<16x16x32xbf16> to vector<1x16x32xbf16>
    %c21 = arith.constant 21 : index
    %c3_50 = arith.constant 3 : index
    %c0_51 = arith.constant 0 : index
    %45 = vector.load %arg6[%c21, %c3_50, %c0_51] : memref<22x22x32xbf16, #tpu.memory_space<vmem>>, vector<1x16x32xbf16>
    tpu.vector_store %arg6[%c21, %c3_50, %c0_51], %44 {strides = array<i32>} : memref<22x22x32xbf16, #tpu.memory_space<vmem>>, vector<1x16x32xbf16>,
    %c0_52 = arith.constant 0 : index
    %c4 = arith.constant 4 : index
    %c0_53 = arith.constant 0 : index
    %46 = vector.load %arg6[%c0_52, %c4, %c0_53] : memref<22x22x32xbf16, #tpu.memory_space<vmem>>, vector<22x1x32xbf16>
    %c0_54 = arith.constant 0 : index
    %c2_55 = arith.constant 2 : index
    %c0_56 = arith.constant 0 : index
    %47 = vector.load %arg6[%c0_54, %c2_55, %c0_56] : memref<22x22x32xbf16, #tpu.memory_space<vmem>>, vector<22x1x32xbf16>
    tpu.vector_store %arg6[%c0_54, %c2_55, %c0_56], %46 {strides = array<i32>} : memref<22x22x32xbf16, #tpu.memory_space<vmem>>, vector<22x1x32xbf16>,
    %c0_57 = arith.constant 0 : index
    %c17_58 = arith.constant 17 : index
    %c0_59 = arith.constant 0 : index
    %48 = vector.load %arg6[%c0_57, %c17_58, %c0_59] : memref<22x22x32xbf16, #tpu.memory_space<vmem>>, vector<22x1x32xbf16>
    %c0_60 = arith.constant 0 : index
    %c19_61 = arith.constant 19 : index
    %c0_62 = arith.constant 0 : index
    %49 = vector.load %arg6[%c0_60, %c19_61, %c0_62] : memref<22x22x32xbf16, #tpu.memory_space<vmem>>, vector<22x1x32xbf16>
    tpu.vector_store %arg6[%c0_60, %c19_61, %c0_62], %48 {strides = array<i32>} : memref<22x22x32xbf16, #tpu.memory_space<vmem>>, vector<22x1x32xbf16>,
    %c0_63 = arith.constant 0 : index
    %c5 = arith.constant 5 : index
    %c0_64 = arith.constant 0 : index
    %50 = vector.load %arg6[%c0_63, %c5, %c0_64] : memref<22x22x32xbf16, #tpu.memory_space<vmem>>, vector<22x1x32xbf16>
    %c0_65 = arith.constant 0 : index
    %c1_66 = arith.constant 1 : index
    %c0_67 = arith.constant 0 : index
    %51 = vector.load %arg6[%c0_65, %c1_66, %c0_67] : memref<22x22x32xbf16, #tpu.memory_space<vmem>>, vector<22x1x32xbf16>
    tpu.vector_store %arg6[%c0_65, %c1_66, %c0_67], %50 {strides = array<i32>} : memref<22x22x32xbf16, #tpu.memory_space<vmem>>, vector<22x1x32xbf16>,
    %c0_68 = arith.constant 0 : index
    %c16 = arith.constant 16 : index
    %c0_69 = arith.constant 0 : index
    %52 = vector.load %arg6[%c0_68, %c16, %c0_69] : memref<22x22x32xbf16, #tpu.memory_space<vmem>>, vector<22x1x32xbf16>
    %c0_70 = arith.constant 0 : index
    %c20_71 = arith.constant 20 : index
    %c0_72 = arith.constant 0 : index
    %53 = vector.load %arg6[%c0_70, %c20_71, %c0_72] : memref<22x22x32xbf16, #tpu.memory_space<vmem>>, vector<22x1x32xbf16>
    tpu.vector_store %arg6[%c0_70, %c20_71, %c0_72], %52 {strides = array<i32>} : memref<22x22x32xbf16, #tpu.memory_space<vmem>>, vector<22x1x32xbf16>,
    %c0_73 = arith.constant 0 : index
    %c6 = arith.constant 6 : index
    %c0_74 = arith.constant 0 : index
    %54 = vector.load %arg6[%c0_73, %c6, %c0_74] : memref<22x22x32xbf16, #tpu.memory_space<vmem>>, vector<22x1x32xbf16>
    %c0_75 = arith.constant 0 : index
    %c0_76 = arith.constant 0 : index
    %c0_77 = arith.constant 0 : index
    %55 = vector.load %arg6[%c0_75, %c0_76, %c0_77] : memref<22x22x32xbf16, #tpu.memory_space<vmem>>, vector<22x1x32xbf16>
    tpu.vector_store %arg6[%c0_75, %c0_76, %c0_77], %54 {strides = array<i32>} : memref<22x22x32xbf16, #tpu.memory_space<vmem>>, vector<22x1x32xbf16>,
    %c0_78 = arith.constant 0 : index
    %c15_79 = arith.constant 15 : index
    %c0_80 = arith.constant 0 : index
    %56 = vector.load %arg6[%c0_78, %c15_79, %c0_80] : memref<22x22x32xbf16, #tpu.memory_space<vmem>>, vector<22x1x32xbf16>
    %c0_81 = arith.constant 0 : index
    %c21_82 = arith.constant 21 : index
    %c0_83 = arith.constant 0 : index
    %57 = vector.load %arg6[%c0_81, %c21_82, %c0_83] : memref<22x22x32xbf16, #tpu.memory_space<vmem>>, vector<22x1x32xbf16>
    tpu.vector_store %arg6[%c0_81, %c21_82, %c0_83], %56 {strides = array<i32>} : memref<22x22x32xbf16, #tpu.memory_space<vmem>>, vector<22x1x32xbf16>,
    %c0_84 = arith.constant 0 : index
    %c0_85 = arith.constant 0 : index
    %c0_86 = arith.constant 0 : index
    %58 = vector.load %arg6[%c0_84, %c0_85, %c0_86] : memref<22x22x32xbf16, #tpu.memory_space<vmem>>, vector<22x22x32xbf16>
    %59 = vector.extract_strided_slice %58 {offsets = [0, 0, 0], sizes = [22, 16, 32], strides = [1, 1, 1]} : vector<22x22x32xbf16> to vector<22x16x32xbf16>
    %60 = vector.extract_strided_slice %58 {offsets = [0, 1, 0], sizes = [22, 16, 32], strides = [1, 1, 1]} : vector<22x22x32xbf16> to vector<22x16x32xbf16>
    %61 = vector.extract_strided_slice %58 {offsets = [0, 2, 0], sizes = [22, 16, 32], strides = [1, 1, 1]} : vector<22x22x32xbf16> to vector<22x16x32xbf16>
    %62 = vector.extract_strided_slice %58 {offsets = [0, 3, 0], sizes = [22, 16, 32], strides = [1, 1, 1]} : vector<22x22x32xbf16> to vector<22x16x32xbf16>
    %63 = vector.extract_strided_slice %58 {offsets = [0, 4, 0], sizes = [22, 16, 32], strides = [1, 1, 1]} : vector<22x22x32xbf16> to vector<22x16x32xbf16>
    %64 = vector.extract_strided_slice %58 {offsets = [0, 5, 0], sizes = [22, 16, 32], strides = [1, 1, 1]} : vector<22x22x32xbf16> to vector<22x16x32xbf16>
    %65 = vector.extract_strided_slice %58 {offsets = [0, 6, 0], sizes = [22, 16, 32], strides = [1, 1, 1]} : vector<22x22x32xbf16> to vector<22x16x32xbf16>
    %66 = tpu.concatenate %59, %60, %61, %62, %63, %64, %65 in 2 : vector<22x16x32xbf16>, vector<22x16x32xbf16>, vector<22x16x32xbf16>, vector<22x16x32xbf16>, vector<22x16x32xbf16>, vector<22x16x32xbf16>, vector<22x16x32xbf16> -> vector<22x16x224xbf16>
    %67 = vector.extract_strided_slice %66 {offsets = [0, 0, 0], sizes = [16, 16, 224], strides = [1, 1, 1]} : vector<22x16x224xbf16> to vector<16x16x224xbf16>
    %c0_87 = arith.constant 0 : index
    %c0_88 = arith.constant 0 : index
    %c0_89 = arith.constant 0 : index
    %68 = vector.load %arg3[%c0_87, %c0_88, %c0_89] : memref<7x224x8xbf16, #tpu.memory_space<vmem>>, vector<1x224x8xbf16>
    %69 = vector.shape_cast %68 : vector<1x224x8xbf16> to vector<224x8xbf16>
    "tpu.trace_start"() <{level = 10 : i32, message = "hwk,ko->hwo"}> : () -> ()
    %cst_90 = arith.constant dense<0.000000e+00> : vector<16x16x8xf32>
    %70 = tpu.matmul %67, %69, %cst_90 {dimension_numbers = #tpu.dot_dimension_numbers<[2], [0], [0, 1], [1], [0, 0, 0, 1, 1, 1], [], []>} : vector<16x16x224xbf16>, vector<224x8xbf16>, vector<16x16x8xf32> -> vector<16x16x8xf32>
    "tpu.trace_stop"() : () -> ()
    %71 = vector.extract_strided_slice %66 {offsets = [1, 0, 0], sizes = [16, 16, 224], strides = [1, 1, 1]} : vector<22x16x224xbf16> to vector<16x16x224xbf16>
    %c1_91 = arith.constant 1 : index
    %c0_92 = arith.constant 0 : index
    %c0_93 = arith.constant 0 : index
    %72 = vector.load %arg3[%c1_91, %c0_92, %c0_93] : memref<7x224x8xbf16, #tpu.memory_space<vmem>>, vector<1x224x8xbf16>
    %73 = vector.shape_cast %72 : vector<1x224x8xbf16> to vector<224x8xbf16>
    "tpu.trace_start"() <{level = 10 : i32, message = "hwk,ko->hwo"}> : () -> ()
    %cst_94 = arith.constant dense<0.000000e+00> : vector<16x16x8xf32>
    %74 = tpu.matmul %71, %73, %cst_94 {dimension_numbers = #tpu.dot_dimension_numbers<[2], [0], [0, 1], [1], [0, 0, 0, 1, 1, 1], [], []>} : vector<16x16x224xbf16>, vector<224x8xbf16>, vector<16x16x8xf32> -> vector<16x16x8xf32>
    "tpu.trace_stop"() : () -> ()
    %75 = arith.addf %70, %74 : vector<16x16x8xf32>
    %76 = vector.extract_strided_slice %66 {offsets = [2, 0, 0], sizes = [16, 16, 224], strides = [1, 1, 1]} : vector<22x16x224xbf16> to vector<16x16x224xbf16>
    %c2_95 = arith.constant 2 : index
    %c0_96 = arith.constant 0 : index
    %c0_97 = arith.constant 0 : index
    %77 = vector.load %arg3[%c2_95, %c0_96, %c0_97] : memref<7x224x8xbf16, #tpu.memory_space<vmem>>, vector<1x224x8xbf16>
    %78 = vector.shape_cast %77 : vector<1x224x8xbf16> to vector<224x8xbf16>
    "tpu.trace_start"() <{level = 10 : i32, message = "hwk,ko->hwo"}> : () -> ()
    %cst_98 = arith.constant dense<0.000000e+00> : vector<16x16x8xf32>
    %79 = tpu.matmul %76, %78, %cst_98 {dimension_numbers = #tpu.dot_dimension_numbers<[2], [0], [0, 1], [1], [0, 0, 0, 1, 1, 1], [], []>} : vector<16x16x224xbf16>, vector<224x8xbf16>, vector<16x16x8xf32> -> vector<16x16x8xf32>
    "tpu.trace_stop"() : () -> ()
    %80 = arith.addf %75, %79 : vector<16x16x8xf32>
    %81 = vector.extract_strided_slice %66 {offsets = [3, 0, 0], sizes = [16, 16, 224], strides = [1, 1, 1]} : vector<22x16x224xbf16> to vector<16x16x224xbf16>
    %c3_99 = arith.constant 3 : index
    %c0_100 = arith.constant 0 : index
    %c0_101 = arith.constant 0 : index
    %82 = vector.load %arg3[%c3_99, %c0_100, %c0_101] : memref<7x224x8xbf16, #tpu.memory_space<vmem>>, vector<1x224x8xbf16>
    %83 = vector.shape_cast %82 : vector<1x224x8xbf16> to vector<224x8xbf16>
    "tpu.trace_start"() <{level = 10 : i32, message = "hwk,ko->hwo"}> : () -> ()
    %cst_102 = arith.constant dense<0.000000e+00> : vector<16x16x8xf32>
    %84 = tpu.matmul %81, %83, %cst_102 {dimension_numbers = #tpu.dot_dimension_numbers<[2], [0], [0, 1], [1], [0, 0, 0, 1, 1, 1], [], []>} : vector<16x16x224xbf16>, vector<224x8xbf16>, vector<16x16x8xf32> -> vector<16x16x8xf32>
    "tpu.trace_stop"() : () -> ()
    %85 = arith.addf %80, %84 : vector<16x16x8xf32>
    %86 = vector.extract_strided_slice %66 {offsets = [4, 0, 0], sizes = [16, 16, 224], strides = [1, 1, 1]} : vector<22x16x224xbf16> to vector<16x16x224xbf16>
    %c4_103 = arith.constant 4 : index
    %c0_104 = arith.constant 0 : index
    %c0_105 = arith.constant 0 : index
    %87 = vector.load %arg3[%c4_103, %c0_104, %c0_105] : memref<7x224x8xbf16, #tpu.memory_space<vmem>>, vector<1x224x8xbf16>
    %88 = vector.shape_cast %87 : vector<1x224x8xbf16> to vector<224x8xbf16>
    "tpu.trace_start"() <{level = 10 : i32, message = "hwk,ko->hwo"}> : () -> ()
    %cst_106 = arith.constant dense<0.000000e+00> : vector<16x16x8xf32>
    %89 = tpu.matmul %86, %88, %cst_106 {dimension_numbers = #tpu.dot_dimension_numbers<[2], [0], [0, 1], [1], [0, 0, 0, 1, 1, 1], [], []>} : vector<16x16x224xbf16>, vector<224x8xbf16>, vector<16x16x8xf32> -> vector<16x16x8xf32>
    "tpu.trace_stop"() : () -> ()
    %90 = arith.addf %85, %89 : vector<16x16x8xf32>
    %91 = vector.extract_strided_slice %66 {offsets = [5, 0, 0], sizes = [16, 16, 224], strides = [1, 1, 1]} : vector<22x16x224xbf16> to vector<16x16x224xbf16>
    %c5_107 = arith.constant 5 : index
    %c0_108 = arith.constant 0 : index
    %c0_109 = arith.constant 0 : index
    %92 = vector.load %arg3[%c5_107, %c0_108, %c0_109] : memref<7x224x8xbf16, #tpu.memory_space<vmem>>, vector<1x224x8xbf16>
    %93 = vector.shape_cast %92 : vector<1x224x8xbf16> to vector<224x8xbf16>
    "tpu.trace_start"() <{level = 10 : i32, message = "hwk,ko->hwo"}> : () -> ()
    %cst_110 = arith.constant dense<0.000000e+00> : vector<16x16x8xf32>
    %94 = tpu.matmul %91, %93, %cst_110 {dimension_numbers = #tpu.dot_dimension_numbers<[2], [0], [0, 1], [1], [0, 0, 0, 1, 1, 1], [], []>} : vector<16x16x224xbf16>, vector<224x8xbf16>, vector<16x16x8xf32> -> vector<16x16x8xf32>
    "tpu.trace_stop"() : () -> ()
    %95 = arith.addf %90, %94 : vector<16x16x8xf32>
    %96 = vector.extract_strided_slice %66 {offsets = [6, 0, 0], sizes = [16, 16, 224], strides = [1, 1, 1]} : vector<22x16x224xbf16> to vector<16x16x224xbf16>
    %c6_111 = arith.constant 6 : index
    %c0_112 = arith.constant 0 : index
    %c0_113 = arith.constant 0 : index
    %97 = vector.load %arg3[%c6_111, %c0_112, %c0_113] : memref<7x224x8xbf16, #tpu.memory_space<vmem>>, vector<1x224x8xbf16>
    %98 = vector.shape_cast %97 : vector<1x224x8xbf16> to vector<224x8xbf16>
    "tpu.trace_start"() <{level = 10 : i32, message = "hwk,ko->hwo"}> : () -> ()
    %cst_114 = arith.constant dense<0.000000e+00> : vector<16x16x8xf32>
    %99 = tpu.matmul %96, %98, %cst_114 {dimension_numbers = #tpu.dot_dimension_numbers<[2], [0], [0, 1], [1], [0, 0, 0, 1, 1, 1], [], []>} : vector<16x16x224xbf16>, vector<224x8xbf16>, vector<16x16x8xf32> -> vector<16x16x8xf32>
    "tpu.trace_stop"() : () -> ()
    %100 = arith.addf %95, %99 : vector<16x16x8xf32>
    %c0_115 = arith.constant 0 : index
    %c0_116 = arith.constant 0 : index
    %c0_117 = arith.constant 0 : index
    %c0_118 = arith.constant 0 : index
    %101 = vector.load %arg4[%c0_115, %c0_116, %c0_117, %c0_118] : memref<1x16x16x8xf32, #tpu.memory_space<vmem>>, vector<1x16x16x8xf32>
    %102 = vector.shape_cast %101 : vector<1x16x16x8xf32> to vector<16x16x8xf32>
    %103 = vector.shape_cast %100 : vector<16x16x8xf32> to vector<1x16x16x8xf32>
    tpu.vector_store %arg4[%c0_115, %c0_116, %c0_117, %c0_118], %103 {strides = array<i32>} : memref<1x16x16x8xf32, #tpu.memory_space<vmem>>, vector<1x16x16x8xf32>,
    return
  }
  func.func @transform_0(%arg0: i32) -> (i32, i32, i32, i32) {
    %c0_i32 = arith.constant 0 : i32
    %c0_i32_0 = arith.constant 0 : i32
    %c0_i32_1 = arith.constant 0 : i32
    %c0_i32_2 = arith.constant 0 : i32
    return %arg0, %c0_i32, %c0_i32_0, %c0_i32_1 : i32, i32, i32, i32
  }
  func.func @transform_1(%arg0: i32) -> (i32, i32, i32) {
    %c0_i32 = arith.constant 0 : i32
    %c0_i32_0 = arith.constant 0 : i32
    %c0_i32_1 = arith.constant 0 : i32
    %c0_i32_2 = arith.constant 0 : i32
    return %c0_i32, %c0_i32_0, %c0_i32_1 : i32, i32, i32
  }
  func.func @transform_2(%arg0: i32) -> (i32, i32, i32) {
    %c0_i32 = arith.constant 0 : i32
    %c0_i32_0 = arith.constant 0 : i32
    %c0_i32_1 = arith.constant 0 : i32
    %c0_i32_2 = arith.constant 0 : i32
    return %c0_i32, %c0_i32_0, %c0_i32_1 : i32, i32, i32
  }
  func.func @transform_3(%arg0: i32) -> (i32, i32, i32, i32) {
    %c0_i32 = arith.constant 0 : i32
    %c0_i32_0 = arith.constant 0 : i32
    %c0_i32_1 = arith.constant 0 : i32
    %c0_i32_2 = arith.constant 0 : i32
    return %arg0, %c0_i32, %c0_i32_0, %c0_i32_1 : i32, i32, i32, i32
  }
}

</mosaic_0001>

<bundles_post_ra>
// kernel: decoder_forward.2
= control target key start
LH: loop header
LB: loop body
LE: loop exit
PB: predicated region body
PF: predicated region fallthrough
CT: control target
= control target key end

     0   :  { %s3269_s9 = smov 0   ;;  %s3271_s10 = smov 0   ;;  %s3823_s0 = inlined_call_operand.vmem [shape: bf16[2,8,8,64], index: 0, kind: input, shape index: {}]   ;;  %s3824_s1 = inlined_call_operand.vmem [shape: bf16[9,2,3,192,64], index: 1, kind: input, shape index: {}]   ;;  %s3825_s2 = inlined_call_operand.vmem [shape: bf16[2,8,8,64], index: 2, kind: output, shape index: {}]  }
   0x1   :  { %s3273_s11 = smov 0   ;;  %s3275_s12 = smov 0  }
   0x2   :  { %s3277_s13 = smov 0  }
   0x3 LB: > { %s21_s14 = sadd.s32 1, %s3243_s11  ;;  %s24_s15 = sadd.s32 1, %s3247_s12  ;;  %s3251_s13 = sphi %s3277_s13, %s12_s13   ;;  %s3247_s12 = sphi %s3275_s12, %s3835_s12   ;;  %s3243_s11 = sphi %s3273_s11, %s3834_s11   ;;  %s3239_s10 = sphi %s3271_s10, %s3833_s10   ;;  %s3235_s9 = sphi %s3269_s9, %s3832_s9  }
   0x4   : > { %p22_p0 = scmp.ge.s32.totalorder %s21_s14, 9  ;;  %p2496_p1 = scmp.ge.s32.totalorder %s3251_s13, 1 }
   0x5   : > { %p134_p2 = scmp.lt.s32.totalorder %s3251_s13, 19 }
   0x6   : > { %s3837_s14 = smov (%p22_p0, %s21_s14), 0  ;;  %s3839_s15 = smov (!%p22_p0, %s24_s15), %s3247_s12 }
   0x7   : > { %p135_p3 = pnand %p2496_p1, %p134_p2  ;;  %p26_p4 = scmp.ge.s32.totalorder %s3839_s15, 2 }
   0x8   : > { %p161_p5 = scmp.lt.s32.totalorder (!%p135_p3), %s3239_s10, 1  ;;  %p166_p6 = scmp.lt.s32.totalorder (!%p135_p3), %s3235_s9, 8 }
   0x9   : > { %s3841_s15 = smov (%p26_p4, %s3839_s15), 0  ;;  %138 = sbr.rel (%p135_p3) target bundleno = 772 (0x304), region = 28 }
   0xa   : > { %p2502_p7 = scmp.ne.s32.totalorder (!%p135_p3), %s3235_s9, 0 }
   0xe   : > { %s3843_s10 = smov (!%p161_p5, %s3239_s10), 1 }
   0xf   : > { %s167_s16 = scalar_select %p166_p6, %s3235_s9, 8 }
  0x10   : > { %s3058_s17 = sshll.u32 %s3843_s10, 5  ;;  %180 = sbr.rel (%p2502_p7) target bundleno = 32 (0x20), region = 32 }
  0x11   : > { %s165_s20 = scalar_lea.vmem %s3823_s0, %s3058_s17  ;;  %s3171_s21 = smul.u32 576, %s167_s16 }
  0x12   : > { %s3309_s24 = scalar_lea.vmem %s3825_s2, %s3058_s17 }
  0x13   : > { %s3314_s27 = scalar_lea.vmem %s3824_s1, %s3171_s21 }
  0x15   : > { %v3153_v0 = vld [vmem:[%s165_s20] sm:$0xff]   ;;  %vm197_vm0 = vcmask 523264   ;;  %v3168_v1 = vld [vmem:[%s165_s20 + $0x8] sm:$0xff]   ;;  %v3169_v2 = vld [vmem:[%s165_s20 + $0x10] sm:$0xff]  }
  0x16   : > { %v3154_v3 = vunpack.c.l.bf16 %v3153_v0  ;;  %v3155_v4 = vunpack.c.h.bf16 %v3153_v0  ;;  %v3158_v5 = vunpack.c.l.bf16 %v3168_v1  ;;  %v3159_v6 = vunpack.c.h.bf16 %v3168_v1  ;;  %v3170_v7 = vld [vmem:[%s165_s20 + $0x18] sm:$0xff]  }
  0x17   : > { %v3162_v8 = vunpack.c.l.bf16 %v3169_v2  ;;  %v3163_v9 = vunpack.c.h.bf16 %v3169_v2  ;;  %v3166_v10 = vunpack.c.l.bf16 %v3170_v7  ;;  %v3167_v11 = vunpack.c.h.bf16 %v3170_v7 }
  0x18   : > { %198 = vst.msk [vmem:[#allocation2] sm:$0xff] %vm197_vm0, %v3154_v3 }
  0x19   : > { %199 = vst.msk [vmem:[#allocation2 + $0x8] sm:$0xff] %vm197_vm0, %v3155_v4 }
  0x1a   : > { %200 = vst.msk [vmem:[#allocation2 + $0x10] sm:$0xff] %vm197_vm0, %v3158_v5 }
  0x1b   : > { %201 = vst.msk [vmem:[#allocation2 + $0x18] sm:$0xff] %vm197_vm0, %v3159_v6 }
  0x1c   : > { %202 = vst.msk [vmem:[#allocation2 + $0x20] sm:$0xff] %vm197_vm0, %v3162_v8 }
  0x1d   : > { %203 = vst.msk [vmem:[#allocation2 + $0x28] sm:$0xff] %vm197_vm0, %v3163_v9 }
  0x1e   : > { %204 = vst.msk [vmem:[#allocation2 + $0x30] sm:$0xff] %vm197_vm0, %v3166_v10 }
  0x1f   : > { %205 = vst.msk [vmem:[#allocation2 + $0x38] sm:$0xff] %vm197_vm0, %v3167_v11 }
  0x20 PF: > { %v207_v12 = vld [vmem:[#allocation2 + $0x8] sm:$0xff]  ;;  %vm303_vm1 = vcmask 519168   ;;  %vm304_vm2 = vsmask.f32 7938  ;;  %vm309_vm3 = vcmask 516096   ;;  %v206_v19 = vld [vmem:[#allocation2] sm:$0xff] }
  0x21   : > { %v215_v13 = vpack.c.bf16 %v207_v12, %v207_v12  ;;  %vm310_vm4 = vsmask.f32 256  ;;  %v208_v16 = vld [vmem:[#allocation2 + $0x10] sm:$0xff]  ;;  %vm3327_vm5 = vmand %vm303_vm1, %vm304_vm2  ;;  %v357_v21 = vld [vmem:[#allocation3] sm:$0xf]  ;;  %v214_v23 = vpack.c.bf16 %v206_v19, %v206_v19  ;;  %s3253_s28 = smov 64  }
  0x22   : > { %v216_v18 = vpack.c.bf16 %v208_v16, %v208_v16  ;;  %v360_v22 = vld [vmem:[#allocation3 + $0x4] sm:$0x1]  ;;  %vm3332_vm6 = vmand %vm309_vm3, %vm310_vm4  ;;  %v315_v26 = vld [vmem:[#allocation3 + $0x10] sm:$0xf]  ;;  %vm701_vm8 = vcmask 523264   ;;  %p3055_p8 = scmp.ne.s32.totalorder %s3235_s9, 8 }
  0x23   : > { %v231_v14 = vshrl.u32 %v215_v13, 16  ;;  %v234_v15 = vshll.u32 %v215_v13, 16  ;;  %v318_v27 = vld [vmem:[#allocation3 + $0x14] sm:$0x1]  ;;  %v223_v33 = vshrl.u32 %v214_v23, 16  ;;  %v226_v35 = vshll.u32 %v214_v23, 16  ;;  %vm3361_vm7 = vmand %vm309_vm3, %vm304_vm2 }
  0x24   : > { %v211_v24 = vld [vmem:[#allocation2 + $0x28] sm:$0xff]  ;;  %v239_v28 = vshrl.u32 %v216_v18, 16  ;;  %v242_v29 = vshll.u32 %v216_v18, 16  ;;  %v321_v42 = vld [vmem:[#allocation3 + $0x18] sm:$0xf]  ;;  %v3148_v25 = vld [vmem:[%s3314_s27 + $0x220] sm:$0xff] }
  0x25   : > { %v233_v20 = vrot.slane %v231_v14, 7  ;;  %v219_v30 = vpack.c.bf16 %v211_v24, %v211_v24  ;;  %v324_v43 = vld [vmem:[#allocation3 + $0x1c] sm:$0x1]  ;;  %v225_v46 = vrot.slane %v223_v33, 7  ;;  %v306_v48 = vld [vmem:[#allocation3 + $0x8] sm:$0xf] }
  0x26   : > { %v241_v34 = vrot.slane %v239_v28, 7  ;;  %v209_v49 = vld [vmem:[#allocation2 + $0x18] sm:$0xff]  ;;  %v212_v50 = vld [vmem:[#allocation2 + $0x30] sm:$0xff]  ;;  %v312_v55 = vld [vmem:[#allocation3 + $0xc] sm:$0x1] }
  0x27   : > { %v236_v31 = vor.u32 %v234_v15, %v233_v20  ;;  %v237_v32 = vrot.slane %v233_v20, 4  ;;  %v263_v36 = vshrl.u32 %v219_v30, 16  ;;  %v266_v37 = vshll.u32 %v219_v30, 16  ;;  %v339_v60 = vld [vmem:[#allocation3 + $0x30] sm:$0xf] }
  0x28   : > { %v244_v44 = vor.u32 %v242_v29, %v241_v34  ;;  %v245_v45 = vrot.slane %v241_v34, 4  ;;  %v228_v53 = vor.u32 %v226_v35, %v225_v46  ;;  %v229_v54 = vrot.slane %v225_v46, 4  ;;  %v342_v13 = vld [vmem:[#allocation3 + $0x34] sm:$0x1] }
  0x29   : > { %v358_v38 = vsel %vm3327_vm5, %v236_v31, %v357_v21  ;;  %v361_v39 = vsel %vm3332_vm6, %v237_v32, %v360_v22  ;;  %v316_v40 = vsel %vm3327_vm5, %v236_v31, %v315_v26  ;;  %v319_v41 = vsel %vm3332_vm6, %v237_v32, %v318_v27 }
  0x2a   : > { %359 = vst [vmem:[#allocation3] sm:$0xf] %v358_v38  ;;  %v3344_v47 = vrot.slane %v263_v36, 7  ;;  %v322_v51 = vsel %vm3327_vm5, %v244_v44, %v321_v42  ;;  %v325_v52 = vsel %vm3332_vm6, %v245_v45, %v324_v43  ;;  %v3351_v57 = vpack.c.bf16 %v209_v49, %v209_v49  ;;  %v210_v49 = vld [vmem:[#allocation2 + $0x20] sm:$0xff] }
  0x2b   : > { %362 = vst [vmem:[#allocation3 + $0x4] sm:$0x1] %v361_v39  ;;  %v3353_v58 = vpack.c.bf16 %v212_v50, %v212_v50  ;;  %v307_v59 = vsel %vm3327_vm5, %v228_v53, %v306_v48  ;;  %v313_v61 = vsel %vm3332_vm6, %v229_v54, %v312_v55 }
  0x2c   : > { %317 = vst [vmem:[#allocation3 + $0x10] sm:$0xf] %v316_v40  ;;  %v268_v56 = vor.u32 %v266_v37, %v3344_v47  ;;  %v269_v63 = vrot.slane %v3344_v47, 4  ;;  %v247_v0 = vshrl.u32 %v3351_v57, 16  ;;  %v250_v1 = vshll.u32 %v3351_v57, 16 }
  0x2d   : > { %320 = vst [vmem:[#allocation3 + $0x14] sm:$0x1] %v319_v41  ;;  %v271_v2 = vshrl.u32 %v3353_v58, 16  ;;  %v274_v27 = vshll.u32 %v3353_v58, 16 }
  0x2e   : > { %323 = vst [vmem:[#allocation3 + $0x18] sm:$0xf] %v322_v51  ;;  %v340_v6 = vsel %vm3327_vm5, %v268_v56, %v339_v60  ;;  %v249_v30 = vrot.slane %v247_v0, 7  ;;  %v343_v34 = vsel %vm3332_vm6, %v269_v63, %v342_v13  ;;  %v327_v56 = vld [vmem:[#allocation3 + $0x20] sm:$0xf]  ;;  %v218_v63 = vpack.c.bf16 %v210_v49, %v210_v49  ;;  %v3093_v49 = vld [vmem:[%s3314_s27 + $0xb8] sm:$0xff] }
  0x2f   : > { %326 = vst [vmem:[#allocation3 + $0x1c] sm:$0x1] %v325_v52  ;;  %v3386_v38 = vrot.slane %v271_v2, 7  ;;  %v330_v60 = vld [vmem:[#allocation3 + $0x24] sm:$0x1]  ;;  %934 = vmatpush.bf16.msra.mxu1 %v3093_v49 }
  0x30   : > { %308 = vst [vmem:[#allocation3 + $0x8] sm:$0xf] %v307_v59  ;;  %v253_v41 = vrot.slane %v249_v30, 4  ;;  %v252_v45 = vor.u32 %v250_v1, %v249_v30 }
  0x31   : > { %v370_v3 = vld [vmem:[#allocation3] sm:$0x2]  ;;  %v420_v4 = vld [vmem:[#allocation3] sm:$0x1]  ;;  %v450_v5 = vld [vmem:[#allocation3] sm:$0x8] }
  0x32   : > { %v2503_v7 = vrot.slane %v370_v3, 9  ;;  %v2513_v8 = vrot.slane %v450_v5, 11  ;;  %v501_v9 = vld [vmem:[#allocation3 + $0x4] sm:$0x1]  ;;  %314 = vst [vmem:[#allocation3 + $0xc] sm:$0x1] %v313_v61  ;;  %v328_v59 = vsel %vm3327_vm5, %v252_v45, %v327_v56  ;;  %v3400_v61 = vor.u32 %v274_v27, %v3386_v38 }
  0x33   : > { %v372_v10 = vld [vmem:[#allocation3 + $0x10] sm:$0x2]  ;;  %v426_v11 = vld [vmem:[#allocation3 + $0x10] sm:$0x1]  ;;  %v452_v12 = vld [vmem:[#allocation3 + $0x10] sm:$0x8] }
  0x34   : > { %v421_v14 = vsel %vm3332_vm6, %v2503_v7, %v420_v4  ;;  %v502_v15 = vsel %vm3361_vm7, %v2513_v8, %v501_v9  ;;  %v2505_v16 = vrot.slane %v372_v10, 9  ;;  %v2515_v18 = vrot.slane %v452_v12, 11  ;;  %v507_v19 = vld [vmem:[#allocation3 + $0x14] sm:$0x1]  ;;  %341 = vst [vmem:[#allocation3 + $0x30] sm:$0xf] %v340_v6 }
  0x35   : > { %422 = vst [vmem:[#allocation3] sm:$0x1] %v421_v14  ;;  %v373_v20 = vld [vmem:[#allocation3 + $0x18] sm:$0x2]  ;;  %v429_v21 = vld [vmem:[#allocation3 + $0x18] sm:$0x1]  ;;  %v331_v4 = vsel %vm3332_vm6, %v253_v41, %v330_v60 }
  0x36   : > { %503 = vst [vmem:[#allocation3 + $0x4] sm:$0x1] %v502_v15  ;;  %v427_v22 = vsel %vm3332_vm6, %v2505_v16, %v426_v11  ;;  %v508_v23 = vsel %vm3361_vm7, %v2515_v18, %v507_v19  ;;  %v2506_v24 = vrot.slane %v373_v20, 9  ;;  %v453_v26 = vld [vmem:[#allocation3 + $0x18] sm:$0x8]  ;;  %v277_v57 = vrot.slane %v3386_v38, 4 }
  0x37   : > { %428 = vst [vmem:[#allocation3 + $0x10] sm:$0x1] %v427_v22  ;;  %v2516_v28 = vrot.slane %v453_v26, 11  ;;  %v510_v29 = vld [vmem:[#allocation3 + $0x1c] sm:$0x1]  ;;  %v255_v18 = vshrl.u32 %v218_v63, 16 }
  0x38   : > { %509 = vst [vmem:[#allocation3 + $0x14] sm:$0x1] %v508_v23  ;;  %v430_v31 = vsel %vm3332_vm6, %v2506_v24, %v429_v21  ;;  %v371_v32 = vld [vmem:[#allocation3 + $0x8] sm:$0x2]  ;;  %v423_v33 = vld [vmem:[#allocation3 + $0x8] sm:$0x1] }
  0x39   : > { %431 = vst [vmem:[#allocation3 + $0x18] sm:$0x1] %v430_v31  ;;  %v511_v35 = vsel %vm3361_vm7, %v2516_v28, %v510_v29  ;;  %v2504_v36 = vrot.slane %v371_v32, 9  ;;  %v451_v37 = vld [vmem:[#allocation3 + $0x8] sm:$0x8]  ;;  %v3081_v12 = vld [vmem:[%s3314_s27 + $0x58] sm:$0xff] }
  0x3a   : > { %512 = vst [vmem:[#allocation3 + $0x1c] sm:$0x1] %v511_v35  ;;  %v2514_v39 = vrot.slane %v451_v37, 11  ;;  %v504_v40 = vld [vmem:[#allocation3 + $0xc] sm:$0x1]  ;;  %1091 = vmatpush.bf16.msra.mxu3 %v3081_v12  ;;  %v3080_v23 = vld [vmem:[%s3314_s27 + $0x50] sm:$0xff] }
  0x3b   : > { %v424_v42 = vsel %vm3332_vm6, %v2504_v36, %v423_v33  ;;  %344 = vst [vmem:[#allocation3 + $0x34] sm:$0x1] %v343_v34  ;;  %v376_v43 = vld [vmem:[#allocation3 + $0x30] sm:$0x2]  ;;  %v438_v44 = vld [vmem:[#allocation3 + $0x30] sm:$0x1] }
  0x3c   : > { %v2525_v46 = vld [vmem:[#allocation3] sm:$0xf]  ;;  %425 = vst [vmem:[#allocation3 + $0x8] sm:$0x1] %v424_v42  ;;  %v505_v47 = vsel %vm3361_vm7, %v2514_v39, %v504_v40  ;;  %v2509_v48 = vrot.slane %v376_v43, 9  ;;  %v257_v26 = vrot.slane %v255_v18, 7 }
  0x3d   : > { %v3060_v50 = vld [vmem:[#allocation3] sm:$0x10]  ;;  %506 = vst [vmem:[#allocation3 + $0xc] sm:$0x1] %v505_v47  ;;  %v456_v51 = vld [vmem:[#allocation3 + $0x30] sm:$0x8] }
  0x3e   : > { %v3392_v52 = vor.u32 %v3060_v50, %v2525_v46  ;;  %v2533_v53 = vld [vmem:[#allocation3 + $0x10] sm:$0xf]  ;;  %v439_v54 = vsel %vm3332_vm6, %v2509_v48, %v438_v44  ;;  %v2519_v55 = vrot.slane %v456_v51, 11  ;;  %329 = vst [vmem:[#allocation3 + $0x20] sm:$0xf] %v328_v59  ;;  %v258_v27 = vshll.u32 %v218_v63, 16  ;;  %1092 = vmatpush.bf16.msra.mxu3 %v3080_v23 }
  0x3f   : > { %v3062_v58 = vld [vmem:[#allocation3 + $0x10] sm:$0x10]  ;;  %440 = vst [vmem:[#allocation3 + $0x30] sm:$0x1] %v439_v54  ;;  %v345_v6 = vld [vmem:[#allocation3 + $0x38] sm:$0xf] }
  0x40   : > { %v602_v0 = vshrl.u32 %v3392_v52, 16  ;;  %v604_v1 = vshll.u32 %v3392_v52, 16  ;;  %v3404_v2 = vor.u32 %v3062_v58, %v2533_v53  ;;  %v2537_v3 = vld [vmem:[#allocation3 + $0x18] sm:$0xf]  ;;  %332 = vst [vmem:[#allocation3 + $0x24] sm:$0x1] %v331_v4  ;;  %v346_v15 = vsel %vm3327_vm5, %v3400_v61, %v345_v6 }
  0x41   : > { %v3063_v5 = vld [vmem:[#allocation3 + $0x18] sm:$0x10]  ;;  %347 = vst [vmem:[#allocation3 + $0x38] sm:$0xf] %v346_v15  ;;  %v333_v32 = vld [vmem:[#allocation3 + $0x28] sm:$0xf]  ;;  %v260_v37 = vor.u32 %v258_v27, %v257_v26 }
  0x42   : > { %v606_v7 = vrot.slane %v604_v1, 1  ;;  %v616_v8 = vshrl.u32 %v3404_v2, 16  ;;  %v618_v9 = vshll.u32 %v3404_v2, 16  ;;  %v3410_v10 = vor.u32 %v3063_v5, %v2537_v3  ;;  %v519_v11 = vld [vmem:[#allocation3 + $0x34] sm:$0x1]  ;;  %v3079_v50 = vld [vmem:[%s3314_s27 + $0x48] sm:$0xff] }
  0x43   : > { %v2529_v13 = vld [vmem:[#allocation3 + $0x8] sm:$0xf]  ;;  %v520_v14 = vsel %vm3361_vm7, %v2519_v55, %v519_v11  ;;  %v348_v16 = vld [vmem:[#allocation3 + $0x3c] sm:$0x1]  ;;  %v261_v43 = vrot.slane %v257_v26, 4  ;;  %v334_v46 = vsel %vm3327_vm5, %v260_v37, %v333_v32  ;;  %v691_v51 = vrot.slane %v3392_v52, 1  ;;  %1093 = vmatpush.bf16.msra.mxu3 %v3079_v50 }
  0x44   : > { %v607_v19 = vor.u32 %v606_v7, %v602_v0  ;;  %v620_v20 = vrot.slane %v618_v9, 1  ;;  %v625_v21 = vshll.u32 %v3410_v10, 16  ;;  %v3061_v22 = vld [vmem:[#allocation3 + $0x8] sm:$0x10]  ;;  %521 = vst [vmem:[#allocation3 + $0x34] sm:$0x1] %v520_v14  ;;  %v349_v31 = vsel %vm3332_vm6, %v277_v57, %v348_v16 }
  0x45   : > { %v2530_v24 = vor.u32 %v3061_v22, %v2529_v13  ;;  %v623_v29 = vshrl.u32 %v3410_v10, 16  ;;  %v374_v35 = vld [vmem:[#allocation3 + $0x20] sm:$0x2]  ;;  %v432_v36 = vld [vmem:[#allocation3 + $0x20] sm:$0x1]  ;;  %v3092_v56 = vld [vmem:[%s3314_s27 + $0xb0] sm:$0xff]  ;;  %v961_v0 = vunpack.c.l.b16 %v691_v51 }
  0x46   : > { %671 = vrot.lane.b32.xlu0 %v607_v19, %s3253_s28  ;;  %v621_v28 = vor.u32 %v620_v20, %v616_v8  ;;  %v627_v30 = vrot.slane %v625_v21, 1  ;;  %v2549_v39 = vld [vmem:[#allocation3 + $0x30] sm:$0xf]  ;;  %v2507_v40 = vrot.slane %v374_v35, 9  ;;  %v454_v41 = vld [vmem:[#allocation3 + $0x20] sm:$0x8]  ;;  %935 = vmatpush.bf16.msra.mxu1 %v3092_v56 }
  0x47   : > { %v609_v33 = vshrl.u32 %v2530_v24, 16  ;;  %v611_v34 = vshll.u32 %v2530_v24, 16  ;;  %v513_v42 = vld [vmem:[#allocation3 + $0x24] sm:$0x1]  ;;  %v2517_v45 = vrot.slane %v454_v41, 11  ;;  %v692_v59 = vrot.slane %v2530_v24, 1 }
  0x48   : > { %675 = vrot.lane.b32.xlu1 %v621_v28, %s3253_s28  ;;  %350 = vst [vmem:[#allocation3 + $0x3c] sm:$0x1] %v349_v31  ;;  %v336_v47 = vld [vmem:[#allocation3 + $0x2c] sm:$0x1]  ;;  %v433_v48 = vsel %vm3332_vm6, %v2507_v40, %v432_v36  ;;  %v3078_v58 = vld [vmem:[%s3314_s27 + $0x40] sm:$0xff]  ;;  %v628_v60 = vor.u32 %v627_v30, %v623_v29  ;;  %v3105_v16 = vld [vmem:[%s3314_s27 + $0x118] sm:$0xff] }
  0x49   : > { %v613_v44 = vrot.slane %v611_v34, 1  ;;  %335 = vst [vmem:[#allocation3 + $0x28] sm:$0xf] %v334_v46  ;;  %v514_v54 = vsel %vm3361_vm7, %v2517_v45, %v513_v42  ;;  %v337_v55 = vsel %vm3332_vm6, %v261_v43, %v336_v47  ;;  %v364_v1 = vld [vmem:[#allocation3 + $0x48] sm:$0xf]  ;;  %v3442_v6 = vunpack.c.l.b16 %v692_v59  ;;  %1094 = vmatpush.bf16.msra.mxu3 %v3078_v58  ;;  %v213_v22 = vld [vmem:[#allocation2 + $0x38] sm:$0xff] }
  0x4a   : > { %434 = vst [vmem:[#allocation3 + $0x20] sm:$0x1] %v433_v48  ;;  %v377_v3 = vld [vmem:[#allocation3 + $0x38] sm:$0x2]  ;;  %v441_v4 = vld [vmem:[#allocation3 + $0x38] sm:$0x1]  ;;  %v365_v7 = vsel %vm3327_vm5, %v3400_v61, %v364_v1  ;;  %v221_v26 = vpack.c.bf16 %v213_v22, %v213_v22 }
  0x4b   : > { %v614_v53 = vor.u32 %v613_v44, %v609_v33  ;;  %v3066_v63 = vld [vmem:[#allocation3 + $0x30] sm:$0x10]  ;;  %515 = vst [vmem:[#allocation3 + $0x24] sm:$0x1] %v514_v54  ;;  %v457_v5 = vld [vmem:[#allocation3 + $0x38] sm:$0x8]  ;;  %v963_v19 = vpack.c.b16 %v3442_v6, %v961_v0 }
  0x4c   : > { %v3440_v52 = vor.u32 %v3066_v63, %v2549_v39  ;;  %v2510_v8 = vrot.slane %v377_v3, 9  ;;  %v2520_v9 = vrot.slane %v457_v5, 11  ;;  %338 = vst [vmem:[#allocation3 + $0x2c] sm:$0x1] %v337_v55  ;;  %v367_v11 = vld [vmem:[#allocation3 + $0x4c] sm:$0x1] }
  0x4d   : > { %v3091_v14 = vld [vmem:[%s3314_s27 + $0xa8] sm:$0xff]  ;;  %366 = vst [vmem:[#allocation3 + $0x48] sm:$0xf] %v365_v7  ;;  %v368_v15 = vsel %vm3332_vm6, %v277_v57, %v367_v11  ;;  %v693_v20 = vrot.slane %v3404_v2, 1  ;;  %1255 = vmatpush.bf16.msrb.mxu3 %v3105_v16  ;;  %v3090_v34 = vld [vmem:[%s3314_s27 + $0xa0] sm:$0xff]  ;;  %v3101_v35 = vld [vmem:[%s3314_s27 + $0xf8] sm:$0xff] }
  0x4e   : > { %673 = vrot.lane.b32.xlu0 %v614_v53, %s3253_s28  ;;  %v644_v12 = vshrl.u32 %v3440_v52, 16  ;;  %v646_v13 = vshll.u32 %v3440_v52, 16  ;;  %v442_v61 = vsel %vm3332_vm6, %v2510_v8, %v441_v4  ;;  %369 = vst [vmem:[#allocation3 + $0x4c] sm:$0x1] %v368_v15  ;;  %936 = vmatpush.bf16.msra.mxu1 %v3091_v14  ;;  %v279_v37 = vshrl.u32 %v221_v26, 16  ;;  %v3100_v0 = vld [vmem:[%s3314_s27 + $0xf0] sm:$0xff] }
  0x4f   : > { %v522_v18 = vld [vmem:[#allocation3 + $0x3c] sm:$0x1]  ;;  %443 = vst [vmem:[#allocation3 + $0x38] sm:$0x1] %v442_v61  ;;  %v3463_v2 = vunpack.c.l.b16 %v693_v20  ;;  %2687 = vmatmul.msk.bf16.vlgmr.msra.gmra.mxu3 %vm701_vm8, %v963_v19  ;;  %v282_v39 = vshll.u32 %v221_v26, 16  ;;  %v694_v63 = vrot.slane %v3410_v10, 1 }
  0x50   : > { %677 = vrot.lane.b32.xlu1 %v628_v60, %s3253_s28  ;;  %v648_v21 = vrot.slane %v646_v13, 1  ;;  %v523_v38 = vsel %vm3361_vm7, %v2520_v9, %v522_v18  ;;  %v375_v57 = vld [vmem:[#allocation3 + $0x28] sm:$0x2]  ;;  %v435_v29 = vld [vmem:[#allocation3 + $0x28] sm:$0x1]  ;;  %v281_v50 = vrot.slane %v279_v37, 7 }
  0x51   : > { %v2541_v23 = vld [vmem:[#allocation3 + $0x20] sm:$0xf]  ;;  %524 = vst [vmem:[#allocation3 + $0x3c] sm:$0x1] %v523_v38  ;;  %v2508_v24 = vrot.slane %v375_v57, 9  ;;  %v806_v49 = vpack.c.b16 %v3463_v2, %v3442_v6  ;;  %v3104_v1 = vld [vmem:[%s3314_s27 + $0x110] sm:$0xff]  ;;  %v794_v13 = vunpack.c.l.b16 %v694_v63 }
  0x52   : > { %v649_v27 = vor.u32 %v648_v21, %v644_v12  ;;  %v3064_v28 = vld [vmem:[#allocation3 + $0x20] sm:$0x10]  ;;  %v455_v30 = vld [vmem:[#allocation3 + $0x28] sm:$0x8]  ;;  %v351_v45 = vld [vmem:[#allocation3 + $0x40] sm:$0xf]  ;;  %937 = vmatpush.bf16.msra.mxu1 %v3090_v34  ;;  %v284_v59 = vor.u32 %v282_v39, %v281_v50  ;;  %1256 = vmatpush.bf16.msrb.mxu3 %v3104_v1 }
  0x53   : > { %v3465_v31 = vor.u32 %v3064_v28, %v2541_v23  ;;  %v436_v32 = vsel %vm3332_vm6, %v2508_v24, %v435_v29  ;;  %v2518_v33 = vrot.slane %v455_v30, 11  ;;  %v516_v36 = vld [vmem:[#allocation3 + $0x2c] sm:$0x1]  ;;  %v354_v46 = vld [vmem:[#allocation3 + $0x44] sm:$0x1]  ;;  %v285_v60 = vrot.slane %v281_v50, 4 }
  0x54   : > { %437 = vst [vmem:[#allocation3 + $0x28] sm:$0x1] %v436_v32  ;;  %v379_v43 = vld [vmem:[#allocation3 + $0x48] sm:$0x2]  ;;  %v447_v44 = vld [vmem:[#allocation3 + $0x48] sm:$0x1]  ;;  %v352_v6 = vsel %vm3327_vm5, %v284_v59, %v351_v45  ;;  %v3504_v57 = vpack.c.b16 %v794_v13, %v3463_v2 }
  0x55   : > { %v630_v40 = vshrl.u32 %v3465_v31, 16  ;;  %v632_v41 = vshll.u32 %v3465_v31, 16  ;;  %v517_v42 = vsel %vm3361_vm7, %v2518_v33, %v516_v36  ;;  %v2512_v47 = vrot.slane %v379_v43, 9  ;;  %v459_v48 = vld [vmem:[#allocation3 + $0x48] sm:$0x8]  ;;  %2635 = vmatmul.msk.bf16.vlgmr.msra.gmra.mxu1 %vm701_vm8, %v806_v49  ;;  %v3089_v7 = vld [vmem:[%s3314_s27 + $0x98] sm:$0xff] }
  0x56   : > { %683 = vrot.lane.b32.xlu0 %v649_v27, %s3253_s28  ;;  %518 = vst [vmem:[#allocation3 + $0x2c] sm:$0x1] %v517_v42  ;;  %v2553_v53 = vld [vmem:[#allocation3 + $0x38] sm:$0xf]  ;;  %v2522_v54 = vrot.slane %v459_v48, 11  ;;  %1222 = vmatpush.bf16.msrb.mxu1 %v3101_v35  ;;  %v355_v10 = vsel %vm3332_vm6, %v285_v60, %v354_v46  ;;  %v3099_v14 = vld [vmem:[%s3314_s27 + $0xe8] sm:$0xff] }
  0x57   : > { %v634_v51 = vrot.slane %v632_v41, 1  ;;  %v528_v55 = vld [vmem:[#allocation3 + $0x4c] sm:$0x1]  ;;  %v448_v58 = vsel %vm3332_vm6, %v2512_v47, %v447_v44  ;;  %v3077_v8 = vld [vmem:[%s3314_s27 + $0x38] sm:$0xff]  ;;  %353 = vst [vmem:[#allocation3 + $0x40] sm:$0xf] %v352_v6  ;;  %901 = vmatpush.bf16.msra.mxu0 %v3089_v7 }
  0x58   : > { %v3067_v56 = vld [vmem:[#allocation3 + $0x38] sm:$0x10]  ;;  %449 = vst [vmem:[#allocation3 + $0x48] sm:$0x1] %v448_v58  ;;  %v529_v5 = vsel %vm3361_vm7, %v2522_v54, %v528_v55  ;;  %v3103_v15 = vld [vmem:[%s3314_s27 + $0x108] sm:$0xff]  ;;  %v3088_v16 = vld [vmem:[%s3314_s27 + $0x90] sm:$0xff]  ;;  %1058 = vmatpush.bf16.msra.mxu2 %v3077_v8 }
  0x59   : > { %v635_v3 = vor.u32 %v634_v51, %v630_v40  ;;  %v3484_v4 = vor.u32 %v3067_v56, %v2553_v53  ;;  %530 = vst [vmem:[#allocation3 + $0x4c] sm:$0x1] %v529_v5  ;;  %v3076_v19 = vld [vmem:[%s3314_s27 + $0x30] sm:$0xff]  ;;  %v695_v21 = vrot.slane %v3465_v31, 1  ;;  %1257 = vmatpush.bf16.msrb.mxu3 %v3103_v15  ;;  %v3098_v26 = vld [vmem:[%s3314_s27 + $0xe0] sm:$0xff]  ;;  %v3087_v27 = vld [vmem:[%s3314_s27 + $0x88] sm:$0xff] }
  0x5a   : > { %356 = vst [vmem:[#allocation3 + $0x44] sm:$0x1] %v355_v10  ;;  %1223 = vmatpush.bf16.msrb.mxu1 %v3100_v0  ;;  %v3075_v29 = vld [vmem:[%s3314_s27 + $0x28] sm:$0xff]  ;;  %v3097_v42 = vld [vmem:[%s3314_s27 + $0xd8] sm:$0xff]  ;;  %v3086_v43 = vld [vmem:[%s3314_s27 + $0x80] sm:$0xff]  ;;  %v697_v60 = vrot.slane %v3440_v52, 1 }
  0x5b   : > { %679 = vrot.lane.b32.xlu2 %v635_v3, %s3253_s28  ;;  %v651_v9 = vshrl.u32 %v3484_v4, 16  ;;  %v653_v11 = vshll.u32 %v3484_v4, 16  ;;  %v2545_v12 = vld [vmem:[#allocation3 + $0x28] sm:$0xf]  ;;  %902 = vmatpush.bf16.msra.mxu0 %v3088_v16  ;;  %v796_v33 = vunpack.c.l.b16 %v695_v21  ;;  %v3074_v45 = vld [vmem:[%s3314_s27 + $0x20] sm:$0xff]  ;;  %v3096_v51 = vld [vmem:[%s3314_s27 + $0xd0] sm:$0xff] }
  0x5c   : > { %1059 = vmatpush.bf16.msra.mxu2 %v3076_v19  ;;  %v3085_v53 = vld [vmem:[%s3314_s27 + $0x78] sm:$0xff]  ;;  %v3102_v56 = vld [vmem:[%s3314_s27 + $0x100] sm:$0xff]  ;;  %v800_v5 = vunpack.c.l.b16 %v697_v60  ;;  %v698_v8 = vrot.slane %v3484_v4, 1  ;;  %v3072_v4 = vld [vmem:[%s3314_s27 + $0x10] sm:$0xff] }
  0x5d   : > { %v655_v61 = vrot.slane %v653_v11, 1  ;;  %v3065_v18 = vld [vmem:[#allocation3 + $0x28] sm:$0x10]  ;;  %v808_v48 = vpack.c.b16 %v796_v33, %v794_v13  ;;  %v3073_v54 = vld [vmem:[%s3314_s27 + $0x18] sm:$0xff]  ;;  %1258 = vmatpush.bf16.msrb.mxu3 %v3102_v56  ;;  %v3070_v19 = vld [vmem:[%s3314_s27] sm:$0xff] }
  0x5e   : > { %v2546_v20 = vor.u32 %v3065_v18, %v2545_v12  ;;  %1224 = vmatpush.bf16.msrb.mxu1 %v3099_v14  ;;  %v378_v32 = vld [vmem:[#allocation3 + $0x40] sm:$0x2]  ;;  %v444_v2 = vld [vmem:[#allocation3 + $0x40] sm:$0x1]  ;;  %v458_v35 = vld [vmem:[#allocation3 + $0x40] sm:$0x8]  ;;  %v802_v52 = vunpack.c.l.b16 %v698_v8 }
  0x5f   : > { %v656_v38 = vor.u32 %v655_v61, %v651_v9  ;;  %v2561_v24 = vld [vmem:[#allocation3 + $0x48] sm:$0xf]  ;;  %v2511_v34 = vrot.slane %v378_v32, 9  ;;  %2688 = vmatmul.msk.bf16.gmra.mxu3 %vm701_vm8, %v3504_v57  ;;  %v2521_v41 = vrot.slane %v458_v35, 11  ;;  %903 = vmatpush.bf16.msra.mxu0 %v3087_v27  ;;  %v3084_v14 = vld [vmem:[%s3314_s27 + $0x70] sm:$0xff]  ;;  %v3082_v18 = vld [vmem:[%s3314_s27 + $0x60] sm:$0xff] }
  0x60   : > { %v637_v22 = vshrl.u32 %v2546_v20, 16  ;;  %v639_v23 = vshll.u32 %v2546_v20, 16  ;;  %v3069_v28 = vld [vmem:[#allocation3 + $0x48] sm:$0x10]  ;;  %1060 = vmatpush.bf16.msra.mxu2 %v3075_v29  ;;  %v696_v49 = vrot.slane %v2546_v20, 1  ;;  %v969_v11 = vpack.c.b16 %v802_v52, %v800_v5  ;;  %v3094_v20 = vld [vmem:[%s3314_s27 + $0xc0] sm:$0xff] }
  0x61   : > { %685 = vrot.lane.b32.xlu1 %v656_v38, %s3253_s28  ;;  %v3510_v31 = vor.u32 %v3069_v28, %v2561_v24  ;;  %v525_v36 = vld [vmem:[#allocation3 + $0x44] sm:$0x1]  ;;  %v445_v44 = vsel %vm3332_vm6, %v2511_v34, %v444_v2  ;;  %v3095_v15 = vld [vmem:[%s3314_s27 + $0xc8] sm:$0xff]  ;;  %v537_v28 = vld [vmem:[#allocation3 + $0x18] sm:$0xf] }
  0x62   : > { %v641_v30 = vrot.slane %v639_v23, 1  ;;  %1225 = vmatpush.bf16.msrb.mxu1 %v3098_v26  ;;  %446 = vst [vmem:[#allocation3 + $0x40] sm:$0x1] %v445_v44  ;;  %v526_v47 = vsel %vm3361_vm7, %v2521_v41, %v525_v36  ;;  %v798_v55 = vunpack.c.l.b16 %v696_v49  ;;  %v3083_v16 = vld [vmem:[%s3314_s27 + $0x68] sm:$0xff] }
  0x63   : > { %v665_v39 = vshrl.u32 %v3510_v31, 16  ;;  %v667_v40 = vshll.u32 %v3510_v31, 16  ;;  %527 = vst [vmem:[#allocation3 + $0x44] sm:$0x1] %v526_v47  ;;  %904 = vmatpush.bf16.msra.mxu0 %v3086_v43  ;;  %v3071_v61 = vld [vmem:[%s3314_s27 + $0x8] sm:$0xff]  ;;  %v700_v41 = vrot.slane %v3510_v31, 1 }
  0x64   : > { %v642_v37 = vor.u32 %v641_v30, %v637_v22  ;;  %1061 = vmatpush.bf16.msra.mxu2 %v3074_v45  ;;  %v967_v0 = vpack.c.b16 %v798_v55, %v796_v33  ;;  %v810_v7 = vpack.c.b16 %v800_v5, %v798_v55  ;;  %v531_v22 = vld [vmem:[#allocation3] sm:$0xf]  ;;  %v533_v24 = vld [vmem:[#allocation3 + $0x8] sm:$0xf]  ;;  %v545_v55 = vld [vmem:[#allocation3 + $0x38] sm:$0xf] }
  0x65   : > { %v669_v46 = vrot.slane %v667_v40, 1  ;;  %2636 = vmatmul.msk.bf16.gmra.mxu1 %vm701_vm8, %v808_v48  ;;  %v541_v43 = vld [vmem:[#allocation3 + $0x28] sm:$0xf]  ;;  %v1143_v45 = vunpack.c.l.b16 %v700_v41 }
  0x66   : > { %681 = vrot.lane.b32.xlu2 %v642_v37, %s3253_s28  ;;  %1226 = vmatpush.bf16.msrb.mxu1 %v3097_v42  ;;  %v539_v42 = vld [vmem:[#allocation3 + $0x20] sm:$0xf] }
  0x67   : > { %v670_v50 = vor.u32 %v669_v46, %v665_v39  ;;  %905 = vmatpush.bf16.msra.mxu0 %v3085_v53 }
  0x68   : > { %1062 = vmatpush.bf16.msra.mxu2 %v3073_v54  ;;  %v543_v54 = vld [vmem:[#allocation3 + $0x30] sm:$0xf] }
  0x69   : > { %689 = vrot.lane.b32.xlu0 %v670_v50, %s3253_s28  ;;  %v2557_v58 = vld [vmem:[#allocation3 + $0x40] sm:$0xf] }
  0x6a   : > { %1227 = vmatpush.bf16.msrb.mxu1 %v3096_v51  ;;  %v3068_v59 = vld [vmem:[#allocation3 + $0x40] sm:$0x10] }
  0x6b   : > { %v2558_v63 = vor.u32 %v3068_v59, %v2557_v58  ;;  %906 = vmatpush.bf16.msra.mxu0 %v3084_v14 }
  0x6c   : > { %1063 = vmatpush.bf16.msra.mxu2 %v3072_v4 }
  0x6d   : > { %v658_v1 = vshrl.u32 %v2558_v63, 16  ;;  %v660_v3 = vshll.u32 %v2558_v63, 16  ;;  %v699_v9 = vrot.slane %v2558_v63, 1 }
  0x6e   : > { %1228 = vmatpush.bf16.msrb.mxu1 %v3095_v15 }
  0x6f   : > { %v662_v6 = vrot.slane %v660_v3, 1  ;;  %2689 = vmatmul.msk.bf16.gmra.mxu3 %vm701_vm8, %v967_v0  ;;  %v804_v12 = vunpack.c.l.b16 %v699_v9  ;;  %907 = vmatpush.bf16.msra.mxu0 %v3083_v16  ;;  %v547_v3 = vld [vmem:[#allocation3 + $0x40] sm:$0xf] }
  0x70   : > { %1064 = vmatpush.bf16.msra.mxu2 %v3071_v61 }
  0x71   : > { %v663_v10 = vor.u32 %v662_v6, %v658_v1  ;;  %v812_v13 = vpack.c.b16 %v804_v12, %v802_v52  ;;  %v1145_v46 = vpack.c.b16 %v1143_v45, %v804_v12  ;;  %v549_v6 = vld [vmem:[#allocation3 + $0x48] sm:$0xf] }
  0x72   : > { %1229 = vmatpush.bf16.msrb.mxu1 %v3094_v20 }
  0x73   : > { %687 = vrot.lane.b32.xlu2 %v663_v10, %s3253_s28  ;;  %908 = vmatpush.bf16.msra.mxu0 %v3082_v18 }
  0x74   : > { %1065 = vmatpush.bf16.msra.mxu2 %v3070_v19 }
  0x75   : > { %2637 = vmatmul.msk.bf16.gmra.mxu1 %vm701_vm8, %v810_v7 }
  0x7f   : > { %2690 = vmatmul.msk.bf16.gmra.mxu3 %vm701_vm8, %v969_v11 }
  0x85   : > { %2638 = vmatmul.msk.bf16.gmra.mxu1 %vm701_vm8, %v812_v13 }
  0x8f   : > { %2763 = vmatmul.msk.bf16.vlgmr.msrb.gmra.mxu3 %vm701_vm8, %v3504_v57  ;;  %v535_v57 = vld [vmem:[#allocation3 + $0x10] sm:$0xf] }
  0x9f   : > { %2764 = vmatmul.msk.bf16.gmra.mxu3 %vm701_vm8, %v967_v0 }
  0xaf   : > { %2765 = vmatmul.msk.bf16.gmra.mxu3 %vm701_vm8, %v969_v11 }
  0xb5   : > { %v680_v30 = vpop.permute.xlu2 %679 }
  0xb6   : > { %v716_v47 = vsel %vm701_vm8, %v539_v42, %v680_v30 }
  0xb7   : > { %v795_v49 = vunpack.c.l.b16 %v716_v47 }
  0xb8   : > { %v672_v21 = vpop.permute.xlu0 %671 }
  0xb9   : > { %v704_v26 = vsel %vm701_vm8, %v531_v22, %v672_v21 }
  0xba   : > { %v676_v38 = vpop.permute.xlu1 %675  ;;  %v960_v2 = vunpack.c.l.b16 %v704_v26 }
  0xbb   : > { %v710_v23 = vsel %vm701_vm8, %v535_v57, %v676_v38 }
  0xbc   : > { %v791_v27 = vunpack.c.l.b16 %v710_v23 }
  0xbf   : > { %2766 = vmatmul.msk.bf16.gmra.mxu3 %vm701_vm8, %v1145_v46 }
  0xc0   : > { %v674_v29 = vpop.permute.xlu0 %673  ;;  %v682_v44 = vpop.permute.xlu2 %681 }
  0xc1   : > { %v707_v32 = vsel %vm701_vm8, %v533_v24, %v674_v29  ;;  %v719_v48 = vsel %vm701_vm8, %v541_v43, %v682_v44 }
  0xc2   : > { %v678_v33 = vpop.permute.xlu1 %677  ;;  %v789_v34 = vunpack.c.l.b16 %v707_v32  ;;  %v797_v50 = vunpack.c.l.b16 %v719_v48 }
  0xc3   : > { %v713_v35 = vsel %vm701_vm8, %v537_v28, %v678_v33 }
  0xc4   : > { %v793_v36 = vunpack.c.l.b16 %v713_v35  ;;  %v805_v37 = vpack.c.b16 %v791_v27, %v789_v34  ;;  %v962_v39 = vpack.c.b16 %v789_v34, %v960_v2  ;;  %v966_v53 = vpack.c.b16 %v797_v50, %v795_v49 }
  0xc6   : > { %909 = vmatmul.bf16.vlgmr.msra.gmra.mxu0 %v805_v37  ;;  %1066 = vmatmul.bf16.vlgmr.msra.gmra.mxu2 %v962_v39  ;;  %v964_v40 = vpack.c.b16 %v793_v36, %v791_v27  ;;  %v807_v51 = vpack.c.b16 %v795_v49, %v793_v36 }
  0xc8   : > { %1230 = vmatmul.bf16.vlgmr.msrb.gmra.mxu1 %v964_v40  ;;  %v684_v31 = vpop.permute.xlu0 %683 }
  0xc9   : > { %v722_v58 = vsel %vm701_vm8, %v543_v54, %v684_v31  ;;  %v3139_v31 = vld [vmem:[%s3314_s27 + $0x1d8] sm:$0xff] }
  0xca   : > { %v799_v60 = vunpack.c.l.b16 %v722_v58  ;;  %v1387_v58 = vld [vmem:[#allocation3 + $0xc] sm:$0x1]  ;;  %2007 = vmatpush.bf16.msrb.mxu2 %v3139_v31 }
  0xcc   : > { %v809_v0 = vpack.c.b16 %v799_v60, %v797_v50 }
  0xcd   : > { %v688_v5 = vpop.permute.xlu2 %687 }
  0xce   : > { %v728_v7 = vsel %vm701_vm8, %v547_v3, %v688_v5 }
  0xcf   : > { %v803_v9 = vunpack.c.l.b16 %v728_v7  ;;  %v3138_v7 = vld [vmem:[%s3314_s27 + $0x1d0] sm:$0xff] }
  0xd0   : > { %2008 = vmatpush.bf16.msrb.mxu2 %v3138_v7 }
  0xd2   : > { %v1096_v52 = vpop.f32.mrf.mxu3  ;;  %v939_v14 = vpop.f32.mrf.mxu1 }
  0xd3   : > { %v686_v56 = vpop.permute.xlu1 %685 }
  0xd4   : > { %v725_v59 = vsel %vm701_vm8, %v545_v55, %v686_v56  ;;  %v3127_v55 = vld [vmem:[%s3314_s27 + $0x178] sm:$0xff]  ;;  %v1384_v56 = vld [vmem:[#allocation3 + $0x8] sm:$0xf] }
  0xd5   : > { %v801_v63 = vunpack.c.l.b16 %v725_v59  ;;  %2164 = vmatpush.bf16.msra.mxu3 %v3127_v55  ;;  %v3136_v55 = vld [vmem:[%s3314_s27 + $0x1c0] sm:$0xff] }
  0xd6   : > { %914 = vmatmul.bf16.gmra.mxu0 %v807_v51  ;;  %1071 = vmatmul.bf16.gmra.mxu2 %v964_v40 }
  0xd7   : > { %v968_v1 = vpack.c.b16 %v801_v63, %v799_v60  ;;  %v811_v12 = vpack.c.b16 %v803_v9, %v801_v63 }
  0xd8   : > { %1235 = vmatmul.bf16.gmra.mxu1 %v966_v53 }
  0xda   : > { %v1098_v4 = vpop.f32.mrf.mxu3  ;;  %v941_v15 = vpop.f32.mrf.mxu1 }
  0xdb   : > { %v690_v10 = vpop.permute.xlu0 %689 }
  0xdc   : > { %v731_v8 = vsel %vm701_vm8, %v549_v6, %v690_v10 }
  0xdd   : > { %v1142_v11 = vunpack.c.l.b16 %v731_v8  ;;  %v3126_v8 = vld [vmem:[%s3314_s27 + $0x170] sm:$0xff] }
  0xde   : > { %2165 = vmatpush.bf16.msra.mxu3 %v3126_v8  ;;  %v1399_v8 = vld [vmem:[#allocation3 + $0x1c] sm:$0x1] }
  0xdf   : > { %v1144_v13 = vpack.c.b16 %v1142_v11, %v803_v9 }
  0xe2   : > { %v1101_v16 = vpop.f32.mrf.mxu3  ;;  %v944_v61 = vpop.f32.mrf.mxu1 }
  0xe6   : > { %919 = vmatmul.bf16.gmra.mxu0 %v809_v0  ;;  %1076 = vmatmul.bf16.gmra.mxu2 %v966_v53 }
  0xe8   : > { %1240 = vmatmul.bf16.gmra.mxu1 %v968_v1 }
  0xea   : > { %v3561_v18 = vpop.f32.mrf.mxu3  ;;  %v3563_v19 = vpop.f32.mrf.mxu1 }
  0xf2   : > { %v3565_v20 = vpop.f32.mrf.mxu3  ;;  %v3567_v21 = vpop.f32.mrf.mxu1 }
  0xf6   : > { %924 = vmatmul.bf16.gmra.mxu0 %v811_v12  ;;  %1081 = vmatmul.bf16.gmra.mxu2 %v968_v1 }
  0xf8   : > { %1245 = vmatmul.bf16.gmra.mxu1 %v1144_v13 }
  0xfa   : > { %v3569_v38 = vpop.f32.mrf.mxu3  ;;  %v3571_v57 = vpop.f32.mrf.mxu1 }
 0x102   : > { %v3573_v22 = vpop.f32.mrf.mxu3  ;;  %v3575_v23 = vpop.f32.mrf.mxu1 }
 0x10a   : > { %v3577_v24 = vpop.f32.mrf.mxu3  ;;  %v3579_v26 = vpop.f32.mrf.mxu1 }
 0x112   : > { %v1260_v27 = vpop.f32.mrf.mxu3 }
 0x11a   : > { %v1262_v30 = vpop.f32.mrf.mxu3 }
 0x122   : > { %v1265_v43 = vpop.f32.mrf.mxu3 }
 0x12a   : > { %v1267_v9 = vpop.f32.mrf.mxu3 }
 0x132   : > { %v1270_v31 = vpop.f32.mrf.mxu3 }
 0x143   : > { %v910_v28 = vpop.f32.mrf.mxu0 }
 0x144   : > { %v940_v32 = vadd.f32 %v939_v14, %v910_v28  ;;  %v3125_v28 = vld [vmem:[%s3314_s27 + $0x168] sm:$0xff] }
 0x145   : > { %v1231_v29 = vpop.f32.mrf.mxu1  ;;  %2166 = vmatpush.bf16.msra.mxu3 %v3125_v28 }
 0x146   : > { %v1261_v35 = vadd.f32 %v1260_v27, %v1231_v29  ;;  %v3137_v27 = vld [vmem:[%s3314_s27 + $0x1c8] sm:$0xff]  ;;  %v1390_v29 = vld [vmem:[#allocation3 + $0x10] sm:$0xf] }
 0x147   : > { %2009 = vmatpush.bf16.msrb.mxu2 %v3137_v27 }
 0x149   : > { %v1067_v2 = vpop.f32.mrf.mxu2 }
 0x14a   : > { %v1068_v33 = vadd.f32 %v1067_v2, %v940_v32  ;;  %v1432_v32 = vld [vmem:[#allocation3] sm:$0xf] }
 0x14b   : > { %v912_v34 = vpop.f32.mrf.mxu0  ;;  %2010 = vmatpush.bf16.msrb.mxu2 %v3136_v55  ;;  %v1405_v55 = vld [vmem:[#allocation3 + $0x24] sm:$0x1] }
 0x14c   : > { %v1097_v36 = vadd.f32 %v1096_v52, %v1068_v33  ;;  %v942_v41 = vadd.f32 %v941_v15, %v912_v34 }
 0x14d   : > { %v1233_v37 = vpop.f32.mrf.mxu1 }
 0x14e   : > { %v1280_v39 = vadd.f32 %v1261_v35, %v1097_v36  ;;  %v1263_v48 = vadd.f32 %v1262_v30, %v1233_v37  ;;  %v1393_v30 = vld [vmem:[#allocation3 + $0x14] sm:$0x1] }
 0x150   : > { %v1288_v40 = vmax.f32 %v1280_v39, 0.0 }
 0x151   : > { %v1069_v42 = vpop.f32.mrf.mxu2 }
 0x152   : > { %v1296_v44 = vpack.c.bf16 %v1288_v40, %v1288_v40  ;;  %v1070_v45 = vadd.f32 %v1069_v42, %v942_v41  ;;  %v1435_v42 = vld [vmem:[#allocation3 + $0x4] sm:$0x1] }
 0x153   : > { %v915_v46 = vpop.f32.mrf.mxu0 }
 0x154   : > { %v1305_v47 = vshrl.u32 %v1296_v44, 16  ;;  %v1099_v49 = vadd.f32 %v1098_v4, %v1070_v45  ;;  %v1308_v53 = vshll.u32 %v1296_v44, 16  ;;  %v945_v0 = vadd.f32 %v944_v61, %v915_v46 }
 0x155   : > { %v1236_v50 = vpop.f32.mrf.mxu1 }
 0x156   : > { %v1307_v51 = vrot.slane %v1305_v47, 7  ;;  %v1281_v54 = vadd.f32 %v1263_v48, %v1099_v49  ;;  %v1266_v12 = vadd.f32 %v1265_v43, %v1236_v50 }
 0x158   : > { %v1310_v59 = vor.u32 %v1308_v53, %v1307_v51  ;;  %v1311_v60 = vrot.slane %v1307_v51, 4  ;;  %v1289_v63 = vmax.f32 %v1281_v54, 0.0 }
 0x159   : > { %v1072_v1 = vpop.f32.mrf.mxu2 }
 0x15a   : > { %v1385_v3 = vsel %vm3327_vm5, %v1310_v59, %v1384_v56  ;;  %v1388_v5 = vsel %vm3332_vm6, %v1311_v60, %v1387_v58  ;;  %v1297_v6 = vpack.c.bf16 %v1289_v63, %v1289_v63  ;;  %v1073_v10 = vadd.f32 %v1072_v1, %v945_v0  ;;  %v3124_v56 = vld [vmem:[%s3314_s27 + $0x160] sm:$0xff]  ;;  %v1396_v63 = vld [vmem:[#allocation3 + $0x18] sm:$0xf] }
 0x15b   : > { %1386 = vst [vmem:[#allocation3 + $0x8] sm:$0xf] %v1385_v3  ;;  %v917_v52 = vpop.f32.mrf.mxu0  ;;  %2167 = vmatpush.bf16.msra.mxu3 %v3124_v56 }
 0x15c   : > { %1389 = vst [vmem:[#allocation3 + $0xc] sm:$0x1] %v1388_v5  ;;  %v1313_v11 = vshrl.u32 %v1297_v6, 16  ;;  %v1102_v13 = vadd.f32 %v1101_v16, %v1073_v10  ;;  %v1316_v15 = vshll.u32 %v1297_v6, 16  ;;  %v947_v35 = vadd.f32 %v3563_v19, %v917_v52 }
 0x15d   : > { %v1238_v14 = vpop.f32.mrf.mxu1 }
 0x15e   : > { %v1315_v4 = vrot.slane %v1313_v11, 7  ;;  %v1282_v61 = vadd.f32 %v1266_v12, %v1102_v13  ;;  %v1268_v0 = vadd.f32 %v1267_v9, %v1238_v14 }
 0x160   : > { %v1318_v2 = vor.u32 %v1316_v15, %v1315_v4  ;;  %v1319_v33 = vrot.slane %v1315_v4, 4  ;;  %v1290_v34 = vmax.f32 %v1282_v61, 0.0 }
 0x161   : > { %v1074_v36 = vpop.f32.mrf.mxu2 }
 0x162   : > { %v1445_v16 = vld [vmem:[#allocation3 + $0x8] sm:$0x2]  ;;  %v1525_v37 = vld [vmem:[#allocation3 + $0x8] sm:$0x8]  ;;  %v1391_v39 = vsel %vm3327_vm5, %v1318_v2, %v1390_v29  ;;  %v1394_v40 = vsel %vm3332_vm6, %v1319_v33, %v1393_v30  ;;  %v1433_v41 = vsel %vm3327_vm5, %v1318_v2, %v1432_v32  ;;  %v1298_v45 = vpack.c.bf16 %v1290_v34, %v1290_v34  ;;  %v1497_v47 = vld [vmem:[#allocation3 + $0x8] sm:$0x1] }
 0x163   : > { %v2768_v43 = vrot.slane %v1445_v16, 9  ;;  %v2778_v44 = vrot.slane %v1525_v37, 11  ;;  %1392 = vst [vmem:[#allocation3 + $0x10] sm:$0xf] %v1391_v39  ;;  %v1075_v19 = vadd.f32 %v1074_v36, %v947_v35  ;;  %v920_v46 = vpop.f32.mrf.mxu0  ;;  %v1577_v48 = vld [vmem:[#allocation3 + $0xc] sm:$0x1]  ;;  %v1436_v51 = vsel %vm3332_vm6, %v1319_v33, %v1435_v42 }
 0x164   : > { %1395 = vst [vmem:[#allocation3 + $0x14] sm:$0x1] %v1394_v40  ;;  %v1321_v53 = vshrl.u32 %v1298_v45, 16  ;;  %v1324_v60 = vshll.u32 %v1298_v45, 16  ;;  %v950_v1 = vadd.f32 %v3567_v21, %v920_v46  ;;  %v1272_v40 = vpop.f32.mrf.mxu3 }
 0x165   : > { %v1498_v49 = vsel %vm3332_vm6, %v2768_v43, %v1497_v47  ;;  %v1578_v50 = vsel %vm3361_vm7, %v2778_v44, %v1577_v48  ;;  %1434 = vst [vmem:[#allocation3] sm:$0xf] %v1433_v41  ;;  %v1241_v54 = vpop.f32.mrf.mxu1  ;;  %v1104_v58 = vadd.f32 %v3561_v18, %v1075_v19 }
 0x166   : > { %1499 = vst [vmem:[#allocation3 + $0x8] sm:$0x1] %v1498_v49  ;;  %v1323_v59 = vrot.slane %v1321_v53, 7  ;;  %v1271_v21 = vadd.f32 %v1270_v31, %v1241_v54  ;;  %v1402_v31 = vld [vmem:[#allocation3 + $0x20] sm:$0xf] }
 0x167   : > { %1579 = vst [vmem:[#allocation3 + $0xc] sm:$0x1] %v1578_v50  ;;  %v1283_v52 = vadd.f32 %v1268_v0, %v1104_v58 }
 0x168   : > { %1437 = vst [vmem:[#allocation3 + $0x4] sm:$0x1] %v1436_v51  ;;  %v1326_v3 = vor.u32 %v1324_v60, %v1323_v59  ;;  %v1327_v7 = vrot.slane %v1323_v59, 4 }
 0x169   : > { %v1077_v5 = vpop.f32.mrf.mxu2  ;;  %v1291_v34 = vmax.f32 %v1283_v52, 0.0 }
 0x16a   : > { %v1446_v6 = vld [vmem:[#allocation3 + $0x10] sm:$0x2]  ;;  %v1526_v10 = vld [vmem:[#allocation3 + $0x10] sm:$0x8]  ;;  %v1078_v11 = vadd.f32 %v1077_v5, %v950_v1  ;;  %v1500_v18 = vld [vmem:[#allocation3 + $0x10] sm:$0x1]  ;;  %v1397_v15 = vsel %vm3327_vm5, %v1326_v3, %v1396_v63 }
 0x16b   : > { %v2769_v12 = vrot.slane %v1446_v6, 9  ;;  %v2779_v13 = vrot.slane %v1526_v10, 11  ;;  %v1580_v4 = vld [vmem:[#allocation3 + $0x14] sm:$0x1]  ;;  %v922_v61 = vpop.f32.mrf.mxu0  ;;  %1398 = vst [vmem:[#allocation3 + $0x18] sm:$0xf] %v1397_v15  ;;  %v1299_v43 = vpack.c.bf16 %v1291_v34, %v1291_v34 }
 0x16c   : > { %v1444_v27 = vld [vmem:[#allocation3] sm:$0x2]  ;;  %v1494_v9 = vld [vmem:[#allocation3] sm:$0x1]  ;;  %v1524_v14 = vld [vmem:[#allocation3] sm:$0x8]  ;;  %v1107_v28 = vadd.f32 %v3565_v20, %v1078_v11  ;;  %v1400_v20 = vsel %vm3332_vm6, %v1327_v7, %v1399_v8  ;;  %v952_v45 = vadd.f32 %v3571_v57, %v922_v61  ;;  %v1275_v61 = vpop.f32.mrf.mxu3 }
 0x16d   : > { %v2767_v29 = vrot.slane %v1444_v27, 9  ;;  %v1501_v30 = vsel %vm3332_vm6, %v2769_v12, %v1500_v18  ;;  %v2777_v32 = vrot.slane %v1524_v14, 11  ;;  %v1581_v2 = vsel %vm3361_vm7, %v2779_v13, %v1580_v4  ;;  %v2793_v33 = vld [vmem:[#allocation3 + $0x8] sm:$0xf]  ;;  %v1243_v39 = vpop.f32.mrf.mxu1  ;;  %1401 = vst [vmem:[#allocation3 + $0x1c] sm:$0x1] %v1400_v20 }
 0x16e   : > { %1502 = vst [vmem:[#allocation3 + $0x10] sm:$0x1] %v1501_v30  ;;  %v1284_v35 = vadd.f32 %v1271_v21, %v1107_v28  ;;  %v3107_v36 = vld [vmem:[#allocation3 + $0x8] sm:$0x10]  ;;  %v1329_v47 = vshrl.u32 %v1299_v43, 16  ;;  %v1332_v54 = vshll.u32 %v1299_v43, 16  ;;  %v1273_v56 = vadd.f32 %v1272_v40, %v1243_v39 }
 0x16f   : > { %v1495_v16 = vsel %vm3332_vm6, %v2767_v29, %v1494_v9  ;;  %v1574_v37 = vld [vmem:[#allocation3 + $0x4] sm:$0x1]  ;;  %1582 = vst [vmem:[#allocation3 + $0x14] sm:$0x1] %v1581_v2  ;;  %v3619_v41 = vor.u32 %v3107_v36, %v2793_v33  ;;  %v1408_v7 = vld [vmem:[#allocation3 + $0x28] sm:$0xf] }
 0x170   : > { %1496 = vst [vmem:[#allocation3] sm:$0x1] %v1495_v16  ;;  %v1575_v42 = vsel %vm3361_vm7, %v2777_v32, %v1574_v37  ;;  %v1292_v44 = vmax.f32 %v1284_v35, 0.0  ;;  %v1331_v63 = vrot.slane %v1329_v47, 7  ;;  %v1411_v4 = vld [vmem:[#allocation3 + $0x2c] sm:$0x1] }
 0x171   : > { %1576 = vst [vmem:[#allocation3 + $0x4] sm:$0x1] %v1575_v42  ;;  %v1079_v19 = vpop.f32.mrf.mxu2  ;;  %v1684_v46 = vshll.u32 %v3619_v41, 16  ;;  %v1682_v57 = vshrl.u32 %v3619_v41, 16  ;;  %v1765_v3 = vrot.slane %v3619_v41, 1 }
 0x172   : > { %v1300_v48 = vpack.c.bf16 %v1292_v44, %v1292_v44  ;;  %v1080_v49 = vadd.f32 %v1079_v19, %v952_v45  ;;  %v1447_v51 = vld [vmem:[#allocation3 + $0x18] sm:$0x2]  ;;  %v1527_v53 = vld [vmem:[#allocation3 + $0x18] sm:$0x8]  ;;  %v1503_v5 = vld [vmem:[#allocation3 + $0x18] sm:$0x1] }
 0x173   : > { %v1686_v50 = vrot.slane %v1684_v46, 1  ;;  %v925_v59 = vpop.f32.mrf.mxu0  ;;  %v2770_v60 = vrot.slane %v1447_v51, 9  ;;  %v2780_v6 = vrot.slane %v1527_v53, 11  ;;  %v1335_v18 = vrot.slane %v1331_v63, 4 }
 0x174   : > { %v1109_v58 = vadd.f32 %v3569_v38, %v1080_v49  ;;  %v1337_v0 = vshrl.u32 %v1300_v48, 16  ;;  %v1340_v10 = vshll.u32 %v1300_v48, 16  ;;  %v1334_v38 = vor.u32 %v1332_v54, %v1331_v63  ;;  %v1583_v30 = vld [vmem:[#allocation3 + $0x1c] sm:$0x1] }
 0x175   : > { %v2797_v1 = vld [vmem:[#allocation3 + $0x10] sm:$0xf]  ;;  %v1687_v52 = vor.u32 %v1686_v50, %v1682_v57  ;;  %v1504_v12 = vsel %vm3332_vm6, %v2770_v60, %v1503_v5  ;;  %v1246_v15 = vpop.f32.mrf.mxu1  ;;  %v955_v14 = vadd.f32 %v3575_v23, %v925_v59  ;;  %v1406_v2 = vsel %vm3332_vm6, %v1335_v18, %v1405_v55  ;;  %v1417_v60 = vld [vmem:[#allocation3 + $0x34] sm:$0x1] }
 0x176   : > { %v1285_v8 = vadd.f32 %v1273_v56, %v1109_v58  ;;  %v3108_v11 = vld [vmem:[#allocation3 + $0x10] sm:$0x10]  ;;  %v1339_v13 = vrot.slane %v1337_v0, 7  ;;  %1505 = vst [vmem:[#allocation3 + $0x18] sm:$0x1] %v1504_v12  ;;  %v1276_v21 = vadd.f32 %v1275_v61, %v1246_v15  ;;  %v1403_v32 = vsel %vm3327_vm5, %v1334_v38, %v1402_v31 }
 0x177   : > { %v2789_v27 = vld [vmem:[#allocation3] sm:$0xf]  ;;  %1746 = vrot.lane.b32.xlu1 %v1687_v52, %s3253_s28  ;;  %v2798_v29 = vor.u32 %v3108_v11, %v2797_v1  ;;  %v1584_v36 = vsel %vm3361_vm7, %v2780_v6, %v1583_v30  ;;  %1404 = vst [vmem:[#allocation3 + $0x20] sm:$0xf] %v1403_v32  ;;  %v1863_v44 = vunpack.c.l.b16 %v1765_v3  ;;  %v1414_v50 = vld [vmem:[#allocation3 + $0x30] sm:$0xf] }
 0x178   : > { %v1293_v9 = vmax.f32 %v1285_v8, 0.0  ;;  %v3106_v28 = vld [vmem:[#allocation3] sm:$0x10]  ;;  %v1342_v33 = vor.u32 %v1340_v10, %v1339_v13  ;;  %v1343_v34 = vrot.slane %v1339_v13, 4  ;;  %1585 = vst [vmem:[#allocation3 + $0x1c] sm:$0x1] %v1584_v36  ;;  %v1277_v8 = vpop.f32.mrf.mxu3 }
 0x179   : > { %v1082_v35 = vpop.f32.mrf.mxu2  ;;  %v3638_v37 = vor.u32 %v3106_v28, %v2789_v27  ;;  %v1766_v40 = vrot.slane %v2798_v29, 1  ;;  %1407 = vst [vmem:[#allocation3 + $0x24] sm:$0x1] %v1406_v2  ;;  %v1691_v19 = vshll.u32 %v2798_v29, 16  ;;  %v1689_v54 = vshrl.u32 %v2798_v29, 16 }
 0x17a   : > { %v1301_v23 = vpack.c.bf16 %v1293_v9, %v1293_v9  ;;  %v1083_v16 = vadd.f32 %v1082_v35, %v955_v14  ;;  %v1409_v20 = vsel %vm3327_vm5, %v1342_v33, %v1408_v7  ;;  %v1412_v39 = vsel %vm3332_vm6, %v1343_v34, %v1411_v4 }
 0x17b   : > { %1410 = vst [vmem:[#allocation3 + $0x28] sm:$0xf] %v1409_v20  ;;  %v1764_v43 = vrot.slane %v3638_v37, 1  ;;  %v3646_v45 = vunpack.c.l.b16 %v1766_v40  ;;  %v927_v49 = vpop.f32.mrf.mxu0  ;;  %v1693_v31 = vrot.slane %v1691_v19, 1  ;;  %v1675_v62 = vshrl.u32 %v3638_v37, 16 }
 0x17c   : > { %v1345_v41 = vshrl.u32 %v1301_v23, 16  ;;  %v1112_v42 = vadd.f32 %v3573_v22, %v1083_v16  ;;  %1413 = vst [vmem:[#allocation3 + $0x2c] sm:$0x1] %v1412_v39  ;;  %v1348_v47 = vshll.u32 %v1301_v23, 16  ;;  %v957_v63 = vadd.f32 %v3579_v26, %v927_v49  ;;  %v1420_v39 = vld [vmem:[#allocation3 + $0x38] sm:$0xf] }
 0x17d   : > { %v1879_v51 = vpack.c.b16 %v3646_v45, %v1863_v44  ;;  %v2034_v53 = vunpack.c.l.b16 %v1764_v43  ;;  %v2801_v58 = vld [vmem:[#allocation3 + $0x18] sm:$0xf]  ;;  %v1694_v1 = vor.u32 %v1693_v31, %v1689_v54  ;;  %v1248_v7 = vpop.f32.mrf.mxu1  ;;  %v1438_v49 = vld [vmem:[#allocation3 + $0x48] sm:$0xf]  ;;  %v1441_v54 = vld [vmem:[#allocation3 + $0x4c] sm:$0x1] }
 0x17e   : > { %v1347_v46 = vrot.slane %v1345_v41, 7  ;;  %v1286_v48 = vadd.f32 %v1276_v21, %v1112_v42  ;;  %v1448_v59 = vld [vmem:[#allocation3 + $0x20] sm:$0x2]  ;;  %v1528_v57 = vld [vmem:[#allocation3 + $0x20] sm:$0x8]  ;;  %v1278_v28 = vadd.f32 %v1277_v8, %v1248_v7 }
 0x17f   : > { %2923 = vmatmul.msk.bf16.vlgmr.msrb.gmra.mxu2 %vm701_vm8, %v1879_v51  ;;  %v2036_v0 = vpack.c.b16 %v1863_v44, %v2034_v53  ;;  %v2771_v5 = vrot.slane %v1448_v59, 9  ;;  %v2781_v6 = vrot.slane %v1528_v57, 11  ;;  %v3109_v52 = vld [vmem:[#allocation3 + $0x18] sm:$0x10]  ;;  %v1506_v11 = vld [vmem:[#allocation3 + $0x20] sm:$0x1]  ;;  %1748 = vrot.lane.b32.xlu2 %v1694_v1, %s3253_s28 }
 0x180   : > { %v1350_v55 = vor.u32 %v1348_v47, %v1347_v46  ;;  %v1351_v22 = vrot.slane %v1347_v46, 4  ;;  %v1294_v56 = vmax.f32 %v1286_v48, 0.0  ;;  %v1586_v12 = vld [vmem:[#allocation3 + $0x24] sm:$0x1]  ;;  %v2802_v18 = vor.u32 %v3109_v52, %v2801_v58  ;;  %v1423_v44 = vld [vmem:[#allocation3 + $0x3c] sm:$0x1] }
 0x181   : > { %v1084_v3 = vpop.f32.mrf.mxu2  ;;  %2975 = vmatmul.msk.bf16.vlgmr.msra.gmra.mxu3 %vm701_vm8, %v2036_v0  ;;  %v1507_v13 = vsel %vm3332_vm6, %v2771_v5, %v1506_v11  ;;  %v1587_v4 = vsel %vm3361_vm7, %v2781_v6, %v1586_v12  ;;  %v1429_v7 = vld [vmem:[#allocation3 + $0x44] sm:$0x1] }
 0x182   : > { %v1415_v10 = vsel %vm3327_vm5, %v1350_v55, %v1414_v50  ;;  %v1302_v38 = vpack.c.bf16 %v1294_v56, %v1294_v56  ;;  %v1085_v26 = vadd.f32 %v1084_v3, %v957_v63  ;;  %v1449_v15 = vld [vmem:[#allocation3 + $0x28] sm:$0x2]  ;;  %v1529_v61 = vld [vmem:[#allocation3 + $0x28] sm:$0x8]  ;;  %v1418_v27 = vsel %vm3332_vm6, %v1351_v22, %v1417_v60  ;;  %1508 = vst [vmem:[#allocation3 + $0x20] sm:$0x1] %v1507_v13 }
 0x183   : > { %1416 = vst [vmem:[#allocation3 + $0x30] sm:$0xf] %v1415_v10  ;;  %v2772_v9 = vrot.slane %v1449_v15, 9  ;;  %v1509_v14 = vld [vmem:[#allocation3 + $0x28] sm:$0x1]  ;;  %v2782_v21 = vrot.slane %v1529_v61, 11 }
 0x184   : > { %v1114_v29 = vadd.f32 %v3577_v24, %v1085_v26  ;;  %1588 = vst [vmem:[#allocation3 + $0x24] sm:$0x1] %v1587_v4  ;;  %v1589_v30 = vld [vmem:[#allocation3 + $0x2c] sm:$0x1]  ;;  %v1353_v32 = vshrl.u32 %v1302_v38, 16  ;;  %v1698_v2 = vshll.u32 %v2802_v18, 16 }
 0x185   : > { %v1510_v33 = vsel %vm3332_vm6, %v2772_v9, %v1509_v14  ;;  %v1590_v34 = vsel %vm3361_vm7, %v2782_v21, %v1589_v30  ;;  %1419 = vst [vmem:[#allocation3 + $0x34] sm:$0x1] %v1418_v27  ;;  %v1356_v23 = vshll.u32 %v1302_v38, 16  ;;  %v1696_v16 = vshrl.u32 %v2802_v18, 16  ;;  %v1426_v63 = vld [vmem:[#allocation3 + $0x40] sm:$0xf] }
 0x186   : > { %v1287_v35 = vadd.f32 %v1278_v28, %v1114_v29  ;;  %1511 = vst [vmem:[#allocation3 + $0x28] sm:$0x1] %v1510_v33  ;;  %v1355_v36 = vrot.slane %v1353_v32, 7  ;;  %v1700_v20 = vrot.slane %v1698_v2, 1  ;;  %v1767_v40 = vrot.slane %v2802_v18, 1 }
 0x187   : > { %1591 = vst [vmem:[#allocation3 + $0x2c] sm:$0x1] %v1590_v34 }
 0x188   : > { %v1295_v24 = vmax.f32 %v1287_v35, 0.0  ;;  %v1358_v43 = vor.u32 %v1356_v23, %v1355_v36  ;;  %v1701_v19 = vor.u32 %v1700_v20, %v1696_v16  ;;  %v1359_v48 = vrot.slane %v1355_v36, 4  ;;  %v3151_v16 = vld [vmem:[%s3314_s27 + $0x238] sm:$0xff] }
 0x189   : > { %v2805_v31 = vld [vmem:[#allocation3 + $0x20] sm:$0xf]  ;;  %v1867_v59 = vunpack.c.l.b16 %v1767_v40  ;;  %v3150_v40 = vld [vmem:[%s3314_s27 + $0x230] sm:$0xff]  ;;  %2328 = vmatpush.bf16.msra.mxu2 %v3151_v16 }
 0x18a   : > { %v1450_v41 = vld [vmem:[#allocation3 + $0x30] sm:$0x2]  ;;  %v1530_v42 = vld [vmem:[#allocation3 + $0x30] sm:$0x8]  ;;  %v1303_v50 = vpack.c.bf16 %v1295_v24, %v1295_v24  ;;  %v1512_v51 = vld [vmem:[#allocation3 + $0x30] sm:$0x1]  ;;  %v1421_v53 = vsel %vm3327_vm5, %v1358_v43, %v1420_v39  ;;  %1750 = vrot.lane.b32.xlu0 %v1701_v19, %s3253_s28  ;;  %v1424_v22 = vsel %vm3332_vm6, %v1359_v48, %v1423_v44  ;;  %v1439_v60 = vsel %vm3327_vm5, %v1358_v43, %v1438_v49 }
 0x18b   : > { %v2773_v46 = vrot.slane %v1450_v41, 9  ;;  %v2783_v47 = vrot.slane %v1530_v42, 11  ;;  %1422 = vst [vmem:[#allocation3 + $0x38] sm:$0xf] %v1421_v53  ;;  %v3110_v58 = vld [vmem:[#allocation3 + $0x20] sm:$0x10]  ;;  %v1442_v3 = vsel %vm3332_vm6, %v1359_v48, %v1441_v54  ;;  %v3680_v38 = vpack.c.b16 %v1867_v59, %v3646_v45 }
 0x18c   : > { %v1361_v56 = vshrl.u32 %v1303_v50, 16  ;;  %v1592_v57 = vld [vmem:[#allocation3 + $0x34] sm:$0x1]  ;;  %v2806_v0 = vor.u32 %v3110_v58, %v2805_v31  ;;  %1425 = vst [vmem:[#allocation3 + $0x3c] sm:$0x1] %v1424_v22  ;;  %v1364_v6 = vshll.u32 %v1303_v50, 16 }
 0x18d   : > { %v1513_v55 = vsel %vm3332_vm6, %v2773_v46, %v1512_v51  ;;  %v1593_v1 = vsel %vm3361_vm7, %v2783_v47, %v1592_v57  ;;  %v2809_v10 = vld [vmem:[#allocation3 + $0x28] sm:$0xf]  ;;  %1440 = vst [vmem:[#allocation3 + $0x48] sm:$0xf] %v1439_v60  ;;  %v3135_v44 = vld [vmem:[%s3314_s27 + $0x1b8] sm:$0xff]  ;;  %v3134_v51 = vld [vmem:[%s3314_s27 + $0x1b0] sm:$0xff]  ;;  %2329 = vmatpush.bf16.msra.mxu2 %v3150_v40 }
 0x18e   : > { %1514 = vst [vmem:[#allocation3 + $0x30] sm:$0x1] %v1513_v55  ;;  %v1363_v5 = vrot.slane %v1361_v56, 7  ;;  %v1768_v8 = vrot.slane %v2806_v0, 1  ;;  %v1705_v52 = vshll.u32 %v2806_v0, 16  ;;  %v1703_v13 = vshrl.u32 %v2806_v0, 16  ;;  %1974 = vmatpush.bf16.msrb.mxu0 %v3135_v44 }
 0x18f   : > { %1594 = vst [vmem:[#allocation3 + $0x34] sm:$0x1] %v1593_v1  ;;  %v3111_v26 = vld [vmem:[#allocation3 + $0x28] sm:$0x10]  ;;  %v3130_v44 = vld [vmem:[%s3314_s27 + $0x190] sm:$0xff] }
 0x190   : > { %v1366_v11 = vor.u32 %v1364_v6, %v1363_v5  ;;  %v1367_v12 = vrot.slane %v1363_v5, 4  ;;  %1443 = vst [vmem:[#allocation3 + $0x4c] sm:$0x1] %v1442_v3  ;;  %v3682_v18 = vunpack.c.l.b16 %v1768_v8  ;;  %v1707_v4 = vrot.slane %v1705_v52, 1  ;;  %v3149_v55 = vld [vmem:[%s3314_s27 + $0x228] sm:$0xff] }
 0x191   : > { %v2810_v15 = vor.u32 %v3111_v26, %v2809_v10  ;;  %2976 = vmatmul.msk.bf16.gmra.mxu3 %vm701_vm8, %v3680_v38  ;;  %v1677_v5 = vshll.u32 %v3638_v37, 16  ;;  %2330 = vmatpush.bf16.msra.mxu2 %v3149_v55  ;;  %v3121_v55 = vld [vmem:[%s3314_s27 + $0x148] sm:$0xff] }
 0x192   : > { %v1427_v61 = vsel %vm3327_vm5, %v1366_v11, %v1426_v63  ;;  %v1430_v27 = vsel %vm3332_vm6, %v1367_v12, %v1429_v7  ;;  %v1451_v9 = vld [vmem:[#allocation3 + $0x38] sm:$0x2]  ;;  %v1515_v14 = vld [vmem:[#allocation3 + $0x38] sm:$0x1]  ;;  %v1531_v45 = vld [vmem:[#allocation3 + $0x38] sm:$0x8]  ;;  %v1881_v21 = vpack.c.b16 %v3682_v18, %v1867_v59  ;;  %v1708_v28 = vor.u32 %v1707_v4, %v1703_v13  ;;  %1975 = vmatpush.bf16.msrb.mxu0 %v3134_v51 }
 0x193   : > { %v2774_v29 = vrot.slane %v1451_v9, 9  ;;  %v2784_v30 = vrot.slane %v1531_v45, 11  ;;  %1428 = vst [vmem:[#allocation3 + $0x40] sm:$0xf] %v1427_v61  ;;  %v1712_v32 = vshll.u32 %v2810_v15, 16  ;;  %v1710_v35 = vshrl.u32 %v2810_v15, 16 }
 0x194   : > { %v1595_v17 = vld [vmem:[#allocation3 + $0x3c] sm:$0x1]  ;;  %1431 = vst [vmem:[#allocation3 + $0x44] sm:$0x1] %v1430_v27  ;;  %2924 = vmatmul.msk.bf16.gmra.mxu2 %vm701_vm8, %v1881_v21  ;;  %1752 = vrot.lane.b32.xlu1 %v1708_v28, %s3253_s28  ;;  %v1453_v20 = vld [vmem:[#allocation3 + $0x48] sm:$0x2] }
 0x195   : > { %v2813_v2 = vld [vmem:[#allocation3 + $0x30] sm:$0xf]  ;;  %v1516_v33 = vsel %vm3332_vm6, %v2774_v29, %v1515_v14  ;;  %v1596_v34 = vsel %vm3361_vm7, %v2784_v30, %v1595_v17  ;;  %v1714_v36 = vrot.slane %v1712_v32, 1  ;;  %v1769_v24 = vrot.slane %v2810_v15, 1  ;;  %v1533_v42 = vld [vmem:[#allocation3 + $0x48] sm:$0x8]  ;;  %2331 = vmatpush.bf16.msra.mxu2 %v3148_v25 }
 0x196   : > { %v3112_v23 = vld [vmem:[#allocation3 + $0x30] sm:$0x10]  ;;  %1517 = vst [vmem:[#allocation3 + $0x38] sm:$0x1] %v1516_v33  ;;  %v2776_v41 = vrot.slane %v1453_v20, 9  ;;  %v2786_v46 = vrot.slane %v1533_v42, 11 }
 0x197   : > { %v2814_v39 = vor.u32 %v3112_v23, %v2813_v2  ;;  %1597 = vst [vmem:[#allocation3 + $0x3c] sm:$0x1] %v1596_v34  ;;  %v1715_v43 = vor.u32 %v1714_v36, %v1710_v35  ;;  %v1521_v19 = vld [vmem:[#allocation3 + $0x48] sm:$0x1]  ;;  %v1601_v50 = vld [vmem:[#allocation3 + $0x4c] sm:$0x1]  ;;  %v1871_v58 = vunpack.c.l.b16 %v1769_v24 }
 0x198   : > { %v1522_v49 = vsel %vm3332_vm6, %v2776_v41, %v1521_v19  ;;  %v1602_v53 = vsel %vm3361_vm7, %v2786_v46, %v1601_v50  ;;  %v1679_v12 = vrot.slane %v1677_v5, 1  ;;  %v3132_v30 = vld [vmem:[%s3314_s27 + $0x1a0] sm:$0xff]  ;;  %v3129_v19 = vld [vmem:[%s3314_s27 + $0x188] sm:$0xff]  ;;  %v3146_v50 = vld [vmem:[%s3314_s27 + $0x210] sm:$0xff] }
 0x199   : > { %v1770_v47 = vrot.slane %v2814_v39, 1  ;;  %v1719_v48 = vshll.u32 %v2814_v39, 16  ;;  %1754 = vrot.lane.b32.xlu2 %v1715_v43, %s3253_s28  ;;  %1523 = vst [vmem:[#allocation3 + $0x48] sm:$0x1] %v1522_v49  ;;  %v1717_v31 = vshrl.u32 %v2814_v39, 16  ;;  %v2040_v8 = vpack.c.b16 %v1871_v58, %v3682_v18  ;;  %v3133_v18 = vld [vmem:[%s3314_s27 + $0x1a8] sm:$0xff] }
 0x19a   : > { %v1452_v54 = vld [vmem:[#allocation3 + $0x40] sm:$0x2]  ;;  %1603 = vst [vmem:[#allocation3 + $0x4c] sm:$0x1] %v1602_v53  ;;  %v1532_v56 = vld [vmem:[#allocation3 + $0x40] sm:$0x8]  ;;  %v1680_v9 = vor.u32 %v1679_v12, %v1675_v62  ;;  %1976 = vmatpush.bf16.msrb.mxu0 %v3133_v18 }
 0x19b   : > { %v2775_v22 = vrot.slane %v1452_v54, 9  ;;  %v1721_v59 = vrot.slane %v1719_v48, 1  ;;  %v1518_v57 = vld [vmem:[#allocation3 + $0x40] sm:$0x1]  ;;  %v2785_v60 = vrot.slane %v1532_v56, 11  ;;  %v1873_v63 = vunpack.c.l.b16 %v1770_v47  ;;  %v3131_v43 = vld [vmem:[%s3314_s27 + $0x198] sm:$0xff] }
 0x19c   : > { %v1598_v1 = vld [vmem:[#allocation3 + $0x44] sm:$0x1]  ;;  %v3123_v47 = vld [vmem:[%s3314_s27 + $0x158] sm:$0xff]  ;;  %v3122_v49 = vld [vmem:[%s3314_s27 + $0x150] sm:$0xff] }
 0x19d   : > { %v1519_v0 = vsel %vm3332_vm6, %v2775_v22, %v1518_v57  ;;  %v1722_v3 = vor.u32 %v1721_v59, %v1717_v31  ;;  %v2817_v6 = vld [vmem:[#allocation3 + $0x38] sm:$0xf]  ;;  %v1599_v10 = vsel %vm3361_vm7, %v2785_v60, %v1598_v1  ;;  %v1883_v11 = vpack.c.b16 %v1873_v63, %v1871_v58  ;;  %v3128_v46 = vld [vmem:[%s3314_s27 + $0x180] sm:$0xff]  ;;  %2131 = vmatpush.bf16.msra.mxu1 %v3123_v47  ;;  %v1606_v31 = vld [vmem:[#allocation3 + $0x8] sm:$0xf] }
 0x19e   : > { %1520 = vst [vmem:[#allocation3 + $0x40] sm:$0x1] %v1519_v0  ;;  %v3113_v7 = vld [vmem:[#allocation3 + $0x38] sm:$0x10]  ;;  %1977 = vmatpush.bf16.msrb.mxu0 %v3132_v30  ;;  %v3145_v57 = vld [vmem:[%s3314_s27 + $0x208] sm:$0xff]  ;;  %v3120_v60 = vld [vmem:[%s3314_s27 + $0x140] sm:$0xff] }
 0x19f   : > { %1600 = vst [vmem:[#allocation3 + $0x44] sm:$0x1] %v1599_v10  ;;  %1756 = vrot.lane.b32.xlu0 %v1722_v3, %s3253_s28  ;;  %v2818_v52 = vor.u32 %v3113_v7, %v2817_v6  ;;  %v3147_v48 = vld [vmem:[%s3314_s27 + $0x218] sm:$0xff]  ;;  %v3144_v0 = vld [vmem:[%s3314_s27 + $0x200] sm:$0xff]  ;;  %v3118_v1 = vld [vmem:[%s3314_s27 + $0x130] sm:$0xff] }
 0x1a0   : > { %v2825_v13 = vld [vmem:[#allocation3 + $0x48] sm:$0xf]  ;;  %v3143_v3 = vld [vmem:[%s3314_s27 + $0x1f8] sm:$0xff]  ;;  %v3116_v6 = vld [vmem:[%s3314_s27 + $0x120] sm:$0xff] }
 0x1a1   : > { %2977 = vmatmul.msk.bf16.gmra.mxu3 %vm701_vm8, %v2040_v8  ;;  %v1726_v26 = vshll.u32 %v2818_v52, 16  ;;  %v3115_v4 = vld [vmem:[#allocation3 + $0x48] sm:$0x10]  ;;  %v1724_v15 = vshrl.u32 %v2818_v52, 16  ;;  %v1771_v28 = vrot.slane %v2818_v52, 1  ;;  %2132 = vmatpush.bf16.msra.mxu1 %v3122_v49  ;;  %v3142_v10 = vld [vmem:[%s3314_s27 + $0x1f0] sm:$0xff] }
 0x1a2   : > { %v2826_v27 = vor.u32 %v3115_v4, %v2825_v13  ;;  %1978 = vmatpush.bf16.msrb.mxu0 %v3131_v43  ;;  %v3117_v5 = vld [vmem:[%s3314_s27 + $0x128] sm:$0xff]  ;;  %v1616_v18 = vld [vmem:[#allocation3 + $0x30] sm:$0xf]  ;;  %v1604_v30 = vld [vmem:[#allocation3] sm:$0xf] }
 0x1a3   : > { %v1728_v61 = vrot.slane %v1726_v26, 1  ;;  %v1875_v34 = vunpack.c.l.b16 %v1771_v28  ;;  %v3141_v62 = vld [vmem:[%s3314_s27 + $0x1e8] sm:$0xff] }
 0x1a4   : > { %2925 = vmatmul.msk.bf16.gmra.mxu2 %vm701_vm8, %v1883_v11  ;;  %v1740_v45 = vshll.u32 %v2826_v27, 16  ;;  %v1773_v32 = vrot.slane %v2826_v27, 1  ;;  %v1738_v35 = vshrl.u32 %v2826_v27, 16  ;;  %v1612_v11 = vld [vmem:[#allocation3 + $0x20] sm:$0xf] }
 0x1a5   : > { %v1729_v14 = vor.u32 %v1728_v61, %v1724_v15  ;;  %v2821_v21 = vld [vmem:[#allocation3 + $0x40] sm:$0xf]  ;;  %v2042_v41 = vpack.c.b16 %v1875_v34, %v1873_v63  ;;  %2133 = vmatpush.bf16.msra.mxu1 %v3121_v55  ;;  %v3119_v63 = vld [vmem:[%s3314_s27 + $0x138] sm:$0xff] }
 0x1a6   : > { %v3114_v29 = vld [vmem:[#allocation3 + $0x40] sm:$0x10]  ;;  %v1742_v17 = vrot.slane %v1740_v45, 1  ;;  %v2216_v20 = vunpack.c.l.b16 %v1773_v32  ;;  %1979 = vmatpush.bf16.msrb.mxu0 %v3130_v44 }
 0x1a7   : > { %1744 = vrot.lane.b32.xlu0 %v1680_v9, %s3253_s28  ;;  %1758 = vrot.lane.b32.xlu1 %v1729_v14, %s3253_s28  ;;  %v2822_v37 = vor.u32 %v3114_v29, %v2821_v21  ;;  %v3140_v15 = vld [vmem:[%s3314_s27 + $0x1e0] sm:$0xff]  ;;  %v1614_v9 = vld [vmem:[#allocation3 + $0x28] sm:$0xf] }
 0x1a8   : > { %v1743_v39 = vor.u32 %v1742_v17, %v1738_v35  ;;  %v1618_v35 = vld [vmem:[#allocation3 + $0x38] sm:$0xf] }
 0x1a9   : > { %v1772_v2 = vrot.slane %v2822_v37, 1  ;;  %v1733_v33 = vshll.u32 %v2822_v37, 16  ;;  %v1731_v23 = vshrl.u32 %v2822_v37, 16  ;;  %2134 = vmatpush.bf16.msra.mxu1 %v3120_v60 }
 0x1aa   : > { %1980 = vmatpush.bf16.msrb.mxu0 %v3129_v19  ;;  %v1622_v19 = vld [vmem:[#allocation3 + $0x48] sm:$0xf] }
 0x1ab   : > { %v1877_v36 = vunpack.c.l.b16 %v1772_v2  ;;  %v1735_v16 = vrot.slane %v1733_v33, 1 }
 0x1ad   : > { %v1736_v24 = vor.u32 %v1735_v16, %v1731_v23  ;;  %v2218_v40 = vpack.c.b16 %v2216_v20, %v1877_v36  ;;  %v1885_v42 = vpack.c.b16 %v1877_v36, %v1875_v34  ;;  %2135 = vmatpush.bf16.msra.mxu1 %v3119_v63  ;;  %v1620_v23 = vld [vmem:[#allocation3 + $0x40] sm:$0xf] }
 0x1ae   : > { %1981 = vmatpush.bf16.msrb.mxu0 %v3128_v46 }
 0x1af   : > { %1762 = vrot.lane.b32.xlu1 %v1743_v39, %s3253_s28  ;;  %1760 = vrot.lane.b32.xlu2 %v1736_v24, %s3253_s28 }
 0x1b1   : > { %2978 = vmatmul.msk.bf16.gmra.mxu3 %vm701_vm8, %v2042_v41  ;;  %2136 = vmatpush.bf16.msra.mxu1 %v3118_v1 }
 0x1b2   : > { %2295 = vmatpush.bf16.msra.mxu0 %v3147_v48 }
 0x1b4   : > { %2926 = vmatmul.msk.bf16.gmra.mxu2 %vm701_vm8, %v1885_v42 }
 0x1b5   : > { %2137 = vmatpush.bf16.msra.mxu1 %v3117_v5 }
 0x1b6   : > { %2296 = vmatpush.bf16.msra.mxu0 %v3146_v50 }
 0x1b9   : > { %2138 = vmatpush.bf16.msra.mxu1 %v3116_v6 }
 0x1ba   : > { %2297 = vmatpush.bf16.msra.mxu0 %v3145_v57 }
 0x1be   : > { %2298 = vmatpush.bf16.msra.mxu0 %v3144_v0 }
 0x1c2   : > { %2299 = vmatpush.bf16.msra.mxu0 %v3143_v3 }
 0x1c4   : > { %3051 = vmatmul.msk.bf16.vlgmr.msra.gmra.mxu2 %vm701_vm8, %v3680_v38  ;;  %v1608_v38 = vld [vmem:[#allocation3 + $0x10] sm:$0xf] }
 0x1c6   : > { %2300 = vmatpush.bf16.msra.mxu0 %v3142_v10 }
 0x1ca   : > { %2301 = vmatpush.bf16.msra.mxu0 %v3141_v62 }
 0x1ce   : > { %2302 = vmatpush.bf16.msra.mxu0 %v3140_v15 }
 0x1d4   : > { %3052 = vmatmul.msk.bf16.gmra.mxu2 %vm701_vm8, %v2040_v8  ;;  %v1610_v8 = vld [vmem:[#allocation3 + $0x18] sm:$0xf] }
 0x1d9   : > { %v1749_v51 = vpop.permute.xlu2 %1748 }
 0x1da   : > { %v3739_v53 = vsel %vm701_vm8, %v1608_v38, %v1749_v51 }
 0x1db   : > { %v1864_v56 = vunpack.c.l.b16 %v3739_v53 }
 0x1e4   : > { %3053 = vmatmul.msk.bf16.gmra.mxu2 %vm701_vm8, %v2042_v41 }
 0x1e9   : > { %v1747_v54 = vpop.permute.xlu1 %1746 }
 0x1ea   : > { %v1779_v22 = vsel %vm701_vm8, %v1606_v31, %v1747_v54 }
 0x1eb   : > { %v1862_v58 = vunpack.c.l.b16 %v1779_v22 }
 0x1ed   : > { %v1878_v59 = vpack.c.b16 %v1864_v56, %v1862_v58 }
 0x1ef   : > { %1982 = vmatmul.bf16.vlgmr.msrb.gmra.mxu0 %v1878_v59 }
 0x1f3   : > { %v1755_v61 = vpop.permute.xlu2 %1754 }
 0x1f4   : > { %3054 = vmatmul.msk.bf16.gmra.mxu2 %vm701_vm8, %v2218_v40  ;;  %v1791_v45 = vsel %vm701_vm8, %v1614_v9, %v1755_v61 }
 0x1f5   : > { %v1870_v28 = vunpack.c.l.b16 %v1791_v45 }
 0x1fc   : > { %v1751_v7 = vpop.permute.xlu0 %1750 }
 0x1fd   : > { %v1785_v52 = vsel %vm701_vm8, %v1610_v8, %v1751_v7 }
 0x1fe   : > { %v1866_v26 = vunpack.c.l.b16 %v1785_v52 }
 0x200   : > { %v2037_v40 = vpack.c.b16 %v1866_v26, %v1864_v56 }
 0x202   : > { %v2012_v43 = vpop.f32.mrf.mxu2 }
 0x204   : > { %v2169_v0 = vpop.f32.mrf.mxu3 }
 0x206   : > { %v1753_v25 = vpop.permute.xlu1 %1752 }
 0x207   : > { %v1788_v12 = vsel %vm701_vm8, %v1612_v11, %v1753_v25 }
 0x208   : > { %v1868_v13 = vunpack.c.l.b16 %v1788_v12 }
 0x209   : > { %v1761_v34 = vpop.permute.xlu2 %1760 }
 0x20a   : > { %v1880_v4 = vpack.c.b16 %v1868_v13, %v1866_v26  ;;  %v1800_v16 = vsel %vm701_vm8, %v1620_v23, %v1761_v34  ;;  %v2039_v41 = vpack.c.b16 %v1870_v28, %v1868_v13  ;;  %v2014_v47 = vpop.f32.mrf.mxu2  ;;  %v2361_v26 = vld [vmem:[#allocation2] sm:$0xff] }
 0x20b   : > { %v1876_v39 = vunpack.c.l.b16 %v1800_v16 }
 0x20c   : > { %1987 = vmatmul.bf16.gmra.mxu0 %v1880_v4  ;;  %v2171_v6 = vpop.f32.mrf.mxu3 }
 0x211   : > { %v1757_v27 = vpop.permute.xlu0 %1756 }
 0x212   : > { %v1794_v14 = vsel %vm701_vm8, %v1616_v18, %v1757_v27 }
 0x213   : > { %v1872_v21 = vunpack.c.l.b16 %v1794_v14 }
 0x214   : > { %v2174_v62 = vpop.f32.mrf.mxu3 }
 0x215   : > { %v1882_v29 = vpack.c.b16 %v1872_v21, %v1870_v28 }
 0x217   : > { %v2017_v50 = vpop.f32.mrf.mxu2 }
 0x219   : > { %v1745_v37 = vpop.permute.xlu0 %1744  ;;  %v1759_v33 = vpop.permute.xlu1 %1758 }
 0x21a   : > { %v1776_v32 = vsel %vm701_vm8, %v1604_v30, %v1745_v37  ;;  %v1797_v36 = vsel %vm701_vm8, %v1618_v35, %v1759_v33  ;;  %v2363_v35 = vld [vmem:[#allocation2 + $0x10] sm:$0xff] }
 0x21b   : > { %v2033_v17 = vunpack.c.l.b16 %v1776_v32  ;;  %v1874_v20 = vunpack.c.l.b16 %v1797_v36 }
 0x21c   : > { %1992 = vmatmul.bf16.gmra.mxu0 %v1882_v29  ;;  %v2176_v32 = vpop.f32.mrf.mxu3 }
 0x21d   : > { %v2035_v2 = vpack.c.b16 %v1862_v58, %v2033_v17  ;;  %v1884_v24 = vpack.c.b16 %v1876_v39, %v1874_v20  ;;  %v2041_v42 = vpack.c.b16 %v1874_v20, %v1872_v21  ;;  %v2362_v21 = vld [vmem:[#allocation2 + $0x8] sm:$0xff] }
 0x21f   : > { %2139 = vmatmul.bf16.vlgmr.msra.gmra.mxu1 %v2035_v2  ;;  %v2019_v38 = vpop.f32.mrf.mxu2 }
 0x221   : > { %v1763_v44 = vpop.permute.xlu1 %1762 }
 0x222   : > { %v1803_v46 = vsel %vm701_vm8, %v1622_v19, %v1763_v44  ;;  %v2364_v44 = vld [vmem:[#allocation2 + $0x18] sm:$0xff] }
 0x223   : > { %v2215_v48 = vunpack.c.l.b16 %v1803_v46 }
 0x225   : > { %v2217_v49 = vpack.c.b16 %v2215_v48, %v1876_v39 }
 0x227   : > { %v2022_v54 = vpop.f32.mrf.mxu2 }
 0x22c   : > { %1997 = vmatmul.bf16.gmra.mxu0 %v1884_v24 }
 0x22f   : > { %2144 = vmatmul.bf16.gmra.mxu1 %v2037_v40  ;;  %v3768_v55 = vpop.f32.mrf.mxu2 }
 0x237   : > { %v3770_v56 = vpop.f32.mrf.mxu2 }
 0x23c   : > { %2303 = vmatmul.bf16.vlgmr.msra.gmra.mxu0 %v2037_v40  ;;  %v2179_v40 = vpop.f32.mrf.mxu3 }
 0x23f   : > { %2149 = vmatmul.bf16.gmra.mxu1 %v2039_v41  ;;  %v3772_v59 = vpop.f32.mrf.mxu2 }
 0x247   : > { %v2333_v1 = vpop.f32.mrf.mxu2 }
 0x24c   : > { %2308 = vmatmul.bf16.gmra.mxu0 %v2039_v41 }
 0x24f   : > { %2154 = vmatmul.bf16.gmra.mxu1 %v2041_v42  ;;  %v2335_v7 = vpop.f32.mrf.mxu2 }
 0x257   : > { %v2338_v27 = vpop.f32.mrf.mxu2 }
 0x25c   : > { %2313 = vmatmul.bf16.gmra.mxu0 %v2041_v42 }
 0x25f   : > { %v2340_v17 = vpop.f32.mrf.mxu2 }
 0x26c   : > { %2318 = vmatmul.bf16.gmra.mxu0 %v2217_v49  ;;  %v1983_v51 = vpop.f32.mrf.mxu0 }
 0x26d   : > { %v2013_v10 = vadd.f32 %v2012_v43, %v1983_v51  ;;  %v2343_v43 = vpop.f32.mrf.mxu2 }
 0x274   : > { %v1985_v53 = vpop.f32.mrf.mxu0 }
 0x275   : > { %v2015_v13 = vadd.f32 %v2014_v47, %v1985_v53  ;;  %v2365_v53 = vld [vmem:[#allocation2 + $0x20] sm:$0xff] }
 0x289   : > { %v1988_v31 = vpop.f32.mrf.mxu0 }
 0x28a   : > { %v2018_v28 = vadd.f32 %v2017_v50, %v1988_v31  ;;  %v2181_v31 = vpop.f32.mrf.mxu3 }
 0x291   : > { %v1990_v22 = vpop.f32.mrf.mxu0 }
 0x292   : > { %v2020_v36 = vadd.f32 %v2019_v38, %v1990_v22 }
 0x299   : > { %v1993_v58 = vpop.f32.mrf.mxu0 }
 0x29a   : > { %v2023_v19 = vadd.f32 %v2022_v54, %v1993_v58 }
 0x29c   : > { %v2140_v60 = vpop.f32.mrf.mxu1 }
 0x29d   : > { %v2141_v8 = vadd.f32 %v2140_v60, %v2013_v10 }
 0x29f   : > { %v2170_v11 = vadd.f32 %v2169_v0, %v2141_v8  ;;  %v2345_v0 = vpop.f32.mrf.mxu2 }
 0x2a1   : > { %v1995_v57 = vpop.f32.mrf.mxu0 }
 0x2a2   : > { %v2025_v22 = vadd.f32 %v3768_v55, %v1995_v57 }
 0x2a4   : > { %v2142_v3 = vpop.f32.mrf.mxu1 }
 0x2a5   : > { %v2143_v15 = vadd.f32 %v2142_v3, %v2015_v13 }
 0x2a7   : > { %v2172_v9 = vadd.f32 %v2171_v6, %v2143_v15 }
 0x2a9   : > { %v3774_v63 = vpop.f32.mrf.mxu0 }
 0x2aa   : > { %v2028_v8 = vadd.f32 %v3770_v56, %v3774_v63 }
 0x2ac   : > { %v2145_v52 = vpop.f32.mrf.mxu1 }
 0x2ad   : > { %v2146_v30 = vadd.f32 %v2145_v52, %v2018_v28 }
 0x2af   : > { %v2175_v33 = vadd.f32 %v2174_v62, %v2146_v30  ;;  %v2367_v62 = vld [vmem:[#allocation2 + $0x30] sm:$0xff] }
 0x2b1   : > { %v3776_v5 = vpop.f32.mrf.mxu0 }
 0x2b2   : > { %v2030_v15 = vadd.f32 %v3772_v59, %v3776_v5 }
 0x2b4   : > { %v2147_v45 = vpop.f32.mrf.mxu1 }
 0x2b5   : > { %v2148_v20 = vadd.f32 %v2147_v45, %v2020_v36 }
 0x2b7   : > { %v2177_v41 = vadd.f32 %v2176_v32, %v2148_v20 }
 0x2b9   : > { %v2304_v25 = vpop.f32.mrf.mxu0 }
 0x2ba   : > { %v2334_v12 = vadd.f32 %v2333_v1, %v2304_v25  ;;  %v2184_v25 = vpop.f32.mrf.mxu3 }
 0x2bc   : > { %v2353_v4 = vadd.f32 %v2334_v12, %v2170_v11  ;;  %v2150_v16 = vpop.f32.mrf.mxu1 }
 0x2bd   : > { %v2151_v47 = vadd.f32 %v2150_v16, %v2023_v19 }
 0x2be   : > { %v2369_v61 = vadd.f32 %v2361_v26, %v2353_v4  ;;  %v2348_v26 = vpop.f32.mrf.mxu2 }
 0x2bf   : > { %v2180_v51 = vadd.f32 %v2179_v40, %v2151_v47 }
 0x2c0   : > { %2377 = vst.msk [vmem:[#allocation2] sm:$0xff] %vm701_vm8, %v2369_v61 }
 0x2c1   : > { %v2306_v18 = vpop.f32.mrf.mxu0 }
 0x2c2   : > { %v2336_v14 = vadd.f32 %v2335_v7, %v2306_v18  ;;  %v2366_v7 = vld [vmem:[#allocation2 + $0x28] sm:$0xff] }
 0x2c4   : > { %v2354_v29 = vadd.f32 %v2336_v14, %v2172_v9  ;;  %v2152_v49 = vpop.f32.mrf.mxu1  ;;  %v2186_v9 = vpop.f32.mrf.mxu3 }
 0x2c5   : > { %v2153_v1 = vadd.f32 %v2152_v49, %v2025_v22 }
 0x2c6   : > { %v2370_v37 = vadd.f32 %v2362_v21, %v2354_v29  ;;  %v2350_v56 = vpop.f32.mrf.mxu2  ;;  %v2368_v21 = vld [vmem:[#allocation2 + $0x38] sm:$0xff] }
 0x2c7   : > { %v2182_v6 = vadd.f32 %v2181_v31, %v2153_v1 }
 0x2c8   : > { %2378 = vst.msk [vmem:[#allocation2 + $0x8] sm:$0xff] %vm701_vm8, %v2370_v37 }
 0x2c9   : > { %v2309_v2 = vpop.f32.mrf.mxu0 }
 0x2ca   : > { %v2339_v34 = vadd.f32 %v2338_v27, %v2309_v2 }
 0x2cc   : > { %v2355_v23 = vadd.f32 %v2339_v34, %v2175_v33  ;;  %v2155_v54 = vpop.f32.mrf.mxu1 }
 0x2cd   : > { %v2156_v11 = vadd.f32 %v2155_v54, %v2028_v8 }
 0x2ce   : > { %v2371_v39 = vadd.f32 %v2363_v35, %v2355_v23 }
 0x2cf   : > { %v2185_v57 = vadd.f32 %v2184_v25, %v2156_v11 }
 0x2d0   : > { %2379 = vst.msk [vmem:[#allocation2 + $0x10] sm:$0xff] %vm701_vm8, %v2371_v39 }
 0x2d1   : > { %v2311_v24 = vpop.f32.mrf.mxu0 }
 0x2d2   : > { %v2341_v42 = vadd.f32 %v2340_v17, %v2311_v24 }
 0x2d4   : > { %v2356_v46 = vadd.f32 %v2341_v42, %v2177_v41  ;;  %v2157_v4 = vpop.f32.mrf.mxu1 }
 0x2d5   : > { %v2158_v27 = vadd.f32 %v2157_v4, %v2030_v15 }
 0x2d6   : > { %v2372_v48 = vadd.f32 %v2364_v44, %v2356_v46 }
 0x2d7   : > { %v2187_v14 = vadd.f32 %v2186_v9, %v2158_v27 }
 0x2d8   : > { %2380 = vst.msk [vmem:[#allocation2 + $0x18] sm:$0xff] %vm701_vm8, %v2372_v48 }
 0x2d9   : > { %v2314_v50 = vpop.f32.mrf.mxu0 }
 0x2da   : > { %v2344_v38 = vadd.f32 %v2343_v43, %v2314_v50 }
 0x2dc   : > { %v2357_v60 = vadd.f32 %v2344_v38, %v2180_v51 }
 0x2de   : > { %v2373_v3 = vadd.f32 %v2365_v53, %v2357_v60 }
 0x2e0   : > { %2381 = vst.msk [vmem:[#allocation2 + $0x20] sm:$0xff] %vm701_vm8, %v2373_v3 }
 0x2e1   : > { %v2316_v58 = vpop.f32.mrf.mxu0 }
 0x2e2   : > { %v2346_v10 = vadd.f32 %v2345_v0, %v2316_v58 }
 0x2e4   : > { %v2358_v52 = vadd.f32 %v2346_v10, %v2182_v6 }
 0x2e6   : > { %v2374_v12 = vadd.f32 %v2366_v7, %v2358_v52 }
 0x2e8   : > { %2382 = vst.msk [vmem:[#allocation2 + $0x28] sm:$0xff] %vm701_vm8, %v2374_v12 }
 0x2e9   : > { %v2319_v55 = vpop.f32.mrf.mxu0 }
 0x2ea   : > { %v2349_v13 = vadd.f32 %v2348_v26, %v2319_v55 }
 0x2ec   : > { %v2359_v61 = vadd.f32 %v2349_v13, %v2185_v57 }
 0x2ee   : > { %v2375_v18 = vadd.f32 %v2367_v62, %v2359_v61 }
 0x2f0   : > { %2383 = vst.msk [vmem:[#allocation2 + $0x30] sm:$0xff] %vm701_vm8, %v2375_v18 }
 0x2f1   : > { %v2321_v63 = vpop.f32.mrf.mxu0 }
 0x2f2   : > { %v2351_v45 = vadd.f32 %v2350_v56, %v2321_v63 }
 0x2f4   : > { %v2360_v28 = vadd.f32 %v2351_v45, %v2187_v14  ;;  %2388 = sbr.rel (%p3055_p8) target bundleno = 772 (0x304), region = 36 }
 0x2f6   : > { %v2376_v29 = vadd.f32 %v2368_v21, %v2360_v28 }
 0x2f8   : > { %2384 = vst.msk [vmem:[#allocation2 + $0x38] sm:$0xff] %vm701_vm8, %v2376_v29 }
 0x2f9   : > { %v2389_v30 = vld [vmem:[#allocation2] sm:$0xff]  ;;  %v2390_v59 = vld [vmem:[#allocation2 + $0x8] sm:$0xff]  ;;  %v2391_v5 = vld [vmem:[#allocation2 + $0x10] sm:$0xff] }
 0x2fa   : > { %v2397_v37 = vpack.c.bf16 %v2389_v30, %v2389_v30  ;;  %v2398_v32 = vpack.c.bf16 %v2390_v59, %v2390_v59  ;;  %v2399_v17 = vpack.c.bf16 %v2391_v5, %v2391_v5  ;;  %v2392_v2 = vld [vmem:[#allocation2 + $0x18] sm:$0xff]  ;;  %v2393_v33 = vld [vmem:[#allocation2 + $0x20] sm:$0xff]  ;;  %v2394_v34 = vld [vmem:[#allocation2 + $0x28] sm:$0xff] }
 0x2fb   : > { %v2400_v35 = vpack.c.bf16 %v2392_v2, %v2392_v2  ;;  %v2395_v36 = vld [vmem:[#allocation2 + $0x30] sm:$0xff]  ;;  %v2401_v23 = vpack.c.bf16 %v2393_v33, %v2393_v33  ;;  %v2402_v20 = vpack.c.bf16 %v2394_v34, %v2394_v34 }
 0x2fc   : > { %2406 = vst.msk [vmem:[%s3309_s24] sm:$0xf] %vm303_vm1, %v2397_v37  ;;  %v2403_v39 = vpack.c.bf16 %v2395_v36, %v2395_v36 }
 0x2fd   : > { %2407 = vst.msk [vmem:[%s3309_s24 + $0x4] sm:$0xf] %vm303_vm1, %v2398_v32 }
 0x2fe   : > { %2408 = vst.msk [vmem:[%s3309_s24 + $0x8] sm:$0xf] %vm303_vm1, %v2399_v17 }
 0x2ff   : > { %v2396_v16 = vld [vmem:[#allocation2 + $0x38] sm:$0xff]  ;;  %2409 = vst.msk [vmem:[%s3309_s24 + $0xc] sm:$0xf] %vm303_vm1, %v2400_v35 }
 0x300   : > { %v2404_v24 = vpack.c.bf16 %v2396_v16, %v2396_v16  ;;  %2410 = vst.msk [vmem:[%s3309_s24 + $0x10] sm:$0xf] %vm303_vm1, %v2401_v23 }
 0x301   : > { %2411 = vst.msk [vmem:[%s3309_s24 + $0x14] sm:$0xf] %vm303_vm1, %v2402_v20 }
 0x302   : > { %2412 = vst.msk [vmem:[%s3309_s24 + $0x18] sm:$0xf] %vm303_vm1, %v2403_v39 }
 0x303   : > { %2413 = vst.msk [vmem:[%s3309_s24 + $0x1c] sm:$0xf] %vm303_vm1, %v2404_v24 }
 0x304 PF: > { %s12_s13 = sadd.s32 1, %s3251_s13   ;;  %s3832_s9 = smov %s3243_s11 }
 0x305   : > { %p9_p9 = scmp.ge.s32.totalorder %s12_s13, 20   ;;  %s3833_s10 = smov %s3247_s12 }
 0x306   : > { %s3834_s11 = smov %s3837_s14  ;;  %s3835_s12 = smov %s3841_s15 }
 0x307   :  { %11 = sbr.rel (!%p9_p9) target bundleno = 3 (0x3), region = 76 }

// kernel: decoder_forward.3
= control target key start
LH: loop header
LB: loop body
LE: loop exit
PB: predicated region body
PF: predicated region fallthrough
CT: control target
= control target key end

     0   :  { %s9348_s12 = smov 0   ;;  %s13346_s0 = inlined_call_operand.vmem [shape: bf16[2,16,16,64], index: 0, kind: input, shape index: {}]   ;;  %s13347_s1 = inlined_call_operand.vmem [shape: bf16[3,192,32], index: 1, kind: input, shape index: {}]   ;;  %s13348_s2 = inlined_call_operand.vmem [shape: bf16[7,224,8], index: 2, kind: input, shape index: {}]   ;;  %s13349_s3 = inlined_call_operand.vmem [shape: f32[2,16,16,8], index: 3, kind: output, shape index: {}]  }
   0x1 LB: > { %s7903_s13 = sadd.s32 4294967295, %s9323_s12   ;;  %p7907_p0 = scmp.ge.s32.totalorder %s9323_s12, 1  ;;  %s9323_s12 = sphi %s9348_s12, %s13_s12  }
   0x2   : > { %p137_p1 = scmp.lt.s32.totalorder %s9323_s12, 3 }
   0x4   : > { %p138_p2 = pnand %p7907_p0, %p137_p1 }
   0x6   : > { %141 = sbr.rel (%p138_p2) target bundleno = 1910 (0x776), region = 32 }
   0xb   : > { %v9153_v0 = vld [vmem:[%s13347_s1 + $0xb8] sm:$0xff]  ;;  %p161_p3 = scmp.lt.s32.totalorder %s7903_s13, 1  ;;  %v9152_v2 = vld [vmem:[%s13347_s1 + $0xb0] sm:$0xff]  ;;  %vm204_vm0 = vsmask.f32 256  ;;  %v9151_v4 = vld [vmem:[%s13347_s1 + $0xa8] sm:$0xff] }
   0xc   : > { %v9141_v1 = vld [vmem:[%s13347_s1 + $0x58] sm:$0xff]  ;;  %1773 = vmatpush.bf16.msra.mxu1 %v9153_v0  ;;  %v9140_v3 = vld [vmem:[%s13347_s1 + $0x50] sm:$0xff]  ;;  %v9139_v5 = vld [vmem:[%s13347_s1 + $0x48] sm:$0xff]  ;;  %vm205_vm1 = vsmask.f32 4368  ;;  %vm528_vm2 = vcmask 519168  }
   0xd   : > { %2026 = vmatpush.bf16.msra.mxu3 %v9141_v1  ;;  %s14033_s13 = smov (!%p161_p3, %s7903_s13), 1  ;;  %vm536_vm3 = vcmask 516096   ;;  %vm529_vm4 = vsmask.f32 7938  ;;  %v9150_v17 = vld [vmem:[%s13347_s1 + $0xa0] sm:$0xff]  ;;  %vm9394_vm5 = vmor %vm204_vm0, %vm205_vm1  ;;  %v13422_v24 = vmov 0 }
   0xe   : > { %s9110_s22 = sshll.u32 %s14033_s13, 7  ;;  %v9138_v18 = vld [vmem:[%s13347_s1 + $0x40] sm:$0xff]  ;;  %v531_v23 = vld [vmem:[#allocation2 + $0xc] sm:$0xf]  ;;  %vm9400_vm6 = vmand %vm536_vm3, %vm204_vm0  ;;  %v13425_v32 = vmov 0  ;;  %vm13358_vm9 = vcmask 1046528  }
   0xf   : > { %s9380_s29 = scalar_lea.vmem %s13346_s0, %s9110_s22  ;;  %v13423_v24 = vsel %vm9400_vm6, 4294967295, %v13422_v24  ;;  %v538_v25 = vld [vmem:[#allocation2 + $0x14] sm:$0x1]  ;;  %vm9406_vm7 = vmand %vm528_vm2, %vm529_vm4  ;;  %v646_v33 = vld [vmem:[#allocation2] sm:$0xf]  ;;  %vm13361_vm10 = vcmask 523264  }
  0x10   : > { %1774 = vmatpush.bf16.msra.mxu1 %v9152_v2  ;;  %v172_v6 = vld [vmem:[%s9380_s29] sm:$0xf]  ;;  %v173_v7 = vld [vmem:[%s9380_s29 + $0x4] sm:$0xf]  ;;  %v174_v8 = vld [vmem:[%s9380_s29 + $0x8] sm:$0xf] }
  0x11   : > { %2027 = vmatpush.bf16.msra.mxu3 %v9140_v3  ;;  %v208_v9 = vshrl.u32 %v172_v6, 16  ;;  %v211_v10 = vshll.u32 %v172_v6, 16  ;;  %v216_v11 = vshrl.u32 %v173_v7, 16  ;;  %v219_v12 = vshll.u32 %v173_v7, 16  ;;  %v175_v13 = vld [vmem:[%s9380_s29 + $0xc] sm:$0xf]  ;;  %vm9443_vm8 = vmand %vm536_vm3, %vm529_vm4 }
  0x12   : > { %v225_v14 = vshrl.u32 %v174_v8, 16  ;;  %v228_v15 = vshll.u32 %v174_v8, 16  ;;  %v233_v16 = vshrl.u32 %v175_v13, 16  ;;  %v236_v22 = vshll.u32 %v175_v13, 16  ;;  %13424 = vst [vmem:[#allocation4_spill] sm:$0xff] %v13423_v24  ;;  %v9165_v39 = vld [vmem:[%s13347_s1 + $0x118] sm:$0xff] }
  0x13   : > { %v210_v20 = vrot.slane %v208_v9, 7  ;;  %v218_v21 = vrot.slane %v216_v11, 7  ;;  %v13426_v32 = vsel %vm9406_vm7, 4294967295, %v13425_v32  ;;  %v176_v34 = vld [vmem:[%s9380_s29 + $0x10] sm:$0xf]  ;;  %v9161_v46 = vld [vmem:[%s13347_s1 + $0xf8] sm:$0xff] }
  0x14   : > { %1775 = vmatpush.bf16.msra.mxu1 %v9151_v4  ;;  %v227_v26 = vrot.slane %v225_v14, 7  ;;  %v235_v27 = vrot.slane %v233_v16, 7  ;;  %13427 = vst [vmem:[#allocation5_spill] sm:$0xff] %v13426_v32  ;;  %v177_v40 = vld [vmem:[%s9380_s29 + $0x14] sm:$0xf]  ;;  %v242_v49 = vshrl.u32 %v176_v34, 16 }
  0x15   : > { %2028 = vmatpush.bf16.msra.mxu3 %v9139_v5  ;;  %v213_v28 = vor.u32 %v211_v10, %v210_v20  ;;  %v214_v29 = vrot.slane %v210_v20, 4  ;;  %v221_v30 = vor.u32 %v219_v12, %v218_v21  ;;  %v223_v31 = vrot.slane %v218_v21, 4  ;;  %v650_v44 = vld [vmem:[#allocation2 + $0x8] sm:$0x1]  ;;  %v541_v48 = vld [vmem:[#allocation2 + $0x18] sm:$0xf] }
  0x16   : > { %v230_v35 = vor.u32 %v228_v15, %v227_v26  ;;  %v231_v36 = vrot.slane %v227_v26, 4  ;;  %v238_v37 = vor.u32 %v236_v22, %v235_v27  ;;  %v240_v38 = vrot.slane %v235_v27, 4  ;;  %v545_v52 = vld [vmem:[#allocation2 + $0x20] sm:$0x1]  ;;  %v548_v62 = vld [vmem:[#allocation2 + $0x24] sm:$0xf] }
  0x17   : > { %v222_v41 = vsel %vm9394_vm5, %v214_v29, %v221_v30  ;;  %v532_v42 = vsel %vm9406_vm7, %v213_v28, %v531_v23  ;;  %v539_v43 = vsel %vm9400_vm6, %v223_v31, %v538_v25  ;;  %v250_v50 = vshrl.u32 %v177_v40, 16  ;;  %v552_v0 = vld [vmem:[#allocation2 + $0x2c] sm:$0x1]  ;;  %v178_v22 = vld [vmem:[%s9380_s29 + $0x18] sm:$0xf]  ;;  %s9325_s15 = smov 64  }
  0x18   : > { %1776 = vmatpush.bf16.msra.mxu1 %v9150_v17  ;;  %533 = vst [vmem:[#allocation2 + $0xc] sm:$0xf] %v532_v42  ;;  %v647_v45 = vsel %vm9406_vm7, %v230_v35, %v646_v33  ;;  %v239_v47 = vsel %vm9394_vm5, %v231_v36, %v238_v37  ;;  %v651_v51 = vsel %vm9400_vm6, %v240_v38, %v650_v44  ;;  %v245_v53 = vshll.u32 %v176_v34, 16  ;;  %v179_v33 = vld [vmem:[%s9380_s29 + $0x1c] sm:$0xf]  ;;  %s9326_s11 = smov 32  }
  0x19   : > { %2029 = vmatpush.bf16.msra.mxu3 %v9138_v18  ;;  %535 = vst.msk [vmem:[#allocation2 + $0x10] sm:$0xf] %vm528_vm2, %v222_v41  ;;  %v253_v54 = vshll.u32 %v177_v40, 16  ;;  %v244_v55 = vrot.slane %v242_v49, 7  ;;  %v252_v56 = vrot.slane %v250_v50, 7  ;;  %v542_v57 = vsel %vm9406_vm7, %v230_v35, %v541_v48  ;;  %s9327_s14 = smov 96  }
  0x1a   : > { %540 = vst [vmem:[#allocation2 + $0x14] sm:$0x1] %v539_v43  ;;  %v546_v58 = vsel %vm9400_vm6, %v240_v38, %v545_v52  ;;  %v13428_v7 = vmov 0  ;;  %v259_v38 = vshrl.u32 %v178_v22, 16  ;;  %v262_v41 = vshll.u32 %v178_v22, 16  ;;  %s9111_s4 = sshll.u32 %s14033_s13, 8 }
  0x1b   : > { %648 = vst [vmem:[#allocation2] sm:$0xf] %v647_v45  ;;  %v247_v59 = vor.u32 %v245_v53, %v244_v55  ;;  %v248_v60 = vrot.slane %v244_v55, 4  ;;  %v255_v61 = vor.u32 %v253_v54, %v252_v56  ;;  %v257_v63 = vrot.slane %v252_v56, 4  ;;  %s13176_s7 = scalar_lea.vmem %s13349_s3, %s9111_s4 }
  0x1c   : > { %2211 = vmatpush.bf16.msrb.mxu1 %v9161_v46  ;;  %649 = vst.msk [vmem:[#allocation2 + $0x4] sm:$0xf] %vm528_vm2, %v239_v47  ;;  %v13429_v7 = vsel %vm9443_vm8, 4294967295, %v13428_v7  ;;  %v267_v42 = vshrl.u32 %v179_v33, 16  ;;  %v261_v45 = vrot.slane %v259_v38, 7  ;;  %vm2841_vm12 = vcmask 257025  }
  0x1d   : > { %2304 = vmatpush.bf16.msrb.mxu3 %v9165_v39  ;;  %652 = vst [vmem:[#allocation2 + $0x8] sm:$0x1] %v651_v51  ;;  %v256_v3 = vsel %vm9394_vm5, %v248_v60, %v255_v61  ;;  %v549_v4 = vsel %vm9406_vm7, %v247_v59, %v548_v62  ;;  %v553_v13 = vsel %vm9400_vm6, %v257_v63, %v552_v0  ;;  %vm13359_vm11 = vsmask.f32 7424 }
  0x1e   : > { %544 = vst.msk [vmem:[#allocation2 + $0x1c] sm:$0xf] %vm528_vm2, %v239_v47  ;;  %v270_v47 = vshll.u32 %v179_v33, 16  ;;  %v264_v50 = vor.u32 %v262_v41, %v261_v45  ;;  %v269_v51 = vrot.slane %v267_v42, 7  ;;  %v265_v56 = vrot.slane %v261_v45, 4 }
  0x1f   : > { %v662_v1 = vld [vmem:[#allocation2 + $0xc] sm:$0x2]  ;;  %v754_v2 = vld [vmem:[#allocation2 + $0xc] sm:$0x1]  ;;  %543 = vst [vmem:[#allocation2 + $0x18] sm:$0xf] %v542_v57 }
  0x20   : > { %v7913_v5 = vrot.slane %v662_v1, 9  ;;  %v806_v6 = vld [vmem:[#allocation2 + $0x10] sm:$0x8]  ;;  %13430 = vst [vmem:[#allocation6_spill] sm:$0xff] %v13429_v7  ;;  %v272_v0 = vor.u32 %v270_v47, %v269_v51  ;;  %vm2842_vm13 = vsmask.f32 7942 }
  0x21   : > { %547 = vst [vmem:[#allocation2 + $0x20] sm:$0x1] %v546_v58  ;;  %v7931_v8 = vrot.slane %v806_v6, 11  ;;  %v899_v9 = vld [vmem:[#allocation2 + $0x14] sm:$0x1]  ;;  %vm10313_vm14 = vmand %vm2841_vm12, %vm2842_vm13  ;;  %vm3116_vm3 = vcmask 254977  }
  0x22   : > { %550 = vst [vmem:[#allocation2 + $0x24] sm:$0xf] %v549_v4  ;;  %v755_v10 = vsel %vm9400_vm6, %v7913_v5, %v754_v2  ;;  %v661_v11 = vld [vmem:[#allocation2] sm:$0x2]  ;;  %v751_v12 = vld [vmem:[#allocation2] sm:$0x1] }
  0x23   : > { %551 = vst.msk [vmem:[#allocation2 + $0x28] sm:$0xf] %vm528_vm2, %v256_v3  ;;  %v900_v14 = vsel %vm9443_vm8, %v7931_v8, %v899_v9  ;;  %v7912_v15 = vrot.slane %v661_v11, 9  ;;  %v805_v16 = vld [vmem:[#allocation2 + $0x4] sm:$0x8]  ;;  %v273_v9 = vsel %vm9394_vm5, %v265_v56, %v272_v0  ;;  %vm2849_vm12 = vcmask 254976  }
  0x24   : > { %756 = vst [vmem:[#allocation2 + $0xc] sm:$0x1] %v755_v10  ;;  %v7930_v17 = vrot.slane %v805_v16, 11  ;;  %v896_v18 = vld [vmem:[#allocation2 + $0x8] sm:$0x1]  ;;  %v274_v10 = vrot.slane %v269_v51, 4 }
  0x25   : > { %901 = vst [vmem:[#allocation2 + $0x14] sm:$0x1] %v900_v14  ;;  %v752_v20 = vsel %vm9400_vm6, %v7912_v15, %v751_v12  ;;  %v807_v21 = vld [vmem:[#allocation2 + $0x1c] sm:$0x8]  ;;  %v555_v57 = vld [vmem:[#allocation2 + $0x30] sm:$0xf] }
  0x26   : > { %554 = vst [vmem:[#allocation2 + $0x2c] sm:$0x1] %v553_v13  ;;  %v897_v23 = vsel %vm9443_vm8, %v7930_v17, %v896_v18  ;;  %v663_v25 = vld [vmem:[#allocation2 + $0x18] sm:$0x2]  ;;  %v757_v26 = vld [vmem:[#allocation2 + $0x18] sm:$0x1]  ;;  %v556_v4 = vsel %vm9406_vm7, %v264_v50, %v555_v57 }
  0x27   : > { %753 = vst [vmem:[#allocation2] sm:$0x1] %v752_v20  ;;  %v7914_v27 = vrot.slane %v663_v25, 9  ;;  %v7932_v28 = vrot.slane %v807_v21, 11  ;;  %v559_v15 = vld [vmem:[#allocation2 + $0x38] sm:$0x1] }
  0x28   : > { %898 = vst [vmem:[#allocation2 + $0x8] sm:$0x1] %v897_v23  ;;  %v902_v29 = vld [vmem:[#allocation2 + $0x20] sm:$0x1]  ;;  %v566_v0 = vld [vmem:[#allocation2 + $0x44] sm:$0x1] }
  0x29   : > { %v664_v30 = vld [vmem:[#allocation2 + $0x24] sm:$0x2]  ;;  %v760_v31 = vld [vmem:[#allocation2 + $0x24] sm:$0x1]  ;;  %v758_v34 = vsel %vm9400_vm6, %v7914_v27, %v757_v26  ;;  %v903_v35 = vsel %vm9443_vm8, %v7932_v28, %v902_v29  ;;  %557 = vst [vmem:[#allocation2 + $0x30] sm:$0xf] %v556_v4 }
  0x2a   : > { %v7915_v36 = vrot.slane %v664_v30, 9  ;;  %v808_v37 = vld [vmem:[#allocation2 + $0x28] sm:$0x8]  ;;  %759 = vst [vmem:[#allocation2 + $0x18] sm:$0x1] %v758_v34  ;;  %v560_v34 = vsel %vm9400_vm6, %v274_v10, %v559_v15 }
  0x2b   : > { %v9464_v39 = vld [vmem:[#allocation2 + $0xc] sm:$0xff]  ;;  %v7933_v40 = vrot.slane %v808_v37, 11  ;;  %904 = vst [vmem:[#allocation2 + $0x20] sm:$0x1] %v903_v35  ;;  %v180_v26 = vld [vmem:[%s9380_s29 + $0x20] sm:$0xf] }
  0x2c   : > { %v955_v43 = vld [vmem:[#allocation2 + $0x14] sm:$0x1]  ;;  %v761_v44 = vsel %vm9400_vm6, %v7915_v36, %v760_v31  ;;  %v1405_v53 = vrot.slane %v9464_v39, 1  ;;  %v1164_v63 = vshll.u32 %v9464_v39, 16  ;;  %558 = vst.msk [vmem:[#allocation2 + $0x34] sm:$0xf] %vm528_vm2, %v273_v9 }
  0x2d   : > { %v1113_v46 = vunpack.c.l.b16 %v955_v43  ;;  %762 = vst [vmem:[#allocation2 + $0x24] sm:$0x1] %v761_v44  ;;  %v905_v49 = vld [vmem:[#allocation2 + $0x2c] sm:$0x1]  ;;  %v1162_v16 = vshrl.u32 %v9464_v39, 16  ;;  %v9160_v31 = vld [vmem:[%s13347_s1 + $0xf0] sm:$0xff] }
  0x2e   : > { %v9468_v48 = vld [vmem:[#allocation2] sm:$0xff]  ;;  %v906_v55 = vsel %vm9443_vm8, %v7933_v40, %v905_v49  ;;  %v1166_v23 = vrot.slane %v1164_v63, 1  ;;  %561 = vst [vmem:[#allocation2 + $0x38] sm:$0x1] %v560_v34  ;;  %2212 = vmatpush.bf16.msrb.mxu1 %v9160_v31  ;;  %v276_v42 = vshrl.u32 %v180_v26, 16 }
  0x2f   : > { %v1131_v52 = vpack.c.b16 %v1113_v46, %v1113_v46  ;;  %v952_v54 = vld [vmem:[#allocation2 + $0x8] sm:$0x1]  ;;  %v1150_v59 = vshrl.u32 %v9468_v48, 16  ;;  %v1152_v60 = vshll.u32 %v9468_v48, 16  ;;  %907 = vst [vmem:[#allocation2 + $0x2c] sm:$0x1] %v906_v55 }
  0x30   : > { %v1112_v58 = vunpack.c.l.b16 %v952_v54  ;;  %v1402_v62 = vrot.slane %v9468_v48, 1  ;;  %v181_v27 = vld [vmem:[%s9380_s29 + $0x24] sm:$0xf]  ;;  %v1167_v44 = vor.u32 %v1166_v23, %v1162_v16  ;;  %v665_v49 = vld [vmem:[#allocation2 + $0x30] sm:$0x2]  ;;  %v279_v54 = vshll.u32 %v180_v26, 16 }
  0x31   : > { %v1406_v61 = vrot.slane %v1131_v52, 1  ;;  %v1154_v2 = vrot.slane %v1152_v60, 1  ;;  %v1169_v3 = vshll.u32 %v1131_v52, 16  ;;  %v9482_v6 = vld [vmem:[#allocation2 + $0x18] sm:$0xff]  ;;  %v284_v43 = vshrl.u32 %v181_v27, 16 }
  0x32   : > { %v1130_v1 = vpack.c.b16 %v1112_v58, %v1112_v58  ;;  %v958_v8 = vld [vmem:[#allocation2 + $0x20] sm:$0x1]  ;;  %v1174_v17 = vshrl.u32 %v9482_v6, 16  ;;  %v1176_v18 = vshll.u32 %v9482_v6, 16  ;;  %v1408_v36 = vrot.slane %v9482_v6, 1 }
  0x33   : > { %v9480_v5 = vsel %vm13358_vm9, %v1405_v53, %v1406_v61  ;;  %v1155_v12 = vor.u32 %v1154_v2, %v1150_v59  ;;  %v1114_v14 = vunpack.c.l.b16 %v958_v8  ;;  %v1171_v28 = vrot.slane %v1169_v3, 1  ;;  %v763_v50 = vld [vmem:[#allocation2 + $0x30] sm:$0x1]  ;;  %v809_v52 = vld [vmem:[#allocation2 + $0x34] sm:$0x8] }
  0x34   : > { %8092 = vmatmul.msk.bf16.vlgmr.msra.gmra.mxu1 %vm13361_vm10, %v9480_v5  ;;  %v1403_v11 = vrot.slane %v1130_v1, 1  ;;  %v1157_v13 = vshll.u32 %v1130_v1, 16  ;;  %v9492_v20 = vld [vmem:[#allocation2 + $0x24] sm:$0xff]  ;;  %v1178_v29 = vrot.slane %v1176_v18, 1  ;;  %v7916_v51 = vrot.slane %v665_v49, 9 }
  0x35   : > { %v1132_v25 = vpack.c.b16 %v1114_v14, %v1114_v14  ;;  %v1188_v33 = vshll.u32 %v9492_v20, 16  ;;  %v1186_v41 = vshrl.u32 %v9492_v20, 16  ;;  %v278_v53 = vrot.slane %v276_v42, 7  ;;  %v562_v4 = vld [vmem:[#allocation2 + $0x3c] sm:$0xf] }
  0x36   : > { %v1404_v21 = vsel %vm13358_vm9, %v1402_v62, %v1403_v11  ;;  %v1159_v22 = vrot.slane %v1157_v13, 1  ;;  %v961_v30 = vld [vmem:[#allocation2 + $0x2c] sm:$0x1]  ;;  %v1179_v40 = vor.u32 %v1178_v29, %v1174_v17  ;;  %v287_v55 = vshll.u32 %v181_v27, 16  ;;  %v908_v8 = vld [vmem:[#allocation2 + $0x38] sm:$0x1] }
  0x37   : > { %8156 = vmatmul.msk.bf16.vlgmr.msra.gmra.mxu3 %vm13361_vm10, %v1404_v21  ;;  %v1181_v37 = vshll.u32 %v1132_v25, 16  ;;  %v1115_v38 = vunpack.c.l.b16 %v961_v30  ;;  %v1190_v47 = vrot.slane %v1188_v33, 1  ;;  %v1409_v56 = vrot.slane %v1132_v25, 1  ;;  %v182_v17 = vld [vmem:[%s9380_s29 + $0x28] sm:$0xf] }
  0x38   : > { %v1160_v35 = vsel %vm13359_vm11, %v1155_v12, %v1159_v22  ;;  %v7934_v59 = vrot.slane %v809_v52, 11  ;;  %v764_v60 = vsel %vm9400_vm6, %v7916_v51, %v763_v50  ;;  %v281_v61 = vor.u32 %v279_v54, %v278_v53  ;;  %v183_v18 = vld [vmem:[%s9380_s29 + $0x2c] sm:$0xf]  ;;  %v184_v52 = vld [vmem:[%s9380_s29 + $0x30] sm:$0xf] }
  0x39   : > { %1365 = vrot.lane.b32.xlu0 %v1160_v35, %s9325_s15  ;;  %v1183_v45 = vrot.slane %v1181_v37, 1  ;;  %v9508_v46 = vpack.c.b16 %v1115_v38, %v1115_v38  ;;  %v282_v62 = vrot.slane %v278_v53, 4  ;;  %v286_v63 = vrot.slane %v284_v43, 7  ;;  %765 = vst [vmem:[#allocation2 + $0x30] sm:$0x1] %v764_v60 }
  0x3a   : > { %v1172_v1 = vsel %vm13359_vm11, %v1167_v44, %v1171_v28  ;;  %v1191_v2 = vor.u32 %v1190_v47, %v1186_v41  ;;  %v563_v11 = vsel %vm9406_vm7, %v281_v61, %v562_v4  ;;  %v909_v12 = vsel %vm9443_vm8, %v7934_v59, %v908_v8  ;;  %v573_v44 = vld [vmem:[#allocation2 + $0x50] sm:$0x1]  ;;  %v185_v53 = vld [vmem:[%s9380_s29 + $0x34] sm:$0xf]  ;;  %v9159_v59 = vld [vmem:[%s13347_s1 + $0xe8] sm:$0xff] }
  0x3b   : > { %v1184_v57 = vsel %vm13359_vm11, %v1179_v40, %v1183_v45  ;;  %v1193_v58 = vshll.u32 %v9508_v46, 16  ;;  %v289_v9 = vor.u32 %v287_v55, %v286_v63  ;;  %v291_v10 = vrot.slane %v286_v63, 4  ;;  %564 = vst [vmem:[#allocation2 + $0x3c] sm:$0xf] %v563_v11  ;;  %v569_v45 = vld [vmem:[#allocation2 + $0x48] sm:$0xf]  ;;  %2213 = vmatpush.bf16.msrb.mxu1 %v9159_v59 }
  0x3c   : > { %1369 = vrot.lane.b32.xlu1 %v1184_v57, %s9325_s15  ;;  %v9522_v13 = vsel %vm13358_vm9, %v1408_v36, %v1409_v56  ;;  %910 = vst [vmem:[#allocation2 + $0x38] sm:$0x1] %v909_v12  ;;  %v293_v21 = vshrl.u32 %v182_v17, 16  ;;  %v301_v22 = vshrl.u32 %v183_v18, 16  ;;  %v304_v29 = vshll.u32 %v183_v18, 16 }
  0x3d   : > { %v1195_v3 = vrot.slane %v1193_v58, 1  ;;  %v290_v14 = vsel %vm9394_vm5, %v282_v62, %v289_v9  ;;  %v567_v15 = vsel %vm9400_vm6, %v291_v10, %v566_v0  ;;  %v296_v37 = vshll.u32 %v182_v17, 16  ;;  %v9164_v58 = vld [vmem:[%s13347_s1 + $0x110] sm:$0xff]  ;;  %v580_v18 = vld [vmem:[#allocation2 + $0x5c] sm:$0x1] }
  0x3e   : > { %565 = vst.msk [vmem:[#allocation2 + $0x40] sm:$0xf] %vm528_vm2, %v290_v14  ;;  %v295_v27 = vrot.slane %v293_v21, 7  ;;  %v303_v28 = vrot.slane %v301_v22, 7  ;;  %v1411_v41 = vrot.slane %v9492_v20, 1  ;;  %v1412_v42 = vrot.slane %v9508_v46, 1  ;;  %2305 = vmatpush.bf16.msrb.mxu3 %v9164_v58 }
  0x3f   : > { %v1196_v16 = vsel %vm13359_vm11, %v1191_v2, %v1195_v3  ;;  %568 = vst [vmem:[#allocation2 + $0x44] sm:$0x1] %v567_v15  ;;  %v310_v56 = vshrl.u32 %v184_v52, 16  ;;  %v318_v57 = vshrl.u32 %v185_v53, 16  ;;  %v321_v4 = vshll.u32 %v185_v53, 16 }
  0x40   : > { %v299_v35 = vrot.slane %v295_v27, 4  ;;  %v306_v36 = vor.u32 %v304_v29, %v303_v28  ;;  %v308_v40 = vrot.slane %v303_v28, 4  ;;  %v298_v43 = vor.u32 %v296_v37, %v295_v27  ;;  %v9567_v2 = vld [vmem:[#allocation2 + $0x30] sm:$0xff] }
  0x41   : > { %1367 = vrot.lane.b32.xlu0 %v1172_v1, %s9325_s15  ;;  %v9551_v20 = vsel %vm13358_vm9, %v1411_v41, %v1412_v42  ;;  %v312_v0 = vrot.slane %v310_v56, 7  ;;  %v320_v1 = vrot.slane %v318_v57, 7  ;;  %v313_v10 = vshll.u32 %v184_v52, 16  ;;  %v576_v21 = vld [vmem:[#allocation2 + $0x54] sm:$0xf] }
  0x42   : > { %v666_v23 = vld [vmem:[#allocation2 + $0x3c] sm:$0x2]  ;;  %v766_v25 = vld [vmem:[#allocation2 + $0x3c] sm:$0x1]  ;;  %v574_v47 = vsel %vm9400_vm6, %v308_v40, %v573_v44  ;;  %v570_v49 = vsel %vm9406_vm7, %v298_v43, %v569_v45  ;;  %v1414_v14 = vrot.slane %v9567_v2, 1  ;;  %v1200_v29 = vshll.u32 %v9567_v2, 16 }
  0x43   : > { %v7917_v26 = vrot.slane %v666_v23, 9  ;;  %575 = vst [vmem:[#allocation2 + $0x50] sm:$0x1] %v574_v47  ;;  %v964_v50 = vld [vmem:[#allocation2 + $0x38] sm:$0x1]  ;;  %v316_v9 = vrot.slane %v312_v0, 4  ;;  %v323_v11 = vor.u32 %v321_v4, %v320_v1 }
  0x44   : > { %8093 = vmatmul.msk.bf16.gmra.mxu1 %vm13361_vm10, %v9522_v13  ;;  %1371 = vrot.lane.b32.xlu1 %v1196_v16, %s9325_s15  ;;  %571 = vst [vmem:[#allocation2 + $0x48] sm:$0xf] %v570_v49  ;;  %v1116_v46 = vunpack.c.l.b16 %v964_v50  ;;  %v325_v12 = vrot.slane %v320_v1, 4  ;;  %v315_v16 = vor.u32 %v313_v10, %v312_v0  ;;  %v187_v43 = vld [vmem:[%s9380_s29 + $0x3c] sm:$0xf]  ;;  %v9136_v52 = vld [vmem:[%s13347_s1 + $0x30] sm:$0xff] }
  0x45   : > { %v810_v30 = vld [vmem:[#allocation2 + $0x40] sm:$0x8]  ;;  %v767_v31 = vsel %vm9400_vm6, %v7917_v26, %v766_v25  ;;  %v324_v17 = vsel %vm9394_vm5, %v316_v9, %v323_v11  ;;  %v335_v58 = vshrl.u32 %v187_v43, 16  ;;  %vm2485_vm15 = vsmask.f32 1280 }
  0x46   : > { %v7935_v33 = vrot.slane %v810_v30, 11  ;;  %v911_v34 = vld [vmem:[#allocation2 + $0x44] sm:$0x1]  ;;  %768 = vst [vmem:[#allocation2 + $0x3c] sm:$0x1] %v767_v31  ;;  %v1134_v3 = vpack.c.b16 %v1116_v46, %v1116_v46  ;;  %v581_v22 = vsel %vm9400_vm6, %v325_v12, %v580_v18  ;;  %v577_v23 = vsel %vm9406_vm7, %v315_v16, %v576_v21  ;;  %v9137_v46 = vld [vmem:[%s13347_s1 + $0x38] sm:$0xff] }
  0x47   : > { %8157 = vmatmul.msk.bf16.gmra.mxu3 %vm13361_vm10, %v9480_v5  ;;  %v307_v5 = vsel %vm9394_vm5, %v299_v35, %v306_v36  ;;  %579 = vst.msk [vmem:[#allocation2 + $0x58] sm:$0xf] %vm528_vm2, %v324_v17  ;;  %v1198_v31 = vshrl.u32 %v9567_v2, 16  ;;  %1933 = vmatpush.bf16.msra.mxu2 %v9137_v46  ;;  %v337_v0 = vrot.slane %v335_v58, 7  ;;  %v587_v16 = vld [vmem:[#allocation2 + $0x68] sm:$0x1] }
  0x48   : > { %v912_v38 = vsel %vm9443_vm8, %v7935_v33, %v911_v34  ;;  %572 = vst.msk [vmem:[#allocation2 + $0x4c] sm:$0xf] %vm528_vm2, %v307_v5  ;;  %v1415_v15 = vrot.slane %v1134_v3, 1  ;;  %v1202_v33 = vrot.slane %v1200_v29, 1  ;;  %v1205_v34 = vshll.u32 %v1134_v3, 16 }
  0x49   : > { %913 = vst [vmem:[#allocation2 + $0x44] sm:$0x1] %v912_v38  ;;  %v186_v38 = vld [vmem:[%s9380_s29 + $0x38] sm:$0xf]  ;;  %v342_v10 = vrot.slane %v337_v0, 4 }
  0x4a   : > { %v914_v55 = vld [vmem:[#allocation2 + $0x50] sm:$0x1]  ;;  %582 = vst [vmem:[#allocation2 + $0x5c] sm:$0x1] %v581_v22  ;;  %v9580_v27 = vsel %vm13358_vm9, %v1414_v14, %v1415_v15  ;;  %v1203_v5 = vor.u32 %v1202_v33, %v1198_v31  ;;  %v1207_v40 = vrot.slane %v1205_v34, 1  ;;  %v327_v57 = vshrl.u32 %v186_v38, 16 }
  0x4b   : > { %v667_v60 = vld [vmem:[#allocation2 + $0x48] sm:$0x2]  ;;  %v769_v62 = vld [vmem:[#allocation2 + $0x48] sm:$0x1]  ;;  %578 = vst [vmem:[#allocation2 + $0x54] sm:$0xf] %v577_v23  ;;  %1934 = vmatpush.bf16.msra.mxu2 %v9136_v52  ;;  %v588_v21 = vsel %vm9400_vm6, %v342_v10, %v587_v16 }
  0x4c   : > { %v7918_v61 = vrot.slane %v667_v60, 9  ;;  %v1208_v53 = vsel %vm13359_vm11, %v1203_v5, %v1207_v40  ;;  %v330_v4 = vshll.u32 %v186_v38, 16  ;;  %v583_v18 = vld [vmem:[#allocation2 + $0x60] sm:$0xf]  ;;  %589 = vst [vmem:[#allocation2 + $0x68] sm:$0x1] %v588_v21 }
  0x4d   : > { %v9594_v44 = vld [vmem:[#allocation2 + $0x3c] sm:$0xff]  ;;  %1373 = vrot.lane.b32.xlu2 %v1208_v53, %s9325_s15  ;;  %v189_v38 = vld [vmem:[%s9380_s29 + $0x44] sm:$0xf]  ;;  %v590_v21 = vld [vmem:[#allocation2 + $0x6c] sm:$0xf] }
  0x4e   : > { %v770_v8 = vsel %vm9400_vm6, %v7918_v61, %v769_v62  ;;  %v812_v37 = vld [vmem:[#allocation2 + $0x58] sm:$0x8]  ;;  %v338_v62 = vshll.u32 %v187_v43, 16  ;;  %v1417_v11 = vrot.slane %v9594_v44, 1  ;;  %v1210_v29 = vshrl.u32 %v9594_v44, 16 }
  0x4f   : > { %v811_v51 = vld [vmem:[#allocation2 + $0x4c] sm:$0x8]  ;;  %771 = vst [vmem:[#allocation2 + $0x48] sm:$0x1] %v770_v8  ;;  %v7937_v41 = vrot.slane %v812_v37, 11  ;;  %v352_v43 = vshrl.u32 %v189_v38, 16 }
  0x50   : > { %v7936_v54 = vrot.slane %v811_v51, 11  ;;  %v967_v25 = vld [vmem:[#allocation2 + $0x44] sm:$0x1]  ;;  %v9149_v51 = vld [vmem:[%s13347_s1 + $0x98] sm:$0xff]  ;;  %v340_v9 = vor.u32 %v338_v62, %v337_v0  ;;  %v188_v37 = vld [vmem:[%s9380_s29 + $0x40] sm:$0xf] }
  0x51   : > { %v1117_v30 = vunpack.c.l.b16 %v967_v25  ;;  %v917_v42 = vld [vmem:[#allocation2 + $0x5c] sm:$0x1]  ;;  %1680 = vmatpush.bf16.msra.mxu0 %v9149_v51  ;;  %vm2486_vm1 = vsmask.f32 5392 }
  0x52   : > { %v915_v63 = vsel %vm9443_vm8, %v7936_v54, %v914_v55  ;;  %v668_v54 = vld [vmem:[#allocation2 + $0x54] sm:$0x2]  ;;  %v772_v55 = vld [vmem:[#allocation2 + $0x54] sm:$0x1]  ;;  %v918_v56 = vsel %vm9443_vm8, %v7937_v41, %v917_v42  ;;  %v344_v42 = vshrl.u32 %v188_v37, 16 }
  0x53   : > { %916 = vst [vmem:[#allocation2 + $0x50] sm:$0x1] %v915_v63  ;;  %v1135_v45 = vpack.c.b16 %v1117_v30, %v1117_v30  ;;  %v7919_v61 = vrot.slane %v668_v54, 9  ;;  %v329_v63 = vrot.slane %v327_v57, 7  ;;  %v9134_v57 = vld [vmem:[%s13347_s1 + $0x20] sm:$0xff] }
  0x54   : > { %8094 = vmatmul.msk.bf16.gmra.mxu1 %vm13361_vm10, %v9551_v20  ;;  %919 = vst [vmem:[#allocation2 + $0x5c] sm:$0x1] %v918_v56  ;;  %v346_v54 = vrot.slane %v344_v42, 7  ;;  %v9147_v56 = vld [vmem:[%s13347_s1 + $0x88] sm:$0xff] }
  0x55   : > { %v773_v3 = vsel %vm9400_vm6, %v7919_v61, %v772_v55  ;;  %v333_v8 = vrot.slane %v329_v63, 4  ;;  %v1418_v12 = vrot.slane %v1135_v45, 1  ;;  %v332_v15 = vor.u32 %v330_v4, %v329_v63  ;;  %v920_v63 = vld [vmem:[#allocation2 + $0x68] sm:$0x1] }
  0x56   : > { %v9586_v35 = vld [vmem:[#allocation2 + $0x48] sm:$0xff]  ;;  %774 = vst [vmem:[#allocation2 + $0x54] sm:$0x1] %v773_v3  ;;  %v1217_v31 = vshll.u32 %v1135_v45, 16  ;;  %v354_v55 = vrot.slane %v352_v43, 7  ;;  %v347_v4 = vshll.u32 %v188_v37, 16 }
  0x57   : > { %8158 = vmatmul.msk.bf16.gmra.mxu3 %vm13361_vm10, %v9522_v13  ;;  %v1222_v47 = vshrl.u32 %v9586_v35, 16  ;;  %v1224_v49 = vshll.u32 %v9586_v35, 16  ;;  %v341_v17 = vsel %vm9394_vm5, %v333_v8, %v340_v9  ;;  %v584_v22 = vsel %vm9406_vm7, %v332_v15, %v583_v18  ;;  %v9135_v45 = vld [vmem:[%s13347_s1 + $0x28] sm:$0xff]  ;;  %v9146_v15 = vld [vmem:[%s13347_s1 + $0x80] sm:$0xff]  ;;  %v594_v18 = vld [vmem:[#allocation2 + $0x74] sm:$0x1] }
  0x58   : > { %586 = vst.msk [vmem:[#allocation2 + $0x64] sm:$0xf] %vm528_vm2, %v341_v17  ;;  %v9625_v25 = vsel %vm13358_vm9, %v1417_v11, %v1418_v12  ;;  %v1219_v40 = vrot.slane %v1217_v31, 1  ;;  %1935 = vmatpush.bf16.msra.mxu2 %v9135_v45  ;;  %v1420_v8 = vrot.slane %v9586_v35, 1  ;;  %v350_v9 = vrot.slane %v346_v54, 4  ;;  %v9133_v35 = vld [vmem:[%s13347_s1 + $0x18] sm:$0xff] }
  0x59   : > { %v1226_v59 = vrot.slane %v1224_v49, 1  ;;  %585 = vst [vmem:[#allocation2 + $0x60] sm:$0xf] %v584_v22  ;;  %v9158_v49 = vld [vmem:[%s13347_s1 + $0xe0] sm:$0xff]  ;;  %v359_v11 = vrot.slane %v354_v55, 4  ;;  %v349_v17 = vor.u32 %v347_v4, %v346_v54 }
  0x5a   : > { %v970_v26 = vld [vmem:[#allocation2 + $0x50] sm:$0x1]  ;;  %2214 = vmatpush.bf16.msrb.mxu1 %v9158_v49  ;;  %v191_v31 = vld [vmem:[%s9380_s29 + $0x4c] sm:$0xf] }
  0x5b   : > { %v1118_v28 = vunpack.c.l.b16 %v970_v26  ;;  %v1227_v1 = vor.u32 %v1226_v59, %v1222_v47  ;;  %v973_v23 = vld [vmem:[#allocation2 + $0x5c] sm:$0x1]  ;;  %v9148_v47 = vld [vmem:[%s13347_s1 + $0x90] sm:$0xff]  ;;  %v595_v22 = vsel %vm9400_vm6, %v359_v11, %v594_v18 }
  0x5c   : > { %v1119_v26 = vunpack.c.l.b16 %v973_v23  ;;  %1681 = vmatpush.bf16.msra.mxu0 %v9148_v47  ;;  %1936 = vmatpush.bf16.msra.mxu2 %v9134_v57  ;;  %v591_v23 = vsel %vm9406_vm7, %v349_v17, %v590_v21  ;;  %596 = vst [vmem:[#allocation2 + $0x74] sm:$0x1] %v595_v22 }
  0x5d   : > { %v9588_v36 = vpack.c.b16 %v1118_v28, %v1118_v28  ;;  %v1212_v28 = vshll.u32 %v9594_v44, 16  ;;  %v9631_v33 = vld [vmem:[#allocation2 + $0x54] sm:$0xff]  ;;  %592 = vst [vmem:[#allocation2 + $0x6c] sm:$0xf] %v591_v23 }
  0x5e   : > { %v9633_v34 = vpack.c.b16 %v1119_v26, %v1119_v26  ;;  %v1236_v46 = vshll.u32 %v9631_v33, 16 }
  0x5f   : > { %v1229_v50 = vshll.u32 %v9588_v36, 16  ;;  %v1214_v30 = vrot.slane %v1212_v28, 1  ;;  %v813_v41 = vld [vmem:[#allocation2 + $0x64] sm:$0x8]  ;;  %v1421_v12 = vrot.slane %v9588_v36, 1  ;;  %v9145_v28 = vld [vmem:[%s13347_s1 + $0x78] sm:$0xff] }
  0x60   : > { %v1241_v51 = vshll.u32 %v9633_v34, 16  ;;  %v7938_v53 = vrot.slane %v813_v41, 11  ;;  %v1238_v58 = vrot.slane %v1236_v46, 1  ;;  %v669_v61 = vld [vmem:[#allocation2 + $0x60] sm:$0x2]  ;;  %1682 = vmatpush.bf16.msra.mxu0 %v9147_v56  ;;  %1937 = vmatpush.bf16.msra.mxu2 %v9133_v35  ;;  %v9131_v41 = vld [vmem:[%s13347_s1 + $0x8] sm:$0xff] }
  0x61   : > { %v1231_v60 = vrot.slane %v1229_v50, 1  ;;  %v1215_v5 = vor.u32 %v1214_v30, %v1210_v29  ;;  %v1234_v50 = vshrl.u32 %v9631_v33, 16  ;;  %v775_v62 = vld [vmem:[#allocation2 + $0x60] sm:$0x1]  ;;  %v9681_v26 = vsel %vm13358_vm9, %v1420_v8, %v1421_v12  ;;  %v9132_v29 = vld [vmem:[%s13347_s1 + $0x10] sm:$0xff] }
  0x62   : > { %v1243_v59 = vrot.slane %v1241_v51, 1  ;;  %v921_v3 = vsel %vm9443_vm8, %v7938_v53, %v920_v63  ;;  %v190_v30 = vld [vmem:[%s9380_s29 + $0x48] sm:$0xf]  ;;  %v9130_v56 = vld [vmem:[%s13347_s1] sm:$0xff] }
  0x63   : > { %v1232_v14 = vsel %vm13359_vm11, %v1227_v1, %v1231_v60  ;;  %v1220_v52 = vsel %vm13359_vm11, %v1215_v5, %v1219_v40  ;;  %v355_v60 = vshll.u32 %v189_v38, 16  ;;  %v1239_v0 = vor.u32 %v1238_v58, %v1234_v50  ;;  %922 = vst [vmem:[#allocation2 + $0x68] sm:$0x1] %v921_v3  ;;  %v9144_v40 = vld [vmem:[%s13347_s1 + $0x70] sm:$0xff]  ;;  %v597_v3 = vld [vmem:[#allocation2 + $0x78] sm:$0xf] }
  0x64   : > { %8095 = vmatmul.msk.bf16.gmra.mxu1 %vm13361_vm10, %v9580_v27  ;;  %1377 = vrot.lane.b32.xlu0 %v1232_v14, %s9325_s15  ;;  %v7920_v1 = vrot.slane %v669_v61, 9  ;;  %v361_v38 = vshrl.u32 %v190_v30, 16  ;;  %v369_v5 = vshrl.u32 %v191_v31, 16  ;;  %v670_v42 = vld [vmem:[#allocation2 + $0x6c] sm:$0x2]  ;;  %v364_v57 = vshll.u32 %v190_v30, 16 }
  0x65   : > { %1375 = vrot.lane.b32.xlu2 %v1220_v52, %s9325_s15  ;;  %v357_v10 = vor.u32 %v355_v60, %v354_v55  ;;  %v1244_v14 = vsel %vm13359_vm11, %v1239_v0, %v1243_v59  ;;  %1683 = vmatpush.bf16.msra.mxu0 %v9146_v15  ;;  %v7921_v47 = vrot.slane %v670_v42, 9  ;;  %v923_v45 = vld [vmem:[#allocation2 + $0x74] sm:$0x1]  ;;  %v778_v46 = vld [vmem:[#allocation2 + $0x6c] sm:$0x1]  ;;  %v372_v52 = vshll.u32 %v191_v31, 16 }
  0x66   : > { %v776_v16 = vsel %vm9400_vm6, %v7920_v1, %v775_v62  ;;  %1379 = vrot.lane.b32.xlu1 %v1244_v14, %s9325_s15  ;;  %1938 = vmatpush.bf16.msra.mxu2 %v9132_v29  ;;  %v363_v49 = vrot.slane %v361_v38, 7  ;;  %v371_v50 = vrot.slane %v369_v5, 7  ;;  %v9143_v55 = vld [vmem:[%s13347_s1 + $0x68] sm:$0xff]  ;;  %v1423_v60 = vrot.slane %v9631_v33, 1  ;;  %v9142_v62 = vld [vmem:[%s13347_s1 + $0x60] sm:$0xff] }
  0x67   : > { %8159 = vmatmul.msk.bf16.gmra.mxu3 %vm13361_vm10, %v9551_v20  ;;  %777 = vst [vmem:[#allocation2 + $0x60] sm:$0x1] %v776_v16  ;;  %v358_v36 = vsel %vm9394_vm5, %v350_v9, %v357_v10  ;;  %v779_v53 = vsel %vm9400_vm6, %v7921_v47, %v778_v46  ;;  %v1424_v61 = vrot.slane %v9633_v34, 1  ;;  %v601_v1 = vld [vmem:[#allocation2 + $0x80] sm:$0x1] }
  0x68   : > { %593 = vst.msk [vmem:[#allocation2 + $0x70] sm:$0xf] %vm528_vm2, %v358_v36  ;;  %v367_v54 = vrot.slane %v363_v49, 4  ;;  %v374_v58 = vor.u32 %v372_v52, %v371_v50  ;;  %v376_v59 = vrot.slane %v371_v50, 4  ;;  %v366_v63 = vor.u32 %v364_v57, %v363_v49  ;;  %v192_v14 = vld [vmem:[%s9380_s29 + $0x50] sm:$0xf] }
  0x69   : > { %1684 = vmatpush.bf16.msra.mxu0 %v9145_v28  ;;  %780 = vst [vmem:[#allocation2 + $0x6c] sm:$0x1] %v779_v53  ;;  %v9724_v4 = vsel %vm13358_vm9, %v1423_v60, %v1424_v61  ;;  %v193_v15 = vld [vmem:[%s9380_s29 + $0x54] sm:$0xf]  ;;  %v378_v18 = vshrl.u32 %v192_v14, 16  ;;  %v9163_v36 = vld [vmem:[%s13347_s1 + $0x108] sm:$0xff] }
  0x6a   : > { %1939 = vmatpush.bf16.msra.mxu2 %v9131_v41  ;;  %v375_v0 = vsel %vm9394_vm5, %v367_v54, %v374_v58  ;;  %v602_v33 = vsel %vm9400_vm6, %v376_v59, %v601_v1  ;;  %v598_v34 = vsel %vm9406_vm7, %v366_v63, %v597_v3  ;;  %v976_v9 = vld [vmem:[#allocation2 + $0x68] sm:$0x1]  ;;  %v386_v35 = vshrl.u32 %v193_v15, 16  ;;  %2306 = vmatpush.bf16.msrb.mxu3 %v9163_v36  ;;  %v9157_v41 = vld [vmem:[%s13347_s1 + $0xd8] sm:$0xff]  ;;  %v608_v58 = vld [vmem:[#allocation2 + $0x8c] sm:$0x1] }
  0x6b   : > { %600 = vst.msk [vmem:[#allocation2 + $0x7c] sm:$0xf] %vm528_vm2, %v375_v0  ;;  %v1120_v11 = vunpack.c.l.b16 %v976_v9  ;;  %v380_v31 = vrot.slane %v378_v18, 7  ;;  %v381_v49 = vshll.u32 %v192_v14, 16  ;;  %2215 = vmatpush.bf16.msrb.mxu1 %v9157_v41  ;;  %v604_v60 = vld [vmem:[#allocation2 + $0x84] sm:$0xf] }
  0x6c   : > { %603 = vst [vmem:[#allocation2 + $0x80] sm:$0x1] %v602_v33  ;;  %v388_v5 = vrot.slane %v386_v35, 7 }
  0x6d   : > { %1685 = vmatpush.bf16.msra.mxu0 %v9144_v40  ;;  %599 = vst [vmem:[#allocation2 + $0x78] sm:$0xf] %v598_v34  ;;  %v389_v40 = vshll.u32 %v193_v15, 16  ;;  %v384_v50 = vrot.slane %v380_v31, 4 }
  0x6e   : > { %1940 = vmatpush.bf16.msra.mxu2 %v9130_v56  ;;  %v9735_v22 = vld [vmem:[#allocation2 + $0x60] sm:$0xff]  ;;  %v393_v53 = vrot.slane %v388_v5, 4  ;;  %v383_v56 = vor.u32 %v381_v49, %v380_v31 }
  0x6f   : > { %v814_v37 = vld [vmem:[#allocation2 + $0x70] sm:$0x8]  ;;  %v391_v46 = vor.u32 %v389_v40, %v388_v5  ;;  %v1426_v54 = vrot.slane %v9735_v22, 1  ;;  %v1248_v3 = vshll.u32 %v9735_v22, 16  ;;  %v1246_v34 = vshrl.u32 %v9735_v22, 16 }
  0x70   : > { %v7939_v43 = vrot.slane %v814_v37, 11  ;;  %v9737_v23 = vld [vmem:[#allocation2 + $0x6c] sm:$0xff]  ;;  %v1138_v37 = vpack.c.b16 %v1120_v11, %v1120_v11  ;;  %v609_v61 = vsel %vm9400_vm6, %v393_v53, %v608_v58  ;;  %v194_v11 = vld [vmem:[%s9380_s29 + $0x58] sm:$0xf] }
  0x71   : > { %1686 = vmatpush.bf16.msra.mxu0 %v9143_v55  ;;  %v1258_v42 = vshrl.u32 %v9737_v23, 16  ;;  %v392_v57 = vsel %vm9394_vm5, %v384_v50, %v391_v46  ;;  %610 = vst [vmem:[#allocation2 + $0x8c] sm:$0x1] %v609_v61  ;;  %v395_v36 = vshrl.u32 %v194_v11, 16  ;;  %v398_v50 = vshll.u32 %v194_v11, 16 }
  0x72   : > { %v924_v51 = vsel %vm9443_vm8, %v7939_v43, %v923_v45  ;;  %v815_v12 = vld [vmem:[#allocation2 + $0x7c] sm:$0x8]  ;;  %v1260_v43 = vshll.u32 %v9737_v23, 16  ;;  %v1427_v55 = vrot.slane %v1138_v37, 1  ;;  %607 = vst.msk [vmem:[#allocation2 + $0x88] sm:$0xf] %vm528_vm2, %v392_v57 }
  0x73   : > { %925 = vst [vmem:[#allocation2 + $0x74] sm:$0x1] %v924_v51  ;;  %v7940_v16 = vrot.slane %v815_v12, 11  ;;  %v926_v17 = vld [vmem:[#allocation2 + $0x80] sm:$0x1]  ;;  %v1253_v9 = vshll.u32 %v1138_v37, 16 }
  0x74   : > { %8096 = vmatmul.msk.bf16.gmra.mxu1 %vm13361_vm10, %v9625_v25  ;;  %v671_v21 = vld [vmem:[#allocation2 + $0x78] sm:$0x2]  ;;  %v781_v38 = vld [vmem:[#allocation2 + $0x78] sm:$0x1]  ;;  %v1262_v51 = vrot.slane %v1260_v43, 1  ;;  %v9761_v1 = vsel %vm13358_vm9, %v1426_v54, %v1427_v55  ;;  %v397_v40 = vrot.slane %v395_v36, 7 }
  0x75   : > { %1687 = vmatpush.bf16.msra.mxu0 %v9142_v62  ;;  %v7922_v29 = vrot.slane %v671_v21, 9  ;;  %v927_v30 = vsel %vm9443_vm8, %v7940_v16, %v926_v17  ;;  %v605_v62 = vsel %vm9406_vm7, %v383_v56, %v604_v60  ;;  %v1255_v14 = vrot.slane %v1253_v9, 1  ;;  %v195_v17 = vld [vmem:[%s9380_s29 + $0x5c] sm:$0xf]  ;;  %v615_v60 = vld [vmem:[#allocation2 + $0x98] sm:$0x1] }
  0x76   : > { %928 = vst [vmem:[#allocation2 + $0x80] sm:$0x1] %v927_v30  ;;  %v1263_v59 = vor.u32 %v1262_v51, %v1258_v42  ;;  %v403_v21 = vshrl.u32 %v195_v17, 16  ;;  %v401_v46 = vrot.slane %v397_v40, 4  ;;  %v1429_v56 = vrot.slane %v9737_v23, 1 }
  0x77   : > { %8160 = vmatmul.msk.bf16.gmra.mxu3 %vm13361_vm10, %v9580_v27  ;;  %v782_v45 = vsel %vm9400_vm6, %v7922_v29, %v781_v38  ;;  %606 = vst [vmem:[#allocation2 + $0x84] sm:$0xf] %v605_v62  ;;  %v406_v38 = vshll.u32 %v195_v17, 16  ;;  %v400_v58 = vor.u32 %v398_v50, %v397_v40  ;;  %v611_v62 = vld [vmem:[#allocation2 + $0x90] sm:$0xf] }
  0x78   : > { %783 = vst [vmem:[#allocation2 + $0x78] sm:$0x1] %v782_v45  ;;  %v929_v16 = vld [vmem:[#allocation2 + $0x8c] sm:$0x1]  ;;  %v405_v41 = vrot.slane %v403_v21, 7 }
  0x79   : > { %v196_v9 = vld [vmem:[%s9380_s29 + $0x60] sm:$0xf] }
  0x7a   : > { %v979_v8 = vld [vmem:[#allocation2 + $0x74] sm:$0x1]  ;;  %v408_v51 = vor.u32 %v406_v38, %v405_v41  ;;  %v410_v55 = vrot.slane %v405_v41, 4  ;;  %v415_v41 = vshll.u32 %v196_v9, 16 }
  0x7b   : > { %v1121_v10 = vunpack.c.l.b16 %v979_v8  ;;  %v1250_v8 = vrot.slane %v1248_v3, 1  ;;  %v9156_v38 = vld [vmem:[%s13347_s1 + $0xd0] sm:$0xff] }
  0x7c   : > { %2216 = vmatpush.bf16.msrb.mxu1 %v9156_v38 }
  0x7d   : > { %v9739_v28 = vpack.c.b16 %v1121_v10, %v1121_v10  ;;  %v982_v0 = vld [vmem:[#allocation2 + $0x80] sm:$0x1]  ;;  %v816_v10 = vld [vmem:[#allocation2 + $0x88] sm:$0x8]  ;;  %v1251_v12 = vor.u32 %v1250_v8, %v1246_v34 }
  0x7e   : > { %v1122_v33 = vunpack.c.l.b16 %v982_v0  ;;  %v7941_v15 = vrot.slane %v816_v10, 11  ;;  %v672_v35 = vld [vmem:[#allocation2 + $0x84] sm:$0x2]  ;;  %v784_v5 = vld [vmem:[#allocation2 + $0x84] sm:$0x1] }
  0x7f   : > { %v1265_v47 = vshll.u32 %v9739_v28, 16  ;;  %v9774_v29 = vld [vmem:[#allocation2 + $0x78] sm:$0xff]  ;;  %v1256_v30 = vsel %vm13359_vm11, %v1251_v12, %v1255_v14  ;;  %v7923_v31 = vrot.slane %v672_v35, 9  ;;  %v1430_v57 = vrot.slane %v9739_v28, 1  ;;  %v197_v12 = vld [vmem:[%s9380_s29 + $0x64] sm:$0xf] }
  0x80   : > { %v9772_v18 = vpack.c.b16 %v1122_v33, %v1122_v33  ;;  %v930_v37 = vsel %vm9443_vm8, %v7941_v15, %v929_v16  ;;  %1381 = vrot.lane.b32.xlu2 %v1256_v30, %s9325_s15  ;;  %v1270_v42 = vshrl.u32 %v9774_v29, 16  ;;  %v1272_v43 = vshll.u32 %v9774_v29, 16 }
  0x81   : > { %v1267_v52 = vrot.slane %v1265_v47, 1  ;;  %931 = vst [vmem:[#allocation2 + $0x8c] sm:$0x1] %v930_v37  ;;  %v785_v45 = vsel %vm9400_vm6, %v7923_v31, %v784_v5  ;;  %v9800_v3 = vsel %vm13358_vm9, %v1429_v56, %v1430_v57  ;;  %v412_v14 = vshrl.u32 %v196_v9, 16 }
  0x82   : > { %v1277_v47 = vshll.u32 %v9772_v18, 16  ;;  %786 = vst [vmem:[#allocation2 + $0x84] sm:$0x1] %v785_v45  ;;  %v1274_v53 = vrot.slane %v1272_v43, 1  ;;  %v420_v16 = vshrl.u32 %v197_v12, 16  ;;  %v423_v31 = vshll.u32 %v197_v12, 16 }
  0x83   : > { %v1268_v63 = vsel %vm13359_vm11, %v1263_v59, %v1267_v52  ;;  %v409_v59 = vsel %vm9394_vm5, %v401_v46, %v408_v51  ;;  %v1433_v45 = vrot.slane %v9772_v18, 1  ;;  %v622_v46 = vld [vmem:[#allocation2 + $0xa4] sm:$0x1]  ;;  %v618_v51 = vld [vmem:[#allocation2 + $0x9c] sm:$0xf] }
  0x84   : > { %8097 = vmatmul.msk.bf16.gmra.mxu1 %vm13361_vm10, %v9681_v26  ;;  %1383 = vrot.lane.b32.xlu0 %v1268_v63, %s9325_s15  ;;  %v1279_v54 = vrot.slane %v1277_v47, 1  ;;  %v1275_v61 = vor.u32 %v1274_v53, %v1270_v42  ;;  %614 = vst.msk [vmem:[#allocation2 + $0x94] sm:$0xf] %vm528_vm2, %v409_v59  ;;  %v612_v63 = vsel %vm9406_vm7, %v400_v58, %v611_v62  ;;  %v422_v30 = vrot.slane %v420_v16, 7 }
  0x85   : > { %613 = vst [vmem:[#allocation2 + $0x90] sm:$0xf] %v612_v63  ;;  %v1432_v47 = vrot.slane %v9774_v29, 1 }
  0x86   : > { %v1280_v28 = vsel %vm13359_vm11, %v1275_v61, %v1279_v54  ;;  %v425_v42 = vor.u32 %v423_v31, %v422_v30  ;;  %v427_v43 = vrot.slane %v422_v30, 4 }
  0x87   : > { %8161 = vmatmul.msk.bf16.gmra.mxu3 %vm13361_vm10, %v9625_v25  ;;  %1385 = vrot.lane.b32.xlu1 %v1280_v28, %s9325_s15  ;;  %v9834_v56 = vsel %vm13358_vm9, %v1432_v47, %v1433_v45 }
  0x88   : > { %v985_v59 = vld [vmem:[#allocation2 + $0x8c] sm:$0x1] }
  0x89   : > { %v1123_v61 = vunpack.c.l.b16 %v985_v59 }
  0x8b   : > { %v817_v8 = vld [vmem:[#allocation2 + $0x94] sm:$0x8] }
  0x8c   : > { %v7942_v10 = vrot.slane %v817_v8, 11  ;;  %v673_v15 = vld [vmem:[#allocation2 + $0x90] sm:$0x2]  ;;  %v787_v21 = vld [vmem:[#allocation2 + $0x90] sm:$0x1] }
  0x8d   : > { %v7924_v17 = vrot.slane %v673_v15, 9 }
  0x8f   : > { %v788_v5 = vsel %vm9400_vm6, %v7924_v17, %v787_v21  ;;  %v9857_v17 = vld [vmem:[#allocation2 + $0x84] sm:$0xff] }
  0x90   : > { %789 = vst [vmem:[#allocation2 + $0x90] sm:$0x1] %v788_v5 }
  0x94   : > { %8098 = vmatmul.msk.bf16.gmra.mxu1 %vm13361_vm10, %v9724_v4 }
  0x97   : > { %8162 = vmatmul.msk.bf16.gmra.mxu3 %vm13361_vm10, %v9681_v26 }
  0xa4   : > { %8099 = vmatmul.msk.bf16.gmra.mxu1 %vm13361_vm10, %v9761_v1 }
  0xa7   : > { %8163 = vmatmul.msk.bf16.gmra.mxu3 %vm13361_vm10, %v9724_v4 }
  0xab   : > { %v1366_v49 = vpop.permute.xlu0 %1365 }
  0xac   : > { %v1458_v52 = vsel %vm13361_vm10, %v9468_v48, %v1366_v49  ;;  %v616_v48 = vsel %vm9400_vm6, %v410_v55, %v615_v60 }
  0xad   : > { %1941 = vmatmul.bf16.vlgmr.msra.gmra.mxu2 %v1458_v52  ;;  %617 = vst [vmem:[#allocation2 + $0x98] sm:$0x1] %v616_v48  ;;  %v623_v52 = vsel %vm9400_vm6, %v427_v43, %v622_v46  ;;  %v198_v48 = vld [vmem:[%s9380_s29 + $0x68] sm:$0xf] }
  0xae   : > { %v1370_v53 = vpop.permute.xlu1 %1369  ;;  %624 = vst [vmem:[#allocation2 + $0xa4] sm:$0x1] %v623_v52 }
  0xaf   : > { %v9840_v58 = vsel %vm13361_vm10, %v9482_v6, %v1370_v53  ;;  %v629_v53 = vld [vmem:[#allocation2 + $0xb0] sm:$0x1] }
  0xb1   : > { %v9797_v0 = vpop.f32.mrf.mxu1 }
  0xb3   : > { %v1368_v33 = vpop.permute.xlu0 %1367 }
  0xb4   : > { %v1461_v34 = vsel %vm13361_vm10, %v9464_v39, %v1368_v33  ;;  %8100 = vmatmul.msk.bf16.gmra.mxu1 %vm13361_vm10, %v9800_v3  ;;  %v932_v11 = vld [vmem:[#allocation2 + $0x98] sm:$0x1]  ;;  %v414_v39 = vrot.slane %v412_v14, 7  ;;  %v199_v33 = vld [vmem:[%s9380_s29 + $0x6c] sm:$0xf] }
  0xb5   : > { %1688 = vmatmul.bf16.vlgmr.msra.gmra.mxu0 %v1461_v34  ;;  %v933_v35 = vsel %vm9443_vm8, %v7942_v10, %v932_v11  ;;  %v935_v28 = vld [vmem:[#allocation2 + $0xa4] sm:$0x1]  ;;  %v437_v9 = vshrl.u32 %v199_v33, 16  ;;  %v9851_v10 = vld [vmem:[#allocation2 + $0x90] sm:$0xff]  ;;  %v440_v15 = vshll.u32 %v199_v33, 16 }
  0xb6   : > { %934 = vst [vmem:[#allocation2 + $0x98] sm:$0x1] %v933_v35  ;;  %v418_v40 = vrot.slane %v414_v39, 4  ;;  %v417_v49 = vor.u32 %v415_v41, %v414_v39  ;;  %v1141_v35 = vpack.c.b16 %v1123_v61, %v1123_v61  ;;  %v1294_v31 = vshrl.u32 %v9851_v10, 16 }
  0xb7   : > { %8164 = vmatmul.msk.bf16.gmra.mxu3 %vm13361_vm10, %v9761_v1  ;;  %v439_v21 = vrot.slane %v437_v9, 7  ;;  %v1296_v38 = vshll.u32 %v9851_v10, 16  ;;  %v432_v41 = vshll.u32 %v198_v48, 16  ;;  %v1284_v9 = vshll.u32 %v9857_v17, 16 }
  0xb8   : > { %v426_v50 = vsel %vm9394_vm5, %v418_v40, %v425_v42  ;;  %v619_v54 = vsel %vm9406_vm7, %v417_v49, %v618_v51  ;;  %v1436_v46 = vrot.slane %v1141_v35, 1 }
  0xb9   : > { %v9813_v36 = vpop.f32.mrf.mxu1  ;;  %621 = vst.msk [vmem:[#allocation2 + $0xa0] sm:$0xf] %vm528_vm2, %v426_v50  ;;  %v442_v43 = vor.u32 %v440_v15, %v439_v21  ;;  %v1298_v47 = vrot.slane %v1296_v38, 1  ;;  %v444_v49 = vrot.slane %v439_v21, 4  ;;  %v1435_v50 = vrot.slane %v9857_v17, 1 }
  0xba   : > { %v9815_v37 = vpop.f32.mrf.mxu3  ;;  %620 = vst [vmem:[#allocation2 + $0x9c] sm:$0xf] %v619_v54  ;;  %v1289_v15 = vshll.u32 %v1141_v35, 16  ;;  %v200_v21 = vld [vmem:[%s9380_s29 + $0x70] sm:$0xf] }
  0xbb   : > { %v1299_v54 = vor.u32 %v1298_v47, %v1294_v31  ;;  %v630_v59 = vsel %vm9400_vm6, %v444_v49, %v629_v53 }
  0xbc   : > { %631 = vst [vmem:[#allocation2 + $0xb0] sm:$0x1] %v630_v59  ;;  %v1291_v47 = vrot.slane %v1289_v15, 1 }
  0xbd   : > { %1946 = vmatmul.bf16.gmra.mxu2 %v1461_v34  ;;  %v988_v55 = vld [vmem:[#allocation2 + $0x98] sm:$0x1]  ;;  %v429_v34 = vshrl.u32 %v198_v48, 16 }
  0xbe   : > { %v1124_v60 = vunpack.c.l.b16 %v988_v55  ;;  %v625_v55 = vld [vmem:[#allocation2 + $0xa8] sm:$0xf] }
  0xbf   : > { %v431_v14 = vrot.slane %v429_v34, 7  ;;  %v9297_v34 = vld [vmem:[#allocation2 + $0x24] sm:$0xff] }
  0xc0   : > { %v818_v62 = vld [vmem:[#allocation2 + $0xa0] sm:$0x8]  ;;  %v9849_v8 = vpack.c.b16 %v1124_v60, %v1124_v60  ;;  %v1372_v60 = vpop.permute.xlu1 %1371 }
  0xc1   : > { %v9831_v18 = vpop.f32.mrf.mxu1  ;;  %v7943_v63 = vrot.slane %v818_v62, 11  ;;  %v674_v6 = vld [vmem:[#allocation2 + $0x9c] sm:$0x2]  ;;  %v790_v39 = vld [vmem:[#allocation2 + $0x9c] sm:$0x1]  ;;  %v435_v42 = vrot.slane %v431_v14, 4  ;;  %v434_v51 = vor.u32 %v432_v41, %v431_v14 }
  0xc2   : > { %v9836_v57 = vpop.f32.mrf.mxu3  ;;  %v7925_v11 = vrot.slane %v674_v6, 9  ;;  %v1301_v5 = vshll.u32 %v9849_v8, 16  ;;  %v9885_v6 = vsel %vm13361_vm10, %v9297_v34, %v1372_v60  ;;  %v1286_v14 = vrot.slane %v1284_v9, 1 }
  0xc3   : > { %v936_v12 = vsel %vm9443_vm8, %v7943_v63, %v935_v28  ;;  %v443_v52 = vsel %vm9394_vm5, %v435_v42, %v442_v43  ;;  %v626_v61 = vsel %vm9406_vm7, %v434_v51, %v625_v55  ;;  %v9879_v28 = vsel %vm13358_vm9, %v1435_v50, %v1436_v46  ;;  %v9162_v43 = vld [vmem:[%s13347_s1 + $0x100] sm:$0xff] }
  0xc4   : > { %8101 = vmatmul.msk.bf16.gmra.mxu1 %vm13361_vm10, %v9834_v56  ;;  %937 = vst [vmem:[#allocation2 + $0xa4] sm:$0x1] %v936_v12  ;;  %v791_v40 = vsel %vm9400_vm6, %v7925_v11, %v790_v39  ;;  %v1303_v45 = vrot.slane %v1301_v5, 1  ;;  %v1282_v12 = vshrl.u32 %v9857_v17, 16  ;;  %v938_v5 = vld [vmem:[#allocation2 + $0xb0] sm:$0x1]  ;;  %2307 = vmatpush.bf16.msrb.mxu3 %v9162_v43 }
  0xc5   : > { %1693 = vmatmul.bf16.gmra.mxu0 %v9840_v58  ;;  %792 = vst [vmem:[#allocation2 + $0x9c] sm:$0x1] %v791_v40  ;;  %v201_v40 = vld [vmem:[%s9380_s29 + $0x74] sm:$0xf]  ;;  %v446_v41 = vshrl.u32 %v200_v21, 16 }
  0xc6   : > { %628 = vst.msk [vmem:[#allocation2 + $0xac] sm:$0xf] %vm528_vm2, %v443_v52  ;;  %v1304_v62 = vsel %vm13359_vm11, %v1299_v54, %v1303_v45  ;;  %v1287_v31 = vor.u32 %v1286_v14, %v1282_v12  ;;  %v454_v49 = vshrl.u32 %v201_v40, 16  ;;  %v457_v52 = vshll.u32 %v201_v40, 16 }
  0xc7   : > { %8165 = vmatmul.msk.bf16.gmra.mxu3 %vm13361_vm10, %v9800_v3  ;;  %627 = vst [vmem:[#allocation2 + $0xa8] sm:$0xf] %v626_v61  ;;  %1389 = vrot.lane.b32.xlu0 %v1304_v62, %s9325_s15  ;;  %v448_v51 = vrot.slane %v446_v41, 7  ;;  %v9155_v61 = vld [vmem:[%s13347_s1 + $0xc8] sm:$0xff] }
  0xc8   : > { %v1292_v54 = vsel %vm13359_vm11, %v1287_v31, %v1291_v47  ;;  %v9908_v59 = vrot.slane %v454_v49, 7  ;;  %2217 = vmatpush.bf16.msrb.mxu1 %v9155_v61  ;;  %v632_v47 = vld [vmem:[#allocation2 + $0xb4] sm:$0xf]  ;;  %v1374_v49 = vpop.permute.xlu2 %1373  ;;  %v202_v61 = vld [vmem:[%s9380_s29 + $0x78] sm:$0xf] }
  0xc9   : > { %v9855_v16 = vpop.f32.mrf.mxu1  ;;  %1387 = vrot.lane.b32.xlu2 %v1292_v54, %s9325_s15  ;;  %v452_v12 = vrot.slane %v448_v51, 4  ;;  %v9950_v54 = vsel %vm13361_vm10, %v9567_v2, %v1374_v49 }
  0xca   : > { %v9859_v30 = vpop.f32.mrf.mxu3  ;;  %13431 = vst [vmem:[#allocation7_spill] sm:$0xff] %v9908_v59  ;;  %v459_v14 = vor.u32 %v457_v52, %v9908_v59  ;;  %v13350_v31 = vrot.slane %v9908_v59, 4 }
  0xcb   : > { %v991_v48 = vld [vmem:[#allocation2 + $0xa4] sm:$0x1] }
  0xcc   : > { %v1125_v11 = vunpack.c.l.b16 %v991_v48  ;;  %v9901_v35 = vld [vmem:[#allocation2 + $0x9c] sm:$0xff]  ;;  %v460_v41 = vsel %vm9394_vm5, %v452_v12, %v459_v14 }
  0xcd   : > { %1951 = vmatmul.bf16.gmra.mxu2 %v9840_v58  ;;  %v819_v39 = vld [vmem:[#allocation2 + $0xac] sm:$0x8]  ;;  %v1306_v62 = vshrl.u32 %v9901_v35, 16  ;;  %v1308_v48 = vshll.u32 %v9901_v35, 16  ;;  %635 = vst.msk [vmem:[#allocation2 + $0xb8] sm:$0xf] %vm528_vm2, %v460_v41 }
  0xce   : > { %v7944_v38 = vrot.slane %v819_v39, 11  ;;  %v9896_v42 = vpack.c.b16 %v1125_v11, %v1125_v11  ;;  %v675_v45 = vld [vmem:[#allocation2 + $0xa8] sm:$0x2]  ;;  %v793_v55 = vld [vmem:[#allocation2 + $0xa8] sm:$0x1]  ;;  %v449_v11 = vshll.u32 %v200_v21, 16 }
  0xcf   : > { %v7926_v50 = vrot.slane %v675_v45, 9  ;;  %v1310_v15 = vrot.slane %v1308_v48, 1  ;;  %v636_v21 = vld [vmem:[#allocation2 + $0xbc] sm:$0x1]  ;;  %657 = vst.msk [vmem:[#allocation2 + $0xd0] sm:$0xf] %vm528_vm2, %v460_v41 }
  0xd0   : > { %v939_v46 = vsel %vm9443_vm8, %v7944_v38, %v938_v5  ;;  %v1313_v34 = vshll.u32 %v9896_v42, 16  ;;  %v1438_v38 = vrot.slane %v9851_v10, 1  ;;  %v1439_v5 = vrot.slane %v9849_v8, 1 }
  0xd1   : > { %v9876_v63 = vpop.f32.mrf.mxu1  ;;  %940 = vst [vmem:[#allocation2 + $0xb0] sm:$0x1] %v939_v46  ;;  %v794_v9 = vsel %vm9400_vm6, %v7926_v50, %v793_v55  ;;  %v9926_v40 = vor.u32 %v449_v11, %v448_v51  ;;  %v1311_v43 = vor.u32 %v1310_v15, %v1306_v62  ;;  %v637_v45 = vsel %vm9400_vm6, %v13350_v31, %v636_v21 }
  0xd2   : > { %v9882_v33 = vpop.f32.mrf.mxu3  ;;  %795 = vst [vmem:[#allocation2 + $0xa8] sm:$0x1] %v794_v9  ;;  %v1315_v39 = vrot.slane %v1313_v34, 1  ;;  %v9942_v51 = vsel %vm13358_vm9, %v1438_v38, %v1439_v5  ;;  %v203_v34 = vld [vmem:[%s9380_s29 + $0x7c] sm:$0xf]  ;;  %v463_v9 = vshrl.u32 %v202_v61, 16 }
  0xd3   : > { %13432 = vst [vmem:[#allocation8_spill] sm:$0xff] %v9926_v40  ;;  %v633_v8 = vsel %vm9406_vm7, %v9926_v40, %v632_v47  ;;  %v471_v12 = vshrl.u32 %v203_v34, 16 }
  0xd4   : > { %8102 = vmatmul.msk.bf16.gmra.mxu1 %vm13361_vm10, %v9879_v28  ;;  %638 = vst [vmem:[#allocation2 + $0xbc] sm:$0x1] %v637_v45  ;;  %v1316_v50 = vsel %vm13359_vm11, %v1311_v43, %v1315_v39  ;;  %v820_v55 = vld [vmem:[#allocation2 + $0xb8] sm:$0x8]  ;;  %v465_v15 = vrot.slane %v463_v9, 7  ;;  %v474_v39 = vshll.u32 %v203_v34, 16 }
  0xd5   : > { %1698 = vmatmul.bf16.gmra.mxu0 %v9885_v6  ;;  %634 = vst [vmem:[#allocation2 + $0xb4] sm:$0xf] %v633_v8  ;;  %1391 = vrot.lane.b32.xlu1 %v1316_v50, %s9325_s15  ;;  %v7945_v62 = vrot.slane %v820_v55, 11  ;;  %v473_v41 = vrot.slane %v471_v12, 7  ;;  %v466_v45 = vshll.u32 %v202_v61, 16  ;;  %v1441_v50 = vrot.slane %v9901_v35, 1  ;;  %v1376_v61 = vpop.permute.xlu2 %1375 }
  0xd6   : > { %v469_v47 = vrot.slane %v465_v15, 4  ;;  %v1442_v55 = vrot.slane %v9896_v42, 1  ;;  %v643_v34 = vld [vmem:[#allocation2 + $0xc8] sm:$0x1]  ;;  %v639_v9 = vld [vmem:[#allocation2 + $0xc0] sm:$0xf] }
  0xd7   : > { %8166 = vmatmul.msk.bf16.gmra.mxu3 %vm13361_vm10, %v9834_v56  ;;  %v476_v49 = vor.u32 %v474_v39, %v473_v41  ;;  %v478_v8 = vrot.slane %v473_v41, 4 }
  0xd8   : > { %v9980_v42 = vsel %vm13358_vm9, %v1441_v50, %v1442_v55  ;;  %v994_v39 = vld [vmem:[#allocation2 + $0xb0] sm:$0x1]  ;;  %v1380_v40 = vpop.permute.xlu1 %1379 }
  0xd9   : > { %v9905_v53 = vpop.f32.mrf.mxu1  ;;  %v1126_v41 = vunpack.c.l.b16 %v994_v39 }
  0xda   : > { %v9910_v60 = vpop.f32.mrf.mxu3 }
  0xdb   : > { %v941_v48 = vld [vmem:[#allocation2 + $0xbc] sm:$0x1] }
  0xdc   : > { %v676_v11 = vld [vmem:[#allocation2 + $0xb4] sm:$0x2]  ;;  %v942_v2 = vsel %vm9443_vm8, %v7945_v62, %v941_v48  ;;  %v796_v5 = vld [vmem:[#allocation2 + $0xb4] sm:$0x1]  ;;  %v468_v62 = vor.u32 %v466_v45, %v465_v15  ;;  %v477_v48 = vsel %vm9394_vm5, %v469_v47, %v476_v49  ;;  %v9986_v15 = vsel %vm13361_vm10, %v9594_v44, %v1376_v61  ;;  %v9154_v61 = vld [vmem:[%s13347_s1 + $0xc0] sm:$0xff] }
  0xdd   : > { %1956 = vmatmul.bf16.gmra.mxu2 %v9885_v6  ;;  %v7927_v14 = vrot.slane %v676_v11, 9  ;;  %943 = vst [vmem:[#allocation2 + $0xbc] sm:$0x1] %v942_v2  ;;  %v644_v11 = vsel %vm9400_vm6, %v478_v8, %v643_v34  ;;  %v1144_v34 = vpack.c.b16 %v1126_v41, %v1126_v41  ;;  %2218 = vmatpush.bf16.msrb.mxu1 %v9154_v61  ;;  %v9298_v61 = vld [vmem:[#allocation2 + $0x48] sm:$0xff]  ;;  %vm10328_vm5 = vmor %vm2485_vm15, %vm2486_vm1  ;;  %vm13360_vm1 = vcmask 257024  }
  0xde   : > { %642 = vst.msk [vmem:[#allocation2 + $0xc4] sm:$0xf] %vm528_vm2, %v477_v48  ;;  %v640_v12 = vsel %vm9406_vm7, %v468_v62, %v639_v9  ;;  %v9999_v48 = vld [vmem:[#allocation2 + $0xa8] sm:$0xff]  ;;  %vm3449_vm2 = vcmask 253952  }
  0xdf   : > { %v797_v43 = vsel %vm9400_vm6, %v7927_v14, %v796_v5  ;;  %645 = vst [vmem:[#allocation2 + $0xc8] sm:$0x1] %v644_v11 }
  0xe0   : > { %798 = vst [vmem:[#allocation2 + $0xb4] sm:$0x1] %v797_v43 }
  0xe1   : > { %v9939_v46 = vpop.f32.mrf.mxu1  ;;  %641 = vst [vmem:[#allocation2 + $0xc0] sm:$0xf] %v640_v12 }
  0xe2   : > { %v9946_v52 = vpop.f32.mrf.mxu3 }
  0xe4   : > { %8103 = vmatmul.msk.bf16.gmra.mxu1 %vm13361_vm10, %v9942_v51  ;;  %v997_v19 = vld [vmem:[#allocation2 + $0xbc] sm:$0x1] }
  0xe5   : > { %1703 = vmatmul.bf16.gmra.mxu0 %v9950_v54  ;;  %v1127_v5 = vunpack.c.l.b16 %v997_v19  ;;  %v821_v43 = vld [vmem:[#allocation2 + $0xc4] sm:$0x8] }
  0xe6   : > { %v7946_v47 = vrot.slane %v821_v43, 11  ;;  %v944_v45 = vld [vmem:[#allocation2 + $0xc8] sm:$0x1] }
  0xe7   : > { %8167 = vmatmul.msk.bf16.gmra.mxu3 %vm13361_vm10, %v9879_v28  ;;  %v9993_v8 = vld [vmem:[#allocation2 + $0xb4] sm:$0xff]  ;;  %v1145_v50 = vpack.c.b16 %v1127_v5, %v1127_v5 }
  0xe8   : > { %v677_v49 = vld [vmem:[#allocation2 + $0xc0] sm:$0x2]  ;;  %v945_v55 = vsel %vm9443_vm8, %v7946_v47, %v944_v45  ;;  %v799_v9 = vld [vmem:[#allocation2 + $0xc0] sm:$0x1]  ;;  %v1330_v12 = vshrl.u32 %v9993_v8, 16  ;;  %v1332_v19 = vshll.u32 %v9993_v8, 16 }
  0xe9   : > { %v9961_v38 = vpop.f32.mrf.mxu1  ;;  %v7928_v44 = vrot.slane %v677_v49, 9  ;;  %946 = vst [vmem:[#allocation2 + $0xc8] sm:$0x1] %v945_v55  ;;  %v1337_v39 = vshll.u32 %v1145_v50, 16  ;;  %v1444_v47 = vrot.slane %v9999_v48, 1  ;;  %v1445_v45 = vrot.slane %v1144_v34, 1  ;;  %v1378_v55 = vpop.permute.xlu0 %1377 }
  0xea   : > { %v9963_v21 = vpop.f32.mrf.mxu3  ;;  %v1334_v43 = vrot.slane %v1332_v19, 1  ;;  %v10022_v19 = vsel %vm13361_vm10, %v9298_v61, %v1378_v55 }
  0xeb   : > { %v800_v5 = vsel %vm9400_vm6, %v7928_v44, %v799_v9  ;;  %v1339_v41 = vrot.slane %v1337_v39, 1  ;;  %v10016_v59 = vsel %vm13358_vm9, %v1444_v47, %v1445_v45  ;;  %v1320_v39 = vshll.u32 %v9999_v48, 16 }
  0xec   : > { %801 = vst [vmem:[#allocation2 + $0xc0] sm:$0x1] %v800_v5  ;;  %v1335_v49 = vor.u32 %v1334_v43, %v1330_v12  ;;  %v1318_v5 = vshrl.u32 %v9999_v48, 16 }
  0xed   : > { %1961 = vmatmul.bf16.gmra.mxu2 %v9950_v54  ;;  %v1322_v43 = vrot.slane %v1320_v39, 1 }
  0xee   : > { %v1340_v31 = vsel %vm13359_vm11, %v1335_v49, %v1339_v41  ;;  %v1325_v41 = vshll.u32 %v1144_v34, 16 }
  0xef   : > { %1395 = vrot.lane.b32.xlu0 %v1340_v31, %s9325_s15  ;;  %v1323_v31 = vor.u32 %v1322_v43, %v1318_v5 }
  0xf0   : > { %v1000_v44 = vld [vmem:[#allocation2 + $0xc8] sm:$0x1]  ;;  %v1327_v47 = vrot.slane %v1325_v41, 1  ;;  %v1447_v41 = vrot.slane %v9993_v8, 1 }
  0xf1   : > { %v9977_v14 = vpop.f32.mrf.mxu1  ;;  %v1128_v12 = vunpack.c.l.b16 %v1000_v44 }
  0xf2   : > { %v9982_v2 = vpop.f32.mrf.mxu3  ;;  %v1328_v61 = vsel %vm13359_vm11, %v1323_v31, %v1327_v47 }
  0xf3   : > { %v10031_v45 = vld [vmem:[#allocation2 + $0xc0] sm:$0xff]  ;;  %v1146_v49 = vpack.c.b16 %v1128_v12, %v1128_v12  ;;  %1393 = vrot.lane.b32.xlu2 %v1328_v61, %s9325_s15  ;;  %v1448_v12 = vrot.slane %v1145_v50, 1 }
  0xf4   : > { %8104 = vmatmul.msk.bf16.gmra.mxu1 %vm13361_vm10, %v9980_v42  ;;  %v1342_v44 = vshrl.u32 %v10031_v45, 16  ;;  %v1344_v34 = vshll.u32 %v10031_v45, 16 }
  0xf5   : > { %1708 = vmatmul.bf16.gmra.mxu0 %v9986_v15  ;;  %v1349_v39 = vshll.u32 %v1146_v49, 16  ;;  %v10047_v61 = vsel %vm13358_vm9, %v1447_v41, %v1448_v12 }
  0xf6   : > { %v1346_v5 = vrot.slane %v1344_v34, 1  ;;  %v9299_v34 = vld [vmem:[#allocation2 + $0x54] sm:$0xff] }
  0xf7   : > { %8168 = vmatmul.msk.bf16.gmra.mxu3 %vm13361_vm10, %v9942_v51  ;;  %v1351_v43 = vrot.slane %v1349_v39, 1  ;;  %v10053_v39 = vsel %vm13361_vm10, %v9299_v34, %v1380_v40 }
  0xf8   : > { %v1347_v32 = vor.u32 %v1346_v5, %v1342_v44  ;;  %v1450_v44 = vrot.slane %v10031_v45, 1  ;;  %v1451_v5 = vrot.slane %v1146_v49, 1 }
  0xf9   : > { %v9997_v62 = vpop.f32.mrf.mxu1 }
  0xfa   : > { %v10001_v11 = vpop.f32.mrf.mxu3  ;;  %v1352_v31 = vsel %vm13359_vm11, %v1347_v32, %v1351_v43  ;;  %v1382_v43 = vpop.permute.xlu2 %1381  ;;  %v10069_v41 = vsel %vm13358_vm9, %v1450_v44, %v1451_v5  ;;  %vm10334_vm9 = vmand %vm3449_vm2, %vm529_vm4 }
  0xfb   : > { %1397 = vrot.lane.b32.xlu1 %v1352_v31, %s9325_s15  ;;  %13437 = vst [vmem:[#allocation13_spill] sm:$0xff] %v10069_v41  ;;  %v10075_v31 = vsel %vm13361_vm10, %v9735_v22, %v1382_v43  ;;  %v1384_v44 = vpop.permute.xlu0 %1383  ;;  %vm10340_vm11 = vmand %vm3116_vm3, %vm2485_vm15 }
  0xfc   : > { %vm10347_vm4 = vmand %vm2849_vm12, %vm2485_vm15  ;;  %vm3605_vm15 = vcmask 256002   ;;  %vm3606_vm12 = vsmask.f32 2304 }
  0xfd   : > { %1966 = vmatmul.bf16.gmra.mxu2 %v9986_v15 }
 0x101   : > { %v10013_v7 = vpop.f32.mrf.mxu1 }
 0x102   : > { %v10019_v9 = vpop.f32.mrf.mxu3 }
 0x104   : > { %8105 = vmatmul.msk.bf16.gmra.mxu1 %vm13361_vm10, %v10016_v59 }
 0x105   : > { %1713 = vmatmul.bf16.gmra.mxu0 %v10022_v19 }
 0x107   : > { %8169 = vmatmul.msk.bf16.gmra.mxu3 %vm13361_vm10, %v9980_v42 }
 0x109   : > { %v10033_v55 = vpop.f32.mrf.mxu1 }
 0x10a   : > { %13433 = vst [vmem:[#allocation9_spill] sm:$0xff] %v10033_v55  ;;  %v10036_v24 = vpop.f32.mrf.mxu3 }
 0x10d   : > { %1971 = vmatmul.bf16.gmra.mxu2 %v10022_v19 }
 0x111   : > { %v10044_v47 = vpop.f32.mrf.mxu1 }
 0x112   : > { %v10050_v55 = vpop.f32.mrf.mxu3 }
 0x113   : > { %13434 = vst [vmem:[#allocation10_spill] sm:$0xff] %v10050_v55 }
 0x114   : > { %8106 = vmatmul.msk.bf16.gmra.mxu1 %vm13361_vm10, %v10047_v61 }
 0x115   : > { %1718 = vmatmul.bf16.gmra.mxu0 %v10053_v39 }
 0x117   : > { %8170 = vmatmul.msk.bf16.gmra.mxu3 %vm13361_vm10, %v10016_v59 }
 0x119   : > { %v10060_v32 = vpop.f32.mrf.mxu1 }
 0x11a   : > { %v10062_v50 = vpop.f32.mrf.mxu3 }
 0x11b   : > { %13435 = vst [vmem:[#allocation11_spill] sm:$0xff] %v10062_v50  ;;  %v10093_v50 = vsel %vm13361_vm10, %v9737_v23, %v1384_v44 }
 0x11d   : > { %1976 = vmatmul.bf16.gmra.mxu2 %v10053_v39 }
 0x121   : > { %v10066_v40 = vpop.f32.mrf.mxu1 }
 0x122   : > { %13436 = vst [vmem:[#allocation12_spill] sm:$0xff] %v10066_v40  ;;  %v10071_v12 = vpop.f32.mrf.mxu3 }
 0x123   : > { %13438 = vst [vmem:[#allocation14_spill] sm:$0xff] %v10071_v12 }
 0x124   : > { %8107 = vmatmul.msk.bf16.gmra.mxu1 %vm13361_vm10, %v10069_v41 }
 0x125   : > { %1723 = vmatmul.bf16.gmra.mxu0 %v10075_v31 }
 0x127   : > { %8171 = vmatmul.msk.bf16.gmra.mxu3 %vm13361_vm10, %v10047_v61 }
 0x129   : > { %v10082_v49 = vpop.f32.mrf.mxu1 }
 0x12a   : > { %13439 = vst [vmem:[#allocation15_spill] sm:$0xff] %v10082_v49  ;;  %v10084_v34 = vpop.f32.mrf.mxu3 }
 0x12b   : > { %13440 = vst [vmem:[#allocation16_spill] sm:$0xff] %v10084_v34 }
 0x12d   : > { %1981 = vmatmul.bf16.gmra.mxu2 %v10075_v31 }
 0x130   : > { %v1942_v5 = vpop.f32.mrf.mxu2 }
 0x131   : > { %v10087_v12 = vpop.f32.mrf.mxu1 }
 0x132   : > { %13441 = vst [vmem:[#allocation17_spill] sm:$0xff] %v10087_v12  ;;  %v1689_v22 = vpop.f32.mrf.mxu0  ;;  %v10089_v43 = vpop.f32.mrf.mxu3 }
 0x133   : > { %13442 = vst [vmem:[#allocation18_spill] sm:$0xff] %v10089_v43  ;;  %v1779_v55 = vadd.f32 %v9797_v0, %v1689_v22  ;;  %v1386_v0 = vpop.permute.xlu1 %1385 }
 0x134   : > { %2219 = vmatmul.bf16.vlgmr.msrb.gmra.mxu1 %v9840_v58 }
 0x135   : > { %v10097_v49 = vadd.f32 %v1942_v5, %v1779_v55  ;;  %1728 = vmatmul.bf16.gmra.mxu0 %v10093_v50 }
 0x137   : > { %8244 = vmatmul.msk.bf16.vlgmr.msrb.gmra.mxu3 %vm13361_vm10, %v9522_v13  ;;  %v10116_v13 = vsel %vm13361_vm10, %v9774_v29, %v1386_v0 }
 0x138   : > { %v1944_v34 = vpop.f32.mrf.mxu2 }
 0x139   : > { %v10102_v12 = vpop.f32.mrf.mxu1 }
 0x13a   : > { %13443 = vst [vmem:[#allocation19_spill] sm:$0xff] %v10102_v12  ;;  %v1691_v41 = vpop.f32.mrf.mxu0  ;;  %v10104_v43 = vpop.f32.mrf.mxu3 }
 0x13b   : > { %13444 = vst [vmem:[#allocation20_spill] sm:$0xff] %v10104_v43  ;;  %v1781_v23 = vadd.f32 %v9813_v36, %v1691_v41 }
 0x13d   : > { %v10107_v44 = vadd.f32 %v1944_v34, %v1781_v23  ;;  %1986 = vmatmul.bf16.gmra.mxu2 %v10093_v50 }
 0x140   : > { %v1947_v58 = vpop.f32.mrf.mxu2 }
 0x141   : > { %v10110_v55 = vpop.f32.mrf.mxu1 }
 0x142   : > { %13445 = vst [vmem:[#allocation21_spill] sm:$0xff] %v10110_v55  ;;  %v1694_v5 = vpop.f32.mrf.mxu0  ;;  %v10112_v22 = vpop.f32.mrf.mxu3 }
 0x143   : > { %13446 = vst [vmem:[#allocation22_spill] sm:$0xff] %v10112_v22  ;;  %v1784_v12 = vadd.f32 %v9831_v18, %v1694_v5  ;;  %v1388_v18 = vpop.permute.xlu2 %1387 }
 0x144   : > { %2224 = vmatmul.bf16.gmra.mxu1 %v9885_v6 }
 0x145   : > { %v10120_v36 = vadd.f32 %v1947_v58, %v1784_v12  ;;  %1733 = vmatmul.bf16.gmra.mxu0 %v10116_v13 }
 0x147   : > { %8245 = vmatmul.msk.bf16.gmra.mxu3 %vm13361_vm10, %v9551_v20  ;;  %v10139_v20 = vsel %vm13361_vm10, %v9857_v17, %v1388_v18 }
 0x148   : > { %v1949_v41 = vpop.f32.mrf.mxu2 }
 0x149   : > { %v10125_v34 = vpop.f32.mrf.mxu1 }
 0x14a   : > { %13447 = vst [vmem:[#allocation23_spill] sm:$0xff] %v10125_v34  ;;  %v1696_v23 = vpop.f32.mrf.mxu0  ;;  %v10127_v55 = vpop.f32.mrf.mxu3 }
 0x14b   : > { %13448 = vst [vmem:[#allocation24_spill] sm:$0xff] %v10127_v55  ;;  %v1786_v29 = vadd.f32 %v9855_v16, %v1696_v23 }
 0x14d   : > { %v10130_v0 = vadd.f32 %v1949_v41, %v1786_v29  ;;  %1991 = vmatmul.bf16.gmra.mxu2 %v10116_v13 }
 0x150   : > { %v1952_v6 = vpop.f32.mrf.mxu2 }
 0x151   : > { %v10133_v12 = vpop.f32.mrf.mxu1 }
 0x152   : > { %13449 = vst [vmem:[#allocation25_spill] sm:$0xff] %v10133_v12  ;;  %v1699_v58 = vpop.f32.mrf.mxu0  ;;  %v10135_v5 = vpop.f32.mrf.mxu3 }
 0x153   : > { %13450 = vst [vmem:[#allocation26_spill] sm:$0xff] %v10135_v5  ;;  %v1789_v34 = vadd.f32 %v9876_v63, %v1699_v58  ;;  %v1390_v63 = vpop.permute.xlu0 %1389 }
 0x154   : > { %2229 = vmatmul.bf16.gmra.mxu1 %v9950_v54 }
 0x155   : > { %v10143_v16 = vadd.f32 %v1952_v6, %v1789_v34  ;;  %1738 = vmatmul.bf16.gmra.mxu0 %v10139_v20 }
 0x157   : > { %8246 = vmatmul.msk.bf16.gmra.mxu3 %vm13361_vm10, %v9580_v27  ;;  %v10162_v27 = vsel %vm13361_vm10, %v9851_v10, %v1390_v63 }
 0x158   : > { %v1954_v41 = vpop.f32.mrf.mxu2 }
 0x159   : > { %v10148_v23 = vpop.f32.mrf.mxu1 }
 0x15a   : > { %13451 = vst [vmem:[#allocation27_spill] sm:$0xff] %v10148_v23  ;;  %v1701_v29 = vpop.f32.mrf.mxu0  ;;  %v10150_v5 = vpop.f32.mrf.mxu3 }
 0x15b   : > { %13452 = vst [vmem:[#allocation28_spill] sm:$0xff] %v10150_v5  ;;  %v1791_v17 = vadd.f32 %v9905_v53, %v1701_v29 }
 0x15d   : > { %v10153_v18 = vadd.f32 %v1954_v41, %v1791_v17  ;;  %1996 = vmatmul.bf16.gmra.mxu2 %v10139_v20 }
 0x160   : > { %v1957_v54 = vpop.f32.mrf.mxu2 }
 0x161   : > { %v10156_v34 = vpop.f32.mrf.mxu1 }
 0x162   : > { %13453 = vst [vmem:[#allocation29_spill] sm:$0xff] %v10156_v34  ;;  %v1704_v6 = vpop.f32.mrf.mxu0  ;;  %v10158_v58 = vpop.f32.mrf.mxu3 }
 0x163   : > { %13454 = vst [vmem:[#allocation30_spill] sm:$0xff] %v10158_v58  ;;  %v1794_v23 = vadd.f32 %v9939_v46, %v1704_v6  ;;  %v1392_v46 = vpop.permute.xlu1 %1391 }
 0x164   : > { %2234 = vmatmul.bf16.gmra.mxu1 %v9986_v15  ;;  %v9215_v15 = vld [vmem:[%s13348_s2 + $0xd8] sm:$0xff] }
 0x165   : > { %v10166_v53 = vadd.f32 %v1957_v54, %v1794_v23  ;;  %1743 = vmatmul.bf16.gmra.mxu0 %v10162_v27  ;;  %5839 = vmatpush.bf16.msrb.mxu2 %v9215_v15 }
 0x167   : > { %8247 = vmatmul.msk.bf16.gmra.mxu3 %vm13361_vm10, %v9625_v25 }
 0x168   : > { %v1959_v41 = vpop.f32.mrf.mxu2 }
 0x169   : > { %v10171_v29 = vpop.f32.mrf.mxu1 }
 0x16a   : > { %13455 = vst [vmem:[#allocation31_spill] sm:$0xff] %v10171_v29  ;;  %v1706_v17 = vpop.f32.mrf.mxu0  ;;  %v10173_v34 = vpop.f32.mrf.mxu3 }
 0x16b   : > { %13456 = vst [vmem:[#allocation32_spill] sm:$0xff] %v10173_v34  ;;  %v1796_v10 = vadd.f32 %v9961_v38, %v1706_v17  ;;  %v10192_v38 = vsel %vm13361_vm10, %v9901_v35, %v1392_v46  ;;  %v1394_v46 = vpop.permute.xlu2 %1393 }
 0x16d   : > { %v10176_v63 = vadd.f32 %v1959_v41, %v1796_v10  ;;  %2001 = vmatmul.bf16.gmra.mxu2 %v10162_v27  ;;  %v9209_v41 = vld [vmem:[%s13348_s2 + $0xa8] sm:$0xff] }
 0x16e   : > { %5748 = vmatpush.bf16.msrb.mxu0 %v9209_v41 }
 0x170   : > { %v10182_v23 = vpop.f32.mrf.mxu2 }
 0x171   : > { %v10184_v25 = vpop.f32.mrf.mxu1 }
 0x172   : > { %13457 = vst [vmem:[#allocation33_spill] sm:$0xff] %v10184_v25  ;;  %v10186_v54 = vpop.f32.mrf.mxu0  ;;  %v10188_v6 = vpop.f32.mrf.mxu3 }
 0x173   : > { %13458 = vst [vmem:[#allocation34_spill] sm:$0xff] %v10188_v6 }
 0x174   : > { %2239 = vmatmul.bf16.gmra.mxu1 %v10022_v19 }
 0x175   : > { %1748 = vmatmul.bf16.gmra.mxu0 %v10192_v38 }
 0x177   : > { %8248 = vmatmul.msk.bf16.gmra.mxu3 %vm13361_vm10, %v9681_v26  ;;  %v10220_v26 = vsel %vm13361_vm10, %v9999_v48, %v1394_v46 }
 0x178   : > { %v10201_v17 = vpop.f32.mrf.mxu2 }
 0x179   : > { %v10203_v10 = vpop.f32.mrf.mxu1 }
 0x17a   : > { %13459 = vst [vmem:[#allocation35_spill] sm:$0xff] %v10203_v10  ;;  %v10205_v15 = vpop.f32.mrf.mxu0  ;;  %v10207_v35 = vpop.f32.mrf.mxu3 }
 0x17b   : > { %13460 = vst [vmem:[#allocation36_spill] sm:$0xff] %v10207_v35 }
 0x17d   : > { %2006 = vmatmul.bf16.gmra.mxu2 %v10192_v38 }
 0x180   : > { %v10210_v25 = vpop.f32.mrf.mxu2 }
 0x181   : > { %v10212_v19 = vpop.f32.mrf.mxu1 }
 0x182   : > { %13461 = vst [vmem:[#allocation37_spill] sm:$0xff] %v10212_v19  ;;  %v10214_v6 = vpop.f32.mrf.mxu0  ;;  %v10216_v41 = vpop.f32.mrf.mxu3 }
 0x183   : > { %13462 = vst [vmem:[#allocation38_spill] sm:$0xff] %v10216_v41  ;;  %v1396_v41 = vpop.permute.xlu0 %1395 }
 0x184   : > { %2244 = vmatmul.bf16.gmra.mxu1 %v10053_v39 }
 0x185   : > { %1753 = vmatmul.bf16.gmra.mxu0 %v10220_v26 }
 0x187   : > { %8249 = vmatmul.msk.bf16.gmra.mxu3 %vm13361_vm10, %v9724_v4  ;;  %v10245_v4 = vsel %vm13361_vm10, %v9993_v8, %v1396_v41 }
 0x188   : > { %v10226_v10 = vpop.f32.mrf.mxu2 }
 0x189   : > { %v10228_v35 = vpop.f32.mrf.mxu1 }
 0x18a   : > { %13463 = vst [vmem:[#allocation39_spill] sm:$0xff] %v10228_v35  ;;  %v10230_v19 = vpop.f32.mrf.mxu0  ;;  %v10232_v34 = vpop.f32.mrf.mxu3  ;;  %v9208_v35 = vld [vmem:[%s13348_s2 + $0xa0] sm:$0xff] }
 0x18b   : > { %13464 = vst [vmem:[#allocation40_spill] sm:$0xff] %v10232_v34  ;;  %5749 = vmatpush.bf16.msrb.mxu0 %v9208_v35 }
 0x18d   : > { %2011 = vmatmul.bf16.gmra.mxu2 %v10220_v26 }
 0x190   : > { %v10235_v48 = vpop.f32.mrf.mxu2 }
 0x191   : > { %13465 = vst [vmem:[#allocation41_spill] sm:$0xff] %v10235_v48  ;;  %v10237_v46 = vpop.f32.mrf.mxu1 }
 0x192   : > { %13466 = vst [vmem:[#allocation42_spill] sm:$0xff] %v10237_v46  ;;  %v10239_v39 = vpop.f32.mrf.mxu0  ;;  %v10241_v29 = vpop.f32.mrf.mxu3  ;;  %v9214_v46 = vld [vmem:[%s13348_s2 + $0xd0] sm:$0xff] }
 0x193   : > { %13467 = vst [vmem:[#allocation43_spill] sm:$0xff] %v10241_v29  ;;  %5840 = vmatpush.bf16.msrb.mxu2 %v9214_v46 }
 0x194   : > { %2249 = vmatmul.bf16.gmra.mxu1 %v10075_v31  ;;  %v1398_v31 = vpop.permute.xlu1 %1397 }
 0x195   : > { %1758 = vmatmul.bf16.gmra.mxu0 %v10245_v4  ;;  %v10276_v12 = vsel %vm13361_vm10, %v10031_v45, %v1398_v31 }
 0x197   : > { %8250 = vmatmul.msk.bf16.gmra.mxu3 %vm13361_vm10, %v9761_v1 }
 0x198   : > { %v10257_v29 = vpop.f32.mrf.mxu2 }
 0x199   : > { %13468 = vst [vmem:[#allocation44_spill] sm:$0xff] %v10257_v29  ;;  %v10259_v8 = vpop.f32.mrf.mxu1 }
 0x19a   : > { %13469 = vst [vmem:[#allocation45_spill] sm:$0xff] %v10259_v8  ;;  %v10261_v41 = vpop.f32.mrf.mxu0  ;;  %v10263_v34 = vpop.f32.mrf.mxu3 }
 0x19b   : > { %13470 = vst [vmem:[#allocation46_spill] sm:$0xff] %v10263_v34 }
 0x19d   : > { %2016 = vmatmul.bf16.gmra.mxu2 %v10245_v4 }
 0x1a0   : > { %v10266_v35 = vpop.f32.mrf.mxu2 }
 0x1a1   : > { %13471 = vst [vmem:[#allocation47_spill] sm:$0xff] %v10266_v35  ;;  %v10268_v58 = vpop.f32.mrf.mxu1 }
 0x1a2   : > { %13472 = vst [vmem:[#allocation48_spill] sm:$0xff] %v10268_v58  ;;  %v10270_v1 = vpop.f32.mrf.mxu0  ;;  %v10272_v5 = vpop.f32.mrf.mxu3 }
 0x1a3   : > { %13473 = vst [vmem:[#allocation49_spill] sm:$0xff] %v10270_v1 }
 0x1a4   : > { %13474 = vst [vmem:[#allocation50_spill] sm:$0xff] %v10272_v5  ;;  %2254 = vmatmul.bf16.gmra.mxu1 %v10093_v50 }
 0x1a5   : > { %1763 = vmatmul.bf16.gmra.mxu0 %v10276_v12 }
 0x1a7   : > { %8251 = vmatmul.msk.bf16.gmra.mxu3 %vm13361_vm10, %v9800_v3 }
 0x1a8   : > { %v10282_v46 = vpop.f32.mrf.mxu2 }
 0x1a9   : > { %13475 = vst [vmem:[#allocation51_spill] sm:$0xff] %v10282_v46  ;;  %v10284_v8 = vpop.f32.mrf.mxu1 }
 0x1aa   : > { %13476 = vst [vmem:[#allocation52_spill] sm:$0xff] %v10284_v8  ;;  %v10286_v34 = vpop.f32.mrf.mxu0  ;;  %v10288_v55 = vpop.f32.mrf.mxu3 }
 0x1ab   : > { %13477 = vst [vmem:[#allocation53_spill] sm:$0xff] %v10286_v34 }
 0x1ac   : > { %13478 = vst [vmem:[#allocation54_spill] sm:$0xff] %v10288_v55  ;;  %v2032_v55 = vadd.f32 %v9815_v37, %v10097_v49 }
 0x1b0   : > { %v10290_v5 = vpop.f32.mrf.mxu2 }
 0x1b1   : > { %13479 = vst [vmem:[#allocation55_spill] sm:$0xff] %v10290_v5  ;;  %v2220_v22 = vpop.f32.mrf.mxu1 }
 0x1b2   : > { %v10292_v45 = vpop.f32.mrf.mxu0  ;;  %v10294_v31 = vpop.f32.mrf.mxu3 }
 0x1b3   : > { %13480 = vst [vmem:[#allocation56_spill] sm:$0xff] %v10292_v45 }
 0x1b4   : > { %13481 = vst [vmem:[#allocation57_spill] sm:$0xff] %v10294_v31  ;;  %2259 = vmatmul.bf16.gmra.mxu1 %v10116_v13  ;;  %v2034_v13 = vadd.f32 %v9836_v57, %v10107_v44 }
 0x1b7   : > { %8252 = vmatmul.msk.bf16.gmra.mxu3 %vm13361_vm10, %v9834_v56 }
 0x1b8   : > { %v10299_v3 = vpop.f32.mrf.mxu2 }
 0x1b9   : > { %13482 = vst [vmem:[#allocation58_spill] sm:$0xff] %v10299_v3  ;;  %v2222_v50 = vpop.f32.mrf.mxu1 }
 0x1ba   : > { %v10301_v8 = vpop.f32.mrf.mxu0  ;;  %v2309_v43 = vpop.f32.mrf.mxu3 }
 0x1bb   : > { %13483 = vst [vmem:[#allocation59_spill] sm:$0xff] %v10301_v8  ;;  %v2310_v58 = vadd.f32 %v2309_v43, %v2220_v22  ;;  %v2844_v22 = vld [vmem:[#allocation3 + $0x24] sm:$0xe] }
 0x1bd   : > { %v2389_v5 = vadd.f32 %v2310_v58, %v2032_v55  ;;  %v13486_v55 = vmov 0 }
 0x1be   : > { %v13487_v55 = vsel %vm10313_vm14, 4294967295, %v13486_v55 }
 0x1bf   : > { %v2421_v46 = vmax.f32 %v2389_v5, 0.0  ;;  %13488 = vst [vmem:[#allocation62_spill] sm:$0xff] %v13487_v55 }
 0x1c0   : > { %v10305_v45 = vpop.f32.mrf.mxu2 }
 0x1c1   : > { %13484 = vst [vmem:[#allocation60_spill] sm:$0xff] %v10305_v45  ;;  %v2453_v31 = vpack.c.bf16 %v2421_v46, %v2421_v46  ;;  %v2225_v34 = vpop.f32.mrf.mxu1 }
 0x1c2   : > { %v10309_v56 = vpop.f32.mrf.mxu0  ;;  %v2311_v3 = vpop.f32.mrf.mxu3 }
 0x1c3   : > { %13485 = vst [vmem:[#allocation61_spill] sm:$0xff] %v10309_v56  ;;  %v2489_v35 = vshrl.u32 %v2453_v31, 16  ;;  %v2492_v8 = vshll.u32 %v2453_v31, 16  ;;  %v2312_v29 = vadd.f32 %v2311_v3, %v2222_v50 }
 0x1c4   : > { %2264 = vmatmul.bf16.gmra.mxu1 %v10139_v20 }
 0x1c5   : > { %v2491_v37 = vrot.slane %v2489_v35, 6  ;;  %v2494_v49 = vrot.slane %v2492_v8, 7  ;;  %v2390_v43 = vadd.f32 %v2312_v29, %v2034_v13  ;;  %v2037_v29 = vadd.f32 %v9859_v30, %v10120_v36 }
 0x1c6   : > { %v13494_v30 = vmov 0 }
 0x1c7   : > { %v2495_v57 = vor.u32 %v2494_v49, %v2491_v37  ;;  %v2422_v44 = vmax.f32 %v2390_v43, 0.0  ;;  %8253 = vmatmul.msk.bf16.gmra.mxu3 %vm13361_vm10, %v9879_v28  ;;  %v13491_v49 = vmov 0  ;;  %v13495_v30 = vsel %vm10334_vm9, 4294967295, %v13494_v30 }
 0x1c8   : > { %v10321_v46 = vpop.f32.mrf.mxu2  ;;  %v13492_v49 = vsel %vm10328_vm5, 4294967295, %v13491_v49  ;;  %13496 = vst [vmem:[#allocation66_spill] sm:$0xff] %v13495_v30 }
 0x1c9   : > { %v2845_v5 = vsel %vm10313_vm14, %v2495_v57, %v2844_v22  ;;  %v2454_v58 = vpack.c.bf16 %v2422_v44, %v2422_v44  ;;  %13489 = vst [vmem:[#allocation63_spill] sm:$0xff] %v10321_v46  ;;  %v2227_v20 = vpop.f32.mrf.mxu1  ;;  %v2496_v36 = vrot.slane %v2495_v57, 4  ;;  %v13497_v22 = vmov 0  ;;  %v3460_v44 = vld [vmem:[#allocation3 + $0x24] sm:$0x1] }
 0x1ca   : > { %2846 = vst [vmem:[#allocation3 + $0x24] sm:$0xe] %v2845_v5  ;;  %v10325_v8 = vpop.f32.mrf.mxu0  ;;  %v2314_v35 = vpop.f32.mrf.mxu3  ;;  %v13498_v22 = vsel %vm10340_vm11, 4294967295, %v13497_v22  ;;  %v2851_v5 = vld [vmem:[#allocation3 + $0x2c] sm:$0x3] }
 0x1cb   : > { %13490 = vst [vmem:[#allocation64_spill] sm:$0xff] %v10325_v8  ;;  %v2498_v31 = vshrl.u32 %v2454_v58, 16  ;;  %v2501_v3 = vshll.u32 %v2454_v58, 16  ;;  %v2315_v50 = vadd.f32 %v2314_v35, %v2225_v34  ;;  %v2039_v8 = vadd.f32 %v9882_v33, %v10130_v0 }
 0x1cc   : > { %13493 = vst [vmem:[#allocation65_spill] sm:$0xff] %v13492_v49 }
 0x1cd   : > { %v2500_v28 = vrot.slane %v2498_v31, 6  ;;  %v2503_v13 = vrot.slane %v2501_v3, 7  ;;  %v2391_v37 = vadd.f32 %v2315_v50, %v2037_v29  ;;  %13499 = vst [vmem:[#allocation67_spill] sm:$0xff] %v13498_v22  ;;  %v13500_v31 = vmov 0 }
 0x1ce   : > { %v13501_v31 = vsel %vm10347_vm4, 4294967295, %v13500_v31 }
 0x1cf   : > { %v2504_v43 = vor.u32 %v2503_v13, %v2500_v28  ;;  %v2423_v34 = vmax.f32 %v2391_v37, 0.0  ;;  %13502 = vst [vmem:[#allocation68_spill] sm:$0xff] %v13501_v31 }
 0x1d1   : > { %v3009_v58 = vld [vmem:[#allocation3 + $0x24] sm:$0x4]  ;;  %v2505_v35 = vsel %vm10328_vm5, %v2496_v36, %v2504_v43  ;;  %v2455_v57 = vpack.c.bf16 %v2423_v34, %v2423_v34  ;;  %v2230_v3 = vpop.f32.mrf.mxu1  ;;  %v2506_v13 = vrot.slane %v2504_v43, 4  ;;  %v3127_v45 = vld [vmem:[#allocation3 + $0x24] sm:$0x2] }
 0x1d2   : > { %v3342_v29 = vld [vmem:[#allocation3 + $0x24] sm:$0x4]  ;;  %v8263_v50 = vrot.slane %v3009_v58, 9  ;;  %v10351_v37 = vpop.f32.mrf.mxu0  ;;  %v2316_v46 = vpop.f32.mrf.mxu3  ;;  %2848 = vst.msk [vmem:[#allocation3 + $0x28] sm:$0xf] %vm13360_vm1, %v2505_v35  ;;  %vm10375_vm1 = vmand %vm3449_vm2, %vm204_vm0  ;;  %vm13516_vm2 = vcmask 523264  }
 0x1d3   : > { %v8285_v28 = vrot.slane %v3342_v29, 10  ;;  %13503 = vst [vmem:[#allocation69_spill] sm:$0xff] %v10351_v37  ;;  %v2508_v36 = vshrl.u32 %v2455_v57, 16  ;;  %v2511_v56 = vshll.u32 %v2455_v57, 16  ;;  %v2852_v43 = vsel %vm10347_vm4, %v2506_v13, %v2851_v5  ;;  %v10362_v29 = vpop.f32.mrf.mxu2  ;;  %v2854_v35 = vld [vmem:[#allocation3 + $0x30] sm:$0xe]  ;;  %vm10388_vm0 = vmand %vm3605_vm15, %vm3606_vm12 }
 0x1d4   : > { %v3128_v48 = vsel %vm10340_vm11, %v8263_v50, %v3127_v45  ;;  %v2317_v58 = vadd.f32 %v2316_v46, %v2227_v20  ;;  %13504 = vst [vmem:[#allocation70_spill] sm:$0xff] %v10362_v29  ;;  %2269 = vmatmul.bf16.gmra.mxu1 %v10162_v27  ;;  %v2960_v57 = vld [vmem:[#allocation3 + $0x18] sm:$0xe]  ;;  %v3677_v50 = vld [vmem:[#allocation3 + $0x24] sm:$0x8]  ;;  %v2042_v5 = vadd.f32 %v9910_v60, %v10143_v16  ;;  %vm13520_vm12 = vcmask 257024  }
 0x1d5   : > { %v3461_v34 = vsel %vm10334_vm9, %v8285_v28, %v3460_v44  ;;  %3129 = vst [vmem:[#allocation3 + $0x24] sm:$0x2] %v3128_v48  ;;  %v2510_v33 = vrot.slane %v2508_v36, 6  ;;  %v2513_v0 = vrot.slane %v2511_v56, 7  ;;  %v8307_v13 = vrot.slane %v3677_v50, 11 }
 0x1d6   : > { %3462 = vst [vmem:[#allocation3 + $0x24] sm:$0x1] %v3461_v34  ;;  %v2392_v37 = vadd.f32 %v2317_v58, %v2039_v8  ;;  %v13512_v58 = vmov 0 }
 0x1d7   : > { %2853 = vst [vmem:[#allocation3 + $0x2c] sm:$0x3] %v2852_v43  ;;  %v2514_v45 = vor.u32 %v2513_v0, %v2510_v33  ;;  %8254 = vmatmul.msk.bf16.gmra.mxu3 %vm13361_vm10, %v9942_v51  ;;  %v13506_v51 = vmov 0  ;;  %vm10383_vm10 = vmand %vm3116_vm3, %vm2842_vm13  ;;  %v13513_v58 = vsel %vm10388_vm0, 4294967295, %v13512_v58  ;;  %v3617_v0 = vld [vmem:[#allocation3 + $0x2c] sm:$0x4] }
 0x1d8   : > { %v2424_v44 = vmax.f32 %v2392_v37, 0.0  ;;  %v13507_v51 = vsel %vm10375_vm1, 4294967295, %v13506_v51  ;;  %v13509_v37 = vmov 0  ;;  %13514 = vst [vmem:[#allocation74_spill] sm:$0xff] %v13513_v58  ;;  %vm3961_vm13 = vsmask.f32 7946 }
 0x1d9   : > { %v2855_v46 = vsel %vm10313_vm14, %v2514_v45, %v2854_v35  ;;  %v2961_v27 = vsel %vm10313_vm14, %v2514_v45, %v2960_v57  ;;  %v2232_v48 = vpop.f32.mrf.mxu1  ;;  %13508 = vst [vmem:[#allocation72_spill] sm:$0xff] %v13507_v51  ;;  %v13510_v37 = vsel %vm10383_vm10, 4294967295, %v13509_v37  ;;  %vm10424_vm3 = vmand %vm3605_vm15, %vm3961_vm13 }
 0x1da   : > { %2856 = vst [vmem:[#allocation3 + $0x30] sm:$0xe] %v2855_v46  ;;  %v2456_v56 = vpack.c.bf16 %v2424_v44, %v2424_v44  ;;  %v10371_v20 = vpop.f32.mrf.mxu0  ;;  %v2319_v8 = vpop.f32.mrf.mxu3  ;;  %vm13521_vm15 = vmmov %vm13520_vm12 }
 0x1db   : > { %13505 = vst [vmem:[#allocation71_spill] sm:$0xff] %v10371_v20  ;;  %v2320_v28 = vadd.f32 %v2319_v8, %v2230_v3  ;;  %v10394_v35 = vpop.f32.mrf.mxu2  ;;  %vm13522_vm13 = vmmov %vm13516_vm2 }
 0x1dc   : > { %2962 = vst [vmem:[#allocation3 + $0x18] sm:$0xe] %v2961_v27  ;;  %v2517_v36 = vshrl.u32 %v2456_v56, 16  ;;  %v2520_v34 = vshll.u32 %v2456_v56, 16  ;;  %v3463_v56 = vld [vmem:[#allocation3 + $0x30] sm:$0x1] }
 0x1dd   : > { %13511 = vst [vmem:[#allocation73_spill] sm:$0xff] %v13510_v37  ;;  %v3794_v43 = vld [vmem:[#allocation3 + $0x24] sm:$0x1]  ;;  %v2393_v33 = vadd.f32 %v2320_v28, %v2042_v5  ;;  %v2515_v28 = vrot.slane %v2514_v45, 4 }
 0x1de   : > { %v3795_v60 = vsel %vm10375_vm1, %v8307_v13, %v3794_v43  ;;  %v3187_v16 = vld [vmem:[#allocation3 + $0x2c] sm:$0x1]  ;;  %13515 = vst [vmem:[#allocation75_spill] sm:$0xff] %v10394_v35  ;;  %v2519_v50 = vrot.slane %v2517_v36, 6  ;;  %v2522_v46 = vrot.slane %v2520_v34, 7 }
 0x1df   : > { %v3520_v3 = vld [vmem:[#allocation3 + $0x2c] sm:$0x1]  ;;  %3796 = vst [vmem:[#allocation3 + $0x24] sm:$0x1] %v3795_v60  ;;  %v3231_v57 = vrot.slane %v3187_v16, 7  ;;  %v2425_v8 = vmax.f32 %v2393_v33, 0.0 }
 0x1e0   : > { %v3564_v44 = vrot.slane %v3520_v3, 6  ;;  %v3282_v27 = vld [vmem:[#allocation3 + $0x2c] sm:$0x2]  ;;  %v2523_v20 = vor.u32 %v2522_v46, %v2519_v50  ;;  %v3457_v36 = vld [vmem:[#allocation3 + $0x18] sm:$0x1] }
 0x1e1   : > { %v3283_v29 = vsel %vm10383_vm10, %v3231_v57, %v3282_v27  ;;  %v3010_v13 = vld [vmem:[#allocation3 + $0x30] sm:$0x4]  ;;  %v2235_v40 = vpop.f32.mrf.mxu1  ;;  %v2457_v34 = vpack.c.bf16 %v2425_v8, %v2425_v8  ;;  %v3130_v57 = vld [vmem:[#allocation3 + $0x30] sm:$0x2]  ;;  %v2858_v27 = vld [vmem:[#allocation3 + $0x38] sm:$0x3] }
 0x1e2   : > { %v3618_v5 = vsel %vm10388_vm0, %v3564_v44, %v3617_v0  ;;  %v3343_v43 = vld [vmem:[#allocation3 + $0x30] sm:$0x4]  ;;  %3284 = vst [vmem:[#allocation3 + $0x2c] sm:$0x2] %v3283_v29  ;;  %v8264_v16 = vrot.slane %v3010_v13, 9  ;;  %v10400_v35 = vpop.f32.mrf.mxu0  ;;  %v2321_v33 = vpop.f32.mrf.mxu3  ;;  %v2524_v0 = vsel %vm10328_vm5, %v2515_v28, %v2523_v20  ;;  %v2525_v45 = vrot.slane %v2523_v20, 4 }
 0x1e3   : > { %v3008_v60 = vld [vmem:[#allocation3 + $0x18] sm:$0x4]  ;;  %v8286_v3 = vrot.slane %v3343_v43, 10  ;;  %3619 = vst [vmem:[#allocation3 + $0x2c] sm:$0x4] %v3618_v5  ;;  %v2322_v8 = vadd.f32 %v2321_v33, %v2232_v48  ;;  %v2044_v5 = vadd.f32 %v9946_v52, %v10153_v18  ;;  %v9207_v13 = vld [vmem:[%s13348_s2 + $0x98] sm:$0xff] }
 0x1e4   : > { %v8262_v1 = vrot.slane %v3008_v60, 9  ;;  %v3124_v44 = vld [vmem:[#allocation3 + $0x18] sm:$0x2]  ;;  %v3131_v50 = vsel %vm10340_vm11, %v8264_v16, %v3130_v57  ;;  %v3341_v29 = vld [vmem:[#allocation3 + $0x18] sm:$0x4]  ;;  %2274 = vmatmul.bf16.gmra.mxu1 %v10192_v38  ;;  %v2530_v60 = vshll.u32 %v2457_v34, 16  ;;  %v2859_v52 = vsel %vm10347_vm4, %v2525_v45, %v2858_v27  ;;  %5750 = vmatpush.bf16.msrb.mxu0 %v9207_v13 }
 0x1e5   : > { %v3464_v46 = vsel %vm10334_vm9, %v8286_v3, %v3463_v56  ;;  %3132 = vst [vmem:[#allocation3 + $0x30] sm:$0x2] %v3131_v50  ;;  %v8284_v20 = vrot.slane %v3341_v29, 10  ;;  %v3854_v43 = vld [vmem:[#allocation3 + $0x28] sm:$0x8]  ;;  %v2527_v56 = vshrl.u32 %v2457_v34, 16  ;;  %v10428_v34 = vpop.f32.mrf.mxu2 }
 0x1e6   : > { %v3125_v28 = vsel %vm10340_vm11, %v8262_v1, %v3124_v44  ;;  %3465 = vst [vmem:[#allocation3 + $0x30] sm:$0x1] %v3464_v46  ;;  %v2964_v18 = vld [vmem:[#allocation3 + $0x20] sm:$0x3]  ;;  %v2394_v1 = vadd.f32 %v2322_v8, %v2044_v5  ;;  %v13517_v48 = vmov 0  ;;  %v2532_v3 = vrot.slane %v2530_v60, 7 }
 0x1e7   : > { %3126 = vst [vmem:[#allocation3 + $0x18] sm:$0x2] %v3125_v28  ;;  %v3458_v38 = vsel %vm10334_vm9, %v8284_v20, %v3457_v36  ;;  %8255 = vmatmul.msk.bf16.gmra.mxu3 %vm13516_vm2, %v9980_v42  ;;  %v13518_v48 = vsel %vm10424_vm3, 4294967295, %v13517_v48  ;;  %v2529_v16 = vrot.slane %v2527_v56, 6  ;;  %v2861_v36 = vld [vmem:[#allocation3 + $0x3c] sm:$0xe]  ;;  %v2965_v46 = vsel %vm10347_vm4, %v2525_v45, %v2964_v18  ;;  %vm13523_vm2 = vmmov %vm13520_vm12 }
 0x1e8   : > { %13519 = vst [vmem:[#allocation76_spill] sm:$0xff] %v13518_v48  ;;  %v8329_v33 = vrot.slane %v3854_v43, 9  ;;  %v2976_v57 = vld [vmem:[#allocation3 + $0xc] sm:$0xe]  ;;  %v2426_v44 = vmax.f32 %v2394_v1, 0.0  ;;  %v2047_v5 = vadd.f32 %v9963_v21, %v10166_v53 }
 0x1e9   : > { %3459 = vst [vmem:[#allocation3 + $0x18] sm:$0x1] %v3458_v38  ;;  %v2237_v50 = vpop.f32.mrf.mxu1  ;;  %v3678_v42 = vld [vmem:[#allocation3 + $0x30] sm:$0x8]  ;;  %v2533_v27 = vor.u32 %v2532_v3, %v2529_v16  ;;  %v3676_v20 = vld [vmem:[#allocation3 + $0x18] sm:$0x8] }
 0x1ea   : > { %2857 = vst.msk [vmem:[#allocation3 + $0x34] sm:$0xf] %vm13520_vm12, %v2524_v0  ;;  %v3972_v29 = vld [vmem:[#allocation3 + $0x2c] sm:$0x4]  ;;  %v2324_v8 = vpop.f32.mrf.mxu3  ;;  %v2458_v13 = vpack.c.bf16 %v2426_v44, %v2426_v44  ;;  %v10442_v60 = vpop.f32.mrf.mxu0  ;;  %v8308_v38 = vrot.slane %v3678_v42, 11  ;;  %v8306_v18 = vrot.slane %v3676_v20, 11  ;;  %vm13524_vm12 = vmmov %vm13523_vm2 }
 0x1eb   : > { %2860 = vst [vmem:[#allocation3 + $0x38] sm:$0x3] %v2859_v52  ;;  %v3973_v28 = vsel %vm10424_vm3, %v8329_v33, %v3972_v29  ;;  %v2325_v43 = vadd.f32 %v2324_v8, %v2235_v40  ;;  %v2862_v56 = vsel %vm10313_vm14, %v2533_v27, %v2861_v36  ;;  %v2977_v45 = vsel %vm10313_vm14, %v2533_v27, %v2976_v57 }
 0x1ec   : > { %2963 = vst.msk [vmem:[#allocation3 + $0x1c] sm:$0xf] %vm13521_vm15, %v2524_v0  ;;  %v2536_v21 = vshrl.u32 %v2458_v13, 16  ;;  %v2539_v53 = vshll.u32 %v2458_v13, 16  ;;  %v2534_v44 = vrot.slane %v2533_v27, 4  ;;  %vm13525_vm15 = vmmov %vm13522_vm13 }
 0x1ed   : > { %3974 = vst [vmem:[#allocation3 + $0x2c] sm:$0x4] %v3973_v28  ;;  %v2395_v52 = vadd.f32 %v2325_v43, %v2047_v5  ;;  %v3797_v1 = vld [vmem:[#allocation3 + $0x30] sm:$0x1]  ;;  %v3620_v28 = vld [vmem:[#allocation3 + $0x38] sm:$0x4]  ;;  %v10454_v13 = vpop.f32.mrf.mxu2 }
 0x1ee   : > { %2966 = vst [vmem:[#allocation3 + $0x20] sm:$0x3] %v2965_v46  ;;  %v3798_v40 = vsel %vm10375_vm1, %v8308_v38, %v3797_v1  ;;  %v2538_v16 = vrot.slane %v2536_v21, 6  ;;  %v2541_v3 = vrot.slane %v2539_v53, 7  ;;  %v1799_v46 = vadd.f32 %v9977_v14, %v10186_v54  ;;  %v3614_v38 = vld [vmem:[#allocation3 + $0x20] sm:$0x4] }
 0x1ef   : > { %2863 = vst [vmem:[#allocation3 + $0x3c] sm:$0xe] %v2862_v56  ;;  %v2427_v33 = vmax.f32 %v2395_v52, 0.0 }
 0x1f0   : > { %v3791_v0 = vld [vmem:[#allocation3 + $0x18] sm:$0x1]  ;;  %2978 = vst [vmem:[#allocation3 + $0xc] sm:$0xe] %v2977_v45  ;;  %v10448_v29 = vor.u32 %v2541_v3, %v2538_v16  ;;  %v2049_v16 = vadd.f32 %v9982_v2, %v10176_v63  ;;  %v1963_v3 = vadd.f32 %v10182_v23, %v1799_v46 }
 0x1f1   : > { %v3792_v36 = vsel %vm10375_vm1, %v8306_v18, %v3791_v0  ;;  %3799 = vst [vmem:[#allocation3 + $0x30] sm:$0x1] %v3798_v40  ;;  %v10450_v42 = vpop.f32.mrf.mxu1  ;;  %v2459_v20 = vpack.c.bf16 %v2427_v33, %v2427_v33 }
 0x1f2   : > { %3793 = vst [vmem:[#allocation3 + $0x18] sm:$0x1] %v3792_v36  ;;  %v3188_v57 = vld [vmem:[#allocation3 + $0x38] sm:$0x1]  ;;  %v2326_v43 = vpop.f32.mrf.mxu3  ;;  %v3285_v56 = vld [vmem:[#allocation3 + $0x38] sm:$0x2]  ;;  %v10459_v27 = vsel %vm10328_vm5, %v2534_v44, %v10448_v29 }
 0x1f3   : > { %v3232_v8 = vrot.slane %v3188_v57, 7  ;;  %v3521_v5 = vld [vmem:[#allocation3 + $0x38] sm:$0x1]  ;;  %v2327_v52 = vadd.f32 %v2326_v43, %v2237_v50  ;;  %v3454_v57 = vld [vmem:[#allocation3 + $0xc] sm:$0x1]  ;;  %v2546_v50 = vshrl.u32 %v2459_v20, 16 }
 0x1f4   : > { %v3565_v45 = vrot.slane %v3521_v5, 6  ;;  %2279 = vmatmul.bf16.gmra.mxu1 %v10220_v26  ;;  %v3466_v44 = vld [vmem:[#allocation3 + $0x3c] sm:$0x1]  ;;  %v2549_v63 = vshll.u32 %v2459_v20, 16  ;;  %v3853_v20 = vld [vmem:[#allocation3 + $0x1c] sm:$0x8] }
 0x1f5   : > { %v3186_v21 = vld [vmem:[#allocation3 + $0x20] sm:$0x1]  ;;  %v3279_v53 = vld [vmem:[#allocation3 + $0x20] sm:$0x2]  ;;  %v3286_v14 = vsel %vm10383_vm10, %v3232_v8, %v3285_v56  ;;  %v10469_v8 = vpop.f32.mrf.mxu0  ;;  %2864 = vst.msk [vmem:[#allocation3 + $0x40] sm:$0xf] %vm13523_vm2, %v10459_v27 }
 0x1f6   : > { %v3519_v54 = vld [vmem:[#allocation3 + $0x20] sm:$0x1]  ;;  %v3230_v18 = vrot.slane %v3186_v21, 7  ;;  %3287 = vst [vmem:[#allocation3 + $0x38] sm:$0x2] %v3286_v14  ;;  %v3621_v0 = vsel %vm10388_vm0, %v3565_v45, %v3620_v28  ;;  %v2396_v14 = vadd.f32 %v2327_v52, %v2049_v16 }
 0x1f7   : > { %v3563_v1 = vrot.slane %v3519_v54, 6  ;;  %v3011_v40 = vld [vmem:[#allocation3 + $0x3c] sm:$0x4]  ;;  %3622 = vst [vmem:[#allocation3 + $0x38] sm:$0x4] %v3621_v0  ;;  %8256 = vmatmul.msk.bf16.gmra.mxu3 %vm13522_vm13, %v10016_v59  ;;  %v9213_v59 = vld [vmem:[%s13348_s2 + $0xc8] sm:$0xff]  ;;  %v2052_v0 = vadd.f32 %v10001_v11, %v1963_v3  ;;  %vm13526_vm13 = vmmov %vm13523_vm2 }
 0x1f8   : > { %v3007_v36 = vld [vmem:[#allocation3 + $0xc] sm:$0x4]  ;;  %v8265_v33 = vrot.slane %v3011_v40, 9  ;;  %v3280_v26 = vsel %vm10383_vm10, %v3230_v18, %v3279_v53  ;;  %v3855_v28 = vld [vmem:[#allocation3 + $0x34] sm:$0x8]  ;;  %v2544_v18 = vrot.slane %v10448_v29, 4  ;;  %5841 = vmatpush.bf16.msrb.mxu2 %v9213_v59 }
 0x1f9   : > { %v3615_v5 = vsel %vm10388_vm0, %v3563_v1, %v3614_v38  ;;  %v8261_v43 = vrot.slane %v3007_v36, 9  ;;  %v3121_v56 = vld [vmem:[#allocation3 + $0xc] sm:$0x2]  ;;  %v3133_v2 = vld [vmem:[#allocation3 + $0x3c] sm:$0x2]  ;;  %v2548_v36 = vrot.slane %v2546_v50, 6 }
 0x1fa   : > { %3281 = vst [vmem:[#allocation3 + $0x20] sm:$0x2] %v3280_v26  ;;  %v3134_v23 = vsel %vm10340_vm11, %v8265_v33, %v3133_v2  ;;  %v3340_v46 = vld [vmem:[#allocation3 + $0xc] sm:$0x4]  ;;  %v3344_v45 = vld [vmem:[#allocation3 + $0x3c] sm:$0x4]  ;;  %v2329_v1 = vpop.f32.mrf.mxu3  ;;  %v10490_v33 = vpop.f32.mrf.mxu1 }
 0x1fb   : > { %v2865_v21 = vld [vmem:[#allocation3 + $0x44] sm:$0x3]  ;;  %3616 = vst [vmem:[#allocation3 + $0x20] sm:$0x4] %v3615_v5  ;;  %v3122_v38 = vsel %vm10340_vm11, %v8261_v43, %v3121_v56  ;;  %v8283_v53 = vrot.slane %v3340_v46, 10  ;;  %v8287_v54 = vrot.slane %v3344_v45, 10  ;;  %v10492_v43 = vpop.f32.mrf.mxu2  ;;  %v2330_v11 = vadd.f32 %v2329_v1, %v10450_v42 }
 0x1fc   : > { %3123 = vst [vmem:[#allocation3 + $0xc] sm:$0x2] %v3122_v38  ;;  %v2980_v16 = vld [vmem:[#allocation3 + $0x14] sm:$0x3]  ;;  %v8330_v29 = vrot.slane %v3855_v28, 9  ;;  %v2551_v26 = vrot.slane %v2549_v63, 7  ;;  %v1801_v42 = vadd.f32 %v9997_v62, %v10205_v15 }
 0x1fd   : > { %3135 = vst [vmem:[#allocation3 + $0x3c] sm:$0x2] %v3134_v23  ;;  %v3455_v52 = vsel %vm10334_vm9, %v8283_v53, %v3454_v57  ;;  %v3467_v40 = vsel %vm10334_vm9, %v8287_v54, %v3466_v44  ;;  %v2428_v5 = vmax.f32 %v2396_v14, 0.0  ;;  %v8328_v3 = vrot.slane %v3853_v20, 9  ;;  %v2868_v28 = vld [vmem:[#allocation3 + $0x48] sm:$0xe]  ;;  %v10505_v38 = vpop.f32.mrf.mxu0 }
 0x1fe   : > { %3456 = vst [vmem:[#allocation3 + $0xc] sm:$0x1] %v3455_v52  ;;  %v3975_v56 = vld [vmem:[#allocation3 + $0x38] sm:$0x4]  ;;  %v2866_v57 = vsel %vm10347_vm4, %v2544_v18, %v2865_v21  ;;  %v2552_v50 = vor.u32 %v2551_v26, %v2548_v36  ;;  %v2397_v63 = vadd.f32 %v2330_v11, %v2052_v0  ;;  %v3675_v23 = vld [vmem:[#allocation3 + $0xc] sm:$0x8]  ;;  %v2981_v21 = vsel %vm10347_vm4, %v2544_v18, %v2980_v16 }
 0x1ff   : > { %3468 = vst [vmem:[#allocation3 + $0x3c] sm:$0x1] %v3467_v40  ;;  %v3976_v44 = vsel %vm10424_vm3, %v8330_v29, %v3975_v56  ;;  %v2460_v2 = vpack.c.bf16 %v2428_v5, %v2428_v5  ;;  %v3679_v46 = vld [vmem:[#allocation3 + $0x3c] sm:$0x8]  ;;  %v8305_v62 = vrot.slane %v3675_v23, 11  ;;  %v1965_v36 = vadd.f32 %v10201_v17, %v1801_v42 }
 0x200   : > { %3977 = vst [vmem:[#allocation3 + $0x38] sm:$0x4] %v3976_v44  ;;  %v2869_v54 = vsel %vm10313_vm14, %v2552_v50, %v2868_v28  ;;  %v2429_v59 = vmax.f32 %v2397_v63, 0.0  ;;  %v2991_v15 = vld [vmem:[#allocation3] sm:$0xe]  ;;  %v8309_v18 = vrot.slane %v3679_v46, 11 }
 0x201   : > { %2867 = vst [vmem:[#allocation3 + $0x44] sm:$0x3] %v2866_v57  ;;  %v2555_v14 = vshrl.u32 %v2460_v2, 16  ;;  %v2558_v20 = vshll.u32 %v2460_v2, 16  ;;  %v2553_v11 = vrot.slane %v2552_v50, 4 }
 0x202   : > { %v3969_v45 = vld [vmem:[#allocation3 + $0x20] sm:$0x4]  ;;  %2979 = vst.msk [vmem:[#allocation3 + $0x10] sm:$0xf] %vm13524_vm12, %v10459_v27  ;;  %v2331_v0 = vpop.f32.mrf.mxu3  ;;  %v2461_v16 = vpack.c.bf16 %v2429_v59, %v2429_v59  ;;  %v1804_v27 = vadd.f32 %v10013_v7, %v10214_v6  ;;  %v2245_v17 = vpop.f32.mrf.mxu1  ;;  %v3623_v2 = vld [vmem:[#allocation3 + $0x44] sm:$0x4]  ;;  %vm13531_vm12 = vmmov %vm13525_vm15 }
 0x203   : > { %v3970_v53 = vsel %vm10424_vm3, %v8328_v3, %v3969_v45  ;;  %v2557_v1 = vrot.slane %v2555_v14, 6  ;;  %2982 = vst [vmem:[#allocation3 + $0x14] sm:$0x3] %v2981_v21  ;;  %v2560_v40 = vrot.slane %v2558_v20, 7  ;;  %v2992_v3 = vsel %vm10313_vm14, %v2552_v50, %v2991_v15  ;;  %v10525_v57 = vpop.f32.mrf.mxu2  ;;  %v3611_v23 = vld [vmem:[#allocation3 + $0x14] sm:$0x4] }
 0x204   : > { %3971 = vst [vmem:[#allocation3 + $0x20] sm:$0x4] %v3970_v53  ;;  %2284 = vmatmul.bf16.gmra.mxu1 %v10245_v4  ;;  %v2565_v7 = vshrl.u32 %v2461_v16, 16  ;;  %v2568_v6 = vshll.u32 %v2461_v16, 16  ;;  %v2872_v46 = vld [vmem:[#allocation3 + $0x50] sm:$0x3]  ;;  %v2332_v42 = vadd.f32 %v2331_v0, %v10490_v33  ;;  %v2054_v45 = vadd.f32 %v10019_v9, %v1965_v36 }
 0x205   : > { %v3788_v52 = vld [vmem:[#allocation3 + $0xc] sm:$0x1]  ;;  %2870 = vst [vmem:[#allocation3 + $0x48] sm:$0xe] %v2869_v54  ;;  %v10523_v56 = vor.u32 %v2560_v40, %v2557_v1  ;;  %v1968_v21 = vadd.f32 %v10210_v25, %v1804_v27  ;;  %v10544_v15 = vpop.f32.mrf.mxu0  ;;  %v9206_v36 = vld [vmem:[%s13348_s2 + $0x90] sm:$0xff] }
 0x206   : > { %v3789_v29 = vsel %vm10375_vm1, %v8305_v62, %v3788_v52  ;;  %v3800_v26 = vld [vmem:[#allocation3 + $0x3c] sm:$0x1]  ;;  %2993 = vst [vmem:[#allocation3] sm:$0xe] %v2992_v3  ;;  %v2567_v62 = vrot.slane %v2565_v7, 6  ;;  %v2570_v33 = vrot.slane %v2568_v6, 7  ;;  %v2398_v27 = vadd.f32 %v2332_v42, %v2054_v45  ;;  %5751 = vmatpush.bf16.msrb.mxu0 %v9206_v36 }
 0x207   : > { %3790 = vst [vmem:[#allocation3 + $0xc] sm:$0x1] %v3789_v29  ;;  %v3801_v5 = vsel %vm10375_vm1, %v8309_v18, %v3800_v26  ;;  %v10530_v4 = vsel %vm10328_vm5, %v2553_v11, %v10523_v56  ;;  %8257 = vmatmul.msk.bf16.gmra.mxu3 %vm13525_vm15, %v10047_v61  ;;  %v2563_v53 = vrot.slane %v10523_v56, 4  ;;  %v3469_v18 = vld [vmem:[#allocation3 + $0x48] sm:$0x1]  ;;  %v2057_v26 = vadd.f32 %v10036_v24, %v1968_v21  ;;  %v10589_v56 = vld [vmem:[#allocation3 + $0x18] sm:$0xff]  ;;  %vm13543_vm15 = vmmov %vm13523_vm2 }
 0x208   : > { %3802 = vst [vmem:[#allocation3 + $0x3c] sm:$0x1] %v3801_v5  ;;  %v3189_v44 = vld [vmem:[#allocation3 + $0x44] sm:$0x1]  ;;  %v3288_v14 = vld [vmem:[#allocation3 + $0x44] sm:$0x2] }
 0x209   : > { %v3522_v28 = vld [vmem:[#allocation3 + $0x44] sm:$0x1]  ;;  %v3233_v50 = vrot.slane %v3189_v44, 7  ;;  %2871 = vst.msk [vmem:[#allocation3 + $0x4c] sm:$0xf] %vm13526_vm13, %v10530_v4  ;;  %v2873_v52 = vsel %vm10347_vm4, %v2563_v53, %v2872_v46  ;;  %vm13366_vm13 = vcmask 1044480  }
 0x20a   : > { %v3566_v63 = vrot.slane %v3522_v28, 6  ;;  %v3185_v54 = vld [vmem:[#allocation3 + $0x14] sm:$0x1]  ;;  %v2334_v9 = vpop.f32.mrf.mxu3  ;;  %v3276_v40 = vld [vmem:[#allocation3 + $0x14] sm:$0x2] }
 0x20b   : > { %v3289_v61 = vsel %vm10383_vm10, %v3233_v50, %v3288_v14  ;;  %v3518_v20 = vld [vmem:[#allocation3 + $0x14] sm:$0x1]  ;;  %v3229_v25 = vrot.slane %v3185_v54, 7  ;;  %v2335_v29 = vadd.f32 %v2334_v9, %v2245_v17  ;;  %v3856_v3 = vld [vmem:[#allocation3 + $0x40] sm:$0x8]  ;;  %v10564_v54 = vor.u32 %v2570_v33, %v2567_v62 }
 0x20c   : > { %v3624_v59 = vsel %vm10388_vm0, %v3566_v63, %v3623_v2  ;;  %3290 = vst [vmem:[#allocation3 + $0x44] sm:$0x2] %v3289_v61  ;;  %v3562_v1 = vrot.slane %v3518_v20, 6  ;;  %v3012_v0 = vld [vmem:[#allocation3 + $0x48] sm:$0x4]  ;;  %v2430_v61 = vmax.f32 %v2398_v27, 0.0  ;;  %v10566_v20 = vpop.f32.mrf.mxu2 }
 0x20d   : > { %3625 = vst [vmem:[#allocation3 + $0x44] sm:$0x4] %v3624_v59  ;;  %v8266_v16 = vrot.slane %v3012_v0, 9  ;;  %v3277_v5 = vsel %vm10383_vm10, %v3229_v25, %v3276_v40  ;;  %v3136_v7 = vld [vmem:[#allocation3 + $0x48] sm:$0x2]  ;;  %v2399_v42 = vadd.f32 %v2335_v29, %v2057_v26  ;;  %v13527_v59 = vld [vmem:[#allocation9_spill] sm:$0xff] }
 0x20e   : > { %v3612_v11 = vsel %vm10388_vm0, %v3562_v1, %v3611_v23  ;;  %v3345_v6 = vld [vmem:[#allocation3 + $0x48] sm:$0x4]  ;;  %2874 = vst [vmem:[#allocation3 + $0x50] sm:$0x3] %v2873_v52  ;;  %v3852_v44 = vld [vmem:[#allocation3 + $0x10] sm:$0x8]  ;;  %v2247_v23 = vpop.f32.mrf.mxu1  ;;  %v1806_v9 = vadd.f32 %v13527_v59, %v10230_v19  ;;  %v2462_v62 = vpack.c.bf16 %v2430_v61, %v2430_v61 }
 0x20f   : > { %3278 = vst [vmem:[#allocation3 + $0x14] sm:$0x2] %v3277_v5  ;;  %v3137_v28 = vsel %vm10340_vm11, %v8266_v16, %v3136_v7  ;;  %v8288_v2 = vrot.slane %v3345_v6, 10  ;;  %v3451_v50 = vld [vmem:[#allocation3] sm:$0x1]  ;;  %v2431_v0 = vmax.f32 %v2399_v42, 0.0  ;;  %v10586_v7 = vpop.f32.mrf.mxu0  ;;  %v1809_v6 = vadd.f32 %v10044_v47, %v10239_v39 }
 0x210   : > { %v2995_v17 = vld [vmem:[#allocation3 + $0x8] sm:$0x3]  ;;  %3613 = vst [vmem:[#allocation3 + $0x14] sm:$0x4] %v3612_v11  ;;  %v3006_v24 = vld [vmem:[#allocation3] sm:$0x4] }
 0x211   : > { %v10560_v63 = vld [vmem:[#allocation3 + $0x48] sm:$0x8]  ;;  %v2875_v46 = vld [vmem:[#allocation3 + $0x54] sm:$0xe]  ;;  %v8260_v45 = vrot.slane %v3006_v24, 9  ;;  %v3470_v14 = vsel %vm10334_vm9, %v8288_v2, %v3469_v18  ;;  %v8327_v52 = vrot.slane %v3852_v44, 9  ;;  %v2996_v27 = vsel %vm10347_vm4, %v2563_v53, %v2995_v17 }
 0x212   : > { %3138 = vst [vmem:[#allocation3 + $0x48] sm:$0x2] %v3137_v28  ;;  %v3339_v21 = vld [vmem:[#allocation3] sm:$0x4]  ;;  %v3118_v25 = vld [vmem:[#allocation3] sm:$0x2]  ;;  %v2336_v33 = vpop.f32.mrf.mxu3  ;;  %v2463_v26 = vpack.c.bf16 %v2431_v0, %v2431_v0  ;;  %v1970_v53 = vadd.f32 %v10226_v10, %v1806_v9 }
 0x213   : > { %v8282_v1 = vrot.slane %v3339_v21, 10  ;;  %3471 = vst [vmem:[#allocation3 + $0x48] sm:$0x1] %v3470_v14  ;;  %v8331_v40 = vrot.slane %v3856_v3, 9  ;;  %v3119_v16 = vsel %vm10340_vm11, %v8260_v45, %v3118_v25  ;;  %v8310_v19 = vrot.slane %v10560_v63, 11  ;;  %v13528_v17 = vld [vmem:[#allocation49_spill] sm:$0xff] }
 0x214   : > { %2994 = vst.msk [vmem:[#allocation3 + $0x4] sm:$0xf] %vm13523_vm2, %v10530_v4  ;;  %v3978_v18 = vld [vmem:[#allocation3 + $0x44] sm:$0x4]  ;;  %v3626_v29 = vld [vmem:[#allocation3 + $0x50] sm:$0x4]  ;;  %v2876_v3 = vsel %vm10313_vm14, %v10564_v54, %v2875_v46  ;;  %2289 = vmatmul.bf16.gmra.mxu1 %v10276_v12  ;;  %v2337_v0 = vadd.f32 %v2336_v33, %v2247_v23 }
 0x215   : > { %3120 = vst [vmem:[#allocation3] sm:$0x2] %v3119_v16  ;;  %v3452_v36 = vsel %vm10334_vm9, %v8282_v1, %v3451_v50  ;;  %v3979_v5 = vsel %vm10424_vm3, %v8331_v40, %v3978_v18  ;;  %v3190_v4 = vld [vmem:[#allocation3 + $0x50] sm:$0x1]  ;;  %v3291_v11 = vld [vmem:[#allocation3 + $0x50] sm:$0x2]  ;;  %v1811_v50 = vadd.f32 %v10060_v32, %v10261_v41 }
 0x216   : > { %3453 = vst [vmem:[#allocation3] sm:$0x1] %v3452_v36  ;;  %v3234_v44 = vrot.slane %v3190_v4, 7  ;;  %v3523_v28 = vld [vmem:[#allocation3 + $0x50] sm:$0x1]  ;;  %v2574_v2 = vshrl.u32 %v2462_v62, 16  ;;  %v10610_v36 = vpop.f32.mrf.mxu2 }
 0x217   : > { %3980 = vst [vmem:[#allocation3 + $0x44] sm:$0x4] %v3979_v5  ;;  %v13529_v24 = vld [vmem:[#allocation12_spill] sm:$0xff]  ;;  %v3966_v46 = vld [vmem:[#allocation3 + $0x14] sm:$0x4]  ;;  %v3567_v12 = vrot.slane %v3523_v28, 6 }
 0x218   : > { %v1814_v63 = vadd.f32 %v13529_v24, %v13528_v17  ;;  %2997 = vst [vmem:[#allocation3 + $0x8] sm:$0x3] %v2996_v27  ;;  %v2577_v42 = vshll.u32 %v2462_v62, 16  ;;  %v3967_v10 = vsel %vm10424_vm3, %v8327_v52, %v3966_v46  ;;  %v3674_v45 = vld [vmem:[#allocation3] sm:$0x8]  ;;  %v3292_v47 = vsel %vm10383_vm10, %v3234_v44, %v3291_v11  ;;  %v13530_v14 = vld [vmem:[#allocation13_spill] sm:$0xff]  ;;  %v2250_v52 = vpop.f32.mrf.mxu1 }
 0x219   : > { %2877 = vst [vmem:[#allocation3 + $0x54] sm:$0xe] %v2876_v3  ;;  %v2576_v39 = vrot.slane %v2574_v2, 6  ;;  %v2584_v21 = vshrl.u32 %v2463_v26, 16  ;;  %8258 = vmatmul.msk.bf16.gmra.mxu3 %vm13531_vm12, %v13530_v14  ;;  %v3627_v41 = vsel %vm10388_vm0, %v3567_v12, %v3626_v29  ;;  %v2587_v59 = vshll.u32 %v2463_v26, 16  ;;  %v13532_v9 = vld [vmem:[#allocation10_spill] sm:$0xff]  ;;  %vm13549_vm12 = vmmov %vm13543_vm15 }
 0x21a   : > { %3968 = vst [vmem:[#allocation3 + $0x14] sm:$0x4] %v3967_v10  ;;  %v3803_v32 = vld [vmem:[#allocation3 + $0x48] sm:$0x1]  ;;  %v2579_v61 = vrot.slane %v2577_v42, 7  ;;  %v2059_v25 = vadd.f32 %v13532_v9, %v1970_v53  ;;  %v13533_v40 = vld [vmem:[#allocation41_spill] sm:$0xff]  ;;  %v2339_v27 = vpop.f32.mrf.mxu3 }
 0x21b   : > { %v3804_v1 = vsel %vm10375_vm1, %v8310_v19, %v3803_v32  ;;  %3293 = vst [vmem:[#allocation3 + $0x50] sm:$0x2] %v3292_v47  ;;  %v1973_v16 = vadd.f32 %v13533_v40, %v1809_v6  ;;  %v8304_v62 = vrot.slane %v3674_v45, 11  ;;  %v10613_v29 = vshrl.u32 %v10589_v56, 16  ;;  %v13535_v26 = vld [vmem:[#allocation44_spill] sm:$0xff]  ;;  %v13536_v4 = vld [vmem:[#allocation47_spill] sm:$0xff] }
 0x21c   : > { %3805 = vst [vmem:[#allocation3 + $0x48] sm:$0x1] %v3804_v1  ;;  %v2580_v18 = vor.u32 %v2579_v61, %v2576_v39  ;;  %v1975_v5 = vadd.f32 %v13535_v26, %v1811_v50  ;;  %v1978_v11 = vadd.f32 %v13536_v4, %v1814_v63  ;;  %v2572_v23 = vrot.slane %v10564_v54, 4  ;;  %v3608_v53 = vld [vmem:[#allocation3 + $0x8] sm:$0x4]  ;;  %v10625_v54 = vld [vmem:[#allocation3 + $0xc] sm:$0xff] }
 0x21d   : > { %13534 = vst [vmem:[#allocation9_spill] sm:$0xff] %v10610_v36  ;;  %v3785_v3 = vld [vmem:[#allocation3] sm:$0x1]  ;;  %v10619_v33 = vshll.u32 %v10589_v56, 16  ;;  %v3857_v6 = vld [vmem:[#allocation3 + $0x4c] sm:$0x8]  ;;  %v2340_v2 = vadd.f32 %v2339_v27, %v2250_v52  ;;  %v2400_v46 = vadd.f32 %v2337_v0, %v2059_v25 }
 0x21e   : > { %3628 = vst [vmem:[#allocation3 + $0x50] sm:$0x4] %v3627_v41  ;;  %v3786_v19 = vsel %vm10375_vm1, %v8304_v62, %v3785_v3  ;;  %v2586_v44 = vrot.slane %v2584_v21, 6  ;;  %v2589_v28 = vrot.slane %v2587_v59, 7  ;;  %v3472_v50 = vld [vmem:[#allocation3 + $0x54] sm:$0x1]  ;;  %v2581_v24 = vsel %vm10328_vm5, %v2572_v23, %v2580_v18  ;;  %v10630_v41 = vpop.f32.mrf.mxu0 }
 0x21f   : > { %3787 = vst [vmem:[#allocation3] sm:$0x1] %v3786_v19  ;;  %v3184_v17 = vld [vmem:[#allocation3 + $0x8] sm:$0x1]  ;;  %v2879_v63 = vld [vmem:[#allocation3 + $0x5c] sm:$0x3] }
 0x220   : > { %v13537_v12 = vld [vmem:[#allocation11_spill] sm:$0xff]  ;;  %v13538_v10 = vld [vmem:[#allocation53_spill] sm:$0xff]  ;;  %v3228_v39 = vrot.slane %v3184_v17, 7  ;;  %v3517_v14 = vld [vmem:[#allocation3 + $0x8] sm:$0x1]  ;;  %v2582_v32 = vrot.slane %v2580_v18, 4  ;;  %v10641_v18 = vor.u32 %v2589_v28, %v2586_v44 }
 0x221   : > { %v2062_v42 = vadd.f32 %v13537_v12, %v1973_v16  ;;  %v13539_v45 = vld [vmem:[#allocation15_spill] sm:$0xff]  ;;  %v3013_v21 = vld [vmem:[#allocation3 + $0x54] sm:$0x4]  ;;  %13540 = vst [vmem:[#allocation49_spill] sm:$0xff] %v10630_v41  ;;  %v13541_v61 = vld [vmem:[#allocation14_spill] sm:$0xff]  ;;  %v3561_v0 = vrot.slane %v3517_v14, 6 }
 0x222   : > { %v1816_v47 = vadd.f32 %v13539_v45, %v13538_v10  ;;  %v10633_v59 = vadd.f32 %v13541_v61, %v1975_v5  ;;  %v13542_v9 = vld [vmem:[#allocation16_spill] sm:$0xff]  ;;  %v8267_v52 = vrot.slane %v3013_v21, 9  ;;  %v3346_v40 = vld [vmem:[#allocation3 + $0x54] sm:$0x4]  ;;  %v3139_v62 = vld [vmem:[#allocation3 + $0x54] sm:$0x2]  ;;  %v2880_v12 = vsel %vm10347_vm4, %v2582_v32, %v2879_v63  ;;  %v10669_v63 = vpop.f32.mrf.mxu2 }
 0x223   : > { %v10636_v1 = vadd.f32 %v13542_v9, %v1978_v11  ;;  %v3273_v25 = vld [vmem:[#allocation3 + $0x8] sm:$0x2]  ;;  %v8289_v27 = vrot.slane %v3346_v40, 10  ;;  %2878 = vst.msk [vmem:[#allocation3 + $0x58] sm:$0xf] %vm13543_vm15, %v2581_v24  ;;  %v2401_v5 = vadd.f32 %v2340_v2, %v2062_v42  ;;  %v3609_v4 = vsel %vm10388_vm0, %v3561_v0, %v3608_v53  ;;  %v13544_v24 = vld [vmem:[#allocation51_spill] sm:$0xff] }
 0x224   : > { %v3274_v16 = vsel %vm10383_vm10, %v3228_v39, %v3273_v25  ;;  %v9212_v26 = vld [vmem:[%s13348_s2 + $0xc0] sm:$0xff]  ;;  %v3851_v11 = vld [vmem:[#allocation3 + $0x4] sm:$0x8]  ;;  %v8332_v3 = vrot.slane %v3857_v6, 9  ;;  %v3140_v23 = vsel %vm10340_vm11, %v8267_v52, %v3139_v62  ;;  %v2882_v19 = vld [vmem:[#allocation3 + $0x60] sm:$0xe]  ;;  %v10651_v44 = vadd.f32 %v13544_v24, %v1816_v47 }
 0x225   : > { %3275 = vst [vmem:[#allocation3 + $0x8] sm:$0x2] %v3274_v16  ;;  %v2432_v17 = vmax.f32 %v2400_v46, 0.0  ;;  %v3981_v28 = vld [vmem:[#allocation3 + $0x50] sm:$0x4]  ;;  %v3473_v2 = vsel %vm10334_vm9, %v8289_v27, %v3472_v50  ;;  %5842 = vmatpush.bf16.msrb.mxu2 %v9212_v26  ;;  %v10660_v45 = vshrl.u32 %v10625_v54, 16  ;;  %v2883_v50 = vsel %vm10313_vm14, %v10641_v18, %v2882_v19 }
 0x226   : > { %3610 = vst [vmem:[#allocation3 + $0x8] sm:$0x4] %v3609_v4  ;;  %v4034_v53 = vld [vmem:[#allocation3 + $0x14] sm:$0x7]  ;;  %v3982_v6 = vsel %vm10424_vm3, %v8332_v3, %v3981_v28  ;;  %v3681_v42 = vld [vmem:[#allocation3 + $0x54] sm:$0x8] }
 0x227   : > { %3141 = vst [vmem:[#allocation3 + $0x54] sm:$0x2] %v3140_v23  ;;  %v2464_v46 = vpack.c.bf16 %v2432_v17, %v2432_v17  ;;  %v4228_v10 = vunpack.c.l.b16 %v4034_v53  ;;  %v13545_v47 = vld [vmem:[#allocation56_spill] sm:$0xff]  ;;  %v13546_v39 = vld [vmem:[#allocation17_spill] sm:$0xff]  ;;  %v10672_v21 = vshll.u32 %v10625_v54, 16  ;;  %v2433_v32 = vmax.f32 %v2401_v5, 0.0  ;;  %v10686_v17 = vpop.f32.mrf.mxu0 }
 0x228   : > { %v10664_v14 = vadd.f32 %v13546_v39, %v13545_v47  ;;  %3983 = vst [vmem:[#allocation3 + $0x50] sm:$0x4] %v3982_v6  ;;  %v4037_v61 = vld [vmem:[#allocation3 + $0x20] sm:$0x7]  ;;  %v5202_v52 = vrot.slane %v10625_v54, 3  ;;  %v8326_v40 = vrot.slane %v3851_v11, 9 }
 0x229   : > { %13547 = vst [vmem:[#allocation12_spill] sm:$0xff] %v10669_v63  ;;  %v2593_v9 = vshrl.u32 %v2464_v46, 16  ;;  %v2596_v25 = vshll.u32 %v2464_v46, 16  ;;  %v10674_v0 = vpack.c.b16 %v4228_v10, %v4228_v10  ;;  %v2591_v16 = vrot.slane %v10641_v18, 4  ;;  %v9205_v23 = vld [vmem:[%s13348_s2 + $0x88] sm:$0xff]  ;;  %v13552_v63 = vld [vmem:[#allocation19_spill] sm:$0xff] }
 0x22a   : > { %3474 = vst [vmem:[#allocation3 + $0x54] sm:$0x1] %v3473_v2  ;;  %v4288_v62 = vrot.slane %v10672_v21, 1  ;;  %v2465_v27 = vpack.c.bf16 %v2433_v32, %v2433_v32  ;;  %v8311_v26 = vrot.slane %v3681_v42, 11  ;;  %vm13363_vm2 = vsmask.f32 5376  ;;  %5752 = vmatpush.bf16.msrb.mxu0 %v9205_v23 }
 0x22b   : > { %2881 = vst [vmem:[#allocation3 + $0x5c] sm:$0x3] %v2880_v12  ;;  %v2595_v4 = vrot.slane %v2593_v9, 6  ;;  %v2598_v3 = vrot.slane %v2596_v25, 7  ;;  %v4229_v5 = vunpack.c.l.b16 %v4037_v61  ;;  %v5203_v19 = vrot.slane %v10674_v0, 3 }
 0x22c   : > { %2884 = vst [vmem:[#allocation3 + $0x60] sm:$0xe] %v2883_v50  ;;  %v10684_v11 = vshll.u32 %v10674_v0, 16  ;;  %v5007_v18 = vrot.slane %v10660_v45, 2  ;;  %v5008_v24 = vrot.slane %v10672_v21, 3  ;;  %v2603_v12 = vshrl.u32 %v2465_v27, 16  ;;  %v2252_v50 = vpop.f32.mrf.mxu1 }
 0x22d   : > { %13548 = vst [vmem:[#allocation13_spill] sm:$0xff] %v10686_v17  ;;  %v3963_v28 = vld [vmem:[#allocation3 + $0x8] sm:$0x4]  ;;  %v2599_v2 = vor.u32 %v2598_v3, %v2595_v4  ;;  %v2606_v53 = vshll.u32 %v2465_v27, 16  ;;  %v4702_v6 = vshrl.u32 %v10674_v0, 16  ;;  %v5204_v10 = vsel %vm13366_vm13, %v5202_v52, %v5203_v19 }
 0x22e   : > { %v3964_v42 = vsel %vm10424_vm3, %v8326_v40, %v3963_v28  ;;  %v2886_v46 = vld [vmem:[#allocation3 + $0x68] sm:$0x3]  ;;  %v4289_v47 = vor.u32 %v4288_v62, %v10660_v45  ;;  %v4293_v39 = vrot.slane %v10684_v11, 1  ;;  %v3629_v32 = vld [vmem:[#allocation3 + $0x5c] sm:$0x4]  ;;  %5267 = vrot.lane.b32.xlu0 %v5204_v10, %s9325_s15  ;;  %v2605_v25 = vrot.slane %v2603_v12, 6  ;;  %v2341_v40 = vpop.f32.mrf.mxu3 }
 0x22f   : > { %3965 = vst [vmem:[#allocation3 + $0x8] sm:$0x4] %v3964_v42  ;;  %v2600_v61 = vsel %vm10328_vm5, %v2591_v16, %v2599_v2  ;;  %v2601_v9 = vrot.slane %v2599_v2, 4  ;;  %v2608_v27 = vrot.slane %v2606_v53, 7  ;;  %vm13550_vm15 = vsmask.f32 7424 }
 0x230   : > { %2885 = vst.msk [vmem:[#allocation3 + $0x64] sm:$0xf] %vm13549_vm12, %v2600_v61  ;;  %v4294_v52 = vsel %vm13550_vm15, %v4289_v47, %v4293_v39  ;;  %v5010_v62 = vrot.slane %v4702_v6, 2  ;;  %v5011_v3 = vrot.slane %v10684_v11, 3  ;;  %v10702_v23 = vpack.c.b16 %v4229_v5, %v4229_v5  ;;  %v3475_v2 = vld [vmem:[#allocation3 + $0x60] sm:$0x1] }
 0x231   : > { %v3806_v4 = vld [vmem:[#allocation3 + $0x54] sm:$0x1]  ;;  %v2887_v12 = vsel %vm10347_vm4, %v2601_v9, %v2886_v46  ;;  %4537 = vrot.lane.b32.xlu1 %v4294_v52, %s9326_s11  ;;  %v10709_v53 = vor.u32 %v2608_v27, %v2605_v25  ;;  %v2889_v42 = vld [vmem:[#allocation3 + $0x6c] sm:$0xe]  ;;  %v2342_v10 = vadd.f32 %v2341_v40, %v2252_v50  ;;  %v5009_v61 = vor.u32 %v5008_v24, %v5007_v18 }
 0x232   : > { %v3807_v19 = vsel %vm10375_vm1, %v8311_v26, %v3806_v4  ;;  %v3191_v16 = vld [vmem:[#allocation3 + $0x5c] sm:$0x1]  ;;  %v5012_v17 = vor.u32 %v5011_v3, %v5010_v62  ;;  %v10711_v26 = vpop.f32.mrf.mxu2  ;;  %v13551_v4 = vld [vmem:[#allocation59_spill] sm:$0xff]  ;;  %v3294_v36 = vld [vmem:[#allocation3 + $0x5c] sm:$0x2]  ;;  %v5014_v52 = vrot.slane %v10613_v29, 2 }
 0x233   : > { %v3524_v28 = vld [vmem:[#allocation3 + $0x5c] sm:$0x1]  ;;  %3808 = vst [vmem:[#allocation3 + $0x54] sm:$0x1] %v3807_v19  ;;  %v3235_v47 = vrot.slane %v3191_v16, 7  ;;  %v1821_v41 = vadd.f32 %v13552_v63, %v13551_v4  ;;  %v2402_v25 = vadd.f32 %v2342_v10, %v10633_v59  ;;  %v2890_v59 = vsel %vm10313_vm14, %v10709_v53, %v2889_v42 }
 0x234   : > { %v3568_v5 = vrot.slane %v3524_v28, 6  ;;  %v3014_v39 = vld [vmem:[#allocation3 + $0x60] sm:$0x4]  ;;  %v3142_v18 = vld [vmem:[#allocation3 + $0x60] sm:$0x2]  ;;  %v5013_v40 = vsel %vm13363_vm2, %v5009_v61, %v5012_v17  ;;  %v4704_v17 = vrot.slane %v4702_v6, 1  ;;  %v1764_v28 = vpop.f32.mrf.mxu0 }
 0x235   : > { %v8268_v46 = vrot.slane %v3014_v39, 9  ;;  %v3347_v9 = vld [vmem:[#allocation3 + $0x60] sm:$0x4]  ;;  %v3295_v50 = vsel %vm10383_vm10, %v3235_v47, %v3294_v36  ;;  %2888 = vst [vmem:[#allocation3 + $0x68] sm:$0x3] %v2887_v12  ;;  %5156 = vrot.lane.b32.xlu2 %v5013_v40, %s9326_s11  ;;  %v4699_v36 = vrot.slane %v10660_v45, 1 }
 0x236   : > { %v3630_v27 = vsel %vm10388_vm0, %v3568_v5, %v3629_v32  ;;  %v8290_v24 = vrot.slane %v3347_v9, 10  ;;  %3296 = vst [vmem:[#allocation3 + $0x5c] sm:$0x2] %v3295_v50  ;;  %v3858_v63 = vld [vmem:[#allocation3 + $0x58] sm:$0x8]  ;;  %v4700_v32 = vrot.slane %v10672_v21, 2 }
 0x237   : > { %v3143_v62 = vsel %vm10340_vm11, %v8268_v46, %v3142_v18  ;;  %3631 = vst [vmem:[#allocation3 + $0x5c] sm:$0x4] %v3630_v27  ;;  %v4705_v19 = vrot.slane %v10684_v11, 2  ;;  %v10734_v16 = vshll.u32 %v10702_v23, 16  ;;  %v13553_v12 = vld [vmem:[#allocation55_spill] sm:$0xff]  ;;  %v13554_v10 = vld [vmem:[#allocation58_spill] sm:$0xff] }
 0x238   : > { %v3476_v3 = vsel %vm10334_vm9, %v8290_v24, %v3475_v2  ;;  %v1983_v42 = vadd.f32 %v13553_v12, %v10664_v14  ;;  %v10739_v47 = vadd.f32 %v13554_v10, %v1821_v41  ;;  %3144 = vst [vmem:[#allocation3 + $0x60] sm:$0x2] %v3143_v62  ;;  %v4711_v45 = vshrl.u32 %v10702_v23, 16  ;;  %v10743_v5 = vld [vmem:[#allocation3 + $0x2c] sm:$0x7] }
 0x239   : > { %v5015_v21 = vrot.slane %v10619_v33, 3  ;;  %3477 = vst [vmem:[#allocation3 + $0x60] sm:$0x1] %v3476_v3  ;;  %v4701_v6 = vor.u32 %v4700_v32, %v4699_v36  ;;  %v4706_v11 = vor.u32 %v4705_v19, %v4704_v17  ;;  %v5018_v2 = vrot.slane %v10734_v16, 3  ;;  %v13555_v14 = vld [vmem:[#allocation48_spill] sm:$0xff] }
 0x23a   : > { %v2434_v39 = vmax.f32 %v2402_v25, 0.0  ;;  %v8333_v61 = vrot.slane %v3858_v63, 9  ;;  %2891 = vst [vmem:[#allocation3 + $0x6c] sm:$0xe] %v2890_v59  ;;  %vm13362_vm12 = vsmask.f32 6400  ;;  %v1854_v4 = vadd.f32 %v13555_v14, %v1764_v28  ;;  %v2017_v28 = vpop.f32.mrf.mxu2 }
 0x23b   : > { %v5017_v41 = vrot.slane %v4711_v45, 2  ;;  %v3682_v46 = vld [vmem:[#allocation3 + $0x60] sm:$0x8]  ;;  %v4707_v9 = vsel %vm13362_vm12, %v4701_v6, %v4706_v11  ;;  %v4583_v27 = vrot.slane %v10674_v0, 1  ;;  %v4230_v18 = vunpack.c.l.b16 %v10743_v5  ;;  %v3632_v3 = vld [vmem:[#allocation3 + $0x68] sm:$0x4] }
 0x23c   : > { %v2466_v50 = vpack.c.bf16 %v2434_v39, %v2434_v39  ;;  %v3192_v24 = vld [vmem:[#allocation3 + $0x68] sm:$0x1]  ;;  %4890 = vrot.lane.b32.xlu0 %v4707_v9, %s9327_s14  ;;  %v5016_v25 = vor.u32 %v5015_v21, %v5014_v52  ;;  %v4582_v62 = vrot.slane %v10625_v54, 1  ;;  %v4300_v59 = vrot.slane %v10619_v33, 1  ;;  %v3297_v10 = vld [vmem:[#allocation3 + $0x68] sm:$0x2]  ;;  %v2255_v21 = vpop.f32.mrf.mxu1  ;;  %v2344_v54 = vpop.f32.mrf.mxu3 }
 0x23d   : > { %v3525_v40 = vld [vmem:[#allocation3 + $0x68] sm:$0x1]  ;;  %v5019_v63 = vor.u32 %v5018_v2, %v5017_v41  ;;  %v3236_v36 = vrot.slane %v3192_v24, 7  ;;  %v2610_v5 = vrot.slane %v10709_v53, 4  ;;  %vm13556_vm15 = vcmask 1046528  }
 0x23e   : > { %v3569_v32 = vrot.slane %v3525_v40, 6  ;;  %v2612_v17 = vshrl.u32 %v2466_v50, 16  ;;  %v2615_v19 = vshll.u32 %v2466_v50, 16  ;;  %v3984_v12 = vld [vmem:[#allocation3 + $0x5c] sm:$0x4]  ;;  %v4584_v11 = vsel %vm13556_vm15, %v4582_v62, %v4583_v27  ;;  %v13559_v40 = vld [vmem:[#allocation20_spill] sm:$0xff] }
 0x23f   : > { %v5020_v6 = vsel %vm13363_vm2, %v5016_v25, %v5019_v63  ;;  %v10758_v52 = vadd.f32 %v2017_v28, %v1854_v4  ;;  %v3985_v2 = vsel %vm10424_vm3, %v8333_v61, %v3984_v12  ;;  %v8312_v39 = vrot.slane %v3682_v46, 11  ;;  %4647 = vrot.lane.b32.xlu2 %v4584_v11, %s9325_s15  ;;  %v3478_v9 = vld [vmem:[#allocation3 + $0x6c] sm:$0x1]  ;;  %v13558_v46 = vld [vmem:[#allocation18_spill] sm:$0xff]  ;;  %v10780_v12 = vld [vmem:[#allocation3 + $0x24] sm:$0xff] }
 0x240   : > { %v3298_v41 = vsel %vm10383_vm10, %v3236_v36, %v3297_v10  ;;  %5158 = vrot.lane.b32.xlu1 %v5020_v6, %s9326_s11  ;;  %v2614_v14 = vrot.slane %v2612_v17, 6  ;;  %3986 = vst [vmem:[#allocation3 + $0x5c] sm:$0x4] %v3985_v2  ;;  %v3809_v53 = vld [vmem:[#allocation3 + $0x60] sm:$0x1]  ;;  %v3633_v4 = vsel %vm10388_vm0, %v3569_v32, %v3632_v3  ;;  %v2617_v50 = vrot.slane %v2615_v19, 7 }
 0x241   : > { %13557 = vst [vmem:[#allocation10_spill] sm:$0xff] %v10758_v52  ;;  %v4301_v27 = vor.u32 %v4300_v59, %v10613_v29  ;;  %v4305_v61 = vrot.slane %v10734_v16, 1  ;;  %v10772_v24 = vadd.f32 %v13558_v46, %v10651_v44  ;;  %v10775_v25 = vadd.f32 %v13559_v40, %v1983_v42  ;;  %v3015_v62 = vld [vmem:[#allocation3 + $0x6c] sm:$0x4]  ;;  %v3145_v36 = vld [vmem:[#allocation3 + $0x6c] sm:$0x2] }
 0x242   : > { %v3810_v63 = vsel %vm10375_vm1, %v8312_v39, %v3809_v53  ;;  %3299 = vst [vmem:[#allocation3 + $0x68] sm:$0x2] %v3298_v41  ;;  %v2893_v32 = vld [vmem:[#allocation3 + $0x74] sm:$0x3]  ;;  %v2345_v3 = vadd.f32 %v2344_v54, %v2255_v21  ;;  %v8269_v17 = vrot.slane %v3015_v62, 9  ;;  %v2618_v19 = vor.u32 %v2617_v50, %v2614_v14  ;;  %v13561_v21 = vld [vmem:[#allocation22_spill] sm:$0xff]  ;;  %v11926_v49 = vpop.f32.mrf.mxu2 }
 0x243   : > { %3811 = vst [vmem:[#allocation3 + $0x60] sm:$0x1] %v3810_v63  ;;  %v3348_v59 = vld [vmem:[#allocation3 + $0x6c] sm:$0x4]  ;;  %vm13560_vm15 = vsmask.f32 7424  ;;  %v10782_v44 = vpack.c.b16 %v4230_v18, %v4230_v18  ;;  %v10789_v54 = vadd.f32 %v13561_v21, %v10739_v47 }
 0x244   : > { %v4306_v28 = vsel %vm13560_vm15, %v4301_v27, %v4305_v61  ;;  %3634 = vst [vmem:[#allocation3 + $0x68] sm:$0x4] %v3633_v4  ;;  %v8291_v42 = vrot.slane %v3348_v59, 10  ;;  %v4585_v10 = vrot.slane %v10589_v56, 1  ;;  %v4586_v6 = vrot.slane %v10702_v23, 1  ;;  %v13563_v61 = vld [vmem:[#allocation61_spill] sm:$0xff] }
 0x245   : > { %v2403_v11 = vadd.f32 %v2345_v3, %v10636_v1  ;;  %v3146_v2 = vsel %vm10340_vm11, %v8269_v17, %v3145_v36  ;;  %v2619_v39 = vsel %vm10328_vm5, %v2610_v5, %v2618_v19  ;;  %v2620_v18 = vrot.slane %v2618_v19, 4  ;;  %4539 = vrot.lane.b32.xlu0 %v4306_v28, %s9326_s11  ;;  %v3859_v41 = vld [vmem:[#allocation3 + $0x64] sm:$0x8]  ;;  %v13564_v46 = vld [vmem:[#allocation21_spill] sm:$0xff]  ;;  %v3683_v40 = vld [vmem:[#allocation3 + $0x6c] sm:$0x8]  ;;  %v2257_v36 = vpop.f32.mrf.mxu1  ;;  %v2346_v19 = vpop.f32.mrf.mxu3 }
 0x246   : > { %3147 = vst [vmem:[#allocation3 + $0x6c] sm:$0x2] %v3146_v2  ;;  %v3479_v14 = vsel %vm10334_vm9, %v8291_v42, %v3478_v9  ;;  %vm13562_vm15 = vcmask 1046528   ;;  %v5205_v47 = vrot.slane %v10589_v56, 3  ;;  %v5206_v50 = vrot.slane %v10702_v23, 3 }
 0x247   : > { %v4587_v1 = vsel %vm13562_vm15, %v4585_v10, %v4586_v6  ;;  %v2435_v53 = vmax.f32 %v2403_v11, 0.0  ;;  %3480 = vst [vmem:[#allocation3 + $0x6c] sm:$0x1] %v3479_v14  ;;  %v2894_v4 = vsel %vm10347_vm4, %v2620_v18, %v2893_v32  ;;  %v10804_v5 = vshrl.u32 %v10780_v12, 16 }
 0x248   : > { %v10807_v27 = vshll.u32 %v10780_v12, 16  ;;  %v1824_v9 = vadd.f32 %v13564_v46, %v13563_v61  ;;  %vm13565_vm15 = vcmask 257024   ;;  %4649 = vrot.lane.b32.xlu1 %v4587_v1, %s9325_s15  ;;  %v10814_v63 = vshll.u32 %v10782_v44, 16  ;;  %2895 = vst [vmem:[#allocation3 + $0x74] sm:$0x3] %v2894_v4 }
 0x249   : > { %2892 = vst.msk [vmem:[#allocation3 + $0x70] sm:$0xf] %vm13565_vm15, %v2619_v39  ;;  %v2467_v56 = vpack.c.bf16 %v2435_v53, %v2435_v53  ;;  %v4720_v62 = vshrl.u32 %v10782_v44, 16  ;;  %v8334_v32 = vrot.slane %v3859_v41, 9  ;;  %v5207_v3 = vsel %vm13366_vm13, %v5205_v47, %v5206_v50  ;;  %v2896_v53 = vld [vmem:[#allocation3 + $0x78] sm:$0xe] }
 0x24a   : > { %v5021_v17 = vrot.slane %v10804_v5, 2  ;;  %v5022_v59 = vrot.slane %v10807_v27, 3  ;;  %5269 = vrot.lane.b32.xlu2 %v5207_v3, %s9325_s15  ;;  %v5025_v6 = vrot.slane %v10814_v63, 3  ;;  %v8313_v21 = vrot.slane %v3683_v40, 11  ;;  %13710 = vst [vmem:[#allocation56_spill] sm:$0xff] %v11926_v49 }
 0x24b   : > { %v2622_v28 = vshrl.u32 %v2467_v56, 16  ;;  %v2625_v42 = vshll.u32 %v2467_v56, 16  ;;  %v5024_v10 = vrot.slane %v4720_v62, 2  ;;  %v3987_v11 = vld [vmem:[#allocation3 + $0x68] sm:$0x4]  ;;  %v5209_v39 = vrot.slane %v10782_v44, 3 }
 0x24c   : > { %v5023_v2 = vor.u32 %v5022_v59, %v5021_v17  ;;  %v2347_v18 = vadd.f32 %v2346_v19, %v2257_v36  ;;  %v3988_v41 = vsel %vm10424_vm3, %v8334_v32, %v3987_v11  ;;  %v5208_v4 = vrot.slane %v10780_v12, 3  ;;  %v4043_v17 = vld [vmem:[#allocation3 + $0x38] sm:$0x7]  ;;  %v13566_v59 = vld [vmem:[#allocation60_spill] sm:$0xff] }
 0x24d   : > { %v2624_v14 = vrot.slane %v2622_v28, 6  ;;  %v2627_v1 = vrot.slane %v2625_v42, 7  ;;  %v5026_v47 = vor.u32 %v5025_v6, %v5024_v10  ;;  %3989 = vst [vmem:[#allocation3 + $0x68] sm:$0x4] %v3988_v41  ;;  %v4708_v61 = vrot.slane %v10613_v29, 1 }
 0x24e   : > { %v2404_v50 = vadd.f32 %v2347_v18, %v10772_v24  ;;  %v4709_v46 = vrot.slane %v10619_v33, 2  ;;  %v3812_v40 = vld [vmem:[#allocation3 + $0x6c] sm:$0x1]  ;;  %v4713_v32 = vrot.slane %v4711_v45, 1  ;;  %v4714_v3 = vrot.slane %v10734_v16, 2 }
 0x24f   : > { %v10831_v56 = vor.u32 %v2627_v1, %v2624_v14  ;;  %v5027_v36 = vsel %vm13363_vm2, %v5023_v2, %v5026_v47  ;;  %v10838_v19 = vadd.f32 %v13566_v59, %v1824_v9  ;;  %v3813_v24 = vsel %vm10375_vm1, %v8313_v21, %v3812_v40  ;;  %v3193_v28 = vld [vmem:[#allocation3 + $0x74] sm:$0x1]  ;;  %v3635_v42 = vld [vmem:[#allocation3 + $0x74] sm:$0x4]  ;;  %v3300_v6 = vld [vmem:[#allocation3 + $0x74] sm:$0x2] }
 0x250   : > { %5160 = vrot.lane.b32.xlu0 %v5027_v36, %s9326_s11  ;;  %v5210_v29 = vsel %vm13366_vm13, %v5208_v4, %v5209_v39  ;;  %v2436_v33 = vmax.f32 %v2404_v50, 0.0  ;;  %3814 = vst [vmem:[#allocation3 + $0x6c] sm:$0x1] %v3813_v24  ;;  %v4710_v16 = vor.u32 %v4709_v46, %v4708_v61  ;;  %v4715_v9 = vor.u32 %v4714_v3, %v4713_v32  ;;  %v3526_v11 = vld [vmem:[#allocation3 + $0x74] sm:$0x1]  ;;  %v13568_v46 = vld [vmem:[#allocation23_spill] sm:$0xff] }
 0x251   : > { %v2897_v45 = vsel %vm10313_vm14, %v10831_v56, %v2896_v53  ;;  %5271 = vrot.lane.b32.xlu1 %v5210_v29, %s9325_s15  ;;  %v3237_v10 = vrot.slane %v3193_v28, 7  ;;  %v4588_v2 = vrot.slane %v10780_v12, 1  ;;  %v4231_v18 = vunpack.c.l.b16 %v4043_v17  ;;  %v10856_v61 = vld [vmem:[#allocation3 + $0x30] sm:$0xff]  ;;  %v13567_v12 = vld [vmem:[#allocation64_spill] sm:$0xff]  ;;  %v9211_v28 = vld [vmem:[%s13348_s2 + $0xb8] sm:$0xff] }
 0x252   : > { %v2468_v21 = vpack.c.bf16 %v2436_v33, %v2436_v33  ;;  %v3570_v39 = vrot.slane %v3526_v11, 6  ;;  %2898 = vst [vmem:[#allocation3 + $0x78] sm:$0xe] %v2897_v45  ;;  %v4716_v41 = vsel %vm13362_vm12, %v4710_v16, %v4715_v9  ;;  %v4589_v14 = vrot.slane %v10782_v44, 1  ;;  %v3860_v32 = vld [vmem:[#allocation3 + $0x70] sm:$0x8]  ;;  %v2349_v45 = vpop.f32.mrf.mxu3  ;;  %5843 = vmatpush.bf16.msrb.mxu2 %v9211_v28 }
 0x253   : > { %v4717_v1 = vrot.slane %v10804_v5, 1  ;;  %v3301_v53 = vsel %vm10383_vm10, %v3237_v10, %v3300_v6  ;;  %4892 = vrot.lane.b32.xlu2 %v4716_v41, %s9327_s14  ;;  %v4718_v50 = vrot.slane %v10807_v27, 2  ;;  %v10860_v40 = vadd.f32 %v13568_v46, %v13567_v12  ;;  %v9204_v29 = vld [vmem:[%s13348_s2 + $0x80] sm:$0xff] }
 0x254   : > { %v2631_v47 = vshrl.u32 %v2468_v21, 16  ;;  %v2634_v4 = vshll.u32 %v2468_v21, 16  ;;  %3302 = vst [vmem:[#allocation3 + $0x74] sm:$0x2] %v3301_v53  ;;  %v3636_v36 = vsel %vm10388_vm0, %v3570_v39, %v3635_v42  ;;  %v4722_v3 = vrot.slane %v4720_v62, 1  ;;  %v2260_v42 = vpop.f32.mrf.mxu1  ;;  %5753 = vmatpush.bf16.msrb.mxu0 %v9204_v29 }
 0x255   : > { %v4723_v17 = vrot.slane %v10814_v63, 2  ;;  %3637 = vst [vmem:[#allocation3 + $0x74] sm:$0x4] %v3636_v36  ;;  %vm13569_vm15 = vcmask 1046528   ;;  %v10874_v16 = vpack.c.b16 %v4231_v18, %v4231_v18  ;;  %v4719_v62 = vor.u32 %v4718_v50, %v4717_v1  ;;  %v2900_v53 = vld [vmem:[#allocation3 + $0x80] sm:$0x3] }
 0x256   : > { %v2633_v59 = vrot.slane %v2631_v47, 6  ;;  %v2636_v24 = vrot.slane %v2634_v4, 7  ;;  %v4590_v33 = vsel %vm13569_vm15, %v4588_v2, %v4589_v14  ;;  %v2350_v10 = vadd.f32 %v2349_v45, %v2260_v42  ;;  %v3481_v14 = vld [vmem:[#allocation3 + $0x78] sm:$0x1] }
 0x257   : > { %v4724_v9 = vor.u32 %v4723_v17, %v4722_v3  ;;  %v4312_v6 = vrot.slane %v10807_v27, 1  ;;  %v2629_v11 = vrot.slane %v10831_v56, 4  ;;  %v4317_v2 = vrot.slane %v10814_v63, 1 }
 0x258   : > { %v2637_v21 = vor.u32 %v2636_v24, %v2633_v59  ;;  %4651 = vrot.lane.b32.xlu0 %v4590_v33, %s9325_s15  ;;  %v5212_v39 = vrot.slane %v10874_v16, 3  ;;  %v8335_v41 = vrot.slane %v3860_v32, 9  ;;  %v2405_v1 = vadd.f32 %v2350_v10, %v10775_v25 }
 0x259   : > { %v4725_v18 = vsel %vm13362_vm12, %v4719_v62, %v4724_v9  ;;  %v10884_v27 = vshll.u32 %v10856_v61, 16  ;;  %v3016_v56 = vld [vmem:[#allocation3 + $0x78] sm:$0x4]  ;;  %v4313_v63 = vor.u32 %v4312_v6, %v10804_v5  ;;  %v5211_v50 = vrot.slane %v10856_v61, 3  ;;  %v3148_v3 = vld [vmem:[#allocation3 + $0x78] sm:$0x2] }
 0x25a   : > { %v3349_v47 = vld [vmem:[#allocation3 + $0x78] sm:$0x4]  ;;  %v2638_v4 = vsel %vm10328_vm5, %v2629_v11, %v2637_v21  ;;  %4894 = vrot.lane.b32.xlu1 %v4725_v18, %s9327_s14  ;;  %v4320_v12 = vshrl.u32 %v10856_v61, 16  ;;  %v8270_v46 = vrot.slane %v3016_v56, 9  ;;  %v2639_v32 = vrot.slane %v2637_v21, 4  ;;  %v2351_v11 = vpop.f32.mrf.mxu3 }
 0x25b   : > { %v8292_v36 = vrot.slane %v3349_v47, 10  ;;  %v2437_v25 = vmax.f32 %v2405_v1, 0.0  ;;  %vm13570_vm15 = vcmask 257024   ;;  %vm13571_vm12 = vsmask.f32 7424 }
 0x25c   : > { %2899 = vst.msk [vmem:[#allocation3 + $0x7c] sm:$0xf] %vm13570_vm15, %v2638_v4  ;;  %v4318_v17 = vsel %vm13571_vm12, %v4313_v63, %v4317_v2  ;;  %v5213_v59 = vsel %vm13366_vm13, %v5211_v50, %v5212_v39  ;;  %v4324_v24 = vrot.slane %v10884_v27, 1  ;;  %v4327_v29 = vshll.u32 %v10874_v16, 16  ;;  %v3990_v5 = vld [vmem:[#allocation3 + $0x74] sm:$0x4]  ;;  %v2262_v6 = vpop.f32.mrf.mxu1 }
 0x25d   : > { %v3149_v33 = vsel %vm10340_vm11, %v8270_v46, %v3148_v3  ;;  %v3482_v28 = vsel %vm10334_vm9, %v8292_v36, %v3481_v14  ;;  %v2901_v42 = vsel %vm10347_vm4, %v2639_v32, %v2900_v53  ;;  %v2469_v45 = vpack.c.bf16 %v2437_v25, %v2437_v25  ;;  %4541 = vrot.lane.b32.xlu2 %v4318_v17, %s9326_s11  ;;  %v4046_v2 = vld [vmem:[#allocation3 + $0x44] sm:$0x7]  ;;  %v10910_v4 = vld [vmem:[#allocation3 + $0x3c] sm:$0xff] }
 0x25e   : > { %v3991_v62 = vsel %vm10424_vm3, %v8335_v41, %v3990_v5  ;;  %3150 = vst [vmem:[#allocation3 + $0x78] sm:$0x2] %v3149_v33  ;;  %v4325_v9 = vor.u32 %v4324_v24, %v4320_v12  ;;  %v4329_v10 = vrot.slane %v4327_v29, 1  ;;  %v4729_v21 = vshrl.u32 %v10874_v16, 16  ;;  %v2903_v32 = vld [vmem:[#allocation3 + $0x84] sm:$0xe] }
 0x25f   : > { %3992 = vst [vmem:[#allocation3 + $0x74] sm:$0x4] %v3991_v62  ;;  %v2641_v39 = vshrl.u32 %v2469_v45, 16  ;;  %v2644_v14 = vshll.u32 %v2469_v45, 16  ;;  %v2352_v18 = vadd.f32 %v2351_v11, %v2262_v6  ;;  %v5028_v1 = vrot.slane %v4320_v12, 2  ;;  %v13573_v11 = vld [vmem:[#allocation63_spill] sm:$0xff] }
 0x260   : > { %3483 = vst [vmem:[#allocation3 + $0x78] sm:$0x1] %v3482_v28  ;;  %5273 = vrot.lane.b32.xlu0 %v5213_v59, %s9325_s15  ;;  %v4330_v53 = vsel %vm13571_vm12, %v4325_v9, %v4329_v10  ;;  %v5029_v41 = vrot.slane %v10884_v27, 3  ;;  %v5031_v56 = vrot.slane %v4729_v21, 2  ;;  %v5032_v47 = vrot.slane %v4327_v29, 3 }
 0x261   : > { %2902 = vst [vmem:[#allocation3 + $0x80] sm:$0x3] %v2901_v42  ;;  %v2643_v63 = vrot.slane %v2641_v39, 6  ;;  %v2646_v50 = vrot.slane %v2644_v14, 7  ;;  %v2406_v46 = vadd.f32 %v2352_v18, %v10789_v54  ;;  %v4726_v36 = vrot.slane %v4320_v12, 1  ;;  %v13572_v42 = vld [vmem:[#allocation24_spill] sm:$0xff] }
 0x262   : > { %4543 = vrot.lane.b32.xlu1 %v4330_v53, %s9326_s11  ;;  %v5030_v25 = vor.u32 %v5029_v41, %v5028_v1  ;;  %v5033_v3 = vor.u32 %v5032_v47, %v5031_v56  ;;  %v4727_v17 = vrot.slane %v10884_v27, 2  ;;  %v4731_v59 = vrot.slane %v4729_v21, 1  ;;  %v3684_v24 = vld [vmem:[#allocation3 + $0x78] sm:$0x8]  ;;  %v13575_v56 = vld [vmem:[#allocation69_spill] sm:$0xff] }
 0x263   : > { %v2647_v5 = vor.u32 %v2646_v50, %v2643_v63  ;;  %v2438_v33 = vmax.f32 %v2406_v46, 0.0  ;;  %v4732_v28 = vrot.slane %v4327_v29, 2  ;;  %v4232_v45 = vunpack.c.l.b16 %v4046_v2  ;;  %v3638_v2 = vld [vmem:[#allocation3 + $0x80] sm:$0x4]  ;;  %v13576_v47 = vld [vmem:[#allocation25_spill] sm:$0xff] }
 0x264   : > { %v2077_v62 = vadd.f32 %v13572_v42, %v10838_v19  ;;  %v5034_v9 = vsel %vm13363_vm2, %v5030_v25, %v5033_v3  ;;  %v10919_v54 = vshrl.u32 %v10910_v4, 16  ;;  %v4728_v27 = vor.u32 %v4727_v17, %v4726_v36  ;;  %v2265_v36 = vpop.f32.mrf.mxu1 }
 0x265   : > { %v2904_v12 = vsel %vm10313_vm14, %v2647_v5, %v2903_v32  ;;  %v2470_v10 = vpack.c.bf16 %v2438_v33, %v2438_v33  ;;  %5162 = vrot.lane.b32.xlu2 %v5034_v9, %s9326_s11  ;;  %v4733_v6 = vor.u32 %v4732_v28, %v4731_v59  ;;  %v1990_v29 = vadd.f32 %v13573_v11, %v10860_v40  ;;  %v2354_v32 = vpop.f32.mrf.mxu3  ;;  %v3484_v11 = vld [vmem:[#allocation3 + $0x84] sm:$0x1] }
 0x266   : > { %v8314_v21 = vrot.slane %v3684_v24, 11  ;;  %2905 = vst [vmem:[#allocation3 + $0x84] sm:$0xe] %v2904_v12  ;;  %v10926_v19 = vpack.c.b16 %v4232_v45, %v4232_v45  ;;  %v10929_v39 = vshll.u32 %v10910_v4, 16  ;;  %vm13574_vm15 = vsmask.f32 6400 }
 0x267   : > { %v3815_v14 = vld [vmem:[#allocation3 + $0x78] sm:$0x1]  ;;  %v2650_v18 = vshrl.u32 %v2470_v10, 16  ;;  %v2653_v1 = vshll.u32 %v2470_v10, 16  ;;  %v4734_v53 = vsel %vm13574_vm15, %v4728_v27, %v4733_v6  ;;  %v5035_v41 = vrot.slane %v10919_v54, 2 }
 0x268   : > { %v1829_v63 = vadd.f32 %v13576_v47, %v13575_v56  ;;  %v3816_v40 = vsel %vm10375_vm1, %v8314_v21, %v3815_v14  ;;  %v3194_v50 = vld [vmem:[#allocation3 + $0x80] sm:$0x1]  ;;  %4896 = vrot.lane.b32.xlu0 %v4734_v53, %s9327_s14  ;;  %v4591_v25 = vrot.slane %v10856_v61, 1  ;;  %v4592_v3 = vrot.slane %v10874_v16, 1  ;;  %v3303_v28 = vld [vmem:[#allocation3 + $0x80] sm:$0x2] }
 0x269   : > { %v3527_v46 = vld [vmem:[#allocation3 + $0x80] sm:$0x1]  ;;  %3817 = vst [vmem:[#allocation3 + $0x78] sm:$0x1] %v3816_v40  ;;  %v3238_v17 = vrot.slane %v3194_v50, 7  ;;  %v2652_v24 = vrot.slane %v2650_v18, 6  ;;  %v2355_v12 = vadd.f32 %v2354_v32, %v2265_v36 }
 0x26a   : > { %v3571_v59 = vrot.slane %v3527_v46, 6  ;;  %v2655_v33 = vrot.slane %v2653_v1, 7  ;;  %v10941_v45 = vshll.u32 %v10926_v19, 16  ;;  %v4738_v42 = vshrl.u32 %v10926_v19, 16  ;;  %v2907_v21 = vld [vmem:[#allocation3 + $0x8c] sm:$0x3] }
 0x26b   : > { %v5036_v9 = vrot.slane %v10929_v39, 3  ;;  %v3304_v10 = vsel %vm10383_vm10, %v3238_v17, %v3303_v28  ;;  %v2648_v27 = vrot.slane %v2647_v5, 4  ;;  %v2407_v1 = vadd.f32 %v2355_v12, %v2077_v62  ;;  %v13578_v56 = vld [vmem:[#allocation26_spill] sm:$0xff]  ;;  %v13579_v40 = vld [vmem:[#allocation71_spill] sm:$0xff] }
 0x26c   : > { %v3639_v61 = vsel %vm10388_vm0, %v3571_v59, %v3638_v2  ;;  %v2656_v6 = vor.u32 %v2655_v33, %v2652_v24  ;;  %3305 = vst [vmem:[#allocation3 + $0x80] sm:$0x2] %v3304_v10  ;;  %v5038_v14 = vrot.slane %v4738_v42, 2  ;;  %v5039_v18 = vrot.slane %v10941_v45, 3  ;;  %v13580_v50 = vld [vmem:[#allocation27_spill] sm:$0xff] }
 0x26d   : > { %vm13577_vm12 = vcmask 1046528   ;;  %v2079_v47 = vadd.f32 %v13578_v56, %v1990_v29  ;;  %v1831_v46 = vadd.f32 %v13580_v50, %v13579_v40  ;;  %3640 = vst [vmem:[#allocation3 + $0x80] sm:$0x4] %v3639_v61  ;;  %v3861_v2 = vld [vmem:[#allocation3 + $0x7c] sm:$0x8]  ;;  %v5037_v62 = vor.u32 %v5036_v9, %v5035_v41  ;;  %v10968_v41 = vld [vmem:[#allocation3 + $0x48] sm:$0xff]  ;;  %v2267_v40 = vpop.f32.mrf.mxu1  ;;  %v2356_v50 = vpop.f32.mrf.mxu3 }
 0x26e   : > { %v4593_v53 = vsel %vm13577_vm12, %v4591_v25, %v4592_v3  ;;  %v3017_v5 = vld [vmem:[#allocation3 + $0x84] sm:$0x4]  ;;  %v2657_v36 = vsel %vm10328_vm5, %v2648_v27, %v2656_v6  ;;  %v3151_v17 = vld [vmem:[#allocation3 + $0x84] sm:$0x2]  ;;  %v2658_v24 = vrot.slane %v2656_v6, 4  ;;  %v5040_v33 = vor.u32 %v5039_v18, %v5038_v14  ;;  %v13581_v25 = vld [vmem:[#allocation70_spill] sm:$0xff] }
 0x26f   : > { %4653 = vrot.lane.b32.xlu2 %v4593_v53, %s9325_s15  ;;  %v8271_v32 = vrot.slane %v3017_v5, 9  ;;  %v3350_v59 = vld [vmem:[#allocation3 + $0x84] sm:$0x4]  ;;  %v1993_v3 = vadd.f32 %v13581_v25, %v1829_v63  ;;  %vm13582_vm15 = vcmask 257024   ;;  %v2439_v28 = vmax.f32 %v2407_v1, 0.0 }
 0x270   : > { %v8293_v29 = vrot.slane %v3350_v59, 10  ;;  %2906 = vst.msk [vmem:[#allocation3 + $0x88] sm:$0xf] %vm13582_vm15, %v2657_v36  ;;  %v4336_v12 = vrot.slane %v10929_v39, 1  ;;  %v2908_v61 = vsel %vm10347_vm4, %v2658_v24, %v2907_v21  ;;  %v5041_v27 = vsel %vm13363_vm2, %v5037_v62, %v5040_v33  ;;  %v4049_v9 = vld [vmem:[#allocation3 + $0x50] sm:$0x7] }
 0x271   : > { %v3152_v10 = vsel %vm10340_vm11, %v8271_v32, %v3151_v17  ;;  %v4341_v6 = vrot.slane %v10941_v45, 1  ;;  %5164 = vrot.lane.b32.xlu1 %v5041_v27, %s9326_s11  ;;  %v2471_v14 = vpack.c.bf16 %v2439_v28, %v2439_v28  ;;  %v13583_v1 = vld [vmem:[#allocation75_spill] sm:$0xff]  ;;  %v8336_v56 = vrot.slane %v3861_v2, 9  ;;  %2909 = vst [vmem:[#allocation3 + $0x8c] sm:$0x3] %v2908_v61 }
 0x272   : > { %3153 = vst [vmem:[#allocation3 + $0x84] sm:$0x2] %v3152_v10  ;;  %v3485_v63 = vsel %vm10334_vm9, %v8293_v29, %v3484_v11  ;;  %v4337_v18 = vor.u32 %v4336_v12, %v10919_v54  ;;  %v1995_v53 = vadd.f32 %v13583_v1, %v1831_v46  ;;  %v4595_v21 = vrot.slane %v10926_v19, 1  ;;  %v3685_v36 = vld [vmem:[#allocation3 + $0x84] sm:$0x8] }
 0x273   : > { %3486 = vst [vmem:[#allocation3 + $0x84] sm:$0x1] %v3485_v63  ;;  %v4233_v5 = vunpack.c.l.b16 %v4049_v9  ;;  %v2660_v32 = vshrl.u32 %v2471_v14, 16  ;;  %v2663_v17 = vshll.u32 %v2471_v14, 16  ;;  %vm13584_vm12 = vsmask.f32 7424 }
 0x274   : > { %v4342_v11 = vsel %vm13584_vm12, %v4337_v18, %v4341_v6  ;;  %v2357_v59 = vadd.f32 %v2356_v50, %v2267_v40  ;;  %v3993_v24 = vld [vmem:[#allocation3 + $0x80] sm:$0x4]  ;;  %v5214_v62 = vrot.slane %v10910_v4, 3  ;;  %v5215_v46 = vrot.slane %v10926_v19, 3  ;;  %v2910_v12 = vld [vmem:[#allocation3 + $0x90] sm:$0xe] }
 0x275   : > { %4545 = vrot.lane.b32.xlu0 %v4342_v11, %s9326_s11  ;;  %v10980_v2 = vpack.c.b16 %v4233_v5, %v4233_v5  ;;  %v10983_v33 = vshrl.u32 %v10968_v41, 16  ;;  %v3994_v25 = vsel %vm10424_vm3, %v8336_v56, %v3993_v24  ;;  %v2662_v29 = vrot.slane %v2660_v32, 6  ;;  %v13586_v50 = vld [vmem:[#allocation28_spill] sm:$0xff]  ;;  %v9203_v11 = vld [vmem:[%s13348_s2 + $0x78] sm:$0xff] }
 0x276   : > { %v2665_v28 = vrot.slane %v2663_v17, 7  ;;  %v2408_v10 = vadd.f32 %v2357_v59, %v2079_v47  ;;  %3995 = vst [vmem:[#allocation3 + $0x80] sm:$0x4] %v3994_v25  ;;  %v4594_v61 = vrot.slane %v10910_v4, 1  ;;  %v5216_v27 = vsel %vm13366_vm13, %v5214_v62, %v5215_v46  ;;  %v13587_v59 = vld [vmem:[#allocation30_spill] sm:$0xff]  ;;  %v13588_v62 = vld [vmem:[#allocation29_spill] sm:$0xff]  ;;  %5754 = vmatpush.bf16.msrb.mxu0 %v9203_v11 }
 0x277   : > { %v10990_v6 = vshll.u32 %v10968_v41, 16  ;;  %v10993_v9 = vshll.u32 %v10980_v2, 16  ;;  %v8315_v63 = vrot.slane %v3685_v36, 11  ;;  %5275 = vrot.lane.b32.xlu2 %v5216_v27, %s9325_s15  ;;  %v4747_v1 = vshrl.u32 %v10980_v2, 16 }
 0x278   : > { %v2666_v14 = vor.u32 %v2665_v28, %v2662_v29  ;;  %v2440_v18 = vmax.f32 %v2408_v10, 0.0  ;;  %vm13585_vm15 = vcmask 1046528   ;;  %v5042_v56 = vrot.slane %v10983_v33, 2  ;;  %v3195_v25 = vld [vmem:[#allocation3 + $0x8c] sm:$0x1]  ;;  %v2270_v10 = vpop.f32.mrf.mxu1 }
 0x279   : > { %v4596_v47 = vsel %vm13585_vm15, %v4594_v61, %v4595_v21  ;;  %v5043_v4 = vrot.slane %v10990_v6, 3  ;;  %v5046_v40 = vrot.slane %v10993_v9, 3  ;;  %v2082_v5 = vadd.f32 %v13586_v50, %v1993_v3  ;;  %v3528_v29 = vld [vmem:[#allocation3 + $0x8c] sm:$0x1]  ;;  %v3641_v28 = vld [vmem:[#allocation3 + $0x8c] sm:$0x4]  ;;  %v2359_v61 = vpop.f32.mrf.mxu3 }
 0x27a   : > { %v3818_v32 = vld [vmem:[#allocation3 + $0x84] sm:$0x1]  ;;  %v2911_v36 = vsel %vm10313_vm14, %v2666_v14, %v2910_v12  ;;  %4655 = vrot.lane.b32.xlu1 %v4596_v47, %s9325_s15  ;;  %v2472_v17 = vpack.c.bf16 %v2440_v18, %v2440_v18  ;;  %v5045_v21 = vrot.slane %v4747_v1, 2  ;;  %v11009_v24 = vadd.f32 %v13587_v59, %v1995_v53  ;;  %v3306_v53 = vld [vmem:[#allocation3 + $0x8c] sm:$0x2] }
 0x27b   : > { %v11013_v46 = vadd.f32 %v13588_v62, %v10400_v35  ;;  %v3819_v3 = vsel %vm10375_vm1, %v8315_v63, %v3818_v32  ;;  %v5044_v12 = vor.u32 %v5043_v4, %v5042_v56  ;;  %v3239_v27 = vrot.slane %v3195_v25, 7  ;;  %2912 = vst [vmem:[#allocation3 + $0x90] sm:$0xe] %v2911_v36 }
 0x27c   : > { %3820 = vst [vmem:[#allocation3 + $0x84] sm:$0x1] %v3819_v3  ;;  %v3572_v18 = vrot.slane %v3528_v29, 6  ;;  %v2669_v47 = vshrl.u32 %v2472_v17, 16  ;;  %v2672_v50 = vshll.u32 %v2472_v17, 16  ;;  %v5047_v59 = vor.u32 %v5046_v40, %v5045_v21 }
 0x27d   : > { %v5218_v35 = vrot.slane %v10980_v2, 3  ;;  %v2360_v62 = vadd.f32 %v2359_v61, %v2270_v10  ;;  %v4735_v63 = vrot.slane %v10919_v54, 1  ;;  %v3307_v32 = vsel %vm10383_vm10, %v3239_v27, %v3306_v53 }
 0x27e   : > { %v3642_v56 = vsel %vm10388_vm0, %v3572_v18, %v3641_v28  ;;  %v2671_v4 = vrot.slane %v2669_v47, 6  ;;  %v2674_v3 = vrot.slane %v2672_v50, 7  ;;  %3308 = vst [vmem:[#allocation3 + $0x8c] sm:$0x2] %v3307_v32  ;;  %v5048_v17 = vsel %vm13363_vm2, %v5044_v12, %v5047_v59  ;;  %v2914_v28 = vld [vmem:[#allocation3 + $0x98] sm:$0x3] }
 0x27f   : > { %v5217_v11 = vrot.slane %v10968_v41, 3  ;;  %v2409_v36 = vadd.f32 %v2360_v62, %v2082_v5  ;;  %v4736_v40 = vrot.slane %v10929_v39, 2  ;;  %3643 = vst [vmem:[#allocation3 + $0x8c] sm:$0x4] %v3642_v56  ;;  %v2667_v21 = vrot.slane %v2666_v14, 4  ;;  %5166 = vrot.lane.b32.xlu0 %v5048_v17, %s9326_s11 }
 0x280   : > { %v2675_v25 = vor.u32 %v2674_v3, %v2671_v4  ;;  %v4740_v54 = vrot.slane %v4738_v42, 1  ;;  %v4741_v29 = vrot.slane %v10941_v45, 2  ;;  %v4598_v27 = vrot.slane %v10980_v2, 1  ;;  %v3862_v5 = vld [vmem:[#allocation3 + $0x88] sm:$0x8] }
 0x281   : > { %v5219_v10 = vsel %vm13366_vm13, %v5217_v11, %v5218_v35  ;;  %v2441_v61 = vmax.f32 %v2409_v36, 0.0  ;;  %v4737_v12 = vor.u32 %v4736_v40, %v4735_v63  ;;  %v3487_v18 = vld [vmem:[#allocation3 + $0x90] sm:$0x1]  ;;  %v4744_v42 = vrot.slane %v10983_v33, 1  ;;  %v2272_v35 = vpop.f32.mrf.mxu1  ;;  %v2361_v62 = vpop.f32.mrf.mxu3 }
 0x282   : > { %v2676_v39 = vsel %vm10328_vm5, %v2667_v21, %v2675_v25  ;;  %v2677_v14 = vrot.slane %v2675_v25, 4  ;;  %5277 = vrot.lane.b32.xlu1 %v5219_v10, %s9325_s15  ;;  %v4742_v47 = vor.u32 %v4741_v29, %v4740_v54  ;;  %vm13589_vm12 = vcmask 257024   ;;  %v3018_v63 = vld [vmem:[#allocation3 + $0x90] sm:$0x4]  ;;  %v3154_v21 = vld [vmem:[#allocation3 + $0x90] sm:$0x2] }
 0x283   : > { %2913 = vst.msk [vmem:[#allocation3 + $0x94] sm:$0xf] %vm13589_vm12, %v2676_v39  ;;  %v2473_v45 = vpack.c.bf16 %v2441_v61, %v2441_v61  ;;  %v4745_v50 = vrot.slane %v10990_v6, 2  ;;  %v4749_v53 = vrot.slane %v4747_v1, 1  ;;  %v4750_v59 = vrot.slane %v10993_v9, 2 }
 0x284   : > { %v3351_v32 = vld [vmem:[#allocation3 + $0x90] sm:$0x4]  ;;  %v2915_v56 = vsel %vm10347_vm4, %v2677_v14, %v2914_v28  ;;  %vm13590_vm15 = vsmask.f32 6400  ;;  %v4597_v3 = vrot.slane %v10968_v41, 1  ;;  %v2362_v17 = vadd.f32 %v2361_v62, %v2272_v35  ;;  %v11046_v28 = vld [vmem:[#allocation3 + $0x54] sm:$0xff] }
 0x285   : > { %v4743_v4 = vsel %vm13590_vm15, %v4737_v12, %v4742_v47  ;;  %v8337_v11 = vrot.slane %v3862_v5, 9  ;;  %v8272_v36 = vrot.slane %v3018_v63, 9  ;;  %v8294_v40 = vrot.slane %v3351_v32, 10  ;;  %2916 = vst [vmem:[#allocation3 + $0x98] sm:$0x3] %v2915_v56  ;;  %v13592_v56 = vld [vmem:[#allocation31_spill] sm:$0xff] }
 0x286   : > { %4898 = vrot.lane.b32.xlu2 %v4743_v4, %s9327_s14  ;;  %v4751_v1 = vor.u32 %v4750_v59, %v4749_v53  ;;  %v2679_v25 = vshrl.u32 %v2473_v45, 16  ;;  %v2682_v54 = vshll.u32 %v2473_v45, 16  ;;  %vm13591_vm12 = vcmask 1046528   ;;  %v3996_v61 = vld [vmem:[#allocation3 + $0x8c] sm:$0x4] }
 0x287   : > { %v4599_v29 = vsel %vm13591_vm12, %v4597_v3, %v4598_v27  ;;  %v2410_v10 = vadd.f32 %v2362_v17, %v11009_v24  ;;  %v3155_v41 = vsel %vm10340_vm11, %v8272_v36, %v3154_v21  ;;  %v3488_v12 = vsel %vm10334_vm9, %v8294_v40, %v3487_v18  ;;  %v2917_v5 = vld [vmem:[#allocation3 + $0x9c] sm:$0xe]  ;;  %v3686_v59 = vld [vmem:[#allocation3 + $0x90] sm:$0x8]  ;;  %v3644_v3 = vld [vmem:[#allocation3 + $0x98] sm:$0x4] }
 0x288   : > { %v4746_v39 = vor.u32 %v4745_v50, %v4744_v42  ;;  %v4348_v14 = vrot.slane %v10990_v6, 1  ;;  %v4052_v47 = vld [vmem:[#allocation3 + $0x5c] sm:$0x7]  ;;  %v3997_v45 = vsel %vm10424_vm3, %v8337_v11, %v3996_v61  ;;  %3156 = vst [vmem:[#allocation3 + $0x90] sm:$0x2] %v3155_v41  ;;  %v2681_v27 = vrot.slane %v2679_v25, 6  ;;  %4657 = vrot.lane.b32.xlu0 %v4599_v29, %s9325_s15 }
 0x289   : > { %v2684_v24 = vrot.slane %v2682_v54, 7  ;;  %v2442_v53 = vmax.f32 %v2410_v10, 0.0  ;;  %3998 = vst [vmem:[#allocation3 + $0x8c] sm:$0x4] %v3997_v45  ;;  %v4353_v18 = vrot.slane %v10993_v9, 1  ;;  %v4234_v62 = vunpack.c.l.b16 %v4052_v47  ;;  %v9210_v45 = vld [vmem:[%s13348_s2 + $0xb0] sm:$0xff] }
 0x28a   : > { %v4752_v35 = vsel %vm13590_vm15, %v4746_v39, %v4751_v1  ;;  %3489 = vst [vmem:[#allocation3 + $0x90] sm:$0x1] %v3488_v12  ;;  %v4349_v50 = vor.u32 %v4348_v14, %v10983_v33  ;;  %v11063_v63 = vshll.u32 %v11046_v28, 16  ;;  %v1998_v32 = vadd.f32 %v10428_v34, %v11013_v46  ;;  %5844 = vmatpush.bf16.msrb.mxu2 %v9210_v45 }
 0x28b   : > { %v11058_v42 = vor.u32 %v2684_v24, %v2681_v27  ;;  %4900 = vrot.lane.b32.xlu1 %v4752_v35, %s9327_s14  ;;  %v2474_v6 = vpack.c.bf16 %v2442_v53, %v2442_v53  ;;  %v1836_v4 = vadd.f32 %v13592_v56, %v10442_v60  ;;  %v11069_v9 = vpack.c.b16 %v4234_v62, %v4234_v62  ;;  %v2364_v35 = vpop.f32.mrf.mxu3 }
 0x28c   : > { %v8316_v17 = vrot.slane %v3686_v59, 11  ;;  %v3196_v11 = vld [vmem:[#allocation3 + $0x98] sm:$0x1]  ;;  %vm13593_vm12 = vsmask.f32 7424  ;;  %v5220_v1 = vrot.slane %v11046_v28, 3  ;;  %v2275_v59 = vpop.f32.mrf.mxu1 }
 0x28d   : > { %v3529_v36 = vld [vmem:[#allocation3 + $0x98] sm:$0x1]  ;;  %v2918_v40 = vsel %vm10313_vm14, %v11058_v42, %v2917_v5  ;;  %v4354_v33 = vsel %vm13593_vm12, %v4349_v50, %v4353_v18  ;;  %v3240_v21 = vrot.slane %v3196_v11, 7  ;;  %v2688_v34 = vshrl.u32 %v2474_v6, 16  ;;  %v3309_v46 = vld [vmem:[#allocation3 + $0x98] sm:$0x2]  ;;  %vm13595_vm15 = vmmov %vm13593_vm12 }
 0x28e   : > { %v3573_v25 = vrot.slane %v3529_v36, 6  ;;  %2919 = vst [vmem:[#allocation3 + $0x9c] sm:$0xe] %v2918_v40  ;;  %4547 = vrot.lane.b32.xlu2 %v4354_v33, %s9326_s11  ;;  %v11078_v60 = vshrl.u32 %v11046_v28, 16  ;;  %v2691_v54 = vshll.u32 %v2474_v6, 16  ;;  %v5221_v29 = vrot.slane %v11069_v9, 3 }
 0x28f   : > { %v4360_v10 = vrot.slane %v11063_v63, 1  ;;  %v11083_v61 = vshll.u32 %v11069_v9, 16  ;;  %v3310_v41 = vsel %vm10383_vm10, %v3240_v21, %v3309_v46  ;;  %v3863_v5 = vld [vmem:[#allocation3 + $0x94] sm:$0x8]  ;;  %v2690_v39 = vrot.slane %v2688_v34, 6  ;;  %v13594_v18 = vld [vmem:[#allocation32_spill] sm:$0xff] }
 0x290   : > { %v3645_v12 = vsel %vm10388_vm0, %v3573_v25, %v3644_v3  ;;  %v4756_v14 = vshrl.u32 %v11069_v9, 16  ;;  %3311 = vst [vmem:[#allocation3 + $0x98] sm:$0x2] %v3310_v41  ;;  %v2693_v47 = vrot.slane %v2691_v54, 7  ;;  %v5222_v27 = vsel %vm13366_vm13, %v5220_v1, %v5221_v29  ;;  %v3490_v36 = vld [vmem:[#allocation3 + $0x9c] sm:$0x1] }
 0x291   : > { %v4361_v24 = vor.u32 %v4360_v10, %v11078_v60  ;;  %v4365_v53 = vrot.slane %v11083_v61, 1  ;;  %v2087_v62 = vadd.f32 %v13594_v18, %v1998_v32  ;;  %v2000_v6 = vadd.f32 %v10454_v13, %v1836_v4  ;;  %v3821_v50 = vld [vmem:[#allocation3 + $0x90] sm:$0x1]  ;;  %3646 = vst [vmem:[#allocation3 + $0x98] sm:$0x4] %v3645_v12  ;;  %5279 = vrot.lane.b32.xlu0 %v5222_v27, %s9325_s15 }
 0x292   : > { %v2686_v56 = vrot.slane %v11058_v42, 4  ;;  %v2365_v3 = vadd.f32 %v2364_v35, %v2275_v59  ;;  %v3822_v11 = vsel %vm10375_vm1, %v8316_v17, %v3821_v50  ;;  %v2694_v40 = vor.u32 %v2693_v47, %v2690_v39  ;;  %v2921_v33 = vld [vmem:[#allocation3 + $0xa4] sm:$0x3]  ;;  %v13596_v39 = vld [vmem:[#allocation34_spill] sm:$0xff] }
 0x293   : > { %v4366_v1 = vsel %vm13595_vm15, %v4361_v24, %v4365_v53  ;;  %v5049_v32 = vrot.slane %v11078_v60, 2  ;;  %3823 = vst [vmem:[#allocation3 + $0x90] sm:$0x1] %v3822_v11  ;;  %v5050_v42 = vrot.slane %v11063_v63, 3  ;;  %v5052_v4 = vrot.slane %v4756_v14, 2  ;;  %v11112_v53 = vld [vmem:[#allocation3 + $0x60] sm:$0xff] }
 0x294   : > { %4549 = vrot.lane.b32.xlu1 %v4366_v1, %s9326_s11  ;;  %v2411_v13 = vadd.f32 %v2365_v3, %v2087_v62  ;;  %v5053_v21 = vrot.slane %v11083_v61, 3  ;;  %v8338_v25 = vrot.slane %v3863_v5, 9  ;;  %v2695_v46 = vsel %vm10328_vm5, %v2686_v56, %v2694_v40  ;;  %v4055_v5 = vld [vmem:[#allocation3 + $0x68] sm:$0x7]  ;;  %v2277_v11 = vpop.f32.mrf.mxu1 }
 0x295   : > { %v3019_v34 = vld [vmem:[#allocation3 + $0x9c] sm:$0x4]  ;;  %v3157_v29 = vld [vmem:[#allocation3 + $0x9c] sm:$0x2]  ;;  %v2696_v41 = vrot.slane %v2694_v40, 4  ;;  %v2089_v47 = vadd.f32 %v13596_v39, %v2000_v6  ;;  %vm13597_vm12 = vcmask 257024   ;;  %v5051_v45 = vor.u32 %v5050_v42, %v5049_v32  ;;  %v2366_v40 = vpop.f32.mrf.mxu3 }
 0x296   : > { %v3352_v17 = vld [vmem:[#allocation3 + $0x9c] sm:$0x4]  ;;  %v8273_v54 = vrot.slane %v3019_v34, 9  ;;  %v2443_v12 = vmax.f32 %v2411_v13, 0.0  ;;  %2920 = vst.msk [vmem:[#allocation3 + $0xa0] sm:$0xf] %vm13597_vm12, %v2695_v46  ;;  %v5054_v27 = vor.u32 %v5053_v21, %v5052_v4  ;;  %v4235_v3 = vunpack.c.l.b16 %v4055_v5 }
 0x297   : > { %v8295_v10 = vrot.slane %v3352_v17, 10  ;;  %v4753_v24 = vrot.slane %v11078_v60, 1  ;;  %v2922_v18 = vsel %vm10347_vm4, %v2696_v41, %v2921_v33  ;;  %v4754_v56 = vrot.slane %v11063_v63, 2  ;;  %v3687_v46 = vld [vmem:[#allocation3 + $0x9c] sm:$0x8] }
 0x298   : > { %v3158_v59 = vsel %vm10340_vm11, %v8273_v54, %v3157_v29  ;;  %v2475_v62 = vpack.c.bf16 %v2443_v12, %v2443_v12  ;;  %v3999_v6 = vld [vmem:[#allocation3 + $0x98] sm:$0x4]  ;;  %v5055_v50 = vsel %vm13363_vm2, %v5051_v45, %v5054_v27  ;;  %v4758_v60 = vrot.slane %v4756_v14, 1  ;;  %2923 = vst [vmem:[#allocation3 + $0xa4] sm:$0x3] %v2922_v18 }
 0x299   : > { %v3491_v35 = vsel %vm10334_vm9, %v8295_v10, %v3490_v36  ;;  %3159 = vst [vmem:[#allocation3 + $0x9c] sm:$0x2] %v3158_v59  ;;  %v4000_v1 = vsel %vm10424_vm3, %v8338_v25, %v3999_v6  ;;  %5168 = vrot.lane.b32.xlu2 %v5055_v50, %s9326_s11  ;;  %v4759_v33 = vrot.slane %v11083_v61, 2  ;;  %v4755_v13 = vor.u32 %v4754_v56, %v4753_v24  ;;  %v2924_v25 = vld [vmem:[#allocation3 + $0xa8] sm:$0xe] }
 0x29a   : > { %3492 = vst [vmem:[#allocation3 + $0x9c] sm:$0x1] %v3491_v35  ;;  %v2698_v32 = vshrl.u32 %v2475_v62, 16  ;;  %v2701_v36 = vshll.u32 %v2475_v62, 16  ;;  %v11126_v42 = vpack.c.b16 %v4235_v3, %v4235_v3  ;;  %v11129_v63 = vshrl.u32 %v11112_v53, 16  ;;  %v13599_v62 = vld [vmem:[#allocation33_spill] sm:$0xff] }
 0x29b   : > { %4001 = vst [vmem:[#allocation3 + $0x98] sm:$0x4] %v4000_v1  ;;  %v11132_v14 = vshll.u32 %v11112_v53, 16  ;;  %v4760_v34 = vor.u32 %v4759_v33, %v4758_v60  ;;  %v2367_v17 = vadd.f32 %v2366_v40, %v2277_v11  ;;  %vm13598_vm15 = vsmask.f32 6400 }
 0x29c   : > { %v2700_v4 = vrot.slane %v2698_v32, 6  ;;  %v2703_v21 = vrot.slane %v2701_v36, 7  ;;  %v11135_v54 = vshll.u32 %v11126_v42, 16  ;;  %v4765_v61 = vshrl.u32 %v11126_v42, 16  ;;  %v3647_v40 = vld [vmem:[#allocation3 + $0xa4] sm:$0x4] }
 0x29d   : > { %v5056_v29 = vrot.slane %v11129_v63, 2  ;;  %v5057_v10 = vrot.slane %v11132_v14, 3  ;;  %v4761_v12 = vsel %vm13598_vm15, %v4755_v13, %v4760_v34  ;;  %v2412_v39 = vadd.f32 %v2367_v17, %v2089_v47  ;;  %v9202_v13 = vld [vmem:[%s13348_s2 + $0x70] sm:$0xff] }
 0x29e   : > { %v2704_v41 = vor.u32 %v2703_v21, %v2700_v4  ;;  %v4601_v45 = vrot.slane %v11069_v9, 1  ;;  %4902 = vrot.lane.b32.xlu0 %v4761_v12, %s9327_s14  ;;  %v5059_v27 = vrot.slane %v4765_v61, 2  ;;  %v5060_v24 = vrot.slane %v11135_v54, 3  ;;  %5755 = vmatpush.bf16.msrb.mxu0 %v9202_v13 }
 0x29f   : > { %v4600_v5 = vrot.slane %v11046_v28, 1  ;;  %v8317_v59 = vrot.slane %v3687_v46, 11  ;;  %v2444_v18 = vmax.f32 %v2412_v39, 0.0  ;;  %v1839_v6 = vadd.f32 %v13599_v62, %v10469_v8  ;;  %v3197_v28 = vld [vmem:[#allocation3 + $0xa4] sm:$0x1]  ;;  %v2280_v46 = vpop.f32.mrf.mxu1  ;;  %v13601_v62 = vld [vmem:[#allocation36_spill] sm:$0xff] }
 0x2a0   : > { %v2925_v35 = vsel %vm10313_vm14, %v2704_v41, %v2924_v25  ;;  %v5058_v50 = vor.u32 %v5057_v10, %v5056_v29  ;;  %v5061_v56 = vor.u32 %v5060_v24, %v5059_v27  ;;  %vm13600_vm12 = vcmask 1046528   ;;  %v3530_v36 = vld [vmem:[#allocation3 + $0xa4] sm:$0x1]  ;;  %v3312_v21 = vld [vmem:[#allocation3 + $0xa4] sm:$0x2]  ;;  %v2369_v29 = vpop.f32.mrf.mxu3 }
 0x2a1   : > { %v3824_v47 = vld [vmem:[#allocation3 + $0x9c] sm:$0x1]  ;;  %2926 = vst [vmem:[#allocation3 + $0xa8] sm:$0xe] %v2925_v35  ;;  %v4602_v60 = vsel %vm13600_vm12, %v4600_v5, %v4601_v45  ;;  %v2476_v11 = vpack.c.bf16 %v2444_v18, %v2444_v18  ;;  %v3241_v32 = vrot.slane %v3197_v28, 7  ;;  %v2003_v4 = vadd.f32 %v10492_v43, %v1839_v6 }
 0x2a2   : > { %v3825_v3 = vsel %vm10375_vm1, %v8317_v59, %v3824_v47  ;;  %4659 = vrot.lane.b32.xlu2 %v4602_v60, %s9325_s15  ;;  %v5062_v1 = vsel %vm13363_vm2, %v5058_v50, %v5061_v56  ;;  %v3574_v25 = vrot.slane %v3530_v36, 6  ;;  %v4372_v34 = vrot.slane %v11132_v14, 1  ;;  %v3493_v27 = vld [vmem:[#allocation3 + $0xa8] sm:$0x1]  ;;  %v2928_v56 = vld [vmem:[#allocation3 + $0xb0] sm:$0x3] }
 0x2a3   : > { %3826 = vst [vmem:[#allocation3 + $0x9c] sm:$0x1] %v3825_v3  ;;  %5170 = vrot.lane.b32.xlu1 %v5062_v1, %s9326_s11  ;;  %v2707_v8 = vshrl.u32 %v2476_v11, 16  ;;  %v2710_v33 = vshll.u32 %v2476_v11, 16  ;;  %v4377_v17 = vrot.slane %v11135_v54, 1  ;;  %v3313_v10 = vsel %vm10383_vm10, %v3241_v32, %v3312_v21  ;;  %v13605_v21 = vld [vmem:[#allocation35_spill] sm:$0xff] }
 0x2a4   : > { %3314 = vst [vmem:[#allocation3 + $0xa4] sm:$0x2] %v3313_v10  ;;  %v3648_v45 = vsel %vm10388_vm0, %v3574_v25, %v3647_v40  ;;  %v4373_v43 = vor.u32 %v4372_v34, %v11129_v63  ;;  %v4604_v24 = vrot.slane %v11126_v42, 1  ;;  %v2705_v5 = vrot.slane %v2704_v41, 4  ;;  %v3864_v41 = vld [vmem:[#allocation3 + $0xa0] sm:$0x8] }
 0x2a5   : > { %v2709_v12 = vrot.slane %v2707_v8, 6  ;;  %v2712_v39 = vrot.slane %v2710_v33, 7  ;;  %3649 = vst [vmem:[#allocation3 + $0xa4] sm:$0x4] %v3648_v45  ;;  %v2370_v18 = vadd.f32 %v2369_v29, %v2280_v46  ;;  %v2092_v6 = vadd.f32 %v13601_v62, %v2003_v4  ;;  %v11190_v45 = vld [vmem:[#allocation3 + $0x6c] sm:$0xff] }
 0x2a6   : > { %vm13602_vm15 = vsmask.f32 7424  ;;  %v4603_v3 = vrot.slane %v11112_v53, 1  ;;  %vm13603_vm12 = vcmask 257024   ;;  %vm13604_vm2 = vcmask 1046528  }
 0x2a7   : > { %v2713_v35 = vor.u32 %v2712_v39, %v2709_v12  ;;  %v4378_v60 = vsel %vm13602_vm15, %v4373_v43, %v4377_v17  ;;  %v2413_v8 = vadd.f32 %v2370_v18, %v2092_v6  ;;  %v1841_v25 = vadd.f32 %v13605_v21, %v10505_v38 }
 0x2a8   : > { %v3020_v59 = vld [vmem:[#allocation3 + $0xa8] sm:$0x4]  ;;  %v3160_v11 = vld [vmem:[#allocation3 + $0xa8] sm:$0x2]  ;;  %4551 = vrot.lane.b32.xlu0 %v4378_v60, %s9326_s11  ;;  %v4605_v36 = vsel %vm13604_vm2, %v4603_v3, %v4604_v24  ;;  %v8339_v34 = vrot.slane %v3864_v41, 9  ;;  %v5223_v12 = vrot.slane %v11112_v53, 3  ;;  %v2282_v53 = vpop.f32.mrf.mxu1  ;;  %v2371_v62 = vpop.f32.mrf.mxu3 }
 0x2a9   : > { %v8274_v47 = vrot.slane %v3020_v59, 9  ;;  %v3353_v50 = vld [vmem:[#allocation3 + $0xa8] sm:$0x4]  ;;  %v2714_v40 = vsel %vm10328_vm5, %v2705_v5, %v2713_v35  ;;  %v2715_v1 = vrot.slane %v2713_v35, 4  ;;  %v2445_v4 = vmax.f32 %v2413_v8, 0.0 }
 0x2aa   : > { %v8296_v28 = vrot.slane %v3353_v50, 10  ;;  %2927 = vst.msk [vmem:[#allocation3 + $0xac] sm:$0xf] %vm13603_vm12, %v2714_v40  ;;  %v3688_v46 = vld [vmem:[#allocation3 + $0xa8] sm:$0x8]  ;;  %v5224_v39 = vrot.slane %v11126_v42, 3  ;;  %v2005_v38 = vadd.f32 %v10525_v57, %v1841_v25  ;;  %v2372_v8 = vadd.f32 %v2371_v62, %v2282_v53 }
 0x2ab   : > { %v3161_v32 = vsel %vm10340_vm11, %v8274_v47, %v3160_v11  ;;  %v2929_v13 = vsel %vm10347_vm4, %v2715_v1, %v2928_v56  ;;  %4661 = vrot.lane.b32.xlu1 %v4605_v36, %s9325_s15  ;;  %v2477_v29 = vpack.c.bf16 %v2445_v4, %v2445_v4  ;;  %v11195_v35 = vshrl.u32 %v11190_v45, 16  ;;  %v3650_v47 = vld [vmem:[#allocation3 + $0xb0] sm:$0x4]  ;;  %v2931_v60 = vld [vmem:[#allocation3 + $0xb4] sm:$0xe]  ;;  %v13606_v25 = vld [vmem:[#allocation38_spill] sm:$0xff] }
 0x2ac   : > { %3162 = vst [vmem:[#allocation3 + $0xa8] sm:$0x2] %v3161_v32  ;;  %v3494_v33 = vsel %vm10334_vm9, %v8296_v28, %v3493_v27  ;;  %v4002_v17 = vld [vmem:[#allocation3 + $0xa4] sm:$0x4]  ;;  %v4058_v27 = vld [vmem:[#allocation3 + $0x74] sm:$0x7]  ;;  %v5225_v59 = vsel %vm13366_vm13, %v5223_v12, %v5224_v39 }
 0x2ad   : > { %3495 = vst [vmem:[#allocation3 + $0xa8] sm:$0x1] %v3494_v33  ;;  %v4003_v10 = vsel %vm10424_vm3, %v8339_v34, %v4002_v17  ;;  %v2717_v43 = vshrl.u32 %v2477_v29, 16  ;;  %v2720_v24 = vshll.u32 %v2477_v29, 16  ;;  %v4236_v5 = vunpack.c.l.b16 %v4058_v27  ;;  %5281 = vrot.lane.b32.xlu2 %v5225_v59, %s9325_s15  ;;  %v2999_v11 = vld [vmem:[#allocation3 + $0xfc] sm:$0xe] }
 0x2ae   : > { %2930 = vst [vmem:[#allocation3 + $0xb0] sm:$0x3] %v2929_v13  ;;  %v11198_v18 = vshll.u32 %v11190_v45, 16  ;;  %v8318_v6 = vrot.slane %v3688_v46, 11  ;;  %v5063_v28 = vrot.slane %v11195_v35, 2  ;;  %v2094_v34 = vadd.f32 %v13606_v25, %v2005_v38 }
 0x2af   : > { %4004 = vst [vmem:[#allocation3 + $0xa4] sm:$0x4] %v4003_v10  ;;  %v2719_v50 = vrot.slane %v2717_v43, 6  ;;  %v2722_v56 = vrot.slane %v2720_v24, 7  ;;  %v11201_v3 = vpack.c.b16 %v4236_v5, %v4236_v5  ;;  %v5226_v43 = vrot.slane %v11190_v45, 3 }
 0x2b0   : > { %v5064_v36 = vrot.slane %v11198_v18, 3  ;;  %v2414_v5 = vadd.f32 %v2372_v8, %v2094_v34  ;;  %vm13607_vm2 = vsmask.f32 5376  ;;  %vm13609_vm15 = vcmask 1046528  }
 0x2b1   : > { %v11206_v32 = vor.u32 %v2722_v56, %v2719_v50  ;;  %v11210_v4 = vshll.u32 %v11201_v3, 16  ;;  %v4774_v21 = vshrl.u32 %v11201_v3, 16  ;;  %v5227_v24 = vrot.slane %v11201_v3, 3  ;;  %v3496_v56 = vld [vmem:[#allocation3 + $0xb4] sm:$0x1] }
 0x2b2   : > { %v5065_v38 = vor.u32 %v5064_v36, %v5063_v28  ;;  %v2446_v62 = vmax.f32 %v2414_v5, 0.0 }
 0x2b3   : > { %v2932_v46 = vsel %vm10313_vm14, %v11206_v32, %v2931_v60  ;;  %v3000_v29 = vsel %vm10313_vm14, %v11206_v32, %v2999_v11  ;;  %v5066_v39 = vrot.slane %v4774_v21, 2  ;;  %v5067_v27 = vrot.slane %v11210_v4, 3  ;;  %v13608_v60 = vld [vmem:[#allocation37_spill] sm:$0xff] }
 0x2b4   : > { %v3827_v57 = vld [vmem:[#allocation3 + $0xa8] sm:$0x1]  ;;  %2933 = vst [vmem:[#allocation3 + $0xb4] sm:$0xe] %v2932_v46  ;;  %v5228_v53 = vsel %vm13366_vm13, %v5226_v43, %v5227_v24  ;;  %v2478_v50 = vpack.c.bf16 %v2446_v62, %v2446_v62  ;;  %v2724_v43 = vrot.slane %v11206_v32, 4 }
 0x2b5   : > { %v3828_v40 = vsel %vm10375_vm1, %v8318_v6, %v3827_v57  ;;  %v3198_v1 = vld [vmem:[#allocation3 + $0xb0] sm:$0x1]  ;;  %v3315_v17 = vld [vmem:[#allocation3 + $0xb0] sm:$0x2]  ;;  %v5068_v59 = vor.u32 %v5067_v27, %v5066_v39  ;;  %3001 = vst [vmem:[#allocation3 + $0xfc] sm:$0xe] %v3000_v29  ;;  %5283 = vrot.lane.b32.xlu1 %v5228_v53, %s9325_s15  ;;  %v1844_v57 = vadd.f32 %v13608_v60, %v10544_v15  ;;  %v2285_v60 = vpop.f32.mrf.mxu1 }
 0x2b6   : > { %v3531_v41 = vld [vmem:[#allocation3 + $0xb0] sm:$0x1]  ;;  %3829 = vst [vmem:[#allocation3 + $0xa8] sm:$0x1] %v3828_v40  ;;  %v3242_v33 = vrot.slane %v3198_v1, 7  ;;  %v2726_v36 = vshrl.u32 %v2478_v50, 16 }
 0x2b7   : > { %v3575_v13 = vrot.slane %v3531_v41, 6  ;;  %v3865_v6 = vld [vmem:[#allocation3 + $0xac] sm:$0x8]  ;;  %v2729_v8 = vshll.u32 %v2478_v50, 16  ;;  %v3514_v29 = vld [vmem:[#allocation3 + $0xfc] sm:$0x1] }
 0x2b8   : > { %v3316_v10 = vsel %vm10383_vm10, %v3242_v33, %v3315_v17  ;;  %v8340_v11 = vrot.slane %v3865_v6, 9  ;;  %v2728_v24 = vrot.slane %v2726_v36, 6  ;;  %v2935_v62 = vld [vmem:[#allocation3 + $0xbc] sm:$0x3]  ;;  %v4763_v6 = vrot.slane %v11132_v14, 2  ;;  %v13610_v36 = vld [vmem:[#allocation40_spill] sm:$0xff] }
 0x2b9   : > { %v3651_v12 = vsel %vm10388_vm0, %v3575_v13, %v3650_v47  ;;  %3317 = vst [vmem:[#allocation3 + $0xb0] sm:$0x2] %v3316_v10  ;;  %v5069_v47 = vsel %vm13607_vm2, %v5065_v38, %v5068_v59  ;;  %v2008_v10 = vadd.f32 %v10566_v20, %v1844_v57  ;;  %v2731_v5 = vrot.slane %v2729_v8, 7  ;;  %v3003_v20 = vld [vmem:[#allocation3 + $0x104] sm:$0x3]  ;;  %v2374_v57 = vpop.f32.mrf.mxu3  ;;  %vm13611_vm2 = vmmov %vm13603_vm12 }
 0x2ba   : > { %3652 = vst [vmem:[#allocation3 + $0xb0] sm:$0x4] %v3651_v12  ;;  %5172 = vrot.lane.b32.xlu0 %v5069_v47, %s9326_s11  ;;  %v4762_v38 = vrot.slane %v11129_v63, 1  ;;  %v4767_v47 = vrot.slane %v4765_v61, 1  ;;  %v4768_v50 = vrot.slane %v11135_v54, 2  ;;  %v4606_v63 = vrot.slane %v11190_v45, 1 }
 0x2bb   : > { %v3021_v40 = vld [vmem:[#allocation3 + $0xb4] sm:$0x4]  ;;  %v3163_v13 = vld [vmem:[#allocation3 + $0xb4] sm:$0x2]  ;;  %v2732_v32 = vor.u32 %v2731_v5, %v2728_v24  ;;  %v4776_v14 = vrot.slane %v4774_v21, 1  ;;  %v2097_v8 = vadd.f32 %v13610_v36, %v2008_v10 }
 0x2bc   : > { %v3354_v28 = vld [vmem:[#allocation3 + $0xb4] sm:$0x4]  ;;  %v8275_v1 = vrot.slane %v3021_v40, 9  ;;  %v3027_v34 = vld [vmem:[#allocation3 + $0xfc] sm:$0x4]  ;;  %v4771_v40 = vrot.slane %v11195_v35, 1 }
 0x2bd   : > { %v8297_v41 = vrot.slane %v3354_v28, 10  ;;  %v3360_v46 = vld [vmem:[#allocation3 + $0xfc] sm:$0x4]  ;;  %v8281_v12 = vrot.slane %v3027_v34, 9  ;;  %v3181_v39 = vld [vmem:[#allocation3 + $0xfc] sm:$0x2] }
 0x2be   : > { %v3164_v17 = vsel %vm10340_vm11, %v8275_v1, %v3163_v13  ;;  %v8303_v27 = vrot.slane %v3360_v46, 10  ;;  %v4772_v28 = vrot.slane %v11198_v18, 2  ;;  %v3689_v61 = vld [vmem:[#allocation3 + $0xb4] sm:$0x8]  ;;  %v2733_v1 = vsel %vm10328_vm5, %v2724_v43, %v2732_v32  ;;  %v3695_v34 = vld [vmem:[#allocation3 + $0xfc] sm:$0x8]  ;;  %v5268_v43 = vpop.permute.xlu0 %5267 }
 0x2bf   : > { %v3497_v15 = vsel %vm10334_vm9, %v8297_v41, %v3496_v56  ;;  %3165 = vst [vmem:[#allocation3 + $0xb4] sm:$0x2] %v3164_v17  ;;  %v3182_v59 = vsel %vm10340_vm11, %v8281_v12, %v3181_v39  ;;  %v4607_v56 = vrot.slane %v11201_v3, 1  ;;  %v2734_v54 = vrot.slane %v2732_v32, 4 }
 0x2c0   : > { %3498 = vst [vmem:[#allocation3 + $0xb4] sm:$0x1] %v3497_v15  ;;  %v3515_v53 = vsel %vm10334_vm9, %v8303_v27, %v3514_v29  ;;  %v4769_v41 = vor.u32 %v4768_v50, %v4767_v47  ;;  %v4777_v13 = vrot.slane %v11210_v4, 2  ;;  %v8319_v15 = vrot.slane %v3689_v61, 11  ;;  %v3671_v61 = vld [vmem:[#allocation3 + $0x104] sm:$0x4] }
 0x2c1   : > { %v4005_v33 = vld [vmem:[#allocation3 + $0xb0] sm:$0x4]  ;;  %3183 = vst [vmem:[#allocation3 + $0xfc] sm:$0x2] %v3182_v59  ;;  %v4608_v45 = vsel %vm13609_vm15, %v4606_v63, %v4607_v56  ;;  %v2936_v21 = vsel %vm10347_vm4, %v2734_v54, %v2935_v62  ;;  %v3004_v17 = vsel %vm10347_vm4, %v2734_v54, %v3003_v20  ;;  %vm13612_vm15 = vsmask.f32 6400 }
 0x2c2   : > { %v4006_v25 = vsel %vm10424_vm3, %v8340_v11, %v4005_v33  ;;  %3516 = vst [vmem:[#allocation3 + $0xfc] sm:$0x1] %v3515_v53  ;;  %v4764_v11 = vor.u32 %v4763_v6, %v4762_v38  ;;  %v5157_v33 = vpop.permute.xlu2 %5156  ;;  %4663 = vrot.lane.b32.xlu0 %v4608_v45, %s9325_s15  ;;  %v4773_v29 = vor.u32 %v4772_v28, %v4771_v40  ;;  %v4937_v39 = vrot.slane %v10674_v0, 2  ;;  %v13614_v53 = vld [vmem:[#allocation39_spill] sm:$0xff]  ;;  %v9300_v6 = vld [vmem:[#allocation3 + $0xc] sm:$0xff] }
 0x2c3   : > { %4007 = vst [vmem:[#allocation3 + $0xb0] sm:$0x4] %v4006_v25  ;;  %v2375_v25 = vadd.f32 %v2374_v57, %v2285_v60  ;;  %v4778_v10 = vor.u32 %v4777_v13, %v4776_v14  ;;  %v8325_v24 = vrot.slane %v3695_v34, 11  ;;  %v1846_v62 = vadd.f32 %v13614_v53, %v10586_v7  ;;  %v3653_v63 = vld [vmem:[#allocation3 + $0xbc] sm:$0x4]  ;;  %v9201_v7 = vld [vmem:[%s13348_s2 + $0x68] sm:$0xff]  ;;  %v4538_v57 = vpop.permute.xlu1 %4537 }
 0x2c4   : > { %2934 = vst.msk [vmem:[#allocation3 + $0xb8] sm:$0xf] %vm13603_vm12, %v2733_v1  ;;  %v4770_v46 = vsel %vm13612_vm15, %v4764_v11, %v4769_v41  ;;  %vm13613_vm12 = vmmov %vm13612_vm15  ;;  %v4936_v47 = vrot.slane %v9300_v6, 2  ;;  %vm13365_vm15 = vcmask 1045504   ;;  %v2938_v34 = vld [vmem:[#allocation3 + $0xc0] sm:$0xe]  ;;  %6103 = vmatpush.bf16.msra.mxu3 %v9201_v7 }
 0x2c5   : > { %3002 = vst.msk [vmem:[#allocation3 + $0x100] sm:$0xf] %vm13611_vm2, %v2733_v1  ;;  %4904 = vrot.lane.b32.xlu2 %v4770_v46, %s9327_s14  ;;  %v2415_v12 = vadd.f32 %v2375_v25, %v2097_v8  ;;  %v4779_v38 = vsel %vm13613_vm12, %v4773_v29, %v4778_v10  ;;  %vm13364_vm2 = vcmask 261120   ;;  %v13615_v1 = vld [vmem:[#allocation9_spill] sm:$0xff]  ;;  %vm13616_vm12 = vcmask 523264  }
 0x2c6   : > { %2937 = vst [vmem:[#allocation3 + $0xbc] sm:$0x3] %v2936_v21  ;;  %4906 = vrot.lane.b32.xlu1 %v4779_v38, %s9327_s14  ;;  %v4938_v50 = vsel %vm13365_vm15, %v4936_v47, %v4937_v39  ;;  %v2010_v54 = vadd.f32 %v13615_v1, %v1846_v62  ;;  %v2984_v21 = vld [vmem:[#allocation3 + $0xf0] sm:$0xe]  ;;  %v5313_v29 = vsel %vm13364_vm2, %v9300_v6, %v4538_v57  ;;  %v4389_v53 = vrot.slane %v11210_v4, 1  ;;  %v4891_v62 = vpop.permute.xlu0 %4890  ;;  %v13619_v57 = vld [vmem:[#allocation43_spill] sm:$0xff] }
 0x2c7   : > { %v3830_v27 = vld [vmem:[#allocation3 + $0xb4] sm:$0x1]  ;;  %3005 = vst [vmem:[#allocation3 + $0x104] sm:$0x3] %v3004_v17  ;;  %v2447_v59 = vmax.f32 %v2415_v12, 0.0  ;;  %v5470_v11 = vsel %vm13364_vm2, %v4938_v50, %v5157_v33  ;;  %vm13617_vm2 = vcmask 523264  }
 0x2c8   : > { %v3831_v5 = vsel %vm10375_vm1, %v8319_v15, %v3830_v27  ;;  %v11288_v25 = vsel %vm13616_vm12, %v5470_v11, %v5268_v43  ;;  %v4384_v27 = vrot.slane %v11198_v18, 1  ;;  %v9229_v43 = vld [vmem:[%s13348_s2 + $0x148] sm:$0xff]  ;;  %vm13367_vm12 = vcmask 785408   ;;  %v9195_v18 = vld [vmem:[%s13348_s2 + $0x38] sm:$0xff] }
 0x2c9   : > { %3832 = vst [vmem:[#allocation3 + $0xb4] sm:$0x1] %v3831_v5  ;;  %v3848_v20 = vld [vmem:[#allocation3 + $0xfc] sm:$0x1]  ;;  %v2479_v32 = vpack.c.bf16 %v2447_v59, %v2447_v59  ;;  %v4061_v5 = vld [vmem:[#allocation3 + $0x80] sm:$0x7]  ;;  %8520 = vmatmul.msk.bf16.vlgmr.msrb.gmra.mxu2 %vm13367_vm12, %v11288_v25  ;;  %6012 = vmatpush.bf16.msra.mxu1 %v9195_v18  ;;  %v2099_v11 = vadd.f32 %v13619_v57, %v2010_v54 }
 0x2ca   : > { %v3849_v0 = vsel %vm10375_vm1, %v8325_v24, %v3848_v20  ;;  %v4648_v41 = vpop.permute.xlu2 %4647  ;;  %v11299_v24 = vld [vmem:[#allocation3 + $0x78] sm:$0xff]  ;;  %v4385_v6 = vor.u32 %v4384_v27, %v11195_v35  ;;  %v4237_v47 = vunpack.c.l.b16 %v4061_v5  ;;  %6396 = vmatpush.bf16.msra.mxu2 %v9229_v43  ;;  %vm13618_vm15 = vsmask.f32 7424  ;;  %v3499_v18 = vld [vmem:[#allocation3 + $0xc0] sm:$0x1] }
 0x2cb   : > { %3850 = vst [vmem:[#allocation3 + $0xfc] sm:$0x1] %v3849_v0  ;;  %v2736_v56 = vshrl.u32 %v2479_v32, 16  ;;  %v2739_v60 = vshll.u32 %v2479_v32, 16  ;;  %v2287_v0 = vpop.f32.mrf.mxu1  ;;  %v2376_v32 = vpop.f32.mrf.mxu3  ;;  %v11336_v1 = vshrl.u32 %v11299_v24, 16  ;;  %v11352_v27 = vld [vmem:[#allocation3 + $0x18] sm:$0xff] }
 0x2cc   : > { %v4390_v35 = vsel %vm13618_vm15, %v4385_v6, %v4389_v53  ;;  %v3872_v54 = vld [vmem:[#allocation3 + $0x100] sm:$0x8]  ;;  %v4939_v43 = vrot.slane %v11352_v27, 2  ;;  %v3511_v6 = vld [vmem:[#allocation3 + $0xf0] sm:$0x1] }
 0x2cd   : > { %v3199_v40 = vld [vmem:[#allocation3 + $0xbc] sm:$0x1]  ;;  %v3318_v28 = vld [vmem:[#allocation3 + $0xbc] sm:$0x2]  ;;  %v2738_v33 = vrot.slane %v2736_v56, 6  ;;  %v2741_v15 = vrot.slane %v2739_v60, 7  ;;  %v11322_v56 = vpack.c.b16 %v4237_v47, %v4237_v47  ;;  %4553 = vrot.lane.b32.xlu2 %v4390_v35, %s9326_s11 }
 0x2ce   : > { %v3532_v14 = vld [vmem:[#allocation3 + $0xbc] sm:$0x1]  ;;  %v3205_v45 = vld [vmem:[#allocation3 + $0x104] sm:$0x1]  ;;  %v3243_v36 = vrot.slane %v3199_v40, 7  ;;  %v11325_v60 = vshll.u32 %v11299_v24, 16 }
 0x2cf   : > { %v3336_v8 = vld [vmem:[#allocation3 + $0x104] sm:$0x2]  ;;  %v3576_v13 = vrot.slane %v3532_v14, 6  ;;  %v3249_v17 = vrot.slane %v3205_v45, 7  ;;  %v3538_v46 = vld [vmem:[#allocation3 + $0x104] sm:$0x1]  ;;  %v11303_v59 = vor.u32 %v2741_v15, %v2738_v33  ;;  %v2377_v14 = vadd.f32 %v2376_v32, %v2287_v0 }
 0x2d0   : > { %v3319_v10 = vsel %vm10383_vm10, %v3243_v36, %v3318_v28  ;;  %v3582_v12 = vrot.slane %v3538_v46, 6  ;;  %v3866_v40 = vld [vmem:[#allocation3 + $0xb8] sm:$0x8]  ;;  %v5229_v28 = vrot.slane %v11299_v24, 3  ;;  %v11340_v45 = vshll.u32 %v11322_v56, 16 }
 0x2d1   : > { %v3654_v39 = vsel %vm10388_vm0, %v3576_v13, %v3653_v63  ;;  %3320 = vst [vmem:[#allocation3 + $0xbc] sm:$0x2] %v3319_v10  ;;  %v3337_v38 = vsel %vm10383_vm10, %v3249_v17, %v3336_v8  ;;  %v2939_v4 = vsel %vm10313_vm14, %v11303_v59, %v2938_v34  ;;  %v2985_v50 = vsel %vm10313_vm14, %v11303_v59, %v2984_v21  ;;  %v13622_v35 = vld [vmem:[#allocation42_spill] sm:$0xff] }
 0x2d2   : > { %3338 = vst [vmem:[#allocation3 + $0x104] sm:$0x2] %v3337_v38  ;;  %v3672_v20 = vsel %vm10388_vm0, %v3582_v12, %v3671_v61  ;;  %v5357_v63 = vsel %vm13617_vm2, %v5313_v29, %v4648_v41  ;;  %v5230_v61 = vrot.slane %v11322_v56, 3  ;;  %v4396_v41 = vrot.slane %v11325_v60, 1  ;;  %v11342_v8 = vpop.permute.xlu2 %5269  ;;  %vm13620_vm2 = vmmov %vm13618_vm15 }
 0x2d3   : > { %3655 = vst [vmem:[#allocation3 + $0xbc] sm:$0x4] %v3654_v39  ;;  %v11328_v7 = vsel %vm13367_vm12, %v5357_v63, %v4891_v62  ;;  %v2416_v36 = vadd.f32 %v2377_v14, %v2099_v11  ;;  %v4401_v21 = vrot.slane %v11340_v45, 1  ;;  %v8341_v17 = vrot.slane %v3866_v40, 9  ;;  %v13621_v63 = vld [vmem:[#allocation49_spill] sm:$0xff] }
 0x2d4   : > { %3673 = vst [vmem:[#allocation3 + $0x104] sm:$0x4] %v3672_v20  ;;  %5756 = vmatmul.bf16.vlgmr.msrb.gmra.mxu0 %v11328_v7  ;;  %v5231_v13 = vsel %vm13366_vm13, %v5229_v28, %v5230_v61  ;;  %v4397_v34 = vor.u32 %v4396_v41, %v11336_v1  ;;  %v8347_v33 = vrot.slane %v3872_v54, 9  ;;  %v1849_v57 = vadd.f32 %v13622_v35, %v13621_v63 }
 0x2d5   : > { %2940 = vst [vmem:[#allocation3 + $0xc0] sm:$0xe] %v2939_v4  ;;  %5285 = vrot.lane.b32.xlu0 %v5231_v13, %s9325_s15  ;;  %v2448_v46 = vmax.f32 %v2416_v36, 0.0  ;;  %v2743_v41 = vrot.slane %v11303_v59, 4  ;;  %v4940_v13 = vrot.slane %v10702_v23, 2  ;;  %v4783_v59 = vshrl.u32 %v11322_v56, 16 }
 0x2d6   : > { %2986 = vst [vmem:[#allocation3 + $0xf0] sm:$0xe] %v2985_v50  ;;  %v4402_v29 = vsel %vm13620_vm2, %v4397_v34, %v4401_v21  ;;  %v2942_v23 = vld [vmem:[#allocation3 + $0xc8] sm:$0x3]  ;;  %vm13624_vm15 = vcmask 257024  }
 0x2d7   : > { %4555 = vrot.lane.b32.xlu1 %v4402_v29, %s9326_s11  ;;  %v2480_v39 = vpack.c.bf16 %v2448_v46, %v2448_v46  ;;  %v9223_v46 = vld [vmem:[%s13348_s2 + $0x118] sm:$0xff]  ;;  %v5070_v29 = vrot.slane %v11336_v1, 2  ;;  %vm13625_vm2 = vmmov %vm13624_vm15  ;;  %vm13626_vm13 = vsmask.f32 5376 }
 0x2d8   : > { %6305 = vmatpush.bf16.msra.mxu0 %v9223_v46 }
 0x2d9   : > { %v2745_v47 = vshrl.u32 %v2480_v39, 16  ;;  %v2748_v50 = vshll.u32 %v2480_v39, 16  ;;  %v11381_v39 = vld [vmem:[#allocation3 + $0x84] sm:$0xff] }
 0x2da   : > { %v4008_v15 = vld [vmem:[#allocation3 + $0xbc] sm:$0x4] }
 0x2db   : > { %v4009_v10 = vsel %vm10424_vm3, %v8341_v17, %v4008_v15  ;;  %v4026_v12 = vld [vmem:[#allocation3 + $0x104] sm:$0x4]  ;;  %v2747_v61 = vrot.slane %v2745_v47, 6  ;;  %v2750_v17 = vrot.slane %v2748_v50, 7  ;;  %v11376_v15 = vpop.permute.xlu2 %4892 }
 0x2dc   : > { %v4027_v5 = vsel %vm10424_vm3, %v8347_v33, %v4026_v12  ;;  %4010 = vst [vmem:[#allocation3 + $0xbc] sm:$0x4] %v4009_v10  ;;  %v3022_v38 = vld [vmem:[#allocation3 + $0xc0] sm:$0x4]  ;;  %v3166_v53 = vld [vmem:[#allocation3 + $0xc0] sm:$0x2] }
 0x2dd   : > { %4028 = vst [vmem:[#allocation3 + $0x104] sm:$0x4] %v4027_v5  ;;  %v3026_v62 = vld [vmem:[#allocation3 + $0xf0] sm:$0x4]  ;;  %v8276_v20 = vrot.slane %v3022_v38, 9  ;;  %v5071_v10 = vrot.slane %v11325_v60, 3 }
 0x2de   : > { %v8280_v0 = vrot.slane %v3026_v62, 9  ;;  %v3178_v32 = vld [vmem:[#allocation3 + $0xf0] sm:$0x2]  ;;  %v3355_v4 = vld [vmem:[#allocation3 + $0xc0] sm:$0x4]  ;;  %v5074_v12 = vrot.slane %v11340_v45, 3 }
 0x2df   : > { %v3167_v11 = vsel %vm10340_vm11, %v8276_v20, %v3166_v53  ;;  %v3359_v40 = vld [vmem:[#allocation3 + $0xf0] sm:$0x4]  ;;  %v8298_v28 = vrot.slane %v3355_v4, 10  ;;  %v11361_v14 = vld [vmem:[#allocation3 + $0xc0] sm:$0x8]  ;;  %v13623_v5 = vld [vmem:[#allocation12_spill] sm:$0xff]  ;;  %v2751_v53 = vor.u32 %v2750_v17, %v2747_v61  ;;  %v5072_v47 = vor.u32 %v5071_v10, %v5070_v29  ;;  %v2379_v61 = vpop.f32.mrf.mxu3  ;;  %v5159_v10 = vpop.permute.xlu1 %5158 }
 0x2e0   : > { %3168 = vst [vmem:[#allocation3 + $0xc0] sm:$0x2] %v3167_v11  ;;  %v3179_v54 = vsel %vm10340_vm11, %v8280_v0, %v3178_v32  ;;  %v8302_v36 = vrot.slane %v3359_v40, 10  ;;  %v8320_v21 = vrot.slane %v11361_v14, 11  ;;  %v2013_v38 = vadd.f32 %v13623_v5, %v1849_v57  ;;  %v4064_v20 = vld [vmem:[#allocation3 + $0x8c] sm:$0x7] }
 0x2e1   : > { %3180 = vst [vmem:[#allocation3 + $0xf0] sm:$0x2] %v3179_v54  ;;  %v3500_v34 = vsel %vm10334_vm9, %v8298_v28, %v3499_v18  ;;  %v5073_v18 = vrot.slane %v4783_v59, 2  ;;  %v4780_v62 = vrot.slane %v11336_v1, 1  ;;  %v4781_v0 = vrot.slane %v11325_v60, 2  ;;  %v2290_v60 = vpop.f32.mrf.mxu1 }
 0x2e2   : > { %3501 = vst [vmem:[#allocation3 + $0xc0] sm:$0x1] %v3500_v34  ;;  %v3512_v33 = vsel %vm10334_vm9, %v8302_v36, %v3511_v6  ;;  %v2988_v6 = vld [vmem:[#allocation3 + $0xf8] sm:$0x3]  ;;  %v4785_v32 = vrot.slane %v4783_v59, 1  ;;  %v4786_v4 = vrot.slane %v11340_v45, 2  ;;  %v2752_v63 = vsel %vm10328_vm5, %v2743_v41, %v2751_v53 }
 0x2e3   : > { %3513 = vst [vmem:[#allocation3 + $0xf0] sm:$0x1] %v3512_v33  ;;  %v3694_v50 = vld [vmem:[#allocation3 + $0xf0] sm:$0x8]  ;;  %v2753_v35 = vrot.slane %v2751_v53, 4  ;;  %v5075_v57 = vor.u32 %v5074_v12, %v5073_v18  ;;  %v4238_v11 = vunpack.c.l.b16 %v4064_v20  ;;  %v4782_v40 = vor.u32 %v4781_v0, %v4780_v62  ;;  %v13628_v33 = vld [vmem:[#allocation46_spill] sm:$0xff] }
 0x2e4   : > { %2941 = vst.msk [vmem:[#allocation3 + $0xc4] sm:$0xf] %vm13624_vm15, %v2752_v63  ;;  %v4787_v28 = vor.u32 %v4786_v4, %v4785_v32  ;;  %v11391_v1 = vshrl.u32 %v11381_v39, 16  ;;  %v11394_v14 = vshll.u32 %v11381_v39, 16  ;;  %v8324_v34 = vrot.slane %v3694_v50, 11  ;;  %v13630_v32 = vld [vmem:[#allocation13_spill] sm:$0xff] }
 0x2e5   : > { %v2943_v45 = vsel %vm10347_vm4, %v2753_v35, %v2942_v23  ;;  %2987 = vst.msk [vmem:[#allocation3 + $0xf4] sm:$0xf] %vm13625_vm2, %v2752_v63  ;;  %v2989_v41 = vsel %vm10347_vm4, %v2753_v35, %v2988_v6  ;;  %v5076_v54 = vsel %vm13626_vm13, %v5072_v47, %v5075_v57  ;;  %v11402_v36 = vpack.c.b16 %v4238_v11, %v4238_v11  ;;  %v13631_v4 = vld [vmem:[#allocation45_spill] sm:$0xff]  ;;  %v11427_v63 = vpop.permute.xlu2 %4541  ;;  %v11430_v57 = vpop.permute.xlu0 %4539 }
 0x2e6   : > { %2944 = vst [vmem:[#allocation3 + $0xc8] sm:$0x3] %v2943_v45  ;;  %5174 = vrot.lane.b32.xlu2 %v5076_v54, %s9326_s11  ;;  %vm13627_vm15 = vsmask.f32 6400  ;;  %v5077_v46 = vrot.slane %v11391_v1, 2  ;;  %v5078_v59 = vrot.slane %v11394_v14, 3  ;;  %v2102_v23 = vadd.f32 %v13628_v33, %v2013_v38 }
 0x2e7   : > { %v4788_v17 = vsel %vm13627_vm15, %v4782_v40, %v4787_v28  ;;  %2990 = vst [vmem:[#allocation3 + $0xf8] sm:$0x3] %v2989_v41  ;;  %v11411_v12 = vshll.u32 %v11402_v36, 16  ;;  %v4792_v5 = vshrl.u32 %v11402_v36, 16  ;;  %v2380_v53 = vadd.f32 %v2379_v61, %v2290_v60  ;;  %v3656_v28 = vld [vmem:[#allocation3 + $0xc8] sm:$0x4] }
 0x2e8   : > { %4908 = vrot.lane.b32.xlu0 %v4788_v17, %s9327_s14  ;;  %vm13629_vm13 = vcmask 1045504   ;;  %v1851_v50 = vadd.f32 %v13631_v4, %v13630_v32  ;;  %vm13632_vm2 = vcmask 261120   ;;  %v4609_v40 = vrot.slane %v11299_v24, 1  ;;  %v3668_v45 = vld [vmem:[#allocation3 + $0xf8] sm:$0x4] }
 0x2e9   : > { %v3833_v29 = vld [vmem:[#allocation3 + $0xc0] sm:$0x1]  ;;  %v4941_v20 = vsel %vm13629_vm13, %v4939_v43, %v4940_v13  ;;  %v5080_v6 = vrot.slane %v4792_v5, 2  ;;  %v5081_v47 = vrot.slane %v11411_v12, 3  ;;  %v2417_v0 = vadd.f32 %v2380_v53, %v2102_v23 }
 0x2ea   : > { %v3834_v18 = vsel %vm10375_vm1, %v8320_v21, %v3833_v29  ;;  %v3845_v62 = vld [vmem:[#allocation3 + $0xf0] sm:$0x1]  ;;  %v5473_v21 = vsel %vm13632_vm2, %v4941_v20, %v5159_v10  ;;  %v4610_v43 = vrot.slane %v11322_v56, 1  ;;  %v5079_v13 = vor.u32 %v5078_v59, %v5077_v46 }
 0x2eb   : > { %3835 = vst [vmem:[#allocation3 + $0xc0] sm:$0x1] %v3834_v18  ;;  %v3846_v38 = vsel %vm10375_vm1, %v8324_v34, %v3845_v62  ;;  %v5082_v35 = vor.u32 %v5081_v47, %v5080_v6  ;;  %v2449_v11 = vmax.f32 %v2417_v0, 0.0  ;;  %vm13633_vm15 = vsmask.f32 5376  ;;  %v2292_v0 = vpop.f32.mrf.mxu1 }
 0x2ec   : > { %3847 = vst [vmem:[#allocation3 + $0xf0] sm:$0x1] %v3846_v38  ;;  %vm13634_vm13 = vcmask 1046528   ;;  %vm13635_vm2 = vcmask 523264   ;;  %v2015_v46 = vadd.f32 %v10711_v26, %v1851_v50  ;;  %v2945_v47 = vld [vmem:[#allocation3 + $0xcc] sm:$0xe]  ;;  %v2381_v26 = vpop.f32.mrf.mxu3 }
 0x2ed   : > { %v3200_v60 = vld [vmem:[#allocation3 + $0xc8] sm:$0x1]  ;;  %v5083_v41 = vsel %vm13633_vm15, %v5079_v13, %v5082_v35  ;;  %v2481_v54 = vpack.c.bf16 %v2449_v11, %v2449_v11  ;;  %v4611_v34 = vsel %vm13634_vm13, %v4609_v40, %v4610_v43  ;;  %v3321_v23 = vld [vmem:[#allocation3 + $0xc8] sm:$0x2]  ;;  %v11439_v24 = vsel %vm13635_vm2, %v5473_v21, %v11342_v8  ;;  %v2968_v13 = vld [vmem:[#allocation3 + $0xe4] sm:$0xe] }
 0x2ee   : > { %v3533_v61 = vld [vmem:[#allocation3 + $0xc8] sm:$0x1]  ;;  %v3204_v17 = vld [vmem:[#allocation3 + $0xf8] sm:$0x1]  ;;  %v3244_v33 = vrot.slane %v3200_v60, 7  ;;  %5176 = vrot.lane.b32.xlu1 %v5083_v41, %s9326_s11  ;;  %4665 = vrot.lane.b32.xlu2 %v4611_v34, %s9325_s15  ;;  %v4408_v8 = vrot.slane %v11394_v14, 1  ;;  %v2382_v41 = vadd.f32 %v2381_v26, %v2292_v0  ;;  %v11460_v34 = vpop.permute.xlu2 %5162 }
 0x2ef   : > { %v3577_v29 = vrot.slane %v3533_v61, 6  ;;  %v3248_v59 = vrot.slane %v3204_v17, 7  ;;  %v3537_v10 = vld [vmem:[#allocation3 + $0xf8] sm:$0x1]  ;;  %v2755_v53 = vshrl.u32 %v2481_v54, 16  ;;  %v2758_v18 = vshll.u32 %v2481_v54, 16  ;;  %8521 = vmatmul.msk.bf16.gmra.mxu2 %vm13367_vm12, %v11439_v24  ;;  %v4650_v54 = vpop.permute.xlu1 %4649 }
 0x2f0   : > { %v3322_v62 = vsel %vm10383_vm10, %v3244_v33, %v3321_v23  ;;  %v3333_v20 = vld [vmem:[#allocation3 + $0xf8] sm:$0x2]  ;;  %v3581_v38 = vrot.slane %v3537_v10, 6  ;;  %v4413_v21 = vrot.slane %v11411_v12, 1  ;;  %v4409_v35 = vor.u32 %v4408_v8, %v11391_v1 }
 0x2f1   : > { %v3657_v6 = vsel %vm10388_vm0, %v3577_v29, %v3656_v28  ;;  %3323 = vst [vmem:[#allocation3 + $0xc8] sm:$0x2] %v3322_v62  ;;  %v3334_v32 = vsel %vm10383_vm10, %v3248_v59, %v3333_v20  ;;  %v2757_v4 = vrot.slane %v2755_v53, 6  ;;  %v2760_v50 = vrot.slane %v2758_v18, 7  ;;  %v13636_v40 = vld [vmem:[#allocation50_spill] sm:$0xff]  ;;  %v5161_v29 = vpop.permute.xlu0 %5160  ;;  %v11476_v20 = vld [vmem:[#allocation3 + $0x24] sm:$0xff] }
 0x2f2   : > { %3335 = vst [vmem:[#allocation3 + $0xf8] sm:$0x2] %v3334_v32  ;;  %v3669_v43 = vsel %vm10388_vm0, %v3581_v38, %v3668_v45  ;;  %v4613_v11 = vrot.slane %v11402_v36, 1  ;;  %v2104_v28 = vadd.f32 %v13636_v40, %v2015_v46  ;;  %v4612_v61 = vrot.slane %v11381_v39, 1  ;;  %v3867_v59 = vld [vmem:[#allocation3 + $0xc4] sm:$0x8] }
 0x2f3   : > { %3658 = vst [vmem:[#allocation3 + $0xc8] sm:$0x4] %v3657_v6  ;;  %v11457_v60 = vor.u32 %v2760_v50, %v2757_v4  ;;  %vm13637_vm15 = vsmask.f32 7424  ;;  %v4943_v10 = vrot.slane %v10782_v44, 2  ;;  %vm13638_vm2 = vcmask 261120  }
 0x2f4   : > { %3670 = vst [vmem:[#allocation3 + $0xf8] sm:$0x4] %v3669_v43  ;;  %v4414_v17 = vsel %vm13637_vm15, %v4409_v35, %v4413_v21  ;;  %v4614_v23 = vsel %vm13634_vm13, %v4612_v61, %v4613_v11  ;;  %v2418_v46 = vadd.f32 %v2382_v41, %v2104_v28  ;;  %v3871_v53 = vld [vmem:[#allocation3 + $0xf4] sm:$0x8]  ;;  %v5315_v62 = vsel %vm13638_vm2, %v11352_v27, %v11430_v57  ;;  %v3508_v35 = vld [vmem:[#allocation3 + $0xe4] sm:$0x1] }
 0x2f5   : > { %v2946_v45 = vsel %vm10313_vm14, %v11457_v60, %v2945_v47  ;;  %v2969_v33 = vsel %vm10313_vm14, %v11457_v60, %v2968_v13  ;;  %4557 = vrot.lane.b32.xlu0 %v4414_v17, %s9326_s11  ;;  %v4942_v38 = vrot.slane %v11476_v20, 2  ;;  %v8342_v6 = vrot.slane %v3867_v59, 9  ;;  %v3502_v13 = vld [vmem:[#allocation3 + $0xcc] sm:$0x1] }
 0x2f6   : > { %2947 = vst [vmem:[#allocation3 + $0xcc] sm:$0xe] %v2946_v45  ;;  %4667 = vrot.lane.b32.xlu1 %v4614_v23, %s9325_s15  ;;  %v2450_v18 = vmax.f32 %v2418_v46, 0.0  ;;  %v8346_v8 = vrot.slane %v3871_v53, 9  ;;  %vm13639_vm15 = vcmask 1045504   ;;  %vm13640_vm13 = vcmask 523264   ;;  %v11490_v17 = vpop.permute.xlu2 %4653 }
 0x2f7   : > { %2970 = vst [vmem:[#allocation3 + $0xe4] sm:$0xe] %v2969_v33  ;;  %v4944_v26 = vsel %vm13639_vm15, %v4942_v38, %v4943_v10  ;;  %v5359_v4 = vsel %vm13640_vm13, %v5315_v62, %v4650_v54  ;;  %v5272_v41 = vpop.permute.xlu1 %5271  ;;  %vm13641_vm15 = vmmov %vm13640_vm13  ;;  %v2949_v62 = vld [vmem:[#allocation3 + $0xd4] sm:$0x3]  ;;  %v2972_v38 = vld [vmem:[#allocation3 + $0xec] sm:$0x3] }
 0x2f8   : > { %v2482_v47 = vpack.c.bf16 %v2450_v18, %v2450_v18  ;;  %v5476_v57 = vsel %vm13638_vm2, %v4944_v26, %v5161_v29  ;;  %v11488_v54 = vsel %vm13367_vm12, %v5359_v4, %v11376_v15  ;;  %vm13642_vm13 = vmmov %vm13638_vm2  ;;  %vm13643_vm2 = vcmask 1044480  }
 0x2f9   : > { %v11493_v29 = vsel %vm13641_vm15, %v5476_v57, %v5272_v41  ;;  %5761 = vmatmul.bf16.gmra.mxu0 %v11488_v54  ;;  %v11496_v59 = vpop.permute.xlu0 %4651  ;;  %vm13644_vm15 = vcmask 257024  }
 0x2fa   : > { %v4011_v0 = vld [vmem:[#allocation3 + $0xc8] sm:$0x4]  ;;  %v2764_v50 = vshrl.u32 %v2482_v47, 16  ;;  %v2767_v21 = vshll.u32 %v2482_v47, 16 }
 0x2fb   : > { %v4012_v44 = vsel %vm10424_vm3, %v8342_v6, %v4011_v0  ;;  %v4023_v32 = vld [vmem:[#allocation3 + $0xf8] sm:$0x4]  ;;  %v2762_v6 = vrot.slane %v11457_v60, 4 }
 0x2fc   : > { %v4024_v27 = vsel %vm10424_vm3, %v8346_v8, %v4023_v32  ;;  %4013 = vst [vmem:[#allocation3 + $0xc8] sm:$0x4] %v4012_v44  ;;  %v2766_v61 = vrot.slane %v2764_v50, 6  ;;  %v2769_v46 = vrot.slane %v2767_v21, 7  ;;  %v11505_v8 = vld [vmem:[#allocation3 + $0x30] sm:$0xff]  ;;  %v9194_v32 = vld [vmem:[%s13348_s2 + $0x30] sm:$0xff] }
 0x2fd   : > { %4025 = vst [vmem:[#allocation3 + $0xf8] sm:$0x4] %v4024_v27  ;;  %v3023_v43 = vld [vmem:[#allocation3 + $0xcc] sm:$0x4]  ;;  %v3169_v28 = vld [vmem:[#allocation3 + $0xcc] sm:$0x2]  ;;  %6013 = vmatpush.bf16.msra.mxu1 %v9194_v32 }
 0x2fe   : > { %v3025_v11 = vld [vmem:[#allocation3 + $0xe4] sm:$0x4]  ;;  %v8277_v40 = vrot.slane %v3023_v43, 9  ;;  %v3356_v33 = vld [vmem:[#allocation3 + $0xcc] sm:$0x4]  ;;  %v4945_v0 = vrot.slane %v11505_v8, 2  ;;  %v2770_v26 = vor.u32 %v2769_v46, %v2766_v61 }
 0x2ff   : > { %v8279_v45 = vrot.slane %v3025_v11, 9  ;;  %v3358_v23 = vld [vmem:[#allocation3 + $0xe4] sm:$0x4]  ;;  %v3175_v53 = vld [vmem:[#allocation3 + $0xe4] sm:$0x2]  ;;  %v8299_v18 = vrot.slane %v3356_v33, 10  ;;  %8522 = vmatmul.msk.bf16.gmra.mxu2 %vm13367_vm12, %v11493_v29 }
 0x300   : > { %v3170_v10 = vsel %vm10340_vm11, %v8277_v40, %v3169_v28  ;;  %v8301_v15 = vrot.slane %v3358_v23, 10  ;;  %v11508_v44 = vld [vmem:[#allocation3 + $0x90] sm:$0xff]  ;;  %v5232_v50 = vrot.slane %v11381_v39, 3  ;;  %v5233_v21 = vrot.slane %v11402_v36, 3  ;;  %v4067_v27 = vld [vmem:[#allocation3 + $0x98] sm:$0x7] }
 0x301   : > { %3171 = vst [vmem:[#allocation3 + $0xcc] sm:$0x2] %v3170_v10  ;;  %v3176_v47 = vsel %vm10340_vm11, %v8279_v45, %v3175_v53  ;;  %v3503_v4 = vsel %vm10334_vm9, %v8299_v18, %v3502_v13  ;;  %v2771_v57 = vsel %vm10328_vm5, %v2762_v6, %v2770_v26  ;;  %v2772_v43 = vrot.slane %v2770_v26, 4  ;;  %v9222_v13 = vld [vmem:[%s13348_s2 + $0x110] sm:$0xff]  ;;  %v9200_v39 = vld [vmem:[%s13348_s2 + $0x60] sm:$0xff]  ;;  %v4895_v53 = vpop.permute.xlu1 %4894  ;;  %v5274_v32 = vpop.permute.xlu0 %5273 }
 0x302   : > { %3177 = vst [vmem:[#allocation3 + $0xe4] sm:$0x2] %v3176_v47  ;;  %v3509_v60 = vsel %vm10334_vm9, %v8301_v15, %v3508_v35  ;;  %v4239_v11 = vunpack.c.l.b16 %v4067_v27  ;;  %v11522_v40 = vshrl.u32 %v11508_v44, 16  ;;  %v5317_v35 = vsel %vm13642_vm13, %v11476_v20, %v11427_v63  ;;  %v3691_v28 = vld [vmem:[#allocation3 + $0xcc] sm:$0x8]  ;;  %6306 = vmatpush.bf16.msra.mxu0 %v9222_v13  ;;  %6104 = vmatpush.bf16.msra.mxu3 %v9200_v39  ;;  %vm13645_vm13 = vmmov %vm13644_vm15 }
 0x303   : > { %3504 = vst [vmem:[#allocation3 + $0xcc] sm:$0x1] %v3503_v4  ;;  %v5234_v61 = vsel %vm13643_vm2, %v5232_v50, %v5233_v21  ;;  %v11535_v41 = vshll.u32 %v11508_v44, 16  ;;  %v4789_v45 = vrot.slane %v11391_v1, 1  ;;  %v3693_v33 = vld [vmem:[#allocation3 + $0xe4] sm:$0x8]  ;;  %v2950_v23 = vsel %vm10347_vm4, %v2772_v43, %v2949_v62 }
 0x304   : > { %3510 = vst [vmem:[#allocation3 + $0xe4] sm:$0x1] %v3509_v60  ;;  %v2973_v46 = vsel %vm10347_vm4, %v2772_v43, %v2972_v38  ;;  %5287 = vrot.lane.b32.xlu2 %v5234_v61, %s9325_s15  ;;  %v11544_v63 = vpack.c.b16 %v4239_v11, %v4239_v11  ;;  %v5084_v20 = vrot.slane %v11522_v40, 2  ;;  %v9228_v10 = vld [vmem:[%s13348_s2 + $0x140] sm:$0xff]  ;;  %v4790_v18 = vrot.slane %v11394_v14, 2  ;;  %v11555_v38 = vpop.permute.xlu2 %5275 }
 0x305   : > { %2948 = vst.msk [vmem:[#allocation3 + $0xd0] sm:$0xf] %vm13644_vm15, %v2771_v57  ;;  %v5085_v1 = vrot.slane %v11535_v41, 3  ;;  %v4794_v15 = vrot.slane %v4792_v5, 1  ;;  %v4795_v62 = vrot.slane %v11411_v12, 2  ;;  %v5235_v26 = vrot.slane %v11508_v44, 3  ;;  %6397 = vmatpush.bf16.msra.mxu2 %v9228_v10 }
 0x306   : > { %2951 = vst [vmem:[#allocation3 + $0xd4] sm:$0x3] %v2950_v23  ;;  %v11559_v6 = vshll.u32 %v11544_v63, 16  ;;  %v4801_v47 = vshrl.u32 %v11544_v63, 16  ;;  %v5236_v14 = vrot.slane %v11544_v63, 3  ;;  %v8321_v5 = vrot.slane %v3691_v28, 11 }
 0x307   : > { %2971 = vst.msk [vmem:[#allocation3 + $0xe8] sm:$0xf] %vm13645_vm13, %v2771_v57  ;;  %v4946_v12 = vrot.slane %v10874_v16, 2  ;;  %vm13646_vm2 = vcmask 523264   ;;  %v4796_v60 = vor.u32 %v4795_v62, %v4794_v15  ;;  %v8323_v50 = vrot.slane %v3693_v33, 11 }
 0x308   : > { %2974 = vst [vmem:[#allocation3 + $0xec] sm:$0x3] %v2973_v46  ;;  %v5361_v4 = vsel %vm13646_vm2, %v5317_v35, %v11496_v59  ;;  %v5087_v21 = vrot.slane %v4801_v47, 2  ;;  %v5088_v27 = vrot.slane %v11559_v6, 3  ;;  %vm13647_vm15 = vcmask 1044480  }
 0x309   : > { %v5237_v57 = vsel %vm13647_vm15, %v5235_v26, %v5236_v14  ;;  %v5086_v11 = vor.u32 %v5085_v1, %v5084_v20  ;;  %v4791_v13 = vor.u32 %v4790_v18, %v4789_v45  ;;  %v4798_v39 = vrot.slane %v11522_v40, 1  ;;  %v4070_v16 = vld [vmem:[#allocation3 + $0xa4] sm:$0x7]  ;;  %v3659_v1 = vld [vmem:[#allocation3 + $0xd4] sm:$0x4]  ;;  %v11584_v26 = vld [vmem:[#allocation3 + $0x9c] sm:$0xff] }
 0x30a   : > { %v3836_v43 = vld [vmem:[#allocation3 + $0xcc] sm:$0x1]  ;;  %5289 = vrot.lane.b32.xlu1 %v5237_v57, %s9325_s15  ;;  %v4803_v28 = vrot.slane %v4801_v47, 1  ;;  %v5089_v35 = vor.u32 %v5088_v27, %v5087_v21  ;;  %v4799_v33 = vrot.slane %v11535_v41, 2  ;;  %v4804_v23 = vrot.slane %v11559_v6, 2  ;;  %v11593_v21 = vpop.permute.xlu1 %4543 }
 0x30b   : > { %v3837_v61 = vsel %vm10375_vm1, %v8321_v5, %v3836_v43  ;;  %v3842_v59 = vld [vmem:[#allocation3 + $0xe4] sm:$0x1]  ;;  %vm13648_vm13 = vcmask 1045504   ;;  %vm13649_vm2 = vsmask.f32 6400  ;;  %v4420_v47 = vrot.slane %v11535_v41, 1 }
 0x30c   : > { %3838 = vst [vmem:[#allocation3 + $0xcc] sm:$0x1] %v3837_v61  ;;  %v3843_v46 = vsel %vm10375_vm1, %v8323_v50, %v3842_v59  ;;  %v4947_v45 = vsel %vm13648_vm13, %v4945_v0, %v4946_v12  ;;  %v4797_v20 = vsel %vm13649_vm2, %v4791_v13, %v4796_v60  ;;  %v3665_v18 = vld [vmem:[#allocation3 + $0xec] sm:$0x4]  ;;  %vm13650_vm15 = vsmask.f32 5376  ;;  %v11595_v27 = vpop.permute.xlu2 %4898 }
 0x30d   : > { %3844 = vst [vmem:[#allocation3 + $0xe4] sm:$0x1] %v3843_v46  ;;  %v3201_v10 = vld [vmem:[#allocation3 + $0xd4] sm:$0x1]  ;;  %v5090_v15 = vsel %vm13650_vm15, %v5086_v11, %v5089_v35  ;;  %4910 = vrot.lane.b32.xlu2 %v4797_v20, %s9327_s14  ;;  %v4805_v62 = vor.u32 %v4804_v23, %v4803_v28  ;;  %v4240_v14 = vunpack.c.l.b16 %v4070_v16  ;;  %vm13651_vm12 = vcmask 261120  }
 0x30e   : > { %v5479_v5 = vsel %vm13651_vm12, %v4947_v45, %v11460_v34  ;;  %v3245_v0 = vrot.slane %v3201_v10, 7  ;;  %v3534_v12 = vld [vmem:[#allocation3 + $0xd4] sm:$0x1]  ;;  %5178 = vrot.lane.b32.xlu0 %v5090_v15, %s9326_s11  ;;  %vm13652_vm13 = vcmask 785408   ;;  %v4616_v50 = vrot.slane %v11544_v63, 1 }
 0x30f   : > { %v11590_v60 = vsel %vm13652_vm13, %v5361_v4, %v4895_v53  ;;  %v4073_v41 = vld [vmem:[#allocation3 + $0xb0] sm:$0x7]  ;;  %v3203_v57 = vld [vmem:[#allocation3 + $0xec] sm:$0x1]  ;;  %v3324_v43 = vld [vmem:[#allocation3 + $0xd4] sm:$0x2]  ;;  %v4800_v13 = vor.u32 %v4799_v33, %v4798_v39  ;;  %v11601_v28 = vpack.c.b16 %v4240_v14, %v4240_v14  ;;  %v11603_v53 = vpop.permute.xlu0 %4896  ;;  %v4421_v35 = vor.u32 %v4420_v47, %v11522_v40 }
 0x310   : > { %13653 = vst [vmem:[#allocation41_spill] sm:$0xff] %v11590_v60  ;;  %v3536_v11 = vld [vmem:[#allocation3 + $0xec] sm:$0x1]  ;;  %vm13654_vm2 = vcmask 523264   ;;  %5766 = vmatmul.bf16.gmra.mxu0 %v11590_v60  ;;  %v3247_v4 = vrot.slane %v3203_v57, 7  ;;  %v3325_v16 = vsel %vm10383_vm10, %v3245_v0, %v3324_v43  ;;  %v3578_v61 = vrot.slane %v3534_v12, 6  ;;  %vm13656_vm12 = vmmov %vm13652_vm13 }
 0x311   : > { %v11598_v34 = vsel %vm13654_vm2, %v5479_v5, %v5274_v32  ;;  %v3580_v59 = vrot.slane %v3536_v11, 6  ;;  %3326 = vst [vmem:[#allocation3 + $0xd4] sm:$0x2] %v3325_v16  ;;  %v3330_v39 = vld [vmem:[#allocation3 + $0xec] sm:$0x2]  ;;  %v4425_v33 = vrot.slane %v11559_v6, 1  ;;  %v4241_v23 = vunpack.c.l.b16 %v4073_v41 }
 0x312   : > { %13655 = vst [vmem:[#allocation44_spill] sm:$0xff] %v11598_v34  ;;  %8523 = vmatmul.msk.bf16.gmra.mxu2 %vm13656_vm12, %v11598_v34  ;;  %vm13657_vm15 = vsmask.f32 6400  ;;  %v3331_v46 = vsel %vm10383_vm10, %v3247_v4, %v3330_v39  ;;  %v3660_v45 = vsel %vm10388_vm0, %v3578_v61, %v3659_v1  ;;  %v11620_v10 = vshrl.u32 %v11584_v26, 16  ;;  %v11635_v5 = vld [vmem:[#allocation3 + $0xa8] sm:$0xff]  ;;  %v5165_v43 = vpop.permute.xlu1 %5164  ;;  %v9221_v61 = vld [vmem:[%s13348_s2 + $0x108] sm:$0xff] }
 0x313   : > { %v4806_v32 = vsel %vm13657_vm15, %v4800_v13, %v4805_v62  ;;  %v3666_v20 = vsel %vm10388_vm0, %v3580_v59, %v3665_v18  ;;  %3332 = vst [vmem:[#allocation3 + $0xec] sm:$0x2] %v3331_v46  ;;  %v4615_v40 = vrot.slane %v11508_v44, 1  ;;  %v11624_v6 = vshll.u32 %v11584_v26, 16  ;;  %v11630_v62 = vld [vmem:[#allocation3 + $0x3c] sm:$0xff]  ;;  %6307 = vmatpush.bf16.msra.mxu0 %v9221_v61 }
 0x314   : > { %4912 = vrot.lane.b32.xlu1 %v4806_v32, %s9327_s14  ;;  %v11627_v15 = vshll.u32 %v11601_v28, 16  ;;  %3661 = vst [vmem:[#allocation3 + $0xd4] sm:$0x4] %v3660_v45  ;;  %vm13658_vm13 = vsmask.f32 7424  ;;  %v4948_v18 = vrot.slane %v11630_v62, 2  ;;  %v11641_v57 = vpack.c.b16 %v4241_v23, %v4241_v23  ;;  %v11647_v16 = vpop.permute.xlu2 %4547 }
 0x315   : > { %v4426_v1 = vsel %vm13658_vm13, %v4421_v35, %v4425_v33  ;;  %v4949_v47 = vrot.slane %v10926_v19, 2  ;;  %v4810_v14 = vshrl.u32 %v11601_v28, 16  ;;  %3667 = vst [vmem:[#allocation3 + $0xec] sm:$0x4] %v3666_v20  ;;  %v3868_v44 = vld [vmem:[#allocation3 + $0xd0] sm:$0x8]  ;;  %vm13661_vm15 = vmmov %vm13658_vm13 }
 0x316   : > { %vm13659_vm2 = vcmask 1046528   ;;  %4559 = vrot.lane.b32.xlu2 %v4426_v1, %s9326_s11  ;;  %v4432_v12 = vrot.slane %v11624_v6, 1  ;;  %v4437_v41 = vrot.slane %v11627_v15, 1  ;;  %v5091_v19 = vrot.slane %v11620_v10, 2  ;;  %v3870_v59 = vld [vmem:[#allocation3 + $0xe8] sm:$0x8] }
 0x317   : > { %v4617_v0 = vsel %vm13659_vm2, %v4615_v40, %v4616_v50  ;;  %v5092_v11 = vrot.slane %v11624_v6, 3  ;;  %v5094_v13 = vrot.slane %v4810_v14, 2  ;;  %v5095_v4 = vrot.slane %v11627_v15, 3  ;;  %v9193_v50 = vld [vmem:[%s13348_s2 + $0x28] sm:$0xff]  ;;  %v11657_v35 = vpop.permute.xlu0 %4545 }
 0x318   : > { %4669 = vrot.lane.b32.xlu0 %v4617_v0, %s9325_s15  ;;  %v5239_v39 = vrot.slane %v11601_v28, 3  ;;  %v4433_v32 = vor.u32 %v4432_v12, %v11620_v10  ;;  %v8343_v33 = vrot.slane %v3868_v44, 9  ;;  %v5238_v23 = vrot.slane %v11584_v26, 3  ;;  %6014 = vmatpush.bf16.msra.mxu1 %v9193_v50 }
 0x319   : > { %vm13660_vm12 = vcmask 1045504   ;;  %v5096_v45 = vor.u32 %v5095_v4, %v5094_v13  ;;  %v11663_v40 = vshrl.u32 %v11635_v5, 16  ;;  %v11666_v1 = vshll.u32 %v11635_v5, 16 }
 0x31a   : > { %v4950_v46 = vsel %vm13660_vm12, %v4948_v18, %v4949_v47  ;;  %v4438_v20 = vsel %vm13661_vm15, %v4433_v32, %v4437_v41  ;;  %v11669_v0 = vshll.u32 %v11641_v57, 16  ;;  %v8345_v12 = vrot.slane %v3870_v59, 9 }
 0x31b   : > { %vm13662_vm13 = vcmask 261120   ;;  %v5093_v18 = vor.u32 %v5092_v11, %v5091_v19  ;;  %v13368_v47 = vshrl.u32 %v11641_v57, 16  ;;  %v4014_v41 = vld [vmem:[#allocation3 + $0xd4] sm:$0x4]  ;;  %vm13663_vm2 = vcmask 1044480  }
 0x31c   : > { %v5319_v44 = vsel %vm13662_vm13, %v11505_v8, %v11593_v21  ;;  %4561 = vrot.lane.b32.xlu1 %v4438_v20, %s9326_s11  ;;  %v5240_v13 = vsel %vm13663_vm2, %v5238_v23, %v5239_v39  ;;  %v5098_v4 = vrot.slane %v11663_v40, 2  ;;  %v5099_v50 = vrot.slane %v11666_v1, 3  ;;  %v4020_v32 = vld [vmem:[#allocation3 + $0xec] sm:$0x4]  ;;  %vm13664_vm12 = vmmov %vm13662_vm13  ;;  %v11697_v20 = vpop.permute.xlu2 %5168 }
 0x31d   : > { %v5102_v61 = vrot.slane %v11669_v0, 3  ;;  %v4015_v59 = vsel %vm10424_vm3, %v8343_v33, %v4014_v41  ;;  %v5482_v8 = vsel %vm13664_vm12, %v4950_v46, %v5165_v43  ;;  %vm13665_vm15 = vsmask.f32 5376 }
 0x31e   : > { %v5097_v21 = vsel %vm13665_vm15, %v5093_v18, %v5096_v45  ;;  %v5101_v19 = vrot.slane %v13368_v47, 2  ;;  %v4021_v11 = vsel %vm10424_vm3, %v8345_v12, %v4020_v32  ;;  %4016 = vst [vmem:[#allocation3 + $0xd4] sm:$0x4] %v4015_v59  ;;  %vm13666_vm13 = vcmask 523264   ;;  %v4656_v45 = vpop.permute.xlu1 %4655  ;;  %v4076_v12 = vld [vmem:[#allocation3 + $0xbc] sm:$0x7] }
 0x31f   : > { %v5363_v39 = vsel %vm13666_vm13, %v5319_v44, %v11490_v17  ;;  %5180 = vrot.lane.b32.xlu2 %v5097_v21, %s9326_s11  ;;  %v4812_v23 = vrot.slane %v4810_v14, 1  ;;  %v4813_v33 = vrot.slane %v11627_v15, 2  ;;  %4022 = vst [vmem:[#allocation3 + $0xec] sm:$0x4] %v4021_v11  ;;  %vm13667_vm2 = vcmask 785408   ;;  %vm13669_vm12 = vmmov %vm13666_vm13  ;;  %v5167_v18 = vpop.permute.xlu0 %5166  ;;  %v9227_v11 = vld [vmem:[%s13348_s2 + $0x138] sm:$0xff] }
 0x320   : > { %5291 = vrot.lane.b32.xlu0 %v5240_v13, %s9325_s15  ;;  %v11695_v43 = vsel %vm13667_vm2, %v5363_v39, %v11603_v53  ;;  %v5103_v46 = vor.u32 %v5102_v61, %v5101_v19  ;;  %v11701_v17 = vsel %vm13669_vm12, %v5482_v8, %v11555_v38  ;;  %v4807_v14 = vrot.slane %v11620_v10, 1  ;;  %vm13671_vm15 = vmmov %vm13667_vm2  ;;  %v9199_v19 = vld [vmem:[%s13348_s2 + $0x58] sm:$0xff]  ;;  %6398 = vmatpush.bf16.msra.mxu2 %v9227_v11 }
 0x321   : > { %13668 = vst [vmem:[#allocation47_spill] sm:$0xff] %v11695_v43  ;;  %v4808_v15 = vrot.slane %v11624_v6, 2  ;;  %v5100_v44 = vor.u32 %v5099_v50, %v5098_v4  ;;  %5771 = vmatmul.bf16.gmra.mxu0 %v11695_v43  ;;  %v4619_v53 = vrot.slane %v11601_v28, 1  ;;  %v4814_v41 = vor.u32 %v4813_v33, %v4812_v23  ;;  %6105 = vmatpush.bf16.msra.mxu3 %v9199_v19 }
 0x322   : > { %13670 = vst [vmem:[#allocation11_spill] sm:$0xff] %v11701_v17  ;;  %8524 = vmatmul.msk.bf16.gmra.mxu2 %vm13671_vm15, %v11701_v17  ;;  %vm13672_vm13 = vsmask.f32 5376  ;;  %v4242_v61 = vunpack.c.l.b16 %v4076_v12  ;;  %v4618_v38 = vrot.slane %v11584_v26, 1  ;;  %vm13673_vm2 = vcmask 1046528  }
 0x323   : > { %v5104_v13 = vsel %vm13672_vm13, %v5100_v44, %v5103_v46  ;;  %v4809_v10 = vor.u32 %v4808_v15, %v4807_v14  ;;  %vm13674_vm12 = vsmask.f32 6400  ;;  %v4622_v50 = vrot.slane %v11641_v57, 1  ;;  %v654_v12 = vld [vmem:[#allocation2 + $0xcc] sm:$0xf]  ;;  %v11737_v14 = vld [vmem:[#allocation3 + $0x48] sm:$0xff]  ;;  %vm13676_vm13 = vmmov %vm13673_vm2 }
 0x324   : > { %5182 = vrot.lane.b32.xlu1 %v5104_v13, %s9326_s11  ;;  %v4620_v6 = vsel %vm13673_vm2, %v4618_v38, %v4619_v53  ;;  %v11716_v59 = vpack.c.b16 %v4242_v61, %v4242_v61  ;;  %v4952_v32 = vrot.slane %v10980_v2, 2  ;;  %v11720_v21 = vpop.permute.xlu2 %4659  ;;  %vm13675_vm15 = vcmask 261120   ;;  %v11733_v2 = vld [vmem:[#allocation3 + $0xb4] sm:$0xff]  ;;  %v658_v53 = vld [vmem:[#allocation2 + $0xd4] sm:$0x1] }
 0x325   : > { %v4815_v4 = vsel %vm13674_vm12, %v4809_v10, %v4814_v41  ;;  %v5321_v39 = vsel %vm13675_vm15, %v11630_v62, %v11657_v35  ;;  %v4444_v23 = vrot.slane %v11666_v1, 1  ;;  %v4621_v33 = vrot.slane %v11635_v5, 1 }
 0x326   : > { %v5278_v8 = vpop.permute.xlu1 %5277  ;;  %v4951_v15 = vrot.slane %v11737_v14, 2  ;;  %v5242_v44 = vrot.slane %v11641_v57, 3  ;;  %v4449_v41 = vrot.slane %v11669_v0, 1  ;;  %v11744_v35 = vshll.u32 %v11716_v59, 16 }
 0x327   : > { %4671 = vrot.lane.b32.xlu2 %v4620_v6, %s9325_s15  ;;  %v11735_v46 = vpop.permute.xlu0 %4657  ;;  %v4623_v62 = vsel %vm13676_vm13, %v4621_v33, %v4622_v50  ;;  %v4828_v13 = vshrl.u32 %v11716_v59, 16  ;;  %vm13677_vm2 = vcmask 523264   ;;  %vm13678_vm12 = vcmask 1045504   ;;  %v13679_v6 = vld [vmem:[#allocation8_spill] sm:$0xff] }
 0x328   : > { %4914 = vrot.lane.b32.xlu0 %v4815_v4, %s9327_s14  ;;  %v5365_v61 = vsel %vm13677_vm2, %v5321_v39, %v4656_v45  ;;  %v4953_v38 = vsel %vm13678_vm12, %v4951_v15, %v4952_v32  ;;  %v5241_v10 = vrot.slane %v11635_v5, 3  ;;  %v655_v19 = vsel %vm9406_vm7, %v13679_v6, %v654_v12  ;;  %v13681_v45 = vld [vmem:[#allocation7_spill] sm:$0xff]  ;;  %v4079_v4 = vld [vmem:[#allocation3 + $0xc8] sm:$0x7] }
 0x329   : > { %v4445_v50 = vor.u32 %v4444_v23, %v11663_v40  ;;  %v11756_v33 = vshrl.u32 %v11733_v2, 16  ;;  %v11759_v47 = vshll.u32 %v11733_v2, 16  ;;  %656 = vst [vmem:[#allocation2 + $0xcc] sm:$0xf] %v655_v19  ;;  %v13682_v11 = vrot.slane %v13681_v45, 4 }
 0x32a   : > { %v5485_v15 = vsel %vm13675_vm15, %v4953_v38, %v5167_v18  ;;  %vm13684_vm13 = vcmask 1044480   ;;  %v13685_v12 = vshrl.u32 %v11641_v57, 16  ;;  %v4822_v23 = vrot.slane %v11669_v0, 2 }
 0x32b   : > { %v659_v32 = vsel %vm9400_vm6, %v13682_v11, %v658_v53  ;;  %vm13686_vm7 = vsmask.f32 7424  ;;  %v5108_v19 = vrot.slane %v4828_v13, 2  ;;  %v5109_v45 = vrot.slane %v11744_v35, 3  ;;  %v822_v11 = vld [vmem:[#allocation2 + $0xd0] sm:$0x8] }
 0x32c   : > { %4673 = vrot.lane.b32.xlu1 %v4623_v62, %s9325_s15  ;;  %v5243_v62 = vsel %vm13684_vm13, %v5241_v10, %v5242_v44  ;;  %v4821_v6 = vrot.slane %v13685_v12, 1  ;;  %660 = vst [vmem:[#allocation2 + $0xd4] sm:$0x1] %v659_v32  ;;  %v4450_v48 = vsel %vm13686_vm7, %v4445_v50, %v4449_v41  ;;  %v5245_v53 = vrot.slane %v11716_v59, 3 }
 0x32d   : > { %vm13687_vm2 = vcmask 785408   ;;  %v4816_v0 = vrot.slane %v11663_v40, 1  ;;  %v4817_v41 = vrot.slane %v11666_v1, 2  ;;  %vm13689_vm12 = vcmask 523264  }
 0x32e   : > { %v11776_v18 = vsel %vm13687_vm2, %v5365_v61, %v11595_v27  ;;  %v11779_v44 = vpop.permute.xlu1 %4900  ;;  %v11784_v38 = vsel %vm13689_vm12, %v5485_v15, %v5278_v8  ;;  %v5105_v10 = vrot.slane %v11756_v33, 2  ;;  %v5106_v50 = vrot.slane %v11759_v47, 3  ;;  %v11790_v27 = vpop.permute.xlu2 %5281  ;;  %vm13691_vm15 = vmmov %vm13687_vm2 }
 0x32f   : > { %5293 = vrot.lane.b32.xlu2 %v5243_v62, %s9325_s15  ;;  %13688 = vst [vmem:[#allocation53_spill] sm:$0xff] %v11776_v18  ;;  %v5244_v32 = vrot.slane %v11733_v2, 3  ;;  %v11792_v61 = vpop.permute.xlu0 %5279  ;;  %v4243_v40 = vunpack.c.l.b16 %v4079_v4  ;;  %v7947_v1 = vrot.slane %v822_v11, 11  ;;  %v5110_v8 = vor.u32 %v5109_v45, %v5108_v19 }
 0x330   : > { %4563 = vrot.lane.b32.xlu0 %v4450_v48, %s9326_s11  ;;  %13690 = vst [vmem:[#allocation15_spill] sm:$0xff] %v11784_v38  ;;  %v4823_v48 = vor.u32 %v4822_v23, %v4821_v6  ;;  %v4830_v62 = vrot.slane %v4828_v13, 1  ;;  %v4831_v12 = vrot.slane %v11744_v35, 2  ;;  %v4818_v58 = vor.u32 %v4817_v41, %v4816_v0  ;;  %v678_v37 = vld [vmem:[#allocation2 + $0xcc] sm:$0x2]  ;;  %v11814_v41 = vld [vmem:[#allocation3 + $0xc0] sm:$0xff] }
 0x331   : > { %5776 = vmatmul.bf16.gmra.mxu0 %v11776_v18  ;;  %v5246_v15 = vsel %vm13684_vm13, %v5244_v32, %v5245_v53  ;;  %v802_v51 = vld [vmem:[#allocation2 + $0xcc] sm:$0x1]  ;;  %v5107_v31 = vor.u32 %v5106_v50, %v5105_v10  ;;  %v4825_v6 = vrot.slane %v11756_v33, 1  ;;  %v4826_v23 = vrot.slane %v11759_v47, 2 }
 0x332   : > { %8525 = vmatmul.msk.bf16.gmra.mxu2 %vm13691_vm15, %v11784_v38  ;;  %v7929_v30 = vrot.slane %v678_v37, 9  ;;  %vm13692_vm7 = vsmask.f32 6400  ;;  %v11802_v19 = vpack.c.b16 %v4243_v40, %v4243_v40  ;;  %vm13694_vm2 = vsmask.f32 5376 }
 0x333   : > { %v947_v22 = vld [vmem:[#allocation2 + $0xd4] sm:$0x1]  ;;  %v4824_v4 = vsel %vm13692_vm7, %v4818_v58, %v4823_v48  ;;  %v5111_v53 = vsel %vm13694_vm2, %v5107_v31, %v5110_v8  ;;  %v4832_v11 = vor.u32 %v4831_v12, %v4830_v62  ;;  %v4456_v58 = vrot.slane %v11759_v47, 1  ;;  %v9220_v31 = vld [vmem:[%s13348_s2 + $0x100] sm:$0xff] }
 0x334   : > { %5295 = vrot.lane.b32.xlu1 %v5246_v15, %s9325_s15  ;;  %v948_v13 = vsel %vm9443_vm8, %v7947_v1, %v947_v22  ;;  %v803_v0 = vsel %vm9400_vm6, %v7929_v30, %v802_v51  ;;  %v9192_v22 = vld [vmem:[%s13348_s2 + $0x20] sm:$0xff]  ;;  %v4827_v39 = vor.u32 %v4826_v23, %v4825_v6  ;;  %v4461_v30 = vrot.slane %v11744_v35, 1  ;;  %6308 = vmatpush.bf16.msra.mxu0 %v9220_v31  ;;  %vm13695_vm6 = vmmov %vm13692_vm7  ;;  %v11845_v15 = vld [vmem:[#allocation3 + $0x54] sm:$0xff] }
 0x335   : > { %949 = vst [vmem:[#allocation2 + $0xd4] sm:$0x1] %v948_v13  ;;  %v11824_v51 = vshll.u32 %v11802_v19, 16  ;;  %v4837_v10 = vshrl.u32 %v11802_v19, 16  ;;  %6015 = vmatpush.bf16.msra.mxu1 %v9192_v22  ;;  %v4955_v47 = vrot.slane %v11069_v9, 2  ;;  %v4625_v50 = vrot.slane %v11716_v59, 1 }
 0x336   : > { %v11811_v37 = vpop.permute.xlu1 %4549  ;;  %804 = vst [vmem:[#allocation2 + $0xcc] sm:$0x1] %v803_v0  ;;  %v4833_v32 = vsel %vm13695_vm6, %v4827_v39, %v4832_v11  ;;  %v11830_v48 = vpop.permute.xlu2 %4904  ;;  %vm13696_vm8 = vcmask 261120   ;;  %v4457_v35 = vor.u32 %v4456_v58, %v11756_v33  ;;  %v11840_v8 = vshrl.u32 %v11814_v41, 16  ;;  %v4031_v11 = vld [vmem:[#allocation3 + $0x8] sm:$0x7] }
 0x337   : > { %4916 = vrot.lane.b32.xlu2 %v4824_v4, %s9327_s14  ;;  %v5323_v40 = vsel %vm13696_vm8, %v11737_v14, %v11647_v16  ;;  %v11837_v1 = vpop.permute.xlu0 %4902  ;;  %v11843_v9 = vshll.u32 %v11814_v41, 16  ;;  %v4954_v62 = vrot.slane %v11845_v15, 2  ;;  %v4624_v16 = vrot.slane %v11733_v2, 1  ;;  %vm13700_vm2 = vmmov %vm13696_vm8 }
 0x338   : > { %5184 = vrot.lane.b32.xlu0 %v5111_v53, %s9326_s11  ;;  %v5367_v12 = vsel %vm13689_vm12, %v5323_v40, %v11735_v46  ;;  %vm13697_vm15 = vsmask.f32 7424  ;;  %v5115_v6 = vrot.slane %v4837_v10, 2  ;;  %v5116_v23 = vrot.slane %v11824_v51, 3  ;;  %vm13703_vm8 = vmmov %vm13689_vm12 }
 0x339   : > { %v4462_v14 = vsel %vm13697_vm15, %v4457_v35, %v4461_v30  ;;  %vm13698_vm13 = vcmask 1045504   ;;  %vm13699_vm7 = vcmask 1046528   ;;  %vm13701_vm6 = vcmask 785408  }
 0x33a   : > { %v4956_v4 = vsel %vm13698_vm13, %v4954_v62, %v4955_v47  ;;  %v4626_v45 = vsel %vm13699_vm7, %v4624_v16, %v4625_v50  ;;  %v11862_v0 = vsel %vm13701_vm6, %v5367_v12, %v11779_v44  ;;  %v5112_v22 = vrot.slane %v11840_v8, 2  ;;  %vm13705_vm12 = vmmov %vm13701_vm6 }
 0x33b   : > { %v5488_v46 = vsel %vm13700_vm2, %v4956_v4, %v11697_v20  ;;  %13702 = vst [vmem:[#allocation14_spill] sm:$0xff] %v11862_v0  ;;  %v5113_v31 = vrot.slane %v11843_v9, 3  ;;  %v5117_v44 = vor.u32 %v5116_v23, %v5115_v6  ;;  %v4227_v50 = vunpack.c.l.b16 %v4031_v11 }
 0x33c   : > { %4918 = vrot.lane.b32.xlu1 %v4833_v32, %s9327_s14  ;;  %v1003_v33 = vld [vmem:[#allocation2 + $0xd4] sm:$0x1]  ;;  %v11869_v39 = vsel %vm13703_vm8, %v5488_v46, %v11792_v61  ;;  %v5248_v32 = vrot.slane %v11802_v19, 3  ;;  %v5247_v62 = vrot.slane %v11814_v41, 3  ;;  %vm13706_vm15 = vsmask.f32 5376  ;;  %vm13712_vm8 = vmmov %vm13700_vm2 }
 0x33d   : > { %v11856_v13 = vld [vmem:[#allocation2 + $0xcc] sm:$0xff]  ;;  %v1129_v53 = vunpack.c.l.b16 %v1003_v33  ;;  %13704 = vst [vmem:[#allocation16_spill] sm:$0xff] %v11869_v39  ;;  %v5114_v61 = vor.u32 %v5113_v31, %v5112_v22  ;;  %v11886_v6 = vpack.c.b16 %v4227_v50, %v4227_v50  ;;  %vm13707_vm13 = vcmask 1044480   ;;  %v11897_v31 = vld [vmem:[#allocation3] sm:$0xff] }
 0x33e   : > { %v5171_v58 = vpop.permute.xlu1 %5170  ;;  %v1354_v47 = vshrl.u32 %v11856_v13, 16  ;;  %v1356_v20 = vshll.u32 %v11856_v13, 16  ;;  %v5249_v23 = vsel %vm13707_vm13, %v5247_v62, %v5248_v32  ;;  %vm13708_vm7 = vsmask.f32 7424  ;;  %v11912_v62 = vld [vmem:[#allocation3 + $0x60] sm:$0xff] }
 0x33f   : > { %4565 = vrot.lane.b32.xlu2 %v4462_v14, %s9326_s11  ;;  %v11871_v30 = vpack.c.b16 %v1129_v53, %v1129_v53  ;;  %v11881_v14 = vpop.permute.xlu2 %4553  ;;  %v5118_v33 = vsel %vm13706_vm15, %v5114_v61, %v5117_v44  ;;  %v11884_v4 = vpop.permute.xlu0 %4551  ;;  %v4839_v53 = vrot.slane %v4837_v10, 1  ;;  %v4840_v11 = vrot.slane %v11824_v51, 2  ;;  %v9198_v10 = vld [vmem:[%s13348_s2 + $0x50] sm:$0xff] }
 0x340   : > { %4675 = vrot.lane.b32.xlu0 %v4626_v45, %s9325_s15  ;;  %v1358_v40 = vrot.slane %v1356_v20, 1  ;;  %v4468_v22 = vrot.slane %v11843_v9, 1  ;;  %v4958_v20 = vrot.slane %v11126_v42, 2  ;;  %v4834_v44 = vrot.slane %v11840_v8, 1  ;;  %v11910_v61 = vpop.f32.mrf.mxu0  ;;  %6106 = vmatpush.bf16.msra.mxu3 %v9198_v10 }
 0x341   : > { %5781 = vmatmul.bf16.gmra.mxu0 %v11862_v0  ;;  %v1361_v35 = vshll.u32 %v11871_v30, 16  ;;  %v4835_v50 = vrot.slane %v11843_v9, 2  ;;  %v4473_v32 = vrot.slane %v11824_v51, 1  ;;  %13709 = vst [vmem:[#allocation51_spill] sm:$0xff] %v11910_v61  ;;  %v4957_v42 = vrot.slane %v11912_v62, 2 }
 0x342   : > { %8526 = vmatmul.msk.bf16.gmra.mxu2 %vm13705_vm12, %v11869_v39  ;;  %v1359_v12 = vor.u32 %v1358_v40, %v1354_v47  ;;  %v4082_v47 = vld [vmem:[#allocation3 + $0xd4] sm:$0x7]  ;;  %v11907_v40 = vshll.u32 %v11886_v6, 16  ;;  %v4841_v9 = vor.u32 %v4840_v11, %v4839_v53  ;;  %v5325_v51 = vsel %vm13700_vm2, %v11845_v15, %v11811_v37  ;;  %vm13713_vm12 = vmmov %vm13708_vm7 }
 0x343   : > { %v1363_v16 = vrot.slane %v1361_v35, 1  ;;  %v4693_v35 = vshrl.u32 %v11886_v6, 16  ;;  %vm13711_vm6 = vcmask 1045504   ;;  %v4627_v53 = vrot.slane %v11814_v41, 1 }
 0x344   : > { %v4959_v55 = vsel %vm13711_vm6, %v4957_v42, %v4958_v20  ;;  %v4836_v11 = vor.u32 %v4835_v50, %v4834_v44  ;;  %vm13714_vm15 = vcmask 523264   ;;  %vm13715_vm13 = vcmask 1046528  }
 0x345   : > { %v1364_v45 = vsel %vm13708_vm7, %v1359_v12, %v1363_v16  ;;  %v4628_v12 = vrot.slane %v11802_v19, 1  ;;  %v4244_v16 = vunpack.c.l.b16 %v4082_v47  ;;  %v5491_v47 = vsel %vm13712_vm8, %v4959_v55, %v5171_v58  ;;  %v9226_v55 = vld [vmem:[%s13348_s2 + $0x130] sm:$0xff]  ;;  %vm13720_vm6 = vmmov %vm13714_vm15 }
 0x346   : > { %1399 = vrot.lane.b32.xlu1 %v1364_v45, %s9325_s15  ;;  %v11894_v46 = vpop.permute.xlu1 %4661  ;;  %v11924_v45 = vshll.u32 %v11897_v31, 16  ;;  %v5003_v37 = vrot.slane %v4693_v35, 2  ;;  %v5369_v15 = vsel %vm13714_vm15, %v5325_v51, %v11720_v21  ;;  %vm13716_vm7 = vsmask.f32 6400  ;;  %6399 = vmatpush.bf16.msra.mxu2 %v9226_v55 }
 0x347   : > { %5186 = vrot.lane.b32.xlu2 %v5118_v33, %s9326_s11  ;;  %v4469_v33 = vor.u32 %v4468_v22, %v11840_v8  ;;  %v5004_v8 = vrot.slane %v11907_v40, 3  ;;  %v4629_v22 = vsel %vm13715_vm13, %v4627_v53, %v4628_v12  ;;  %v4842_v61 = vsel %vm13716_vm7, %v4836_v11, %v4841_v9  ;;  %v11938_v20 = vpop.permute.xlu2 %5174  ;;  %v5173_v44 = vpop.permute.xlu0 %5172 }
 0x348   : > { %5297 = vrot.lane.b32.xlu0 %v5249_v23, %s9325_s15  ;;  %v11921_v23 = vshrl.u32 %v11897_v31, 16  ;;  %v11940_v42 = vpack.c.b16 %v4244_v16, %v4244_v16  ;;  %vm13718_vm2 = vcmask 785408   ;;  %v4276_v21 = vrot.slane %v11924_v45, 1 }
 0x349   : > { %v4474_v10 = vsel %vm13713_vm12, %v4469_v33, %v4473_v32  ;;  %v11947_v58 = vsel %vm13718_vm2, %v5369_v15, %v11837_v1  ;;  %v5001_v12 = vrot.slane %v11924_v45, 3  ;;  %v11958_v9 = vsel %vm13720_vm6, %v5491_v47, %v11790_v27  ;;  %v11961_v1 = vld [vmem:[#allocation3 + $0xcc] sm:$0xff]  ;;  %vm13722_vm8 = vmmov %vm13718_vm2  ;;  %v9191_v33 = vld [vmem:[%s13348_s2 + $0x18] sm:$0xff] }
 0x34a   : > { %13717 = vst [vmem:[#allocation17_spill] sm:$0xff] %v11940_v42  ;;  %v5000_v32 = vrot.slane %v11921_v23, 2  ;;  %v4281_v16 = vrot.slane %v11907_v40, 1  ;;  %v5005_v51 = vor.u32 %v5004_v8, %v5003_v37  ;;  %v9219_v27 = vld [vmem:[%s13348_s2 + $0xf8] sm:$0xff]  ;;  %v11974_v53 = vshll.u32 %v11940_v42, 16  ;;  %6016 = vmatpush.bf16.msra.mxu1 %v9191_v33  ;;  %vm13729_vm2 = vmmov %vm13720_vm6 }
 0x34b   : > { %13719 = vst [vmem:[#allocation59_spill] sm:$0xff] %v11947_v58  ;;  %v4277_v37 = vor.u32 %v4276_v21, %v11921_v23  ;;  %6309 = vmatpush.bf16.msra.mxu0 %v9219_v27  ;;  %v11980_v15 = vshrl.u32 %v11961_v1, 16  ;;  %vm13723_vm12 = vcmask 1044480   ;;  %vm13724_vm15 = vsmask.f32 7424 }
 0x34c   : > { %13721 = vst [vmem:[#allocation19_spill] sm:$0xff] %v11958_v9  ;;  %v5002_v8 = vor.u32 %v5001_v12, %v5000_v32  ;;  %v5846_v55 = vpop.f32.mrf.mxu2  ;;  %vm13725_vm13 = vsmask.f32 5376  ;;  %v4695_v21 = vrot.slane %v4693_v35, 1  ;;  %v4696_v32 = vrot.slane %v11907_v40, 2 }
 0x34d   : > { %v13727_v12 = vshrl.u32 %v11940_v42, 16  ;;  %v5123_v27 = vrot.slane %v11974_v53, 3  ;;  %v4691_v35 = vrot.slane %v11924_v45, 2  ;;  %v5119_v40 = vrot.slane %v11980_v15, 2 }
 0x34e   : > { %4920 = vrot.lane.b32.xlu1 %v4842_v61, %s9327_s14  ;;  %v11952_v50 = vpop.permute.xlu1 %5283  ;;  %v5200_v61 = vrot.slane %v11886_v6, 3  ;;  %v5006_v11 = vsel %vm13725_vm13, %v5002_v8, %v5005_v51  ;;  %v4961_v51 = vrot.slane %v11201_v3, 2  ;;  %vm13728_vm7 = vcmask 261120  }
 0x34f   : > { %4567 = vrot.lane.b32.xlu2 %v4474_v10, %s9326_s11  ;;  %v5199_v10 = vrot.slane %v11897_v31, 3  ;;  %v5122_v33 = vrot.slane %v13727_v12, 2  ;;  %v4697_v8 = vor.u32 %v4696_v32, %v4695_v21  ;;  %v4579_v3 = vrot.slane %v11897_v31, 1 }
 0x350   : > { %4677 = vrot.lane.b32.xlu0 %v4629_v22, %s9325_s15  ;;  %v11983_v22 = vshll.u32 %v11961_v1, 16  ;;  %vm13730_vm6 = vcmask 1045504  }
 0x351   : > { %5786 = vmatmul.bf16.gmra.mxu0 %v11947_v58  ;;  %v5757_v47 = vpop.f32.mrf.mxu0  ;;  %v4282_v58 = vsel %vm13724_vm15, %v4277_v37, %v4281_v16  ;;  %vm13733_vm15 = vsmask.f32 6400 }
 0x352   : > { %8527 = vmatmul.msk.bf16.gmra.mxu2 %vm13722_vm8, %v11958_v9  ;;  %v5201_v9 = vsel %vm13723_vm12, %v5199_v10, %v5200_v61  ;;  %v11988_v49 = vadd.f32 %v5846_v55, %v5757_v47  ;;  %v4690_v61 = vrot.slane %v11921_v23, 1  ;;  %v12001_v47 = vpop.permute.xlu2 %4665  ;;  %v4664_v10 = vpop.permute.xlu0 %4663  ;;  %v9308_v23 = vld [vmem:[#allocation3 + $0x6c] sm:$0xff]  ;;  %v5124_v55 = vor.u32 %v5123_v27, %v5122_v33  ;;  %vm13731_vm8 = vmmov %vm13728_vm7 }
 0x353   : > { %v4960_v37 = vrot.slane %v9308_v23, 2  ;;  %vm13732_vm12 = vcmask 1046528   ;;  %v4480_v32 = vrot.slane %v11983_v22, 1  ;;  %v4631_v33 = vrot.slane %v11940_v42, 1 }
 0x354   : > { %13726 = vst [vmem:[#allocation55_spill] sm:$0xff] %v11988_v49  ;;  %v4692_v49 = vor.u32 %v4691_v35, %v4690_v61  ;;  %v5250_v27 = vrot.slane %v11961_v1, 3 }
 0x355   : > { %v4962_v12 = vsel %vm13730_vm6, %v4960_v37, %v4961_v51  ;;  %v13739_v51 = vshrl.u32 %v11940_v42, 16 }
 0x356   : > { %4535 = vrot.lane.b32.xlu1 %v4282_v58, %s9326_s11  ;;  %v11998_v16 = vpop.permute.xlu1 %4906  ;;  %v4580_v58 = vrot.slane %v11886_v6, 1  ;;  %v5494_v39 = vsel %vm13731_vm8, %v4962_v12, %v5173_v44  ;;  %vm13738_vm8 = vcmask 1044480   ;;  %v9309_v12 = vld [vmem:[#allocation3 + $0x78] sm:$0xff] }
 0x357   : > { %5154 = vrot.lane.b32.xlu2 %v5006_v11, %s9326_s11  ;;  %v5120_v11 = vrot.slane %v11983_v22, 3  ;;  %v12027_v44 = vsel %vm13729_vm2, %v5494_v39, %v11952_v50  ;;  %v4481_v39 = vor.u32 %v4480_v32, %v11980_v15  ;;  %v4630_v50 = vrot.slane %v11961_v1, 1 }
 0x358   : > { %5265 = vrot.lane.b32.xlu0 %v5201_v9, %s9325_s15  ;;  %v5327_v9 = vsel %vm13728_vm7, %v11912_v62, %v11884_v4  ;;  %v4581_v4 = vsel %vm13732_vm12, %v4579_v3, %v4580_v58  ;;  %v4698_v62 = vsel %vm13733_vm15, %v4692_v49, %v4697_v8  ;;  %vm13734_vm7 = vcmask 785408   ;;  %13736 = vst [vmem:[#allocation48_spill] sm:$0xff] %v12027_v44 }
 0x359   : > { %v5371_v45 = vsel %vm13729_vm2, %v5327_v9, %v11894_v46  ;;  %v5121_v52 = vor.u32 %v5120_v11, %v5119_v40  ;;  %v5251_v49 = vrot.slane %v11940_v42, 3  ;;  %vm13737_vm6 = vmmov %vm13734_vm7  ;;  %v4848_v35 = vrot.slane %v13739_v51, 1  ;;  %v9197_v51 = vld [vmem:[%s13348_s2 + $0x48] sm:$0xff] }
 0x35a   : > { %v12021_v21 = vsel %vm13734_vm7, %v5371_v45, %v11830_v48  ;;  %v4485_v48 = vrot.slane %v11974_v53, 1  ;;  %v4849_v40 = vrot.slane %v11974_v53, 2  ;;  %vm13740_vm12 = vsmask.f32 7424  ;;  %vm13743_vm7 = vmmov %vm13729_vm2  ;;  %6107 = vmatpush.bf16.msra.mxu3 %v9197_v51 }
 0x35b   : > { %v5125_v0 = vsel %vm13725_vm13, %v5121_v52, %v5124_v55  ;;  %13735 = vst [vmem:[#allocation58_spill] sm:$0xff] %v12021_v21  ;;  %v5252_v61 = vsel %vm13738_vm8, %v5250_v27, %v5251_v49  ;;  %vm13741_vm15 = vcmask 1046528   ;;  %v4843_v58 = vrot.slane %v11980_v15, 1  ;;  %v12050_v55 = vpop.f32.mrf.mxu2 }
 0x35c   : > { %v4486_v11 = vsel %vm13740_vm12, %v4481_v39, %v4485_v48  ;;  %v4632_v9 = vsel %vm13741_vm15, %v4630_v50, %v4631_v33  ;;  %v4844_v1 = vrot.slane %v11983_v22, 2  ;;  %v4850_v8 = vor.u32 %v4849_v40, %v4848_v35  ;;  %vm13749_vm15 = vmmov %vm13743_vm7  ;;  %v9225_v35 = vld [vmem:[%s13348_s2 + $0x128] sm:$0xff] }
 0x35d   : > { %v4964_v53 = vrot.slane %v11322_v56, 2  ;;  %vm13742_vm13 = vcmask 261120   ;;  %vm13744_vm2 = vsmask.f32 6400  ;;  %vm13747_vm12 = vcmask 785408   ;;  %6400 = vmatpush.bf16.msra.mxu2 %v9225_v35 }
 0x35e   : > { %5188 = vrot.lane.b32.xlu1 %v5125_v0, %s9326_s11  ;;  %v4556_v46 = vpop.permute.xlu1 %4555  ;;  %v5288_v52 = vpop.permute.xlu2 %5287  ;;  %v5329_v3 = vsel %vm13742_vm13, %v9308_v23, %v11881_v14  ;;  %v4845_v45 = vor.u32 %v4844_v1, %v4843_v58  ;;  %vm13746_vm8 = vmmov %vm13742_vm13  ;;  %v9190_v23 = vld [vmem:[%s13348_s2 + $0x10] sm:$0xff]  ;;  %v4967_v39 = vrot.slane %v11402_v36, 2 }
 0x35f   : > { %4645 = vrot.lane.b32.xlu2 %v4581_v4, %s9325_s15  ;;  %v5286_v0 = vpop.permute.xlu0 %5285  ;;  %v4963_v4 = vrot.slane %v9309_v12, 2  ;;  %vm13751_vm13 = vmmov %vm13747_vm12  ;;  %6017 = vmatpush.bf16.msra.mxu1 %v9190_v23 }
 0x360   : > { %4888 = vrot.lane.b32.xlu0 %v4698_v62, %s9327_s14  ;;  %v5373_v62 = vsel %vm13743_vm7, %v5329_v3, %v4664_v10  ;;  %v4851_v15 = vsel %vm13744_vm2, %v4845_v45, %v4850_v8  ;;  %v12071_v10 = vpop.f32.mrf.mxu0  ;;  %vm13752_vm7 = vmmov %vm13746_vm8 }
 0x361   : > { %5791 = vmatmul.bf16.gmra.mxu0 %v12021_v21  ;;  %v12063_v56 = vsel %vm13747_vm12, %v5373_v62, %v11998_v16  ;;  %v5331_v40 = vsel %vm13752_vm7, %v9309_v12, %v4556_v46 }
 0x362   : > { %8528 = vmatmul.msk.bf16.gmra.mxu2 %vm13737_vm6, %v12027_v44  ;;  %vm13745_vm6 = vcmask 1045504   ;;  %13748 = vst [vmem:[#allocation18_spill] sm:$0xff] %v12063_v56 }
 0x363   : > { %v4965_v22 = vsel %vm13745_vm6, %v4963_v4, %v4964_v53  ;;  %vm13753_vm2 = vmmov %vm13745_vm6 }
 0x364   : > { %v5497_v48 = vsel %vm13746_vm8, %v4965_v22, %v11938_v20  ;;  %vm13754_vm6 = vmmov %vm13752_vm7 }
 0x365   : > { %v12066_v14 = vsel %vm13749_vm15, %v5497_v48, %v5286_v0  ;;  %v9310_v0 = vld [vmem:[#allocation3 + $0x84] sm:$0xff]  ;;  %vm13755_vm8 = vmmov %vm13749_vm15  ;;  %v9311_v48 = vld [vmem:[#allocation3 + $0x90] sm:$0xff] }
 0x366   : > { %4679 = vrot.lane.b32.xlu1 %v4632_v9, %s9325_s15  ;;  %v5177_v37 = vpop.permute.xlu1 %5176  ;;  %13750 = vst [vmem:[#allocation20_spill] sm:$0xff] %v12066_v14  ;;  %v4966_v50 = vrot.slane %v9310_v0, 2  ;;  %v5375_v8 = vsel %vm13755_vm8, %v5331_v40, %v12001_v47  ;;  %vm13757_vm15 = vmmov %vm13755_vm8  ;;  %v4970_v47 = vrot.slane %v11544_v63, 2 }
 0x367   : > { %5299 = vrot.lane.b32.xlu2 %v5252_v61, %s9325_s15  ;;  %v4911_v32 = vpop.permute.xlu2 %4910  ;;  %v4909_v49 = vpop.permute.xlu0 %4908  ;;  %v9218_v61 = vld [vmem:[%s13348_s2 + $0xf0] sm:$0xff]  ;;  %vm13759_vm7 = vmmov %vm13754_vm6 }
 0x368   : > { %4569 = vrot.lane.b32.xlu0 %v4486_v11, %s9326_s11  ;;  %v4968_v9 = vsel %vm13753_vm2, %v4966_v50, %v4967_v39  ;;  %6310 = vmatpush.bf16.msra.mxu0 %v9218_v61  ;;  %v12094_v3 = vsel %vm13747_vm12, %v5375_v8, %v4909_v49  ;;  %vm13760_vm2 = vmmov %vm13755_vm8 }
 0x369   : > { %v5500_v36 = vsel %vm13754_vm6, %v4968_v9, %v5177_v37  ;;  %13756 = vst [vmem:[#allocation22_spill] sm:$0xff] %v12094_v3  ;;  %vm13761_vm6 = vcmask 1045504   ;;  %vm13762_vm8 = vmmov %vm13759_vm7  ;;  %v9189_v9 = vld [vmem:[%s13348_s2 + $0x8] sm:$0xff] }
 0x36a   : > { %v12097_v46 = vsel %vm13757_vm15, %v5500_v36, %v5288_v52  ;;  %v4969_v52 = vrot.slane %v9311_v48, 2  ;;  %vm13763_vm15 = vmmov %vm13760_vm2  ;;  %6018 = vmatpush.bf16.msra.mxu1 %v9189_v9 }
 0x36c   : > { %v4971_v39 = vsel %vm13761_vm6, %v4969_v52, %v4970_v47  ;;  %vm13766_vm6 = vmmov %vm13762_vm8 }
 0x36e   : > { %v4668_v33 = vpop.permute.xlu1 %4667 }
 0x36f   : > { %4922 = vrot.lane.b32.xlu2 %v4851_v15, %s9327_s14  ;;  %v4558_v16 = vpop.permute.xlu0 %4557 }
 0x370   : > { %v4560_v27 = vpop.permute.xlu2 %4559  ;;  %v5333_v49 = vsel %vm13759_vm7, %v9310_v0, %v4558_v16  ;;  %vm13765_vm7 = vcmask 1046528  }
 0x371   : > { %5796 = vmatmul.bf16.gmra.mxu0 %v12063_v56  ;;  %v5335_v47 = vsel %vm13766_vm6, %v9311_v48, %v4560_v27  ;;  %v9196_v48 = vld [vmem:[%s13348_s2 + $0x40] sm:$0xff] }
 0x372   : > { %8529 = vmatmul.msk.bf16.gmra.mxu2 %vm13751_vm13, %v12066_v14  ;;  %v5851_v20 = vpop.f32.mrf.mxu2  ;;  %vm13758_vm13 = vmmov %vm13747_vm12  ;;  %6108 = vmatpush.bf16.msra.mxu3 %v9196_v48 }
 0x376   : > { %v5762_v1 = vpop.f32.mrf.mxu0 }
 0x377   : > { %v12091_v53 = vadd.f32 %v5851_v20, %v5762_v1  ;;  %v5377_v20 = vsel %vm13760_vm2, %v5333_v49, %v4668_v33  ;;  %v1453_v33 = vrot.slane %v11856_v13, 1  ;;  %v4972_v49 = vrot.slane %v11584_v26, 2 }
 0x378   : > { %v12114_v63 = vsel %vm13747_vm12, %v5377_v20, %v4911_v32 }
 0x379   : > { %v5181_v45 = vpop.permute.xlu2 %5180 }
 0x37a   : > { %v5853_v11 = vpop.f32.mrf.mxu2 }
 0x37c   : > { %v5290_v58 = vpop.permute.xlu1 %5289 }
 0x37e   : > { %v5764_v62 = vpop.f32.mrf.mxu0 }
 0x37f   : > { %v12102_v15 = vadd.f32 %v5853_v11, %v5764_v62  ;;  %v1454_v11 = vrot.slane %v11871_v30, 1  ;;  %v4973_v62 = vrot.slane %v11601_v28, 2  ;;  %v9217_v30 = vld [vmem:[%s13348_s2 + $0xe8] sm:$0xff] }
 0x380   : > { %v5179_v12 = vpop.permute.xlu0 %5178  ;;  %6311 = vmatpush.bf16.msra.mxu0 %v9217_v30  ;;  %v9224_v30 = vld [vmem:[%s13348_s2 + $0x120] sm:$0xff] }
 0x381   : > { %5801 = vmatmul.bf16.gmra.mxu0 %v12094_v3  ;;  %v12106_v23 = vpop.permute.xlu2 %4671  ;;  %v5503_v61 = vsel %vm13762_vm8, %v4971_v39, %v5179_v12  ;;  %vm13767_vm8 = vmmov %vm13760_vm2  ;;  %6401 = vmatpush.bf16.msra.mxu2 %v9224_v30 }
 0x382   : > { %8530 = vmatmul.msk.bf16.gmra.mxu2 %vm13758_vm13, %v12097_v46  ;;  %v5856_v37 = vpop.f32.mrf.mxu2  ;;  %v12117_v16 = vsel %vm13763_vm15, %v5503_v61, %v5290_v58  ;;  %vm13764_vm13 = vmmov %vm13747_vm12  ;;  %v1455_v58 = vsel %vm13765_vm7, %v1453_v33, %v1454_v11  ;;  %vm13768_vm12 = vcmask 1045504  }
 0x383   : > { %8259 = vmatmul.msk.bf16.gmra.mxu3 %vm13760_vm2, %v1455_v58  ;;  %v4974_v61 = vsel %vm13768_vm12, %v4972_v49, %v4973_v62  ;;  %vm13769_vm15 = vmmov %vm13766_vm6  ;;  %v4975_v62 = vrot.slane %v11635_v5, 2  ;;  %v9188_v49 = vld [vmem:[%s13348_s2] sm:$0xff] }
 0x384   : > { %v5506_v28 = vsel %vm13769_vm15, %v4974_v61, %v5181_v45  ;;  %vm13770_vm7 = vmmov %vm13760_vm2  ;;  %6019 = vmatpush.bf16.msra.mxu1 %v9188_v49 }
 0x385   : > { %vm13771_vm2 = vmmov %vm13764_vm13 }
 0x386   : > { %v4913_v4 = vpop.permute.xlu1 %4912  ;;  %vm13774_vm15 = vmmov %vm13770_vm7 }
 0x389   : > { %v5294_v36 = vpop.permute.xlu2 %5293 }
 0x38a   : > { %v4670_v22 = vpop.permute.xlu0 %4669  ;;  %v5858_v50 = vpop.f32.mrf.mxu2 }
 0x38b   : > { %v5379_v52 = vsel %vm13767_vm8, %v5335_v47, %v4670_v22  ;;  %vm13772_vm8 = vmmov %vm13768_vm12 }
 0x38c   : > { %v12143_v11 = vsel %vm13764_vm13, %v5379_v52, %v4913_v4  ;;  %v4976_v4 = vrot.slane %v11641_v57, 2  ;;  %vm13773_vm12 = vmmov %vm13766_vm6 }
 0x38d   : > { %v5767_v35 = vpop.f32.mrf.mxu0 }
 0x38e   : > { %v4562_v51 = vpop.permute.xlu1 %4561  ;;  %v12111_v40 = vadd.f32 %v5856_v37, %v5767_v35  ;;  %v4977_v52 = vsel %vm13772_vm8, %v4975_v62, %v4976_v4  ;;  %vm13776_vm8 = vmmov %vm13770_vm7 }
 0x38f   : > { %v5337_v47 = vsel %vm13766_vm6, %v11584_v26, %v4562_v51 }
 0x390   : > { %v5381_v61 = vsel %vm13774_vm15, %v5337_v47, %v12106_v23  ;;  %v4979_v23 = vrot.slane %v11716_v59, 2  ;;  %vm13778_vm15 = vcmask 1045504  }
 0x391   : > { %5806 = vmatmul.bf16.gmra.mxu0 %v12114_v63  ;;  %v4917_v35 = vpop.permute.xlu2 %4916 }
 0x392   : > { %v5292_v0 = vpop.permute.xlu0 %5291  ;;  %8531 = vmatmul.msk.bf16.gmra.mxu2 %vm13764_vm13, %v12117_v16  ;;  %vm13775_vm13 = vmmov %vm13771_vm2 }
 0x393   : > { %v12146_v27 = vsel %vm13770_vm7, %v5506_v28, %v5292_v0 }
 0x395   : > { %v5861_v32 = vpop.f32.mrf.mxu2  ;;  %v5769_v8 = vpop.f32.mrf.mxu0 }
 0x396   : > { %v5183_v1 = vpop.permute.xlu1 %5182  ;;  %v12128_v12 = vadd.f32 %v5858_v50, %v5769_v8 }
 0x397   : > { %v5509_v57 = vsel %vm13773_vm12, %v4977_v52, %v5183_v1  ;;  %v9216_v52 = vld [vmem:[%s13348_s2 + $0xe0] sm:$0xff]  ;;  %vm13777_vm12 = vmmov %vm13770_vm7 }
 0x398   : > { %v12176_v51 = vsel %vm13770_vm7, %v5509_v57, %v5294_v36  ;;  %v4978_v36 = vrot.slane %v11733_v2, 2  ;;  %6312 = vmatpush.bf16.msra.mxu0 %v9216_v52  ;;  %vm13780_vm7 = vmmov %vm13771_vm2 }
 0x399   : > { %v4566_v0 = vpop.permute.xlu2 %4565 }
 0x39a   : > { %v4915_v37 = vpop.permute.xlu0 %4914  ;;  %v4980_v57 = vsel %vm13778_vm15, %v4978_v36, %v4979_v23  ;;  %v4934_v23 = vrot.slane %v11886_v6, 2 }
 0x39b   : > { %v12173_v48 = vsel %vm13775_vm13, %v5381_v61, %v4915_v37  ;;  %vm13779_vm13 = vmmov %vm13766_vm6 }
 0x39d   : > { %v5863_v20 = vpop.f32.mrf.mxu2 }
 0x39e   : > { %v4674_v39 = vpop.permute.xlu1 %4673  ;;  %v5772_v50 = vpop.f32.mrf.mxu0 }
 0x39f   : > { %v12139_v33 = vadd.f32 %v5861_v32, %v5772_v50 }
 0x3a1   : > { %5811 = vmatmul.bf16.gmra.mxu0 %v12143_v11  ;;  %v5187_v1 = vpop.permute.xlu2 %5186 }
 0x3a2   : > { %v4564_v22 = vpop.permute.xlu0 %4563  ;;  %8532 = vmatmul.msk.bf16.gmra.mxu2 %vm13771_vm2, %v12146_v27 }
 0x3a3   : > { %v5339_v37 = vsel %vm13766_vm6, %v11635_v5, %v4564_v22  ;;  %vm13782_vm6 = vmmov %vm13780_vm7 }
 0x3a5   : > { %v5866_v9 = vpop.f32.mrf.mxu2 }
 0x3a6   : > { %v5296_v32 = vpop.permute.xlu1 %5295  ;;  %v5774_v8 = vpop.f32.mrf.mxu0 }
 0x3a7   : > { %v12154_v45 = vadd.f32 %v5863_v20, %v5774_v8 }
 0x3a9   : > { %v4568_v59 = vpop.permute.xlu2 %4567 }
 0x3aa   : > { %v5185_v58 = vpop.permute.xlu0 %5184 }
 0x3ab   : > { %v5512_v5 = vsel %vm13779_vm13, %v4980_v57, %v5185_v58 }
 0x3ad   : > { %v5868_v20 = vpop.f32.mrf.mxu2 }
 0x3ae   : > { %v5777_v50 = vpop.f32.mrf.mxu0  ;;  %v4919_v26 = vpop.permute.xlu1 %4918 }
 0x3af   : > { %v12170_v28 = vadd.f32 %v5866_v9, %v5777_v50 }
 0x3b1   : > { %5816 = vmatmul.bf16.gmra.mxu0 %v12173_v48  ;;  %v5155_v36 = vpop.permute.xlu2 %5154 }
 0x3b2   : > { %v4676_v8 = vpop.permute.xlu0 %4675  ;;  %8533 = vmatmul.msk.bf16.gmra.mxu2 %vm13771_vm2, %v12176_v51  ;;  %vm13781_vm2 = vmmov %vm13776_vm8 }
 0x3b5   : > { %v5871_v4 = vpop.f32.mrf.mxu2 }
 0x3b6   : > { %v5779_v62 = vpop.f32.mrf.mxu0 }
 0x3b7   : > { %v12181_v30 = vadd.f32 %v5868_v20, %v5779_v62  ;;  %v5383_v20 = vsel %vm13777_vm12, %v5339_v37, %v4674_v39  ;;  %vm13784_vm12 = vmmov %vm13779_vm13 }
 0x3b8   : > { %v1400_v47 = vpop.permute.xlu1 %1399  ;;  %v12198_v62 = vsel %vm13780_vm7, %v5383_v20, %v4917_v35  ;;  %v4982_v20 = vrot.slane %v11802_v19, 2  ;;  %vm13786_vm13 = vmmov %vm13784_vm12 }
 0x3b9   : > { %v1509_v49 = vsel %vm13776_vm8, %v11856_v13, %v1400_v47  ;;  %v12201_v13 = vsel %vm13781_vm2, %v5512_v5, %v5296_v32  ;;  %vm13783_vm8 = vmmov %vm13778_vm15  ;;  %v5341_v5 = vsel %vm13786_vm13, %v11733_v2, %v4566_v0 }
 0x3ba   : > { %v5298_v9 = vpop.permute.xlu0 %5297  ;;  %2294 = vmatmul.bf16.gmra.mxu1 %v1509_v49  ;;  %vm13785_vm15 = vmmov %vm13781_vm2 }
 0x3bb   : > { %vm13787_vm7 = vmmov %vm13782_vm6 }
 0x3bc   : > { %vm13792_vm13 = vmmov %vm13781_vm2 }
 0x3bd   : > { %v5873_v50 = vpop.f32.mrf.mxu2 }
 0x3be   : > { %v5782_v22 = vpop.f32.mrf.mxu0 }
 0x3bf   : > { %v12195_v61 = vadd.f32 %v5871_v4, %v5782_v22  ;;  %v4933_v4 = vrot.slane %v11897_v31, 2  ;;  %v4981_v22 = vrot.slane %v11814_v41, 2 }
 0x3c0   : > { %v4921_v39 = vpop.permute.xlu1 %4920 }
 0x3c1   : > { %5821 = vmatmul.bf16.gmra.mxu0 %v12198_v62  ;;  %v4935_v35 = vsel %vm13783_vm8, %v4933_v4, %v4934_v23 }
 0x3c2   : > { %v4678_v47 = vpop.permute.xlu0 %4677  ;;  %8534 = vmatmul.msk.bf16.gmra.mxu2 %vm13782_vm6, %v12201_v13  ;;  %v5467_v32 = vsel %vm13784_vm12, %v4935_v35, %v5155_v36  ;;  %vm13788_vm6 = vmmov %vm13783_vm8  ;;  %v4646_v35 = vpop.permute.xlu2 %4645 }
 0x3c3   : > { %v4983_v23 = vsel %vm13788_vm6, %v4981_v22, %v4982_v20  ;;  %vm13789_vm8 = vmmov %vm13784_vm12 }
 0x3c4   : > { %vm13790_vm12 = vmmov %vm13789_vm8  ;;  %v5343_v20 = vsel %vm13789_vm8, %v11814_v41, %v4568_v59 }
 0x3c5   : > { %v5876_v37 = vpop.f32.mrf.mxu2  ;;  %v5515_v36 = vsel %vm13790_vm12, %v4983_v23, %v5187_v1  ;;  %v9237_v1 = vld [vmem:[%s13348_s2 + $0x188] sm:$0xff] }
 0x3c6   : > { %v5784_v58 = vpop.f32.mrf.mxu0  ;;  %v12229_v0 = vsel %vm13792_vm13, %v5515_v36, %v5298_v9  ;;  %6630 = vmatpush.bf16.msrb.mxu1 %v9237_v1 }
 0x3c7   : > { %v12208_v49 = vadd.f32 %v5873_v50, %v5784_v58  ;;  %v5385_v50 = vsel %vm13781_vm2, %v5341_v5, %v4676_v8 }
 0x3c8   : > { %v4536_v6 = vpop.permute.xlu1 %4535 }
 0x3c9   : > { %v5311_v4 = vsel %vm13789_vm8, %v11897_v31, %v4536_v6 }
 0x3ca   : > { %v5266_v52 = vpop.permute.xlu0 %5265 }
 0x3cb   : > { %v5532_v57 = vsel %vm13785_vm15, %v5467_v32, %v5266_v52  ;;  %vm13791_vm15 = vmmov %vm13787_vm7 }
 0x3cc   : > { %8592 = vmatmul.msk.bf16.vlgmr.msra.gmra.mxu3 %vm13787_vm7, %v5532_v57  ;;  %v12226_v2 = vsel %vm13791_vm15, %v5385_v50, %v4919_v26  ;;  %vm13793_vm7 = vmmov %vm13781_vm2  ;;  %v9257_v26 = vld [vmem:[%s13348_s2 + $0x228] sm:$0xff]  ;;  %v9251_v57 = vld [vmem:[%s13348_s2 + $0x1f8] sm:$0xff] }
 0x3cd   : > { %v5878_v58 = vpop.f32.mrf.mxu2  ;;  %v5355_v8 = vsel %vm13793_vm7, %v5311_v4, %v4646_v35  ;;  %vm13794_vm2 = vmmov %vm13791_vm15  ;;  %7046 = vmatpush.bf16.msrb.mxu2 %v9257_v26  ;;  %6955 = vmatpush.bf16.msrb.mxu0 %v9251_v57 }
 0x3ce   : > { %v5787_v42 = vpop.f32.mrf.mxu0  ;;  %vm13795_vm6 = vmmov %vm13794_vm2 }
 0x3cf   : > { %v12222_v19 = vadd.f32 %v5876_v37, %v5787_v42  ;;  %v9243_v42 = vld [vmem:[%s13348_s2 + $0x1b8] sm:$0xff]  ;;  %vm13796_vm12 = vmmov %vm13794_vm2 }
 0x3d0   : > { %6721 = vmatpush.bf16.msrb.mxu3 %v9243_v42  ;;  %vm13797_vm15 = vmmov %vm13793_vm7 }
 0x3d1   : > { %5826 = vmatmul.bf16.gmra.mxu0 %v12226_v2  ;;  %v5387_v5 = vsel %vm13797_vm15, %v5343_v20, %v4678_v47  ;;  %vm13798_vm13 = vmmov %vm13794_vm2 }
 0x3d2   : > { %v4889_v32 = vpop.permute.xlu0 %4888  ;;  %8535 = vmatmul.msk.bf16.gmra.mxu2 %vm13794_vm2, %v12229_v0  ;;  %vm13799_vm7 = vmmov %vm13794_vm2 }
 0x3d3   : > { %v5400_v31 = vsel %vm13795_vm6, %v5355_v8, %v4889_v32  ;;  %vm13801_vm6 = vmmov %vm13794_vm2  ;;  %v9256_v8 = vld [vmem:[%s13348_s2 + $0x220] sm:$0xff] }
 0x3d4   : > { %6020 = vmatmul.bf16.vlgmr.msra.gmra.mxu1 %v5400_v31  ;;  %vm13803_vm8 = vmmov %vm13794_vm2  ;;  %7047 = vmatpush.bf16.msrb.mxu2 %v9256_v8  ;;  %v13816_v8 = vld [vmem:[#allocation14_spill] sm:$0xff] }
 0x3d5   : > { %v5881_v9 = vpop.f32.mrf.mxu2  ;;  %vm13807_vm15 = vmmov %vm13794_vm2 }
 0x3d6   : > { %v5789_v37 = vpop.f32.mrf.mxu0 }
 0x3d7   : > { %v12245_v52 = vadd.f32 %v5878_v58, %v5789_v37  ;;  %v12258_v58 = vsel %vm13798_vm13, %v5387_v5, %v4921_v39  ;;  %vm13809_vm13 = vmmov %vm13794_vm2  ;;  %v9235_v5 = vld [vmem:[%s13348_s2 + $0x178] sm:$0xff] }
 0x3dc   : > { %8593 = vmatmul.msk.bf16.gmra.mxu3 %vm13796_vm12, %v11288_v25  ;;  %vm13805_vm12 = vmmov %vm13794_vm2 }
 0x3dd   : > { %v5883_v6 = vpop.f32.mrf.mxu2 }
 0x3de   : > { %v5792_v22 = vpop.f32.mrf.mxu0 }
 0x3df   : > { %v12255_v50 = vadd.f32 %v5881_v9, %v5792_v22 }
 0x3e1   : > { %5831 = vmatmul.bf16.gmra.mxu0 %v12258_v58 }
 0x3e2   : > { %8692 = vmatmul.msk.bf16.vlgmr.msra.gmra.mxu2 %vm13799_vm7, %v11439_v24  ;;  %vm13811_vm7 = vmmov %vm13794_vm2 }
 0x3e4   : > { %6025 = vmatmul.bf16.gmra.mxu1 %v11328_v7  ;;  %v9236_v7 = vld [vmem:[%s13348_s2 + $0x180] sm:$0xff] }
 0x3e5   : > { %v5886_v25 = vpop.f32.mrf.mxu2  ;;  %6631 = vmatpush.bf16.msrb.mxu1 %v9236_v7 }
 0x3e6   : > { %v5794_v41 = vpop.f32.mrf.mxu0 }
 0x3e7   : > { %v12264_v59 = vadd.f32 %v5883_v6, %v5794_v41 }
 0x3e9   : > { %6632 = vmatpush.bf16.msrb.mxu1 %v9235_v5  ;;  %v13821_v5 = vld [vmem:[#allocation51_spill] sm:$0xff] }
 0x3ec   : > { %8594 = vmatmul.msk.bf16.gmra.mxu3 %vm13794_vm2, %v11439_v24  ;;  %v9250_v24 = vld [vmem:[%s13348_s2 + $0x1f0] sm:$0xff] }
 0x3ed   : > { %v5888_v47 = vpop.f32.mrf.mxu2  ;;  %6956 = vmatpush.bf16.msrb.mxu0 %v9250_v24 }
 0x3ee   : > { %v5797_v23 = vpop.f32.mrf.mxu0 }
 0x3ef   : > { %v12268_v4 = vadd.f32 %v5886_v25, %v5797_v23 }
 0x3f1   : > { %13800 = vst [vmem:[#allocation61_spill] sm:$0xff] %v12268_v4  ;;  %6313 = vmatmul.bf16.vlgmr.msra.gmra.mxu0 %v11488_v54 }
 0x3f2   : > { %8693 = vmatmul.msk.bf16.gmra.mxu2 %vm13801_vm6, %v11493_v29  ;;  %vm13814_vm6 = vmmov %vm13794_vm2 }
 0x3f4   : > { %6030 = vmatmul.bf16.gmra.mxu1 %v11488_v54  ;;  %v9242_v54 = vld [vmem:[%s13348_s2 + $0x1b0] sm:$0xff] }
 0x3f5   : > { %v5891_v39 = vpop.f32.mrf.mxu2  ;;  %6722 = vmatpush.bf16.msrb.mxu3 %v9242_v54 }
 0x3f6   : > { %v5799_v36 = vpop.f32.mrf.mxu0 }
 0x3f7   : > { %v12277_v35 = vadd.f32 %v5888_v47, %v5799_v36 }
 0x3f9   : > { %13802 = vst [vmem:[#allocation21_spill] sm:$0xff] %v12277_v35 }
 0x3fc   : > { %8595 = vmatmul.msk.bf16.gmra.mxu3 %vm13803_vm8, %v11493_v29  ;;  %vm13818_vm8 = vmmov %vm13794_vm2 }
 0x3fd   : > { %v5893_v32 = vpop.f32.mrf.mxu2 }
 0x3fe   : > { %v5802_v31 = vpop.f32.mrf.mxu0 }
 0x3ff   : > { %v12290_v42 = vadd.f32 %v5891_v39, %v5802_v31 }
 0x401   : > { %13804 = vst [vmem:[#allocation60_spill] sm:$0xff] %v12290_v42  ;;  %6318 = vmatmul.bf16.gmra.mxu0 %v11590_v60 }
 0x402   : > { %8694 = vmatmul.msk.bf16.gmra.mxu2 %vm13805_vm12, %v11598_v34  ;;  %vm13823_vm12 = vmmov %vm13794_vm2 }
 0x404   : > { %6035 = vmatmul.bf16.gmra.mxu1 %v11590_v60 }
 0x405   : > { %v5896_v1 = vpop.f32.mrf.mxu2 }
 0x406   : > { %v5804_v26 = vpop.f32.mrf.mxu0  ;;  %v2384_v31 = vpop.f32.mrf.mxu3 }
 0x407   : > { %v12296_v9 = vadd.f32 %v5893_v32, %v5804_v26  ;;  %v13817_v32 = vld [vmem:[#allocation16_spill] sm:$0xff] }
 0x409   : > { %13806 = vst [vmem:[#allocation64_spill] sm:$0xff] %v12296_v9 }
 0x40c   : > { %8596 = vmatmul.msk.bf16.gmra.mxu3 %vm13807_vm15, %v11598_v34  ;;  %vm13829_vm15 = vmmov %vm13794_vm2 }
 0x40d   : > { %v5898_v57 = vpop.f32.mrf.mxu2 }
 0x40e   : > { %v5807_v37 = vpop.f32.mrf.mxu0 }
 0x40f   : > { %v12300_v20 = vadd.f32 %v5896_v1, %v5807_v37  ;;  %v13819_v1 = vld [vmem:[#allocation10_spill] sm:$0xff] }
 0x410   : > { %v13820_v37 = vld [vmem:[#allocation54_spill] sm:$0xff] }
 0x411   : > { %13808 = vst [vmem:[#allocation23_spill] sm:$0xff] %v12300_v20  ;;  %6323 = vmatmul.bf16.gmra.mxu0 %v11695_v43  ;;  %v4091_v20 = vld [vmem:[#allocation3 + $0xf8] sm:$0x7] }
 0x412   : > { %8695 = vmatmul.msk.bf16.gmra.mxu2 %vm13809_vm13, %v11701_v17  ;;  %vm13834_vm13 = vcmask 257024  }
 0x414   : > { %6040 = vmatmul.bf16.gmra.mxu1 %v11695_v43 }
 0x415   : > { %v5901_v25 = vpop.f32.mrf.mxu2 }
 0x416   : > { %v5809_v6 = vpop.f32.mrf.mxu0 }
 0x417   : > { %v12309_v22 = vadd.f32 %v5898_v57, %v5809_v6  ;;  %v2107_v57 = vadd.f32 %v13820_v37, %v13819_v1  ;;  %v13822_v6 = vld [vmem:[#allocation52_spill] sm:$0xff]  ;;  %v2386_v1 = vpop.f32.mrf.mxu3 }
 0x419   : > { %13810 = vst [vmem:[#allocation24_spill] sm:$0xff] %v12309_v22 }
 0x41c   : > { %8597 = vmatmul.msk.bf16.gmra.mxu3 %vm13811_vm7, %v11701_v17  ;;  %vm13836_vm7 = vmmov %vm13794_vm2 }
 0x41d   : > { %v5903_v23 = vpop.f32.mrf.mxu2 }
 0x41e   : > { %v5812_v41 = vpop.f32.mrf.mxu0 }
 0x41f   : > { %v12313_v47 = vadd.f32 %v5901_v25, %v5812_v41  ;;  %v1856_v25 = vadd.f32 %v13822_v6, %v13821_v5 }
 0x421   : > { %13812 = vst [vmem:[#allocation63_spill] sm:$0xff] %v12313_v47  ;;  %6328 = vmatmul.bf16.gmra.mxu0 %v11776_v18 }
 0x422   : > { %8696 = vmatmul.msk.bf16.gmra.mxu2 %vm13794_vm2, %v11784_v38 }
 0x424   : > { %6045 = vmatmul.bf16.gmra.mxu1 %v11776_v18 }
 0x425   : > { %v5906_v36 = vpop.f32.mrf.mxu2 }
 0x426   : > { %v5814_v7 = vpop.f32.mrf.mxu0 }
 0x427   : > { %v12319_v39 = vadd.f32 %v5903_v23, %v5814_v7  ;;  %v13824_v7 = vld [vmem:[#allocation56_spill] sm:$0xff] }
 0x429   : > { %13813 = vst [vmem:[#allocation69_spill] sm:$0xff] %v12319_v39 }
 0x42c   : > { %8598 = vmatmul.msk.bf16.gmra.mxu3 %vm13814_vm6, %v11784_v38 }
 0x42d   : > { %v5908_v39 = vpop.f32.mrf.mxu2 }
 0x42e   : > { %v5817_v24 = vpop.f32.mrf.mxu0 }
 0x42f   : > { %v12323_v54 = vadd.f32 %v5906_v36, %v5817_v24  ;;  %v2020_v36 = vadd.f32 %v13824_v7, %v1856_v25 }
 0x431   : > { %13815 = vst [vmem:[#allocation25_spill] sm:$0xff] %v12323_v54  ;;  %6333 = vmatmul.bf16.gmra.mxu0 %v13816_v8  ;;  %v9249_v54 = vld [vmem:[%s13348_s2 + $0x1e8] sm:$0xff] }
 0x432   : > { %8697 = vmatmul.msk.bf16.gmra.mxu2 %vm13818_vm8, %v13817_v32  ;;  %6957 = vmatpush.bf16.msrb.mxu0 %v9249_v54 }
 0x434   : > { %6050 = vmatmul.bf16.gmra.mxu1 %v13816_v8 }
 0x436   : > { %v5819_v8 = vpop.f32.mrf.mxu0 }
 0x437   : > { %v2295_v26 = vpop.f32.mrf.mxu1  ;;  %v12339_v47 = vadd.f32 %v5908_v39, %v5819_v8  ;;  %v2952_v39 = vld [vmem:[#allocation3 + $0xd8] sm:$0xe] }
 0x438   : > { %v2385_v41 = vadd.f32 %v2384_v31, %v2295_v26  ;;  %v13826_v31 = vld [vmem:[#allocation59_spill] sm:$0xff]  ;;  %v13827_v26 = vld [vmem:[#allocation57_spill] sm:$0xff] }
 0x439   : > { %13825 = vst [vmem:[#allocation26_spill] sm:$0xff] %v12339_v47 }
 0x43a   : > { %v2419_v23 = vadd.f32 %v2385_v41, %v2107_v57  ;;  %v2109_v57 = vadd.f32 %v13827_v26, %v2020_v36 }
 0x43c   : > { %8599 = vmatmul.msk.bf16.gmra.mxu3 %vm13823_vm12, %v13817_v32  ;;  %v2451_v24 = vmax.f32 %v2419_v23, 0.0  ;;  %v13828_v23 = vld [vmem:[#allocation19_spill] sm:$0xff]  ;;  %vm13861_vm12 = vcmask 1046528  }
 0x43e   : > { %v2483_v37 = vpack.c.bf16 %v2451_v24, %v2451_v24 }
 0x43f   : > { %v2297_v5 = vpop.f32.mrf.mxu1 }
 0x440   : > { %v2774_v6 = vshrl.u32 %v2483_v37, 16  ;;  %v2777_v41 = vshll.u32 %v2483_v37, 16  ;;  %v2387_v25 = vadd.f32 %v2386_v1, %v2297_v5  ;;  %v5911_v37 = vpop.f32.mrf.mxu2  ;;  %v5822_v1 = vpop.f32.mrf.mxu0  ;;  %v9241_v5 = vld [vmem:[%s13348_s2 + $0x1a8] sm:$0xff] }
 0x441   : > { %6338 = vmatmul.bf16.gmra.mxu0 %v13826_v31  ;;  %6723 = vmatpush.bf16.msrb.mxu3 %v9241_v5 }
 0x442   : > { %8698 = vmatmul.msk.bf16.gmra.mxu2 %vm13829_vm15, %v13828_v23  ;;  %v2776_v7 = vrot.slane %v2774_v6, 6  ;;  %v2779_v32 = vrot.slane %v2777_v41, 7  ;;  %v2420_v38 = vadd.f32 %v2387_v25, %v2109_v57  ;;  %v9255_v57 = vld [vmem:[%s13348_s2 + $0x218] sm:$0xff]  ;;  %v12357_v41 = vadd.f32 %v5911_v37, %v5822_v1 }
 0x443   : > { %7048 = vmatpush.bf16.msrb.mxu2 %v9255_v57  ;;  %v2956_v37 = vld [vmem:[#allocation3 + $0xe0] sm:$0x3] }
 0x444   : > { %6055 = vmatmul.bf16.gmra.mxu1 %v13826_v31  ;;  %v2780_v8 = vor.u32 %v2779_v32, %v2776_v7  ;;  %v2452_v24 = vmax.f32 %v2420_v38, 0.0  ;;  %v9234_v38 = vld [vmem:[%s13348_s2 + $0x170] sm:$0xff]  ;;  %13831 = vst [vmem:[#allocation71_spill] sm:$0xff] %v12357_v41 }
 0x445   : > { %6633 = vmatpush.bf16.msrb.mxu1 %v9234_v38  ;;  %v3505_v7 = vld [vmem:[#allocation3 + $0xd8] sm:$0x1] }
 0x446   : > { %v2953_v47 = vsel %vm10313_vm14, %v2780_v8, %v2952_v39  ;;  %v2484_v22 = vpack.c.bf16 %v2452_v24, %v2452_v24  ;;  %vm13832_vm14 = vmmov %vm13794_vm2 }
 0x447   : > { %2954 = vst [vmem:[#allocation3 + $0xd8] sm:$0xe] %v2953_v47  ;;  %v2781_v47 = vrot.slane %v2780_v8, 4  ;;  %v13835_v8 = vld [vmem:[#allocation55_spill] sm:$0xff] }
 0x448   : > { %v2783_v36 = vshrl.u32 %v2484_v22, 16  ;;  %v2786_v26 = vshll.u32 %v2484_v22, 16  ;;  %v9248_v22 = vld [vmem:[%s13348_s2 + $0x1e0] sm:$0xff] }
 0x449   : > { %6958 = vmatpush.bf16.msrb.mxu0 %v9248_v22 }
 0x44a   : > { %v2785_v32 = vrot.slane %v2783_v36, 6  ;;  %v2788_v6 = vrot.slane %v2786_v26, 7 }
 0x44c   : > { %8600 = vmatmul.msk.bf16.gmra.mxu3 %vm13832_vm14, %v13828_v23  ;;  %v2789_v25 = vor.u32 %v2788_v6, %v2785_v32  ;;  %vm13863_vm14 = vmmov %vm13861_vm12 }
 0x44e   : > { %v3024_v24 = vld [vmem:[#allocation3 + $0xd8] sm:$0x4]  ;;  %v2790_v26 = vsel %vm10328_vm5, %v2781_v47, %v2789_v25  ;;  %v2791_v23 = vrot.slane %v2789_v25, 4  ;;  %v3172_v5 = vld [vmem:[#allocation3 + $0xd8] sm:$0x2]  ;;  %vm13851_vm5 = vmmov %vm13794_vm2 }
 0x44f   : > { %v6110_v39 = vpop.f32.mrf.mxu3  ;;  %v3357_v54 = vld [vmem:[#allocation3 + $0xd8] sm:$0x4]  ;;  %v8278_v1 = vrot.slane %v3024_v24, 9  ;;  %2955 = vst.msk [vmem:[#allocation3 + $0xdc] sm:$0xf] %vm13834_vm13, %v2790_v26  ;;  %v5913_v24 = vpop.f32.mrf.mxu2 }
 0x450   : > { %v8300_v41 = vrot.slane %v3357_v54, 10  ;;  %v2957_v25 = vsel %vm10347_vm4, %v2791_v23, %v2956_v37  ;;  %v5824_v54 = vpop.f32.mrf.mxu0  ;;  %vm13854_vm4 = vsmask.f32 7424 }
 0x451   : > { %v6021_v31 = vpop.f32.mrf.mxu1  ;;  %6343 = vmatmul.bf16.gmra.mxu0 %v12021_v21  ;;  %v3173_v32 = vsel %vm10340_vm11, %v8278_v1, %v3172_v5  ;;  %v12377_v36 = vadd.f32 %v5913_v24, %v5824_v54  ;;  %2958 = vst [vmem:[#allocation3 + $0xe0] sm:$0x3] %v2957_v25  ;;  %vm13846_vm11 = vmmov %vm13794_vm2 }
 0x452   : > { %v6022_v57 = vadd.f32 %v6021_v31, %v13835_v8  ;;  %8699 = vmatmul.msk.bf16.gmra.mxu2 %vm13836_vm7, %v12027_v44  ;;  %v3506_v22 = vsel %vm10334_vm9, %v8300_v41, %v3505_v7  ;;  %3174 = vst [vmem:[#allocation3 + $0xd8] sm:$0x2] %v3173_v32  ;;  %v9240_v31 = vld [vmem:[%s13348_s2 + $0x1a0] sm:$0xff]  ;;  %v9254_v41 = vld [vmem:[%s13348_s2 + $0x210] sm:$0xff]  ;;  %v5849_v7 = vadd.f32 %v12050_v55, %v12071_v10  ;;  %vm13842_vm9 = vmmov %vm13794_vm2 }
 0x453   : > { %13840 = vst [vmem:[#allocation27_spill] sm:$0xff] %v12377_v36  ;;  %6724 = vmatpush.bf16.msrb.mxu3 %v9240_v31  ;;  %7049 = vmatpush.bf16.msrb.mxu2 %v9254_v41  ;;  %v3662_v55 = vld [vmem:[#allocation3 + $0xe0] sm:$0x4]  ;;  %v9233_v31 = vld [vmem:[%s13348_s2 + $0x168] sm:$0xff]  ;;  %vm13862_vm15 = vmmov %vm13854_vm4 }
 0x454   : > { %v12379_v26 = vadd.f32 %v6110_v39, %v6022_v57  ;;  %6060 = vmatmul.bf16.gmra.mxu1 %v12021_v21  ;;  %3507 = vst [vmem:[#allocation3 + $0xd8] sm:$0x1] %v3506_v22  ;;  %v3692_v39 = vld [vmem:[#allocation3 + $0xd8] sm:$0x8]  ;;  %v9247_v41 = vld [vmem:[%s13348_s2 + $0x1d8] sm:$0xff] }
 0x455   : > { %v8322_v5 = vrot.slane %v3692_v39, 11  ;;  %6634 = vmatpush.bf16.msrb.mxu1 %v9233_v31  ;;  %6959 = vmatpush.bf16.msrb.mxu0 %v9247_v41 }
 0x457   : > { %v6112_v23 = vpop.f32.mrf.mxu3  ;;  %v5916_v8 = vpop.f32.mrf.mxu2 }
 0x458   : > { %v5827_v57 = vpop.f32.mrf.mxu0  ;;  %v3202_v25 = vld [vmem:[#allocation3 + $0xe0] sm:$0x1] }
 0x459   : > { %v6023_v37 = vpop.f32.mrf.mxu1  ;;  %v12390_v32 = vadd.f32 %v5916_v8, %v5827_v57  ;;  %v3535_v24 = vld [vmem:[#allocation3 + $0xe0] sm:$0x1]  ;;  %v3246_v10 = vrot.slane %v3202_v25, 7 }
 0x45a   : > { %v6024_v1 = vadd.f32 %v6023_v37, %v5849_v7  ;;  %v3579_v54 = vrot.slane %v3535_v24, 6  ;;  %v3869_v24 = vld [vmem:[#allocation3 + $0xdc] sm:$0x8] }
 0x45b   : > { %v3839_v38 = vld [vmem:[#allocation3 + $0xd8] sm:$0x1]  ;;  %13841 = vst [vmem:[#allocation70_spill] sm:$0xff] %v12390_v32 }
 0x45c   : > { %v12392_v6 = vadd.f32 %v6112_v23, %v6024_v1  ;;  %8601 = vmatmul.msk.bf16.gmra.mxu3 %vm13842_vm9, %v12027_v44  ;;  %v3840_v47 = vsel %vm10375_vm1, %v8322_v5, %v3839_v38  ;;  %v3327_v23 = vld [vmem:[#allocation3 + $0xe0] sm:$0x2]  ;;  %v3663_v5 = vsel %vm10388_vm0, %v3579_v54, %v3662_v55  ;;  %v4088_v54 = vld [vmem:[#allocation3 + $0xec] sm:$0x7]  ;;  %vm13853_vm1 = vcmask 1044480   ;;  %vm13855_vm0 = vmmov %vm13794_vm2 }
 0x45d   : > { %3841 = vst [vmem:[#allocation3 + $0xd8] sm:$0x1] %v3840_v47  ;;  %v3328_v37 = vsel %vm10383_vm10, %v3246_v10, %v3327_v23  ;;  %v8344_v10 = vrot.slane %v3869_v24, 9  ;;  %vm13850_vm10 = vmmov %vm13794_vm2  ;;  %vm13858_vm2 = vsmask.f32 6400 }
 0x45e   : > { %3329 = vst [vmem:[#allocation3 + $0xe0] sm:$0x2] %v3328_v37  ;;  %vm13859_vm6 = vmmov %vm13855_vm0 }
 0x45f   : > { %v6115_v7 = vpop.f32.mrf.mxu3  ;;  %3664 = vst [vmem:[#allocation3 + $0xe0] sm:$0x4] %v3663_v5  ;;  %v5918_v38 = vpop.f32.mrf.mxu2  ;;  %v4246_v5 = vunpack.c.l.b16 %v4088_v54  ;;  %vm13864_vm13 = vmmov %vm13855_vm0 }
 0x460   : > { %v5829_v22 = vpop.f32.mrf.mxu0  ;;  %vm13865_vm7 = vmmov %vm13853_vm1 }
 0x461   : > { %v6026_v8 = vpop.f32.mrf.mxu1  ;;  %6348 = vmatmul.bf16.gmra.mxu0 %v12063_v56  ;;  %v12412_v47 = vadd.f32 %v5918_v38, %v5829_v22  ;;  %v12428_v22 = vpack.c.b16 %v4246_v5, %v4246_v5 }
 0x462   : > { %v6027_v57 = vadd.f32 %v6026_v8, %v12091_v53  ;;  %8700 = vmatmul.msk.bf16.gmra.mxu2 %vm13846_vm11, %v12066_v14  ;;  %vm13868_vm11 = vmmov %vm13855_vm0 }
 0x463   : > { %13847 = vst [vmem:[#allocation75_spill] sm:$0xff] %v12412_v47  ;;  %v13411_v5 = vshrl.u32 %v12428_v22, 16 }
 0x464   : > { %v12414_v25 = vadd.f32 %v6115_v7, %v6027_v57  ;;  %6065 = vmatmul.bf16.gmra.mxu1 %v12063_v56  ;;  %v12426_v57 = vld [vmem:[#allocation3 + $0xd8] sm:$0xff] }
 0x465   : > { %v4490_v24 = vshll.u32 %v12426_v57, 16 }
 0x466   : > { %v4017_v31 = vld [vmem:[#allocation3 + $0xe0] sm:$0x4] }
 0x467   : > { %v6117_v55 = vpop.f32.mrf.mxu3  ;;  %v4018_v53 = vsel %vm10424_vm3, %v8344_v10, %v4017_v31  ;;  %v5921_v37 = vpop.f32.mrf.mxu2  ;;  %v4488_v31 = vshrl.u32 %v12426_v57, 16  ;;  %v4853_v4 = vrot.slane %v4490_v24, 2  ;;  %vm13856_vm3 = vsmask.f32 5376 }
 0x468   : > { %4019 = vst [vmem:[#allocation3 + $0xe0] sm:$0x4] %v4018_v53  ;;  %v5832_v1 = vpop.f32.mrf.mxu0  ;;  %vm13860_vm8 = vmmov %vm13856_vm3 }
 0x469   : > { %v6028_v41 = vpop.f32.mrf.mxu1  ;;  %v12420_v8 = vadd.f32 %v5921_v37, %v5832_v1  ;;  %vm13867_vm9 = vmmov %vm13856_vm3 }
 0x46a   : > { %v6029_v39 = vadd.f32 %v6028_v41, %v12102_v15 }
 0x46b   : > { %13849 = vst [vmem:[#allocation28_spill] sm:$0xff] %v12420_v8  ;;  %v5253_v8 = vrot.slane %v12426_v57, 3 }
 0x46c   : > { %v12422_v7 = vadd.f32 %v6117_v55, %v6029_v39  ;;  %8602 = vmatmul.msk.bf16.gmra.mxu3 %vm13850_vm10, %v12066_v14  ;;  %v12434_v55 = vld [vmem:[#allocation3 + $0xe4] sm:$0xff]  ;;  %v12439_v39 = vshll.u32 %v12428_v22, 16  ;;  %v5126_v14 = vrot.slane %v4488_v31, 2  ;;  %vm13869_vm10 = vmmov %vm13853_vm1 }
 0x46d   : > { %v12451_v47 = vshrl.u32 %v12434_v55, 16 }
 0x46f   : > { %v6120_v38 = vpop.f32.mrf.mxu3  ;;  %v4085_v54 = vld [vmem:[#allocation3 + $0xe0] sm:$0x7]  ;;  %v5923_v41 = vpop.f32.mrf.mxu2 }
 0x470   : > { %v5834_v23 = vpop.f32.mrf.mxu0  ;;  %v4245_v53 = vunpack.c.l.b16 %v4085_v54 }
 0x471   : > { %v6031_v10 = vpop.f32.mrf.mxu1  ;;  %6353 = vmatmul.bf16.gmra.mxu0 %v12094_v3  ;;  %v12441_v37 = vadd.f32 %v5923_v41, %v5834_v23 }
 0x472   : > { %v6032_v15 = vadd.f32 %v6031_v10, %v12111_v40  ;;  %8701 = vmatmul.msk.bf16.gmra.mxu2 %vm13851_vm5, %v12097_v46  ;;  %v4492_v40 = vrot.slane %v4490_v24, 1  ;;  %v12447_v10 = vpack.c.b16 %v4245_v53, %v4245_v53  ;;  %v5136_v53 = vrot.slane %v13411_v5, 2  ;;  %vm13871_vm5 = vmmov %vm13858_vm2 }
 0x473   : > { %13852 = vst [vmem:[#allocation30_spill] sm:$0xff] %v12441_v37  ;;  %v12457_v37 = vshll.u32 %v12434_v55, 16 }
 0x474   : > { %v12443_v1 = vadd.f32 %v6120_v38, %v6032_v15  ;;  %6070 = vmatmul.bf16.gmra.mxu1 %v12094_v3  ;;  %v5254_v56 = vrot.slane %v12447_v10, 3  ;;  %v4495_v41 = vshll.u32 %v12447_v10, 16  ;;  %v4855_v38 = vshrl.u32 %v12447_v10, 16 }
 0x475   : > { %v5127_v15 = vrot.slane %v4490_v24, 3  ;;  %v4493_v23 = vor.u32 %v4492_v40, %v4488_v31  ;;  %v5137_v3 = vrot.slane %v12439_v39, 3  ;;  %v4852_v40 = vrot.slane %v4488_v31, 1 }
 0x476   : > { %v5255_v32 = vsel %vm13853_vm1, %v5253_v8, %v5254_v56  ;;  %v4497_v36 = vrot.slane %v4495_v41, 1  ;;  %v5129_v21 = vrot.slane %v4855_v38, 2  ;;  %v5130_v18 = vrot.slane %v4495_v41, 3  ;;  %vm13872_vm1 = vmmov %vm13861_vm12 }
 0x477   : > { %v6122_v54 = vpop.f32.mrf.mxu3  ;;  %5301 = vrot.lane.b32.xlu1 %v5255_v32, %s9325_s15  ;;  %v4857_v9 = vrot.slane %v4855_v38, 1  ;;  %v4858_v43 = vrot.slane %v4495_v41, 2  ;;  %v6403_v42 = vpop.f32.mrf.mxu2  ;;  %v5128_v35 = vor.u32 %v5127_v15, %v5126_v14  ;;  %v4247_v32 = vunpack.c.l.b16 %v4091_v20  ;;  %v9239_v38 = vld [vmem:[%s13348_s2 + $0x198] sm:$0xff] }
 0x478   : > { %v6314_v34 = vpop.f32.mrf.mxu0  ;;  %v4498_v5 = vsel %vm13854_vm4, %v4493_v23, %v4497_v36  ;;  %v5131_v60 = vor.u32 %v5130_v18, %v5129_v21  ;;  %v5133_v31 = vrot.slane %v12451_v47, 2  ;;  %v5134_v41 = vrot.slane %v12457_v37, 3  ;;  %6725 = vmatpush.bf16.msrb.mxu3 %v9239_v38  ;;  %vm13873_vm4 = vmmov %vm13858_vm2 }
 0x479   : > { %v6033_v44 = vpop.f32.mrf.mxu1  ;;  %v6404_v8 = vadd.f32 %v6403_v42, %v6314_v34  ;;  %4571 = vrot.lane.b32.xlu2 %v4498_v5, %s9326_s11  ;;  %v9232_v34 = vld [vmem:[%s13348_s2 + $0x160] sm:$0xff]  ;;  %v12484_v21 = vpack.c.b16 %v4247_v32, %v4247_v32  ;;  %v4634_v20 = vrot.slane %v12447_v10, 1  ;;  %v4633_v24 = vrot.slane %v12426_v57, 1  ;;  %v9253_v32 = vld [vmem:[%s13348_s2 + $0x208] sm:$0xff] }
 0x47a   : > { %v6034_v17 = vadd.f32 %v6033_v44, %v12128_v12  ;;  %v5132_v44 = vsel %vm13856_vm3, %v5128_v35, %v5131_v60  ;;  %v4859_v12 = vor.u32 %v4858_v43, %v4857_v9  ;;  %v4854_v60 = vor.u32 %v4853_v4, %v4852_v40  ;;  %6635 = vmatpush.bf16.msrb.mxu1 %v9232_v34  ;;  %vm13874_vm3 = vmmov %vm13862_vm15 }
 0x47b   : > { %v12475_v14 = vadd.f32 %v6404_v8, %v12379_v26  ;;  %5190 = vrot.lane.b32.xlu0 %v5132_v44, %s9326_s11  ;;  %v5138_v43 = vor.u32 %v5137_v3, %v5136_v53  ;;  %13857 = vst [vmem:[#allocation29_spill] sm:$0xff] %v12484_v21  ;;  %v5135_v9 = vor.u32 %v5134_v41, %v5133_v31  ;;  %v4504_v5 = vrot.slane %v12457_v37, 1 }
 0x47c   : > { %v12466_v56 = vadd.f32 %v6122_v54, %v6034_v17  ;;  %8603 = vmatmul.msk.bf16.gmra.mxu3 %vm13855_vm0, %v12097_v46  ;;  %v9246_v17 = vld [vmem:[%s13348_s2 + $0x1d0] sm:$0xff]  ;;  %v4860_v35 = vsel %vm13858_vm2, %v4854_v60, %v4859_v12  ;;  %v12496_v54 = vld [vmem:[#allocation3 + $0xf0] sm:$0xff]  ;;  %v4873_v23 = vshrl.u32 %v12484_v21, 16  ;;  %v4635_v53 = vsel %vm13861_vm12, %v4633_v24, %v4634_v20  ;;  %7050 = vmatpush.bf16.msrb.mxu2 %v9253_v32  ;;  %vm13875_vm2 = vmmov %vm13865_vm7 }
 0x47d   : > { %6960 = vmatpush.bf16.msrb.mxu0 %v9246_v17  ;;  %v5139_v26 = vsel %vm13860_vm8, %v5135_v9, %v5138_v43  ;;  %v4509_v57 = vrot.slane %v12439_v39, 1  ;;  %v12509_v40 = vshll.u32 %v12484_v21, 16  ;;  %v4505_v12 = vor.u32 %v4504_v5, %v12451_v47  ;;  %vm13877_vm8 = vmmov %vm13874_vm3 }
 0x47e   : > { %v4637_v31 = vrot.slane %v12428_v22, 1  ;;  %v12521_v41 = vshrl.u32 %v12496_v54, 16  ;;  %v12524_v34 = vshll.u32 %v12496_v54, 16  ;;  %v5143_v17 = vrot.slane %v4873_v23, 2  ;;  %vm13878_vm12 = vmmov %vm13867_vm9 }
 0x47f   : > { %v6125_v18 = vpop.f32.mrf.mxu3  ;;  %4924 = vrot.lane.b32.xlu1 %v4860_v35, %s9327_s14  ;;  %v6405_v3 = vpop.f32.mrf.mxu2  ;;  %v4636_v60 = vrot.slane %v12434_v55, 1  ;;  %v5257_v43 = vrot.slane %v12428_v22, 3  ;;  %v5144_v35 = vrot.slane %v12509_v40, 3 }
 0x480   : > { %v6316_v4 = vpop.f32.mrf.mxu0 }
 0x481   : > { %v6036_v42 = vpop.f32.mrf.mxu1  ;;  %6358 = vmatmul.bf16.gmra.mxu0 %v12114_v63  ;;  %5192 = vrot.lane.b32.xlu2 %v5139_v26, %s9326_s11  ;;  %v5141_v26 = vrot.slane %v12524_v34, 3  ;;  %v5145_v38 = vor.u32 %v5144_v35, %v5143_v17 }
 0x482   : > { %v6037_v36 = vadd.f32 %v6036_v42, %v12139_v33  ;;  %8702 = vmatmul.msk.bf16.gmra.mxu2 %vm13859_vm6, %v12117_v16  ;;  %v6406_v33 = vadd.f32 %v6405_v3, %v6316_v4  ;;  %v5256_v3 = vrot.slane %v12434_v55, 3  ;;  %v5140_v4 = vrot.slane %v12521_v41, 2  ;;  %vm13876_vm6 = vmmov %vm13855_vm0 }
 0x483   : > { %4681 = vrot.lane.b32.xlu0 %v4635_v53, %s9325_s15  ;;  %v4867_v55 = vrot.slane %v12439_v39, 2  ;;  %v5259_v39 = vrot.slane %v12496_v54, 3 }
 0x484   : > { %v12501_v15 = vadd.f32 %v6125_v18, %v6037_v36  ;;  %6075 = vmatmul.bf16.gmra.mxu1 %v12114_v63  ;;  %v12512_v8 = vadd.f32 %v6406_v33, %v12392_v6  ;;  %v4510_v6 = vsel %vm13862_vm15, %v4505_v12, %v4509_v57  ;;  %v4638_v36 = vsel %vm13863_vm14, %v4636_v60, %v4637_v31  ;;  %v4094_v57 = vld [vmem:[#allocation3 + $0x104] sm:$0x7]  ;;  %vm13879_vm15 = vmmov %vm13873_vm4 }
 0x485   : > { %v13866_v33 = vshrl.u32 %v12428_v22, 16  ;;  %v5142_v12 = vor.u32 %v5141_v26, %v5140_v4  ;;  %v5260_v31 = vrot.slane %v12484_v21, 3  ;;  %v4248_v17 = vunpack.c.l.b16 %v4094_v57  ;;  %v12565_v26 = vld [vmem:[#allocation3 + $0xfc] sm:$0xff]  ;;  %vm13880_vm14 = vmmov %vm13855_vm0 }
 0x487   : > { %v6127_v44 = vpop.f32.mrf.mxu3  ;;  %4573 = vrot.lane.b32.xlu1 %v4510_v6, %s9326_s11  ;;  %v6408_v9 = vpop.f32.mrf.mxu2  ;;  %v4866_v53 = vrot.slane %v13866_v33, 1  ;;  %v4861_v6 = vrot.slane %v12451_v47, 1  ;;  %v5146_v60 = vsel %vm13867_vm9, %v5142_v12, %v5145_v38  ;;  %v4870_v38 = vrot.slane %v12521_v41, 1  ;;  %vm13883_vm9 = vmmov %vm13855_vm0 }
 0x488   : > { %v6319_v20 = vpop.f32.mrf.mxu0  ;;  %v4526_v12 = vshll.u32 %v12565_v26, 16 }
 0x489   : > { %v6038_v18 = vpop.f32.mrf.mxu1  ;;  %v6409_v5 = vadd.f32 %v6408_v9, %v6319_v20  ;;  %4683 = vrot.lane.b32.xlu2 %v4638_v36, %s9325_s15  ;;  %v4868_v35 = vor.u32 %v4867_v55, %v4866_v53  ;;  %v4875_v20 = vrot.slane %v4873_v23, 1  ;;  %v4876_v36 = vrot.slane %v12509_v40, 2 }
 0x48a   : > { %v6039_v42 = vadd.f32 %v6038_v18, %v12154_v45  ;;  %v5258_v45 = vsel %vm13865_vm7, %v5256_v3, %v5257_v43  ;;  %v4862_v18 = vrot.slane %v12457_v37, 2  ;;  %v5261_v37 = vsel %vm13869_vm10, %v5259_v39, %v5260_v31  ;;  %vm13882_vm7 = vmmov %vm13855_vm0 }
 0x48b   : > { %v12546_v32 = vadd.f32 %v6409_v5, %v12414_v25  ;;  %5303 = vrot.lane.b32.xlu0 %v5258_v45, %s9325_s15  ;;  %v4640_v45 = vrot.slane %v12484_v21, 1  ;;  %v4871_v23 = vrot.slane %v12524_v34, 2  ;;  %v4639_v55 = vrot.slane %v12496_v54, 1  ;;  %vm13886_vm10 = vmmov %vm13855_vm0 }
 0x48c   : > { %v12536_v24 = vadd.f32 %v6127_v44, %v6039_v42  ;;  %8604 = vmatmul.msk.bf16.gmra.mxu3 %vm13864_vm13, %v12117_v16  ;;  %v4863_v9 = vor.u32 %v4862_v18, %v4861_v6  ;;  %v4877_v57 = vor.u32 %v4876_v36, %v4875_v20  ;;  %vm13881_vm13 = vmmov %vm13872_vm1 }
 0x48d   : > { %v4641_v6 = vsel %vm13872_vm1, %v4639_v55, %v4640_v45  ;;  %v5262_v45 = vrot.slane %v12565_v26, 3  ;;  %vm13888_vm1 = vcmask 261120  }
 0x48e   : > { %v4869_v5 = vsel %vm13871_vm5, %v4863_v9, %v4868_v35  ;;  %vm13887_vm5 = vcmask 1045504  }
 0x48f   : > { %v6130_v44 = vpop.f32.mrf.mxu3  ;;  %5194 = vrot.lane.b32.xlu1 %v5146_v60, %s9326_s11  ;;  %v6410_v42 = vpop.f32.mrf.mxu2  ;;  %v4521_v60 = vrot.slane %v12509_v40, 1  ;;  %v4528_v40 = vrot.slane %v4526_v12, 1 }
 0x490   : > { %v6321_v47 = vpop.f32.mrf.mxu0 }
 0x491   : > { %v6041_v43 = vpop.f32.mrf.mxu1  ;;  %6363 = vmatmul.bf16.gmra.mxu0 %v12143_v11  ;;  %v6411_v4 = vadd.f32 %v6410_v42, %v6321_v47  ;;  %5305 = vrot.lane.b32.xlu2 %v5261_v37, %s9325_s15 }
 0x492   : > { %v6042_v25 = vadd.f32 %v6041_v43, %v12170_v28  ;;  %8703 = vmatmul.msk.bf16.gmra.mxu2 %vm13868_vm11, %v12146_v27  ;;  %v12567_v28 = vpack.c.b16 %v4248_v17, %v4248_v17  ;;  %v4872_v17 = vor.u32 %v4871_v23, %v4870_v38  ;;  %vm13884_vm11 = vmmov %vm13855_vm0 }
 0x493   : > { %v12574_v33 = vadd.f32 %v6411_v4, %v12422_v7  ;;  %4926 = vrot.lane.b32.xlu0 %v4869_v5, %s9327_s14  ;;  %v9245_v4 = vld [vmem:[%s13348_s2 + $0x1c8] sm:$0xff] }
 0x494   : > { %v12561_v3 = vadd.f32 %v6130_v44, %v6042_v25  ;;  %6080 = vmatmul.bf16.gmra.mxu1 %v12143_v11  ;;  %13870 = vst [vmem:[#allocation31_spill] sm:$0xff] %v12567_v28  ;;  %v4516_v44 = vrot.slane %v12524_v34, 1  ;;  %v4531_v31 = vshll.u32 %v12567_v28, 16  ;;  %v4882_v7 = vshrl.u32 %v12567_v28, 16  ;;  %6961 = vmatpush.bf16.msrb.mxu0 %v9245_v4 }
 0x495   : > { %v4878_v34 = vsel %vm13873_vm4, %v4872_v17, %v4877_v57  ;;  %v4524_v25 = vshrl.u32 %v12565_v26, 16  ;;  %vm13889_vm4 = vcmask 523264  }
 0x496   : > { %v4517_v35 = vor.u32 %v4516_v44, %v12521_v41  ;;  %v5150_v9 = vrot.slane %v4882_v7, 2  ;;  %v5151_v20 = vrot.slane %v4531_v31, 3  ;;  %v9231_v41 = vld [vmem:[%s13348_s2 + $0x158] sm:$0xff]  ;;  %v4533_v38 = vrot.slane %v4531_v31, 1 }
 0x497   : > { %v6132_v53 = vpop.f32.mrf.mxu3  ;;  %4685 = vrot.lane.b32.xlu1 %v4641_v6, %s9325_s15  ;;  %v6413_v54 = vpop.f32.mrf.mxu2  ;;  %v5147_v23 = vrot.slane %v4524_v25, 2  ;;  %v4529_v55 = vor.u32 %v4528_v40, %v4524_v25  ;;  %6636 = vmatpush.bf16.msrb.mxu1 %v9231_v41  ;;  %v4884_v6 = vrot.slane %v4882_v7, 1 }
 0x498   : > { %v6324_v39 = vpop.f32.mrf.mxu0  ;;  %v4522_v37 = vsel %vm13874_vm3, %v4517_v35, %v4521_v60  ;;  %v5152_v44 = vor.u32 %v5151_v20, %v5150_v9  ;;  %v4880_v35 = vrot.slane %v4526_v12, 2  ;;  %v4643_v9 = vrot.slane %v12567_v28, 1  ;;  %vm13892_vm3 = vmmov %vm13888_vm1 }
 0x499   : > { %v6043_v18 = vpop.f32.mrf.mxu1  ;;  %v6414_v47 = vadd.f32 %v6413_v54, %v6324_v39  ;;  %4928 = vrot.lane.b32.xlu2 %v4878_v34, %s9327_s14  ;;  %v4534_v54 = vsel %vm13877_vm8, %v4529_v55, %v4533_v38  ;;  %v4879_v34 = vrot.slane %v4524_v25, 1  ;;  %vm13897_vm8 = vmmov %vm13855_vm0 }
 0x49a   : > { %v6044_v43 = vadd.f32 %v6043_v18, %v12181_v30  ;;  %v5263_v30 = vrot.slane %v12567_v28, 3  ;;  %v4885_v18 = vrot.slane %v4531_v31, 2 }
 0x49b   : > { %v12597_v36 = vadd.f32 %v6414_v47, %v12443_v1  ;;  %4575 = vrot.lane.b32.xlu0 %v4522_v37, %s9326_s11 }
 0x49c   : > { %v12589_v42 = vadd.f32 %v6132_v53, %v6044_v43  ;;  %8605 = vmatmul.msk.bf16.gmra.mxu3 %vm13855_vm0, %v12146_v27  ;;  %v5148_v53 = vrot.slane %v4526_v12, 3  ;;  %v5264_v1 = vsel %vm13875_vm2, %v5262_v45, %v5263_v30  ;;  %v4881_v30 = vor.u32 %v4880_v35, %v4879_v34  ;;  %vm13895_vm2 = vmmov %vm13855_vm0 }
 0x49e   : > { %v5149_v39 = vor.u32 %v5148_v53, %v5147_v23 }
 0x49f   : > { %v6135_v5 = vpop.f32.mrf.mxu3  ;;  %5307 = vrot.lane.b32.xlu1 %v5264_v1, %s9325_s15  ;;  %v6415_v60 = vpop.f32.mrf.mxu2 }
 0x4a0   : > { %v6326_v43 = vpop.f32.mrf.mxu0  ;;  %v5153_v31 = vsel %vm13878_vm12, %v5149_v39, %v5152_v44  ;;  %vm13899_vm12 = vmmov %vm13855_vm0 }
 0x4a1   : > { %v6046_v57 = vpop.f32.mrf.mxu1  ;;  %6368 = vmatmul.bf16.gmra.mxu0 %v12173_v48  ;;  %v6416_v7 = vadd.f32 %v6415_v60, %v6326_v43  ;;  %4577 = vrot.lane.b32.xlu2 %v4534_v54, %s9326_s11 }
 0x4a2   : > { %v6047_v17 = vadd.f32 %v6046_v57, %v12195_v61  ;;  %8704 = vmatmul.msk.bf16.gmra.mxu2 %vm13876_vm6, %v12176_v51  ;;  %v4886_v61 = vor.u32 %v4885_v18, %v4884_v6  ;;  %vm13896_vm6 = vmmov %vm13889_vm4 }
 0x4a3   : > { %v12620_v40 = vadd.f32 %v6416_v7, %v12466_v56  ;;  %5196 = vrot.lane.b32.xlu0 %v5153_v31, %s9326_s11  ;;  %v9244_v31 = vld [vmem:[%s13348_s2 + $0x1c0] sm:$0xff] }
 0x4a4   : > { %v12614_v47 = vadd.f32 %v6135_v5, %v6047_v17  ;;  %6085 = vmatmul.bf16.gmra.mxu1 %v12173_v48  ;;  %v4887_v25 = vsel %vm13879_vm15, %v4881_v30, %v4886_v61  ;;  %v4642_v5 = vrot.slane %v12565_v26, 1  ;;  %v9252_v26 = vld [vmem:[%s13348_s2 + $0x200] sm:$0xff]  ;;  %v9230_v17 = vld [vmem:[%s13348_s2 + $0x150] sm:$0xff]  ;;  %6962 = vmatpush.bf16.msrb.mxu0 %v9244_v31  ;;  %v9285_v31 = vld [vmem:[%s13348_s2 + $0x308] sm:$0xff] }
 0x4a5   : > { %7051 = vmatpush.bf16.msrb.mxu2 %v9252_v26  ;;  %6637 = vmatpush.bf16.msrb.mxu1 %v9230_v17  ;;  %vm13903_vm15 = vmmov %vm13855_vm0 }
 0x4a6   : > { %v4644_v38 = vsel %vm13881_vm13, %v4642_v5, %v4643_v9  ;;  %v5189_v5 = vpop.permute.xlu1 %5188  ;;  %vm13909_vm13 = vmmov %vm13855_vm0 }
 0x4a7   : > { %v6137_v37 = vpop.f32.mrf.mxu3  ;;  %4930 = vrot.lane.b32.xlu1 %v4887_v25, %s9327_s14  ;;  %v6418_v41 = vpop.f32.mrf.mxu2 }
 0x4a8   : > { %v6329_v4 = vpop.f32.mrf.mxu0 }
 0x4a9   : > { %v6048_v12 = vpop.f32.mrf.mxu1  ;;  %v6419_v56 = vadd.f32 %v6418_v41, %v6329_v4  ;;  %7696 = vmatpush.bf16.msra.mxu2 %v9285_v31  ;;  %v13901_v31 = vld [vmem:[#allocation64_spill] sm:$0xff] }
 0x4aa   : > { %v6049_v20 = vadd.f32 %v6048_v12, %v12208_v49  ;;  %v9238_v49 = vld [vmem:[%s13348_s2 + $0x190] sm:$0xff] }
 0x4ab   : > { %v12634_v23 = vadd.f32 %v6419_v56, %v12501_v15  ;;  %4687 = vrot.lane.b32.xlu0 %v4644_v38, %s9325_s15  ;;  %6726 = vmatpush.bf16.msrb.mxu3 %v9238_v49  ;;  %v9312_v56 = vld [vmem:[#allocation3 + $0xcc] sm:$0xff] }
 0x4ac   : > { %v12628_v45 = vadd.f32 %v6137_v37, %v6049_v20  ;;  %8606 = vmatmul.msk.bf16.gmra.mxu3 %vm13880_vm14, %v12176_v51  ;;  %v13885_v20 = vld [vmem:[#allocation17_spill] sm:$0xff]  ;;  %v4984_v38 = vrot.slane %v9312_v56, 2  ;;  %vm13905_vm14 = vmmov %vm13855_vm0 }
 0x4ad   : > { %v4985_v41 = vrot.slane %v13885_v20, 2 }
 0x4af   : > { %v6140_v53 = vpop.f32.mrf.mxu3  ;;  %v6420_v15 = vpop.f32.mrf.mxu2 }
 0x4b0   : > { %v6331_v57 = vpop.f32.mrf.mxu0 }
 0x4b1   : > { %v6051_v55 = vpop.f32.mrf.mxu1  ;;  %6373 = vmatmul.bf16.gmra.mxu0 %v12198_v62  ;;  %v6421_v6 = vadd.f32 %v6420_v15, %v6331_v57 }
 0x4b2   : > { %v6052_v1 = vadd.f32 %v6051_v55, %v12222_v19  ;;  %8705 = vmatmul.msk.bf16.gmra.mxu2 %vm13882_vm7, %v12201_v13  ;;  %vm13911_vm7 = vmmov %vm13855_vm0 }
 0x4b3   : > { %v12651_v18 = vadd.f32 %v6421_v6, %v12536_v24  ;;  %v5300_v6 = vpop.permute.xlu2 %5299 }
 0x4b4   : > { %v12647_v44 = vadd.f32 %v6140_v53, %v6052_v1  ;;  %6090 = vmatmul.bf16.gmra.mxu1 %v12198_v62 }
 0x4b7   : > { %v6142_v60 = vpop.f32.mrf.mxu3  ;;  %v6423_v54 = vpop.f32.mrf.mxu2 }
 0x4b8   : > { %v6334_v39 = vpop.f32.mrf.mxu0 }
 0x4b9   : > { %v6053_v19 = vpop.f32.mrf.mxu1  ;;  %v6424_v35 = vadd.f32 %v6423_v54, %v6334_v39 }
 0x4ba   : > { %v6054_v43 = vadd.f32 %v6053_v19, %v12245_v52 }
 0x4bb   : > { %v12662_v24 = vadd.f32 %v6424_v35, %v12561_v3 }
 0x4bc   : > { %v12657_v34 = vadd.f32 %v6142_v60, %v6054_v43  ;;  %8607 = vmatmul.msk.bf16.gmra.mxu3 %vm13883_vm9, %v12201_v13  ;;  %v13890_v60 = vld [vmem:[#allocation61_spill] sm:$0xff]  ;;  %vm13915_vm9 = vmmov %vm13855_vm0 }
 0x4bf   : > { %v6145_v7 = vpop.f32.mrf.mxu3  ;;  %v6425_v37 = vpop.f32.mrf.mxu2 }
 0x4c0   : > { %v6336_v30 = vpop.f32.mrf.mxu0 }
 0x4c1   : > { %v6056_v61 = vpop.f32.mrf.mxu1  ;;  %6378 = vmatmul.bf16.gmra.mxu0 %v12226_v2  ;;  %v6426_v3 = vadd.f32 %v6425_v37, %v6336_v30 }
 0x4c2   : > { %v6057_v52 = vadd.f32 %v6056_v61, %v12255_v50  ;;  %8706 = vmatmul.msk.bf16.gmra.mxu2 %vm13884_vm11, %v12229_v0  ;;  %v4570_v61 = vpop.permute.xlu0 %4569  ;;  %vm13917_vm11 = vmmov %vm13855_vm0 }
 0x4c3   : > { %v12675_v12 = vadd.f32 %v6426_v3, %v12589_v42  ;;  %v4986_v42 = vsel %vm13887_vm5, %v4984_v38, %v4985_v41  ;;  %v5345_v30 = vsel %vm13892_vm3, %v9312_v56, %v4570_v61  ;;  %v4680_v3 = vpop.permute.xlu1 %4679  ;;  %v9265_v56 = vld [vmem:[%s13348_s2 + $0x268] sm:$0xff]  ;;  %vm13924_vm5 = vmmov %vm13855_vm0 }
 0x4c4   : > { %v12671_v25 = vadd.f32 %v6145_v7, %v6057_v52  ;;  %6095 = vmatmul.bf16.gmra.mxu1 %v12226_v2  ;;  %v5518_v1 = vsel %vm13888_vm1, %v4986_v42, %v5189_v5  ;;  %v9271_v7 = vld [vmem:[%s13348_s2 + $0x298] sm:$0xff]  ;;  %v5389_v38 = vsel %vm13896_vm6, %v5345_v30, %v4680_v3  ;;  %vm13929_vm1 = vmmov %vm13855_vm0 }
 0x4c5   : > { %7371 = vmatpush.bf16.msra.mxu3 %v9271_v7  ;;  %v9279_v42 = vld [vmem:[%s13348_s2 + $0x2d8] sm:$0xff]  ;;  %7280 = vmatpush.bf16.msra.mxu1 %v9265_v56  ;;  %vm13939_vm3 = vmmov %vm13855_vm0 }
 0x4c6   : > { %7605 = vmatpush.bf16.msra.mxu0 %v9279_v42  ;;  %vm13943_vm6 = vmmov %vm13855_vm0 }
 0x4c7   : > { %v6147_v9 = vpop.f32.mrf.mxu3  ;;  %v6428_v49 = vpop.f32.mrf.mxu2 }
 0x4c8   : > { %v6339_v26 = vpop.f32.mrf.mxu0 }
 0x4c9   : > { %v6058_v4 = vpop.f32.mrf.mxu1  ;;  %v6429_v55 = vadd.f32 %v6428_v49, %v6339_v26  ;;  %v4923_v26 = vpop.permute.xlu2 %4922 }
 0x4ca   : > { %v6059_v50 = vadd.f32 %v6058_v4, %v12264_v59  ;;  %v12689_v59 = vsel %vm13889_vm4, %v5518_v1, %v5300_v6  ;;  %v12724_v1 = vsel %vm13897_vm8, %v5389_v38, %v4923_v26  ;;  %v13898_v6 = vld [vmem:[#allocation60_spill] sm:$0xff]  ;;  %vm13932_vm4 = vmmov %vm13855_vm0 }
 0x4cb   : > { %v12686_v15 = vadd.f32 %v6429_v55, %v12614_v47  ;;  %v13891_v47 = vld [vmem:[#allocation41_spill] sm:$0xff]  ;;  %vm13944_vm8 = vmmov %vm13855_vm0 }
 0x4cc   : > { %v12679_v53 = vadd.f32 %v6147_v9, %v6059_v50  ;;  %8792 = vmatmul.msk.bf16.vlgmr.msrb.gmra.mxu3 %vm13886_vm10, %v11493_v29  ;;  %v13893_v9 = vld [vmem:[#allocation21_spill] sm:$0xff]  ;;  %v13894_v50 = vld [vmem:[#allocation44_spill] sm:$0xff]  ;;  %vm13921_vm10 = vmmov %vm13855_vm0 }
 0x4cf   : > { %v6150_v57 = vpop.f32.mrf.mxu3  ;;  %v6430_v29 = vpop.f32.mrf.mxu2 }
 0x4d0   : > { %v6341_v43 = vpop.f32.mrf.mxu0 }
 0x4d1   : > { %v6061_v17 = vpop.f32.mrf.mxu1  ;;  %6383 = vmatmul.bf16.gmra.mxu0 %v12258_v58  ;;  %v6431_v39 = vadd.f32 %v6430_v29, %v6341_v43  ;;  %v13900_v43 = vld [vmem:[#allocation47_spill] sm:$0xff] }
 0x4d2   : > { %v6062_v19 = vadd.f32 %v6061_v17, %v13890_v60  ;;  %8707 = vmatmul.msk.bf16.gmra.mxu2 %vm13855_vm0, %v12689_v59 }
 0x4d3   : > { %v12699_v35 = vadd.f32 %v6431_v39, %v12628_v45 }
 0x4d4   : > { %v12695_v54 = vadd.f32 %v6150_v57, %v6062_v19  ;;  %6638 = vmatmul.bf16.vlgmr.msrb.gmra.mxu1 %v13891_v47 }
 0x4d7   : > { %v6152_v52 = vpop.f32.mrf.mxu3  ;;  %v6433_v45 = vpop.f32.mrf.mxu2 }
 0x4d8   : > { %v6344_v41 = vpop.f32.mrf.mxu0 }
 0x4d9   : > { %v6063_v37 = vpop.f32.mrf.mxu1  ;;  %v6434_v5 = vadd.f32 %v6433_v45, %v6344_v41 }
 0x4da   : > { %v6064_v20 = vadd.f32 %v6063_v37, %v13893_v9  ;;  %v13902_v9 = vld [vmem:[#allocation11_spill] sm:$0xff] }
 0x4db   : > { %v12715_v49 = vadd.f32 %v6434_v5, %v12647_v44 }
 0x4dc   : > { %v12709_v4 = vadd.f32 %v6152_v52, %v6064_v20  ;;  %8793 = vmatmul.msk.bf16.gmra.mxu3 %vm13895_vm2, %v13894_v50  ;;  %vm13942_vm2 = vmmov %vm13855_vm0 }
 0x4df   : > { %v6155_v55 = vpop.f32.mrf.mxu3  ;;  %v6435_v17 = vpop.f32.mrf.mxu2 }
 0x4e0   : > { %v6346_v60 = vpop.f32.mrf.mxu0 }
 0x4e1   : > { %v6066_v57 = vpop.f32.mrf.mxu1  ;;  %6388 = vmatmul.bf16.gmra.mxu0 %v12724_v1  ;;  %v6436_v29 = vadd.f32 %v6435_v17, %v6346_v60 }
 0x4e2   : > { %v6067_v44 = vadd.f32 %v6066_v57, %v13898_v6  ;;  %8892 = vmatmul.msk.bf16.vlgmr.msrb.gmra.mxu2 %vm13899_vm12, %v13894_v50  ;;  %v13907_v6 = vld [vmem:[#allocation24_spill] sm:$0xff]  ;;  %vm13945_vm12 = vmmov %vm13855_vm0 }
 0x4e3   : > { %v12732_v39 = vadd.f32 %v6436_v29, %v12657_v34  ;;  %v13904_v34 = vld [vmem:[#allocation23_spill] sm:$0xff] }
 0x4e4   : > { %v6156_v19 = vadd.f32 %v6155_v55, %v6067_v44  ;;  %6643 = vmatmul.bf16.gmra.mxu1 %v13900_v43  ;;  %v13906_v55 = vld [vmem:[#allocation53_spill] sm:$0xff] }
 0x4e7   : > { %v6157_v47 = vpop.f32.mrf.mxu3  ;;  %v6438_v52 = vpop.f32.mrf.mxu2 }
 0x4e8   : > { %v6349_v37 = vpop.f32.mrf.mxu0 }
 0x4e9   : > { %v6068_v7 = vpop.f32.mrf.mxu1  ;;  %v6439_v3 = vadd.f32 %v6438_v52, %v6349_v37  ;;  %v13910_v37 = vld [vmem:[#allocation63_spill] sm:$0xff] }
 0x4ea   : > { %v6069_v61 = vadd.f32 %v6068_v7, %v13901_v31  ;;  %v9278_v31 = vld [vmem:[%s13348_s2 + $0x2d0] sm:$0xff] }
 0x4eb   : > { %v12738_v20 = vadd.f32 %v6439_v3, %v12671_v25  ;;  %7606 = vmatpush.bf16.msra.mxu0 %v9278_v31  ;;  %v13914_v31 = vld [vmem:[#allocation16_spill] sm:$0xff] }
 0x4ec   : > { %v6158_v30 = vadd.f32 %v6157_v47, %v6069_v61  ;;  %8794 = vmatmul.msk.bf16.gmra.mxu3 %vm13903_vm15, %v13902_v9  ;;  %v13908_v47 = vld [vmem:[#allocation15_spill] sm:$0xff]  ;;  %vm13946_vm15 = vmmov %vm13855_vm0 }
 0x4ef   : > { %v6160_v45 = vpop.f32.mrf.mxu3  ;;  %v6440_v50 = vpop.f32.mrf.mxu2 }
 0x4f0   : > { %v6351_v38 = vpop.f32.mrf.mxu0 }
 0x4f1   : > { %v6071_v41 = vpop.f32.mrf.mxu1  ;;  %6963 = vmatmul.bf16.vlgmr.msrb.gmra.mxu0 %v13900_v43  ;;  %v6441_v26 = vadd.f32 %v6440_v50, %v6351_v38  ;;  %v13912_v50 = vld [vmem:[#allocation14_spill] sm:$0xff] }
 0x4f2   : > { %v6072_v5 = vadd.f32 %v6071_v41, %v13904_v34  ;;  %8893 = vmatmul.msk.bf16.gmra.mxu2 %vm13905_vm14, %v13902_v9  ;;  %v9270_v41 = vld [vmem:[%s13348_s2 + $0x290] sm:$0xff]  ;;  %vm13947_vm14 = vmmov %vm13855_vm0 }
 0x4f3   : > { %v12746_v42 = vadd.f32 %v6441_v26, %v12679_v53  ;;  %v9264_v53 = vld [vmem:[%s13348_s2 + $0x260] sm:$0xff]  ;;  %7372 = vmatpush.bf16.msra.mxu3 %v9270_v41 }
 0x4f4   : > { %v6161_v56 = vadd.f32 %v6160_v45, %v6072_v5  ;;  %6648 = vmatmul.bf16.gmra.mxu1 %v13906_v55  ;;  %v9284_v26 = vld [vmem:[%s13348_s2 + $0x300] sm:$0xff] }
 0x4f5   : > { %7281 = vmatpush.bf16.msra.mxu1 %v9264_v53  ;;  %7697 = vmatpush.bf16.msra.mxu2 %v9284_v26  ;;  %v13918_v26 = vld [vmem:[#allocation59_spill] sm:$0xff] }
 0x4f7   : > { %v6162_v25 = vpop.f32.mrf.mxu3  ;;  %v6443_v17 = vpop.f32.mrf.mxu2 }
 0x4f8   : > { %v6354_v60 = vpop.f32.mrf.mxu0 }
 0x4f9   : > { %v6073_v57 = vpop.f32.mrf.mxu1  ;;  %v6444_v43 = vadd.f32 %v6443_v17, %v6354_v60 }
 0x4fa   : > { %v6074_v44 = vadd.f32 %v6073_v57, %v13907_v6  ;;  %v13913_v6 = vld [vmem:[#allocation69_spill] sm:$0xff] }
 0x4fb   : > { %v12754_v7 = vadd.f32 %v6444_v43, %v12695_v54 }
 0x4fc   : > { %v12749_v29 = vadd.f32 %v6162_v25, %v6074_v44  ;;  %8795 = vmatmul.msk.bf16.gmra.mxu3 %vm13909_vm13, %v13908_v47  ;;  %vm13948_vm13 = vmmov %vm13855_vm0 }
 0x4ff   : > { %v6165_v61 = vpop.f32.mrf.mxu3  ;;  %v6445_v54 = vpop.f32.mrf.mxu2 }
 0x500   : > { %v6356_v45 = vpop.f32.mrf.mxu0 }
 0x501   : > { %v6076_v52 = vpop.f32.mrf.mxu1  ;;  %6968 = vmatmul.bf16.gmra.mxu0 %v13906_v55  ;;  %v6446_v5 = vadd.f32 %v6445_v54, %v6356_v45 }
 0x502   : > { %v6077_v3 = vadd.f32 %v6076_v52, %v13910_v37  ;;  %8894 = vmatmul.msk.bf16.gmra.mxu2 %vm13911_vm7, %v13908_v47  ;;  %v13916_v37 = vld [vmem:[#allocation25_spill] sm:$0xff]  ;;  %vm13949_vm7 = vmmov %vm13855_vm0 }
 0x503   : > { %v12771_v38 = vadd.f32 %v6446_v5, %v12709_v4 }
 0x504   : > { %v6166_v34 = vadd.f32 %v6165_v61, %v6077_v3  ;;  %6653 = vmatmul.bf16.gmra.mxu1 %v13912_v50 }
 0x507   : > { %v6167_v25 = vpop.f32.mrf.mxu3  ;;  %v6448_v17 = vpop.f32.mrf.mxu2 }
 0x508   : > { %v6359_v60 = vpop.f32.mrf.mxu0 }
 0x509   : > { %v6078_v57 = vpop.f32.mrf.mxu1  ;;  %v6449_v53 = vadd.f32 %v6448_v17, %v6359_v60 }
 0x50a   : > { %v6079_v44 = vadd.f32 %v6078_v57, %v13913_v6  ;;  %v13919_v6 = vld [vmem:[#allocation26_spill] sm:$0xff] }
 0x50b   : > { %v12779_v61 = vadd.f32 %v6449_v53, %v6156_v19 }
 0x50c   : > { %v6168_v43 = vadd.f32 %v6167_v25, %v6079_v44  ;;  %8796 = vmatmul.msk.bf16.gmra.mxu3 %vm13915_vm9, %v13914_v31  ;;  %vm13950_vm9 = vmmov %vm13855_vm0 }
 0x50f   : > { %v6170_v4 = vpop.f32.mrf.mxu3  ;;  %v6450_v54 = vpop.f32.mrf.mxu2 }
 0x510   : > { %v6361_v45 = vpop.f32.mrf.mxu0 }
 0x511   : > { %v6081_v52 = vpop.f32.mrf.mxu1  ;;  %6973 = vmatmul.bf16.gmra.mxu0 %v13912_v50  ;;  %v6451_v5 = vadd.f32 %v6450_v54, %v6361_v45  ;;  %v13923_v45 = vld [vmem:[#allocation71_spill] sm:$0xff] }
 0x512   : > { %v6082_v3 = vadd.f32 %v6081_v52, %v13916_v37  ;;  %8895 = vmatmul.msk.bf16.gmra.mxu2 %vm13917_vm11, %v13914_v31  ;;  %v13920_v37 = vld [vmem:[#allocation19_spill] sm:$0xff]  ;;  %vm13951_vm11 = vmmov %vm13855_vm0 }
 0x513   : > { %v12786_v25 = vadd.f32 %v6451_v5, %v6158_v30  ;;  %v9277_v30 = vld [vmem:[%s13348_s2 + $0x2c8] sm:$0xff] }
 0x514   : > { %v6171_v41 = vadd.f32 %v6170_v4, %v6082_v3  ;;  %6658 = vmatmul.bf16.gmra.mxu1 %v13918_v26  ;;  %v9263_v4 = vld [vmem:[%s13348_s2 + $0x258] sm:$0xff]  ;;  %7607 = vmatpush.bf16.msra.mxu0 %v9277_v30 }
 0x515   : > { %7282 = vmatpush.bf16.msra.mxu1 %v9263_v4  ;;  %v13927_v4 = vld [vmem:[#allocation27_spill] sm:$0xff] }
 0x517   : > { %v6172_v57 = vpop.f32.mrf.mxu3  ;;  %v6453_v17 = vpop.f32.mrf.mxu2 }
 0x518   : > { %v6364_v60 = vpop.f32.mrf.mxu0 }
 0x519   : > { %v6083_v19 = vpop.f32.mrf.mxu1  ;;  %v6454_v52 = vadd.f32 %v6453_v17, %v6364_v60 }
 0x51a   : > { %v6084_v44 = vadd.f32 %v6083_v19, %v13919_v6 }
 0x51b   : > { %v12793_v28 = vadd.f32 %v6454_v52, %v6161_v56 }
 0x51c   : > { %v12789_v53 = vadd.f32 %v6172_v57, %v6084_v44  ;;  %8797 = vmatmul.msk.bf16.gmra.mxu3 %vm13921_vm10, %v13920_v37  ;;  %v13925_v44 = vld [vmem:[#allocation58_spill] sm:$0xff]  ;;  %vm13952_vm10 = vmmov %vm13855_vm0 }
 0x51d   : > { %13922 = vst [vmem:[#allocation32_spill] sm:$0xff] %v12793_v28 }
 0x51f   : > { %v6175_v3 = vpop.f32.mrf.mxu3  ;;  %v6455_v56 = vpop.f32.mrf.mxu2 }
 0x520   : > { %v6366_v57 = vpop.f32.mrf.mxu0 }
 0x521   : > { %v6086_v54 = vpop.f32.mrf.mxu1  ;;  %6978 = vmatmul.bf16.gmra.mxu0 %v13918_v26  ;;  %v6456_v6 = vadd.f32 %v6455_v56, %v6366_v57 }
 0x522   : > { %v6087_v5 = vadd.f32 %v6086_v54, %v13923_v45  ;;  %8896 = vmatmul.msk.bf16.gmra.mxu2 %vm13924_vm5, %v13920_v37  ;;  %v13928_v45 = vld [vmem:[#allocation48_spill] sm:$0xff]  ;;  %vm13953_vm5 = vmmov %vm13855_vm0 }
 0x523   : > { %v12807_v17 = vadd.f32 %v6456_v6, %v12749_v29  ;;  %v9283_v29 = vld [vmem:[%s13348_s2 + $0x2f8] sm:$0xff] }
 0x524   : > { %v6176_v19 = vadd.f32 %v6175_v3, %v6087_v5  ;;  %6663 = vmatmul.bf16.gmra.mxu1 %v13925_v44  ;;  %v9269_v3 = vld [vmem:[%s13348_s2 + $0x288] sm:$0xff]  ;;  %7698 = vmatpush.bf16.msra.mxu2 %v9283_v29 }
 0x525   : > { %13926 = vst [vmem:[#allocation34_spill] sm:$0xff] %v12807_v17  ;;  %7373 = vmatpush.bf16.msra.mxu3 %v9269_v3  ;;  %v13935_v3 = vld [vmem:[#allocation75_spill] sm:$0xff] }
 0x527   : > { %v6177_v60 = vpop.f32.mrf.mxu3  ;;  %v6458_v21 = vpop.f32.mrf.mxu2 }
 0x528   : > { %v6369_v26 = vpop.f32.mrf.mxu0 }
 0x529   : > { %v6088_v52 = vpop.f32.mrf.mxu1  ;;  %v6459_v54 = vadd.f32 %v6458_v21, %v6369_v26  ;;  %v13931_v21 = vld [vmem:[#allocation70_spill] sm:$0xff] }
 0x52a   : > { %v6089_v30 = vadd.f32 %v6088_v52, %v13927_v4  ;;  %v13933_v52 = vld [vmem:[#allocation18_spill] sm:$0xff] }
 0x52b   : > { %v12812_v37 = vadd.f32 %v6459_v54, %v6166_v34 }
 0x52c   : > { %v6178_v28 = vadd.f32 %v6177_v60, %v6089_v30  ;;  %8798 = vmatmul.msk.bf16.gmra.mxu3 %vm13929_vm1, %v13928_v45  ;;  %vm13954_vm1 = vmmov %vm13855_vm0 }
 0x52d   : > { %13930 = vst [vmem:[#allocation33_spill] sm:$0xff] %v12812_v37 }
 0x52f   : > { %v6180_v5 = vpop.f32.mrf.mxu3  ;;  %v6460_v34 = vpop.f32.mrf.mxu2 }
 0x530   : > { %v6371_v57 = vpop.f32.mrf.mxu0 }
 0x531   : > { %v6091_v56 = vpop.f32.mrf.mxu1  ;;  %6983 = vmatmul.bf16.gmra.mxu0 %v13925_v44  ;;  %v6461_v60 = vadd.f32 %v6460_v34, %v6371_v57 }
 0x532   : > { %v6092_v26 = vadd.f32 %v6091_v56, %v13931_v21  ;;  %8897 = vmatmul.msk.bf16.gmra.mxu2 %vm13932_vm4, %v13928_v45  ;;  %v13936_v21 = vld [vmem:[#allocation20_spill] sm:$0xff]  ;;  %vm13956_vm4 = vmmov %vm13855_vm0 }
 0x533   : > { %v12825_v4 = vadd.f32 %v6461_v60, %v6168_v43  ;;  %v9276_v43 = vld [vmem:[%s13348_s2 + $0x2c0] sm:$0xff] }
 0x534   : > { %v6181_v6 = vadd.f32 %v6180_v5, %v6092_v26  ;;  %6668 = vmatmul.bf16.gmra.mxu1 %v13933_v52  ;;  %v9262_v5 = vld [vmem:[%s13348_s2 + $0x250] sm:$0xff]  ;;  %7608 = vmatpush.bf16.msra.mxu0 %v9276_v43 }
 0x535   : > { %13934 = vst [vmem:[#allocation36_spill] sm:$0xff] %v12825_v4  ;;  %7283 = vmatpush.bf16.msra.mxu1 %v9262_v5  ;;  %v13941_v5 = vld [vmem:[#allocation30_spill] sm:$0xff] }
 0x537   : > { %v6182_v30 = vpop.f32.mrf.mxu3  ;;  %v6463_v37 = vpop.f32.mrf.mxu2 }
 0x538   : > { %v6374_v17 = vpop.f32.mrf.mxu0 }
 0x539   : > { %v6093_v54 = vpop.f32.mrf.mxu1  ;;  %v6464_v56 = vadd.f32 %v6463_v37, %v6374_v17  ;;  %v13938_v37 = vld [vmem:[#allocation28_spill] sm:$0xff] }
 0x53a   : > { %v6094_v29 = vadd.f32 %v6093_v54, %v13935_v3  ;;  %v13940_v54 = vld [vmem:[#allocation22_spill] sm:$0xff] }
 0x53b   : > { %v12832_v45 = vadd.f32 %v6464_v56, %v6171_v41 }
 0x53c   : > { %v12828_v44 = vadd.f32 %v6182_v30, %v6094_v29  ;;  %8799 = vmatmul.msk.bf16.gmra.mxu3 %vm13855_vm0, %v13936_v21  ;;  %vm13958_vm0 = vcmask 1045504  }
 0x53d   : > { %13937 = vst [vmem:[#allocation35_spill] sm:$0xff] %v12832_v45 }
 0x53f   : > { %v6185_v26 = vpop.f32.mrf.mxu3  ;;  %v6465_v41 = vpop.f32.mrf.mxu2 }
 0x540   : > { %v6376_v57 = vpop.f32.mrf.mxu0 }
 0x541   : > { %v6096_v34 = vpop.f32.mrf.mxu1  ;;  %6988 = vmatmul.bf16.gmra.mxu0 %v13933_v52  ;;  %v6466_v30 = vadd.f32 %v6465_v41, %v6376_v57 }
 0x542   : > { %v6097_v17 = vadd.f32 %v6096_v34, %v13938_v37  ;;  %8898 = vmatmul.msk.bf16.gmra.mxu2 %vm13939_vm3, %v13936_v21  ;;  %vm13959_vm3 = vcmask 261120  }
 0x543   : > { %v12846_v3 = vadd.f32 %v6466_v30, %v12789_v53 }
 0x544   : > { %v6186_v60 = vadd.f32 %v6185_v26, %v6097_v17  ;;  %6673 = vmatmul.bf16.gmra.mxu1 %v13940_v54 }
 0x547   : > { %v6187_v29 = vpop.f32.mrf.mxu3  ;;  %v6468_v45 = vpop.f32.mrf.mxu2 }
 0x548   : > { %v6379_v52 = vpop.f32.mrf.mxu0 }
 0x549   : > { %v6098_v56 = vpop.f32.mrf.mxu1  ;;  %v6469_v34 = vadd.f32 %v6468_v45, %v6379_v52  ;;  %v9282_v52 = vld [vmem:[%s13348_s2 + $0x2f0] sm:$0xff] }
 0x54a   : > { %v6099_v43 = vadd.f32 %v6098_v56, %v13941_v5  ;;  %7699 = vmatpush.bf16.msra.mxu2 %v9282_v52 }
 0x54b   : > { %v12851_v37 = vadd.f32 %v6469_v34, %v6176_v19  ;;  %v9268_v19 = vld [vmem:[%s13348_s2 + $0x280] sm:$0xff] }
 0x54c   : > { %v6188_v4 = vadd.f32 %v6187_v29, %v6099_v43  ;;  %8800 = vmatmul.msk.bf16.gmra.mxu3 %vm13942_vm2, %v12097_v46  ;;  %vm13960_vm2 = vcmask 523264  }
 0x54d   : > { %7374 = vmatpush.bf16.msra.mxu3 %v9268_v19 }
 0x54f   : > { %v6728_v26 = vpop.f32.mrf.mxu3  ;;  %v6470_v53 = vpop.f32.mrf.mxu2 }
 0x550   : > { %v6381_v57 = vpop.f32.mrf.mxu0 }
 0x551   : > { %v6639_v17 = vpop.f32.mrf.mxu1  ;;  %6993 = vmatmul.bf16.gmra.mxu0 %v13940_v54  ;;  %v6471_v30 = vadd.f32 %v6470_v53, %v6381_v57  ;;  %v9275_v53 = vld [vmem:[%s13348_s2 + $0x2b8] sm:$0xff] }
 0x552   : > { %v6729_v41 = vadd.f32 %v6728_v26, %v6639_v17  ;;  %8899 = vmatmul.msk.bf16.gmra.mxu2 %vm13943_vm6, %v12097_v46  ;;  %7609 = vmatpush.bf16.msra.mxu0 %v9275_v53  ;;  %vm13961_vm6 = vmmov %vm13954_vm1 }
 0x553   : > { %v12858_v45 = vadd.f32 %v6471_v30, %v6178_v28 }
 0x554   : > { %v6808_v56 = vadd.f32 %v6729_v41, %v12475_v14  ;;  %6678 = vmatmul.bf16.gmra.mxu1 %v12114_v63  ;;  %v9261_v41 = vld [vmem:[%s13348_s2 + $0x248] sm:$0xff] }
 0x555   : > { %7284 = vmatpush.bf16.msra.mxu1 %v9261_v41 }
 0x557   : > { %v6730_v29 = vpop.f32.mrf.mxu3  ;;  %v6473_v34 = vpop.f32.mrf.mxu2 }
 0x558   : > { %v6384_v26 = vpop.f32.mrf.mxu0 }
 0x559   : > { %v6641_v5 = vpop.f32.mrf.mxu1  ;;  %v6474_v14 = vadd.f32 %v6473_v34, %v6384_v26 }
 0x55a   : > { %v6731_v43 = vadd.f32 %v6730_v29, %v6641_v5 }
 0x55b   : > { %v12871_v28 = vadd.f32 %v6474_v14, %v6181_v6 }
 0x55c   : > { %v12867_v17 = vadd.f32 %v6731_v43, %v12512_v8  ;;  %8801 = vmatmul.msk.bf16.gmra.mxu3 %vm13944_vm8, %v12117_v16  ;;  %vm13962_vm8 = vmmov %vm13959_vm3 }
 0x55f   : > { %v6733_v57 = vpop.f32.mrf.mxu3  ;;  %v6475_v6 = vpop.f32.mrf.mxu2 }
 0x560   : > { %v6386_v19 = vpop.f32.mrf.mxu0 }
 0x561   : > { %v6644_v30 = vpop.f32.mrf.mxu1  ;;  %6998 = vmatmul.bf16.gmra.mxu0 %v12114_v63  ;;  %v6476_v52 = vadd.f32 %v6475_v6, %v6386_v19 }
 0x562   : > { %v6734_v8 = vadd.f32 %v6733_v57, %v6644_v30  ;;  %8900 = vmatmul.msk.bf16.gmra.mxu2 %vm13945_vm12, %v12117_v16  ;;  %vm13963_vm12 = vmmov %vm13960_vm2 }
 0x563   : > { %v12885_v5 = vadd.f32 %v6476_v52, %v12828_v44 }
 0x564   : > { %v6810_v29 = vadd.f32 %v6734_v8, %v12546_v32  ;;  %6683 = vmatmul.bf16.gmra.mxu1 %v12143_v11 }
 0x567   : > { %v6735_v43 = vpop.f32.mrf.mxu3  ;;  %v6478_v14 = vpop.f32.mrf.mxu2 }
 0x568   : > { %v6389_v41 = vpop.f32.mrf.mxu0 }
 0x569   : > { %v6646_v34 = vpop.f32.mrf.mxu1  ;;  %v6479_v53 = vadd.f32 %v6478_v14, %v6389_v41 }
 0x56a   : > { %v6736_v26 = vadd.f32 %v6735_v43, %v6646_v34 }
 0x56b   : > { %v12890_v30 = vadd.f32 %v6479_v53, %v6186_v60 }
 0x56c   : > { %v6811_v57 = vadd.f32 %v6736_v26, %v12574_v33  ;;  %8802 = vmatmul.msk.bf16.gmra.mxu3 %vm13946_vm15, %v12146_v27  ;;  %vm13964_vm15 = vmmov %vm13954_vm1 }
 0x56f   : > { %v6738_v6 = vpop.f32.mrf.mxu3  ;;  %v6480_v44 = vpop.f32.mrf.mxu2 }
 0x570   : > { %v6391_v19 = vpop.f32.mrf.mxu0 }
 0x571   : > { %v6649_v32 = vpop.f32.mrf.mxu1  ;;  %7003 = vmatmul.bf16.gmra.mxu0 %v12143_v11  ;;  %v6481_v52 = vadd.f32 %v6480_v44, %v6391_v19 }
 0x572   : > { %v6739_v8 = vadd.f32 %v6738_v6, %v6649_v32  ;;  %8901 = vmatmul.msk.bf16.gmra.mxu2 %vm13947_vm14, %v12146_v27  ;;  %vm13965_vm14 = vmmov %vm13954_vm1 }
 0x573   : > { %v12897_v33 = vadd.f32 %v6481_v52, %v6188_v4  ;;  %v9274_v4 = vld [vmem:[%s13348_s2 + $0x2b0] sm:$0xff]  ;;  %v9267_v52 = vld [vmem:[%s13348_s2 + $0x278] sm:$0xff] }
 0x574   : > { %v6812_v43 = vadd.f32 %v6739_v8, %v12597_v36  ;;  %6688 = vmatmul.bf16.gmra.mxu1 %v12173_v48  ;;  %v9260_v36 = vld [vmem:[%s13348_s2 + $0x240] sm:$0xff]  ;;  %7610 = vmatpush.bf16.msra.mxu0 %v9274_v4 }
 0x575   : > { %7285 = vmatpush.bf16.msra.mxu1 %v9260_v36  ;;  %7375 = vmatpush.bf16.msra.mxu3 %v9267_v52 }
 0x577   : > { %v6740_v34 = vpop.f32.mrf.mxu3  ;;  %v7053_v14 = vpop.f32.mrf.mxu2 }
 0x578   : > { %v6964_v41 = vpop.f32.mrf.mxu0 }
 0x579   : > { %v6651_v60 = vpop.f32.mrf.mxu1  ;;  %v7054_v6 = vadd.f32 %v7053_v14, %v6964_v41  ;;  %v9281_v14 = vld [vmem:[%s13348_s2 + $0x2e8] sm:$0xff] }
 0x57a   : > { %v6741_v26 = vadd.f32 %v6740_v34, %v6651_v60  ;;  %7700 = vmatpush.bf16.msra.mxu2 %v9281_v14 }
 0x57b   : > { %v12904_v32 = vadd.f32 %v7054_v6, %v6808_v56 }
 0x57c   : > { %v12900_v53 = vadd.f32 %v6741_v26, %v12620_v40  ;;  %8803 = vmatmul.msk.bf16.gmra.mxu3 %vm13948_vm13, %v12176_v51  ;;  %vm13966_vm13 = vmmov %vm13954_vm1 }
 0x57f   : > { %v6743_v8 = vpop.f32.mrf.mxu3  ;;  %v7055_v56 = vpop.f32.mrf.mxu2 }
 0x580   : > { %v6966_v19 = vpop.f32.mrf.mxu0 }
 0x581   : > { %v6654_v44 = vpop.f32.mrf.mxu1  ;;  %7008 = vmatmul.bf16.gmra.mxu0 %v12173_v48  ;;  %v7056_v60 = vadd.f32 %v7055_v56, %v6966_v19 }
 0x582   : > { %v6744_v40 = vadd.f32 %v6743_v8, %v6654_v44  ;;  %8902 = vmatmul.msk.bf16.gmra.mxu2 %vm13949_vm7, %v12176_v51  ;;  %vm13967_vm7 = vmmov %vm13958_vm0 }
 0x583   : > { %v12921_v26 = vadd.f32 %v7056_v60, %v12867_v17 }
 0x584   : > { %v6814_v34 = vadd.f32 %v6744_v40, %v12634_v23  ;;  %6693 = vmatmul.bf16.gmra.mxu1 %v12198_v62 }
 0x587   : > { %v6745_v41 = vpop.f32.mrf.mxu3  ;;  %v7058_v4 = vpop.f32.mrf.mxu2 }
 0x588   : > { %v6969_v8 = vpop.f32.mrf.mxu0 }
 0x589   : > { %v6656_v6 = vpop.f32.mrf.mxu1  ;;  %v7059_v23 = vadd.f32 %v7058_v4, %v6969_v8 }
 0x58a   : > { %v6746_v36 = vadd.f32 %v6745_v41, %v6656_v6 }
 0x58b   : > { %v12931_v40 = vadd.f32 %v7059_v23, %v6810_v29 }
 0x58c   : > { %v12927_v44 = vadd.f32 %v6746_v36, %v12651_v18  ;;  %8804 = vmatmul.msk.bf16.gmra.mxu3 %vm13950_vm9, %v12201_v13  ;;  %vm13968_vm9 = vmmov %vm13959_vm3 }
 0x58f   : > { %v6748_v17 = vpop.f32.mrf.mxu3  ;;  %v7060_v52 = vpop.f32.mrf.mxu2 }
 0x590   : > { %v6971_v60 = vpop.f32.mrf.mxu0 }
 0x591   : > { %v6659_v56 = vpop.f32.mrf.mxu1  ;;  %7013 = vmatmul.bf16.gmra.mxu0 %v12198_v62  ;;  %v7061_v18 = vadd.f32 %v7060_v52, %v6971_v60 }
 0x592   : > { %v6749_v19 = vadd.f32 %v6748_v17, %v6659_v56  ;;  %8903 = vmatmul.msk.bf16.gmra.mxu2 %vm13951_vm11, %v12201_v13  ;;  %vm13969_vm11 = vmmov %vm13960_vm2 }
 0x593   : > { %v12940_v41 = vadd.f32 %v7061_v18, %v6811_v57  ;;  %v9273_v57 = vld [vmem:[%s13348_s2 + $0x2a8] sm:$0xff] }
 0x594   : > { %v12937_v14 = vadd.f32 %v6749_v19, %v12662_v24  ;;  %6698 = vmatmul.bf16.gmra.mxu1 %v12226_v2  ;;  %v9259_v24 = vld [vmem:[%s13348_s2 + $0x238] sm:$0xff]  ;;  %7611 = vmatpush.bf16.msra.mxu0 %v9273_v57 }
 0x595   : > { %7286 = vmatpush.bf16.msra.mxu1 %v9259_v24 }
 0x597   : > { %v6750_v29 = vpop.f32.mrf.mxu3  ;;  %v7063_v4 = vpop.f32.mrf.mxu2 }
 0x598   : > { %v6974_v8 = vpop.f32.mrf.mxu0 }
 0x599   : > { %v6661_v6 = vpop.f32.mrf.mxu1  ;;  %v7064_v17 = vadd.f32 %v7063_v4, %v6974_v8 }
 0x59a   : > { %v6751_v36 = vadd.f32 %v6750_v29, %v6661_v6 }
 0x59b   : > { %v12947_v56 = vadd.f32 %v7064_v17, %v6812_v43 }
 0x59c   : > { %v12943_v23 = vadd.f32 %v6751_v36, %v12675_v12  ;;  %8805 = vmatmul.msk.bf16.gmra.mxu3 %vm13952_vm10, %v12229_v0  ;;  %vm13970_vm10 = vmmov %vm13954_vm1 }
 0x59f   : > { %v6753_v19 = vpop.f32.mrf.mxu3  ;;  %v7065_v43 = vpop.f32.mrf.mxu2 }
 0x5a0   : > { %v6976_v60 = vpop.f32.mrf.mxu0 }
 0x5a1   : > { %v6664_v52 = vpop.f32.mrf.mxu1  ;;  %7018 = vmatmul.bf16.gmra.mxu0 %v12226_v2  ;;  %v7066_v29 = vadd.f32 %v7065_v43, %v6976_v60 }
 0x5a2   : > { %v6754_v12 = vadd.f32 %v6753_v19, %v6664_v52  ;;  %8904 = vmatmul.msk.bf16.gmra.mxu2 %vm13953_vm5, %v12229_v0  ;;  %v9266_v52 = vld [vmem:[%s13348_s2 + $0x270] sm:$0xff]  ;;  %vm13971_vm5 = vmmov %vm13959_vm3 }
 0x5a3   : > { %v12963_v6 = vadd.f32 %v7066_v29, %v12900_v53  ;;  %v9280_v53 = vld [vmem:[%s13348_s2 + $0x2e0] sm:$0xff]  ;;  %7376 = vmatpush.bf16.msra.mxu3 %v9266_v52  ;;  %v9258_v52 = vld [vmem:[%s13348_s2 + $0x230] sm:$0xff] }
 0x5a4   : > { %v12959_v18 = vadd.f32 %v6754_v12, %v12686_v15  ;;  %6703 = vmatmul.bf16.gmra.mxu1 %v12258_v58  ;;  %7701 = vmatpush.bf16.msra.mxu2 %v9280_v53 }
 0x5a5   : > { %7287 = vmatpush.bf16.msra.mxu1 %v9258_v52 }
 0x5a7   : > { %v6755_v36 = vpop.f32.mrf.mxu3  ;;  %v7068_v17 = vpop.f32.mrf.mxu2 }
 0x5a8   : > { %v6979_v24 = vpop.f32.mrf.mxu0 }
 0x5a9   : > { %v6666_v4 = vpop.f32.mrf.mxu1  ;;  %v7069_v19 = vadd.f32 %v7068_v17, %v6979_v24  ;;  %v9313_v17 = vld [vmem:[#allocation3 + $0xd8] sm:$0xff] }
 0x5aa   : > { %v6756_v8 = vadd.f32 %v6755_v36, %v6666_v4  ;;  %v4987_v24 = vrot.slane %v9313_v17, 2 }
 0x5ab   : > { %v12970_v15 = vadd.f32 %v7069_v19, %v6814_v34  ;;  %v4988_v34 = vrot.slane %v12447_v10, 2 }
 0x5ac   : > { %v12966_v57 = vadd.f32 %v6756_v8, %v12699_v35  ;;  %8806 = vmatmul.msk.bf16.gmra.mxu3 %vm13954_vm1, %v12689_v59  ;;  %v5191_v35 = vpop.permute.xlu0 %5190 }
 0x5ad   : > { %13955 = vst [vmem:[#allocation38_spill] sm:$0xff] %v12970_v15  ;;  %v4989_v53 = vsel %vm13958_vm0, %v4987_v24, %v4988_v34  ;;  %vm13973_vm0 = vmmov %vm13954_vm1 }
 0x5af   : > { %v6758_v12 = vpop.f32.mrf.mxu3  ;;  %v7070_v29 = vpop.f32.mrf.mxu2 }
 0x5b0   : > { %v6981_v36 = vpop.f32.mrf.mxu0 }
 0x5b1   : > { %v6669_v43 = vpop.f32.mrf.mxu1  ;;  %7023 = vmatmul.bf16.gmra.mxu0 %v12258_v58  ;;  %v7071_v8 = vadd.f32 %v7070_v29, %v6981_v36 }
 0x5b2   : > { %v6759_v60 = vadd.f32 %v6758_v12, %v6669_v43  ;;  %8905 = vmatmul.msk.bf16.gmra.mxu2 %vm13956_vm4, %v12689_v59  ;;  %v5302_v12 = vpop.permute.xlu1 %5301  ;;  %v5521_v43 = vsel %vm13959_vm3, %v4989_v53, %v5191_v35  ;;  %v9272_v35 = vld [vmem:[%s13348_s2 + $0x2a0] sm:$0xff]  ;;  %vm13972_vm4 = vmmov %vm13960_vm2 }
 0x5b3   : > { %v12987_v19 = vadd.f32 %v7071_v8, %v12927_v44  ;;  %v12995_v15 = vsel %vm13960_vm2, %v5521_v43, %v5302_v12  ;;  %v4572_v44 = vpop.permute.xlu2 %4571  ;;  %7612 = vmatpush.bf16.msra.mxu0 %v9272_v35  ;;  %v4991_v35 = vrot.slane %v12428_v22, 2  ;;  %vm13974_vm3 = vmmov %vm13973_vm0 }
 0x5b4   : > { %v12983_v4 = vadd.f32 %v6759_v60, %v12715_v49  ;;  %6708 = vmatmul.bf16.gmra.mxu1 %v12724_v1  ;;  %v4682_v34 = vpop.permute.xlu0 %4681  ;;  %v5347_v52 = vsel %vm13962_vm8, %v9313_v17, %v4572_v44  ;;  %vm13975_vm2 = vmmov %vm13973_vm0 }
 0x5b5   : > { %13957 = vst [vmem:[#allocation37_spill] sm:$0xff] %v12987_v19  ;;  %vm13982_vm8 = vmmov %vm13973_vm0 }
 0x5b7   : > { %v6760_v10 = vpop.f32.mrf.mxu3  ;;  %v7073_v29 = vpop.f32.mrf.mxu2 }
 0x5b8   : > { %v6984_v36 = vpop.f32.mrf.mxu0 }
 0x5b9   : > { %v6671_v49 = vpop.f32.mrf.mxu1  ;;  %v7074_v19 = vadd.f32 %v7073_v29, %v6984_v36 }
 0x5ba   : > { %v6761_v60 = vadd.f32 %v6760_v10, %v6671_v49  ;;  %v5391_v10 = vsel %vm13963_vm12, %v5347_v52, %v4682_v34  ;;  %v4925_v12 = vpop.permute.xlu1 %4924  ;;  %vm13984_vm12 = vmmov %vm13973_vm0 }
 0x5bb   : > { %v13003_v24 = vadd.f32 %v7074_v19, %v12937_v14  ;;  %v13014_v49 = vsel %vm13965_vm14, %v5391_v10, %v4925_v12  ;;  %vm13990_vm14 = vmmov %vm13973_vm0 }
 0x5bc   : > { %v12998_v8 = vadd.f32 %v6761_v60, %v12732_v39  ;;  %8807 = vmatmul.msk.bf16.gmra.mxu3 %vm13961_vm6, %v12995_v15  ;;  %vm13976_vm6 = vmmov %vm13973_vm0 }
 0x5bf   : > { %v6763_v53 = vpop.f32.mrf.mxu3  ;;  %v7075_v14 = vpop.f32.mrf.mxu2 }
 0x5c0   : > { %v6986_v19 = vpop.f32.mrf.mxu0 }
 0x5c1   : > { %v6674_v39 = vpop.f32.mrf.mxu1  ;;  %7028 = vmatmul.bf16.gmra.mxu0 %v12724_v1  ;;  %v7076_v17 = vadd.f32 %v7075_v14, %v6986_v19  ;;  %v5304_v14 = vpop.permute.xlu0 %5303 }
 0x5c2   : > { %v6764_v43 = vadd.f32 %v6763_v53, %v6674_v39  ;;  %8906 = vmatmul.msk.bf16.gmra.mxu2 %vm13964_vm15, %v12995_v15  ;;  %vm13989_vm15 = vmmov %vm13973_vm0 }
 0x5c3   : > { %v13021_v29 = vadd.f32 %v7076_v17, %v12943_v23 }
 0x5c4   : > { %v13017_v60 = vadd.f32 %v6764_v43, %v12738_v20  ;;  %6713 = vmatmul.bf16.gmra.mxu1 %v13014_v49  ;;  %v9314_v20 = vld [vmem:[#allocation3 + $0xe4] sm:$0xff]  ;;  %v5193_v43 = vpop.permute.xlu2 %5192 }
 0x5c5   : > { %v4990_v12 = vrot.slane %v9314_v20, 2 }
 0x5c7   : > { %v6765_v36 = vpop.f32.mrf.mxu3  ;;  %v7078_v52 = vpop.f32.mrf.mxu2  ;;  %v4992_v19 = vsel %vm13967_vm7, %v4990_v12, %v4991_v35  ;;  %vm13994_vm7 = vmmov %vm13973_vm0 }
 0x5c8   : > { %v6989_v53 = vpop.f32.mrf.mxu0  ;;  %v5524_v22 = vsel %vm13968_vm9, %v4992_v19, %v5193_v43  ;;  %vm13995_vm9 = vmmov %vm13973_vm0 }
 0x5c9   : > { %v6676_v44 = vpop.f32.mrf.mxu1  ;;  %v7079_v10 = vadd.f32 %v7078_v52, %v6989_v53 }
 0x5ca   : > { %v6766_v34 = vadd.f32 %v6765_v36, %v6676_v44  ;;  %v13035_v36 = vsel %vm13969_vm11, %v5524_v22, %v5304_v14  ;;  %vm13996_vm11 = vmmov %vm13973_vm0 }
 0x5cb   : > { %v13030_v23 = vadd.f32 %v7079_v10, %v12959_v18  ;;  %v4574_v10 = vpop.permute.xlu1 %4573 }
 0x5cc   : > { %v13025_v39 = vadd.f32 %v6766_v34, %v12746_v42  ;;  %8992 = vmatmul.msk.bf16.vlgmr.msra.gmra.mxu3 %vm13966_vm13, %v13902_v9  ;;  %vm13993_vm13 = vmmov %vm13973_vm0 }
 0x5cf   : > { %v6768_v17 = vpop.f32.mrf.mxu3  ;;  %v7080_v9 = vpop.f32.mrf.mxu2 }
 0x5d0   : > { %v6991_v34 = vpop.f32.mrf.mxu0 }
 0x5d1   : > { %v6679_v42 = vpop.f32.mrf.mxu1  ;;  %7033 = vmatmul.bf16.gmra.mxu0 %v13014_v49  ;;  %v7081_v52 = vadd.f32 %v7080_v9, %v6991_v34 }
 0x5d2   : > { %v6769_v44 = vadd.f32 %v6768_v17, %v6679_v42  ;;  %8907 = vmatmul.msk.bf16.gmra.mxu2 %vm13970_vm10, %v13035_v36  ;;  %v5349_v17 = vsel %vm13971_vm5, %v9314_v20, %v4574_v10  ;;  %vm13997_vm10 = vmmov %vm13973_vm0 }
 0x5d3   : > { %v13043_v35 = vadd.f32 %v7081_v52, %v12966_v57  ;;  %vm13998_vm5 = vmmov %vm13973_vm0 }
 0x5d4   : > { %v6824_v18 = vadd.f32 %v6769_v44, %v12754_v7  ;;  %7288 = vmatmul.bf16.vlgmr.msra.gmra.mxu1 %v13906_v55  ;;  %v4927_v7 = vpop.permute.xlu0 %4926  ;;  %v4684_v44 = vpop.permute.xlu2 %4683 }
 0x5d5   : > { %v5393_v9 = vsel %vm13972_vm4, %v5349_v17, %v4684_v44  ;;  %vm14000_vm4 = vmmov %vm13973_vm0 }
 0x5d6   : > { %v13054_v34 = vsel %vm13973_vm0, %v5393_v9, %v4927_v7 }
 0x5d7   : > { %v6770_v53 = vpop.f32.mrf.mxu3  ;;  %v7083_v14 = vpop.f32.mrf.mxu2 }
 0x5d8   : > { %v6994_v19 = vpop.f32.mrf.mxu0 }
 0x5d9   : > { %v6681_v12 = vpop.f32.mrf.mxu1  ;;  %v7084_v42 = vadd.f32 %v7083_v14, %v6994_v19 }
 0x5da   : > { %v6771_v43 = vadd.f32 %v6770_v53, %v6681_v12 }
 0x5db   : > { %v13050_v55 = vadd.f32 %v7084_v42, %v12983_v4 }
 0x5dc   : > { %v6825_v22 = vadd.f32 %v6771_v43, %v12771_v38  ;;  %8993 = vmatmul.msk.bf16.gmra.mxu3 %vm13954_vm1, %v13908_v47  ;;  %vm13999_vm1 = vmmov %vm13973_vm0 }
 0x5df   : > { %v6773_v57 = vpop.f32.mrf.mxu3  ;;  %v7085_v38 = vpop.f32.mrf.mxu2 }
 0x5e0   : > { %v6996_v53 = vpop.f32.mrf.mxu0 }
 0x5e1   : > { %v6684_v52 = vpop.f32.mrf.mxu1  ;;  %7038 = vmatmul.bf16.gmra.mxu0 %v13054_v34  ;;  %v7086_v12 = vadd.f32 %v7085_v38, %v6996_v53  ;;  %v13978_v53 = vld [vmem:[#allocation59_spill] sm:$0xff] }
 0x5e2   : > { %v6774_v20 = vadd.f32 %v6773_v57, %v6684_v52  ;;  %9092 = vmatmul.msk.bf16.vlgmr.msra.gmra.mxu2 %vm13974_vm3, %v13908_v47  ;;  %vm14001_vm3 = vmmov %vm13973_vm0 }
 0x5e3   : > { %v13062_v4 = vadd.f32 %v7086_v12, %v12998_v8 }
 0x5e4   : > { %v6826_v10 = vadd.f32 %v6774_v20, %v12779_v61  ;;  %7293 = vmatmul.bf16.gmra.mxu1 %v13912_v50  ;;  %v13977_v20 = vld [vmem:[#allocation32_spill] sm:$0xff] }
 0x5e7   : > { %v6775_v43 = vpop.f32.mrf.mxu3  ;;  %v7088_v17 = vpop.f32.mrf.mxu2 }
 0x5e8   : > { %v6999_v42 = vpop.f32.mrf.mxu0 }
 0x5e9   : > { %v6686_v14 = vpop.f32.mrf.mxu1  ;;  %v7089_v44 = vadd.f32 %v7088_v17, %v6999_v42 }
 0x5ea   : > { %v6776_v19 = vadd.f32 %v6775_v43, %v6686_v14 }
 0x5eb   : > { %v13068_v47 = vadd.f32 %v7089_v44, %v13017_v60 }
 0x5ec   : > { %v6827_v7 = vadd.f32 %v6776_v19, %v12786_v25  ;;  %8994 = vmatmul.msk.bf16.gmra.mxu3 %vm13975_vm2, %v13914_v31  ;;  %vm14002_vm2 = vmmov %vm13973_vm0 }
 0x5ef   : > { %v6778_v61 = vpop.f32.mrf.mxu3  ;;  %v7090_v9 = vpop.f32.mrf.mxu2 }
 0x5f0   : > { %v7001_v52 = vpop.f32.mrf.mxu0 }
 0x5f1   : > { %v6689_v57 = vpop.f32.mrf.mxu1  ;;  %7613 = vmatmul.bf16.vlgmr.msra.gmra.mxu0 %v13912_v50  ;;  %v7091_v25 = vadd.f32 %v7090_v9, %v7001_v52  ;;  %v13980_v50 = vld [vmem:[#allocation34_spill] sm:$0xff] }
 0x5f2   : > { %v6779_v8 = vadd.f32 %v6778_v61, %v6689_v57  ;;  %9093 = vmatmul.msk.bf16.gmra.mxu2 %vm13976_vm6, %v13914_v31  ;;  %v13981_v61 = vld [vmem:[#allocation19_spill] sm:$0xff]  ;;  %vm14003_vm6 = vmmov %vm13973_vm0 }
 0x5f3   : > { %v13076_v12 = vadd.f32 %v7091_v25, %v13025_v39 }
 0x5f4   : > { %v6828_v38 = vadd.f32 %v6779_v8, %v13977_v20  ;;  %7298 = vmatmul.bf16.gmra.mxu1 %v13978_v53  ;;  %v13985_v20 = vld [vmem:[#allocation33_spill] sm:$0xff] }
 0x5f5   : > { %13979 = vst [vmem:[#allocation40_spill] sm:$0xff] %v13076_v12 }
 0x5f7   : > { %v6780_v60 = vpop.f32.mrf.mxu3  ;;  %v7093_v19 = vpop.f32.mrf.mxu2 }
 0x5f8   : > { %v7004_v17 = vpop.f32.mrf.mxu0 }
 0x5f9   : > { %v6691_v43 = vpop.f32.mrf.mxu1  ;;  %v7094_v44 = vadd.f32 %v7093_v19, %v7004_v17 }
 0x5fa   : > { %v6781_v14 = vadd.f32 %v6780_v60, %v6691_v43  ;;  %v13986_v43 = vld [vmem:[#allocation58_spill] sm:$0xff] }
 0x5fb   : > { %v13081_v31 = vadd.f32 %v7094_v44, %v6824_v18 }
 0x5fc   : > { %v6829_v42 = vadd.f32 %v6781_v14, %v13980_v50  ;;  %8995 = vmatmul.msk.bf16.gmra.mxu3 %vm13982_vm8, %v13981_v61  ;;  %vm14004_vm8 = vmmov %vm13973_vm0 }
 0x5fd   : > { %13983 = vst [vmem:[#allocation39_spill] sm:$0xff] %v13081_v31  ;;  %v13987_v31 = vld [vmem:[#allocation36_spill] sm:$0xff] }
 0x5ff   : > { %v6783_v57 = vpop.f32.mrf.mxu3  ;;  %v7095_v39 = vpop.f32.mrf.mxu2 }
 0x600   : > { %v7006_v52 = vpop.f32.mrf.mxu0 }
 0x601   : > { %v6694_v8 = vpop.f32.mrf.mxu1  ;;  %7618 = vmatmul.bf16.gmra.mxu0 %v13978_v53  ;;  %v7096_v60 = vadd.f32 %v7095_v39, %v7006_v52 }
 0x602   : > { %v6784_v9 = vadd.f32 %v6783_v57, %v6694_v8  ;;  %9094 = vmatmul.msk.bf16.gmra.mxu2 %vm13984_vm12, %v13981_v61  ;;  %v13988_v8 = vld [vmem:[#allocation48_spill] sm:$0xff]  ;;  %vm7815_vm12 = vcmask 64512  }
 0x603   : > { %v13088_v14 = vadd.f32 %v7096_v60, %v6825_v22 }
 0x604   : > { %v6830_v25 = vadd.f32 %v6784_v9, %v13985_v20  ;;  %7303 = vmatmul.bf16.gmra.mxu1 %v13986_v43  ;;  %v13991_v20 = vld [vmem:[#allocation35_spill] sm:$0xff] }
 0x607   : > { %v6785_v19 = vpop.f32.mrf.mxu3  ;;  %v7098_v50 = vpop.f32.mrf.mxu2 }
 0x608   : > { %v7009_v44 = vpop.f32.mrf.mxu0 }
 0x609   : > { %v6696_v18 = vpop.f32.mrf.mxu1  ;;  %v7099_v57 = vadd.f32 %v7098_v50, %v7009_v44 }
 0x60a   : > { %v6786_v17 = vadd.f32 %v6785_v19, %v6696_v18 }
 0x60b   : > { %v13093_v61 = vadd.f32 %v7099_v57, %v6826_v10 }
 0x60c   : > { %v6831_v53 = vadd.f32 %v6786_v17, %v13987_v31  ;;  %8996 = vmatmul.msk.bf16.gmra.mxu3 %vm13989_vm15, %v13988_v8  ;;  %v13992_v31 = vld [vmem:[#allocation18_spill] sm:$0xff]  ;;  %vm14005_vm15 = vmmov %vm13973_vm0 }
 0x60f   : > { %v6788_v12 = vpop.f32.mrf.mxu3  ;;  %v7100_v22 = vpop.f32.mrf.mxu2 }
 0x610   : > { %v7011_v52 = vpop.f32.mrf.mxu0 }
 0x611   : > { %v6699_v9 = vpop.f32.mrf.mxu1  ;;  %7623 = vmatmul.bf16.gmra.mxu0 %v13986_v43  ;;  %v7101_v19 = vadd.f32 %v7100_v22, %v7011_v52 }
 0x612   : > { %v6789_v39 = vadd.f32 %v6788_v12, %v6699_v9  ;;  %9095 = vmatmul.msk.bf16.gmra.mxu2 %vm13990_vm14, %v13988_v8  ;;  %vm14006_vm14 = vmmov %vm13973_vm0 }
 0x613   : > { %v13100_v18 = vadd.f32 %v7101_v19, %v6827_v7 }
 0x614   : > { %v6832_v60 = vadd.f32 %v6789_v39, %v13991_v20  ;;  %7308 = vmatmul.bf16.gmra.mxu1 %v13992_v31 }
 0x617   : > { %v6790_v17 = vpop.f32.mrf.mxu3  ;;  %v7103_v44 = vpop.f32.mrf.mxu2 }
 0x618   : > { %v7014_v57 = vpop.f32.mrf.mxu0 }
 0x619   : > { %v6701_v10 = vpop.f32.mrf.mxu1  ;;  %v7104_v12 = vadd.f32 %v7103_v44, %v7014_v57 }
 0x61a   : > { %v6791_v50 = vadd.f32 %v6790_v17, %v6701_v10 }
 0x61b   : > { %v13105_v8 = vadd.f32 %v7104_v12, %v6828_v38 }
 0x61c   : > { %v6833_v43 = vadd.f32 %v6791_v50, %v12846_v3  ;;  %8997 = vmatmul.msk.bf16.gmra.mxu3 %vm13993_vm13, %v13936_v21  ;;  %vm14007_vm13 = vmmov %vm13973_vm0 }
 0x61f   : > { %v6793_v9 = vpop.f32.mrf.mxu3  ;;  %v7105_v7 = vpop.f32.mrf.mxu2 }
 0x620   : > { %v7016_v52 = vpop.f32.mrf.mxu0 }
 0x621   : > { %v6704_v39 = vpop.f32.mrf.mxu1  ;;  %7628 = vmatmul.bf16.gmra.mxu0 %v13992_v31  ;;  %v7106_v19 = vadd.f32 %v7105_v7, %v7016_v52 }
 0x622   : > { %v6794_v22 = vadd.f32 %v6793_v9, %v6704_v39  ;;  %9096 = vmatmul.msk.bf16.gmra.mxu2 %vm13994_vm7, %v13936_v21  ;;  %vm14008_vm7 = vmmov %vm13973_vm0 }
 0x623   : > { %v13112_v3 = vadd.f32 %v7106_v19, %v6829_v42 }
 0x624   : > { %v6834_v20 = vadd.f32 %v6794_v22, %v12851_v37  ;;  %7313 = vmatmul.bf16.gmra.mxu1 %v13940_v54 }
 0x627   : > { %v6795_v17 = vpop.f32.mrf.mxu3  ;;  %v7108_v50 = vpop.f32.mrf.mxu2 }
 0x628   : > { %v7019_v44 = vpop.f32.mrf.mxu0 }
 0x629   : > { %v6706_v38 = vpop.f32.mrf.mxu1  ;;  %v7109_v57 = vadd.f32 %v7108_v50, %v7019_v44 }
 0x62a   : > { %v6796_v10 = vadd.f32 %v6795_v17, %v6706_v38 }
 0x62b   : > { %v13117_v21 = vadd.f32 %v7109_v57, %v6830_v25 }
 0x62c   : > { %v6835_v31 = vadd.f32 %v6796_v10, %v12858_v45  ;;  %8998 = vmatmul.msk.bf16.gmra.mxu3 %vm13995_vm9, %v12097_v46  ;;  %vm14009_vm9 = vmmov %vm13973_vm0 }
 0x62f   : > { %v6798_v12 = vpop.f32.mrf.mxu3  ;;  %v7110_v42 = vpop.f32.mrf.mxu2 }
 0x630   : > { %v7021_v39 = vpop.f32.mrf.mxu0 }
 0x631   : > { %v6709_v37 = vpop.f32.mrf.mxu1  ;;  %7633 = vmatmul.bf16.gmra.mxu0 %v13940_v54  ;;  %v7111_v7 = vadd.f32 %v7110_v42, %v7021_v39 }
 0x632   : > { %v6799_v9 = vadd.f32 %v6798_v12, %v6709_v37  ;;  %9097 = vmatmul.msk.bf16.gmra.mxu2 %vm13996_vm11, %v12097_v46  ;;  %vm14011_vm11 = vmmov %vm13973_vm0 }
 0x633   : > { %v13124_v45 = vadd.f32 %v7111_v7, %v6831_v53 }
 0x634   : > { %v6836_v22 = vadd.f32 %v6799_v9, %v12871_v28  ;;  %7318 = vmatmul.bf16.gmra.mxu1 %v12114_v63 }
 0x637   : > { %v6800_v52 = vpop.f32.mrf.mxu3  ;;  %v7113_v17 = vpop.f32.mrf.mxu2 }
 0x638   : > { %v7024_v38 = vpop.f32.mrf.mxu0 }
 0x639   : > { %v6711_v25 = vpop.f32.mrf.mxu1  ;;  %v7114_v10 = vadd.f32 %v7113_v17, %v7024_v38 }
 0x63a   : > { %v6801_v19 = vadd.f32 %v6800_v52, %v6711_v25 }
 0x63b   : > { %v13129_v46 = vadd.f32 %v7114_v10, %v6832_v60 }
 0x63c   : > { %v6837_v54 = vadd.f32 %v6801_v19, %v12885_v5  ;;  %8999 = vmatmul.msk.bf16.gmra.mxu3 %vm13997_vm10, %v12117_v16  ;;  %vm14012_vm10 = vmmov %vm13973_vm0 }
 0x63f   : > { %v6803_v50 = vpop.f32.mrf.mxu3  ;;  %v7115_v53 = vpop.f32.mrf.mxu2 }
 0x640   : > { %v7026_v57 = vpop.f32.mrf.mxu0 }
 0x641   : > { %v6714_v28 = vpop.f32.mrf.mxu1  ;;  %7638 = vmatmul.bf16.gmra.mxu0 %v12114_v63  ;;  %v7116_v37 = vadd.f32 %v7115_v53, %v7026_v57 }
 0x642   : > { %v6804_v44 = vadd.f32 %v6803_v50, %v6714_v28  ;;  %9098 = vmatmul.msk.bf16.gmra.mxu2 %vm13998_vm5, %v12117_v16  ;;  %vm14015_vm5 = vcmask 1045504  }
 0x643   : > { %v13136_v5 = vadd.f32 %v7116_v37, %v6833_v43 }
 0x644   : > { %v6838_v12 = vadd.f32 %v6804_v44, %v12890_v30  ;;  %7323 = vmatmul.bf16.gmra.mxu1 %v12143_v11 }
 0x647   : > { %v6805_v9 = vpop.f32.mrf.mxu3  ;;  %v7118_v39 = vpop.f32.mrf.mxu2 }
 0x648   : > { %v7029_v7 = vpop.f32.mrf.mxu0 }
 0x649   : > { %v6716_v60 = vpop.f32.mrf.mxu1  ;;  %v7119_v52 = vadd.f32 %v7118_v39, %v7029_v7 }
 0x64a   : > { %v6806_v42 = vadd.f32 %v6805_v9, %v6716_v60 }
 0x64b   : > { %v13141_v16 = vadd.f32 %v7119_v52, %v6834_v20 }
 0x64c   : > { %v6839_v63 = vadd.f32 %v6806_v42, %v12897_v33  ;;  %9000 = vmatmul.msk.bf16.gmra.mxu3 %vm13999_vm1, %v12146_v27  ;;  %vm14016_vm1 = vcmask 261120  }
 0x64f   : > { %v7378_v25 = vpop.f32.mrf.mxu3  ;;  %v7120_v43 = vpop.f32.mrf.mxu2 }
 0x650   : > { %v7031_v19 = vpop.f32.mrf.mxu0 }
 0x651   : > { %v7289_v30 = vpop.f32.mrf.mxu1  ;;  %7643 = vmatmul.bf16.gmra.mxu0 %v12143_v11  ;;  %v7121_v17 = vadd.f32 %v7120_v43, %v7031_v19 }
 0x652   : > { %9099 = vmatmul.msk.bf16.gmra.mxu2 %vm14000_vm4, %v12146_v27  ;;  %vm14017_vm4 = vcmask 523264  }
 0x653   : > { %v13147_v38 = vadd.f32 %v7121_v17, %v6835_v31 }
 0x654   : > { %7328 = vmatmul.bf16.gmra.mxu1 %v12173_v48 }
 0x657   : > { %v7380_v33 = vpop.f32.mrf.mxu3  ;;  %v7123_v50 = vpop.f32.mrf.mxu2 }
 0x658   : > { %v7034_v28 = vpop.f32.mrf.mxu0 }
 0x659   : > { %v7291_v10 = vpop.f32.mrf.mxu1  ;;  %v7124_v20 = vadd.f32 %v7123_v50, %v7034_v28  ;;  %v7379_v50 = vadd.f32 %v7378_v25, %v7289_v30 }
 0x65b   : > { %v13151_v44 = vadd.f32 %v7124_v20, %v6836_v22 }
 0x65c   : > { %9001 = vmatmul.msk.bf16.gmra.mxu3 %vm13973_vm0, %v12176_v51 }
 0x65f   : > { %v7383_v11 = vpop.f32.mrf.mxu3  ;;  %v7125_v27 = vpop.f32.mrf.mxu2 }
 0x660   : > { %v7036_v31 = vpop.f32.mrf.mxu0 }
 0x661   : > { %v7294_v53 = vpop.f32.mrf.mxu1  ;;  %7648 = vmatmul.bf16.gmra.mxu0 %v12173_v48  ;;  %v7126_v57 = vadd.f32 %v7125_v27, %v7036_v31  ;;  %v7458_v27 = vadd.f32 %v7379_v50, %v12904_v32 }
 0x662   : > { %9100 = vmatmul.msk.bf16.gmra.mxu2 %vm14001_vm3, %v12176_v51  ;;  %vm14018_vm3 = vmmov %vm14016_vm1 }
 0x663   : > { %v13157_v37 = vadd.f32 %v7126_v57, %v6837_v54 }
 0x664   : > { %7333 = vmatmul.bf16.gmra.mxu1 %v12198_v62 }
 0x667   : > { %v7385_v9 = vpop.f32.mrf.mxu3  ;;  %v7128_v42 = vpop.f32.mrf.mxu2 }
 0x668   : > { %v7039_v39 = vpop.f32.mrf.mxu0 }
 0x669   : > { %v7296_v60 = vpop.f32.mrf.mxu1  ;;  %v7129_v22 = vadd.f32 %v7128_v42, %v7039_v39 }
 0x66a   : > { %v7386_v50 = vadd.f32 %v7385_v9, %v7296_v60 }
 0x66b   : > { %v13161_v48 = vadd.f32 %v7129_v22, %v6838_v12 }
 0x66c   : > { %9002 = vmatmul.msk.bf16.gmra.mxu3 %vm14002_vm2, %v12201_v13  ;;  %vm14019_vm2 = vmmov %vm14017_vm4 }
 0x66f   : > { %v7388_v7 = vpop.f32.mrf.mxu3  ;;  %v7130_v54 = vpop.f32.mrf.mxu2 }
 0x670   : > { %v7041_v52 = vpop.f32.mrf.mxu0 }
 0x671   : > { %v7299_v51 = vpop.f32.mrf.mxu1  ;;  %7653 = vmatmul.bf16.gmra.mxu0 %v12198_v62  ;;  %v7131_v43 = vadd.f32 %v7130_v54, %v7041_v52  ;;  %v7384_v54 = vadd.f32 %v7383_v11, %v7294_v53 }
 0x672   : > { %9101 = vmatmul.msk.bf16.gmra.mxu2 %vm14003_vm6, %v12201_v13  ;;  %v7389_v9 = vadd.f32 %v7388_v7, %v7299_v51  ;;  %vm14020_vm6 = vmmov %vm13973_vm0 }
 0x673   : > { %v13167_v19 = vadd.f32 %v7131_v43, %v6839_v63  ;;  %v7381_v63 = vadd.f32 %v7380_v33, %v7291_v10 }
 0x674   : > { %7338 = vmatmul.bf16.gmra.mxu1 %v12226_v2 }
 0x675   : > { %v7459_v57 = vadd.f32 %v7381_v63, %v12921_v26  ;;  %v7462_v63 = vadd.f32 %v7389_v9, %v12947_v56  ;;  %v5195_v9 = vpop.permute.xlu1 %5194 }
 0x677   : > { %v7390_v17 = vpop.f32.mrf.mxu3  ;;  %v7703_v12 = vpop.f32.mrf.mxu2 }
 0x678   : > { %v7614_v20 = vpop.f32.mrf.mxu0 }
 0x679   : > { %v7301_v28 = vpop.f32.mrf.mxu1  ;;  %v7704_v31 = vadd.f32 %v7703_v12, %v7614_v20 }
 0x67b   : > { %v7783_v62 = vadd.f32 %v7704_v31, %v7458_v27 }
 0x67c   : > { %9003 = vmatmul.msk.bf16.gmra.mxu3 %vm14004_vm8, %v12229_v0  ;;  %vm14021_vm8 = vmmov %vm13973_vm0 }
 0x67d   : > { %7816 = vst.msk [vmem:[%s13176_s7] sm:$0xff] %vm7815_vm12, %v7783_v62 }
 0x67f   : > { %v7393_v13 = vpop.f32.mrf.mxu3  ;;  %v7705_v32 = vpop.f32.mrf.mxu2 }
 0x680   : > { %v7616_v30 = vpop.f32.mrf.mxu0 }
 0x681   : > { %v7304_v25 = vpop.f32.mrf.mxu1  ;;  %7658 = vmatmul.bf16.gmra.mxu0 %v12226_v2  ;;  %v7706_v42 = vadd.f32 %v7705_v32, %v7616_v30  ;;  %v7460_v2 = vadd.f32 %v7384_v54, %v12931_v40  ;;  %v7461_v40 = vadd.f32 %v7386_v50, %v12940_v41  ;;  %v7391_v30 = vadd.f32 %v7390_v17, %v7301_v28 }
 0x682   : > { %9102 = vmatmul.msk.bf16.gmra.mxu2 %vm14005_vm15, %v12229_v0  ;;  %v7394_v17 = vadd.f32 %v7393_v13, %v7304_v25  ;;  %v14013_v13 = vld [vmem:[#allocation29_spill] sm:$0xff]  ;;  %vm14023_vm15 = vmmov %vm14015_vm5 }
 0x683   : > { %v7784_v39 = vadd.f32 %v7706_v42, %v7459_v57  ;;  %v7463_v51 = vadd.f32 %v7391_v30, %v12963_v6  ;;  %v4994_v25 = vrot.slane %v14013_v13, 2 }
 0x684   : > { %7343 = vmatmul.bf16.gmra.mxu1 %v12258_v58 }
 0x685   : > { %7817 = vst.msk [vmem:[%s13176_s7 + $0x8] sm:$0xff] %vm7815_vm12, %v7784_v39 }
 0x687   : > { %v7395_v22 = vpop.f32.mrf.mxu3  ;;  %v7708_v10 = vpop.f32.mrf.mxu2 }
 0x688   : > { %v7619_v52 = vpop.f32.mrf.mxu0 }
 0x689   : > { %v7306_v33 = vpop.f32.mrf.mxu1  ;;  %v7709_v43 = vadd.f32 %v7708_v10, %v7619_v52  ;;  %v14010_v52 = vld [vmem:[#allocation38_spill] sm:$0xff] }
 0x68b   : > { %v7785_v0 = vadd.f32 %v7709_v43, %v7460_v2  ;;  %v7396_v43 = vadd.f32 %v7395_v22, %v7306_v33  ;;  %v9315_v22 = vld [vmem:[#allocation3 + $0xf0] sm:$0xff] }
 0x68c   : > { %9004 = vmatmul.msk.bf16.gmra.mxu3 %vm14006_vm14, %v12689_v59  ;;  %v4993_v33 = vrot.slane %v9315_v22, 2  ;;  %vm14024_vm14 = vmmov %vm14016_vm1 }
 0x68d   : > { %7818 = vst.msk [vmem:[%s13176_s7 + $0x10] sm:$0xff] %vm7815_vm12, %v7785_v0 }
 0x68f   : > { %v13190_v26 = vpop.f32.mrf.mxu3  ;;  %v7710_v11 = vpop.f32.mrf.mxu2 }
 0x690   : > { %v7621_v53 = vpop.f32.mrf.mxu0 }
 0x691   : > { %v7309_v12 = vpop.f32.mrf.mxu1  ;;  %7663 = vmatmul.bf16.gmra.mxu0 %v12258_v58  ;;  %v7711_v20 = vadd.f32 %v7710_v11, %v7621_v53 }
 0x692   : > { %9103 = vmatmul.msk.bf16.gmra.mxu2 %vm14007_vm13, %v12689_v59  ;;  %vm14025_vm13 = vmmov %vm14019_vm2 }
 0x693   : > { %v7786_v27 = vadd.f32 %v7711_v20, %v7461_v40  ;;  %v14014_v40 = vld [vmem:[#allocation37_spill] sm:$0xff] }
 0x694   : > { %7348 = vmatmul.bf16.gmra.mxu1 %v12724_v1  ;;  %v7465_v20 = vadd.f32 %v7396_v43, %v14014_v40  ;;  %v9316_v40 = vld [vmem:[#allocation3 + $0xfc] sm:$0xff] }
 0x695   : > { %7819 = vst.msk [vmem:[%s13176_s7 + $0x18] sm:$0xff] %vm7815_vm12, %v7786_v27 }
 0x697   : > { %v13199_v31 = vpop.f32.mrf.mxu3  ;;  %v7713_v62 = vpop.f32.mrf.mxu2 }
 0x698   : > { %v7624_v58 = vpop.f32.mrf.mxu0 }
 0x699   : > { %v7311_v60 = vpop.f32.mrf.mxu1  ;;  %v7714_v59 = vadd.f32 %v7713_v62, %v7624_v58  ;;  %v4995_v58 = vsel %vm14015_vm5, %v4993_v33, %v4994_v25 }
 0x69b   : > { %v7787_v41 = vadd.f32 %v7714_v59, %v7462_v63  ;;  %v5527_v63 = vsel %vm14016_vm1, %v4995_v58, %v5195_v9 }
 0x69c   : > { %9005 = vmatmul.msk.bf16.gmra.mxu3 %vm14008_vm7, %v12995_v15  ;;  %vm14026_vm7 = vmmov %vm13973_vm0 }
 0x69d   : > { %7820 = vst.msk [vmem:[%s13176_s7 + $0x20] sm:$0xff] %vm7815_vm12, %v7787_v41  ;;  %v4576_v41 = vpop.permute.xlu0 %4575 }
 0x69f   : > { %v13206_v32 = vpop.f32.mrf.mxu3  ;;  %v7715_v7 = vpop.f32.mrf.mxu2 }
 0x6a0   : > { %v7626_v56 = vpop.f32.mrf.mxu0 }
 0x6a1   : > { %v13210_v57 = vpop.f32.mrf.mxu1  ;;  %7668 = vmatmul.bf16.gmra.mxu0 %v12724_v1  ;;  %v7716_v42 = vadd.f32 %v7715_v7, %v7626_v56 }
 0x6a2   : > { %9104 = vmatmul.msk.bf16.gmra.mxu2 %vm14009_vm9, %v12995_v15  ;;  %v7464_v15 = vadd.f32 %v7394_v17, %v14010_v52  ;;  %v5351_v17 = vsel %vm14018_vm3, %v9315_v22, %v4576_v41  ;;  %vm14027_vm9 = vmmov %vm14016_vm1 }
 0x6a3   : > { %v7788_v39 = vadd.f32 %v7716_v42, %v7463_v51 }
 0x6a4   : > { %7353 = vmatmul.bf16.gmra.mxu1 %v13014_v49 }
 0x6a5   : > { %7821 = vst.msk [vmem:[%s13176_s7 + $0x28] sm:$0xff] %vm7815_vm12, %v7788_v39 }
 0x6a7   : > { %v13217_v54 = vpop.f32.mrf.mxu3  ;;  %v7718_v1 = vpop.f32.mrf.mxu2 }
 0x6a8   : > { %v7629_v10 = vpop.f32.mrf.mxu0 }
 0x6a9   : > { %v13221_v28 = vpop.f32.mrf.mxu1  ;;  %v7719_v2 = vadd.f32 %v7718_v1, %v7629_v10 }
 0x6ab   : > { %v7789_v6 = vadd.f32 %v7719_v2, %v7464_v15 }
 0x6ac   : > { %9006 = vmatmul.msk.bf16.gmra.mxu3 %vm14011_vm11, %v13035_v36  ;;  %vm14028_vm11 = vmmov %vm14019_vm2 }
 0x6ad   : > { %7822 = vst.msk [vmem:[%s13176_s7 + $0x30] sm:$0xff] %vm7815_vm12, %v7789_v6 }
 0x6af   : > { %v13228_v0 = vpop.f32.mrf.mxu3  ;;  %v7720_v11 = vpop.f32.mrf.mxu2 }
 0x6b0   : > { %v7631_v53 = vpop.f32.mrf.mxu0 }
 0x6b1   : > { %v13230_v50 = vpop.f32.mrf.mxu1  ;;  %7673 = vmatmul.bf16.gmra.mxu0 %v13014_v49  ;;  %v7721_v27 = vadd.f32 %v7720_v11, %v7631_v53  ;;  %v5306_v49 = vpop.permute.xlu2 %5305 }
 0x6b2   : > { %9105 = vmatmul.msk.bf16.gmra.mxu2 %vm14012_vm10, %v13035_v36  ;;  %v7399_v36 = vadd.f32 %v13190_v26, %v7309_v12  ;;  %v5572_v51 = vsel %vm14017_vm4, %v5527_v63, %v5306_v49  ;;  %v4686_v26 = vpop.permute.xlu1 %4685  ;;  %v7401_v12 = vadd.f32 %v13199_v31, %v7311_v60  ;;  %v7404_v60 = vadd.f32 %v13206_v32, %v13210_v57  ;;  %v5197_v53 = vpop.permute.xlu0 %5196  ;;  %vm14029_vm10 = vmmov %vm13973_vm0 }
 0x6b3   : > { %v7790_v62 = vadd.f32 %v7721_v27, %v7465_v20  ;;  %v5395_v10 = vsel %vm14019_vm2, %v5351_v17, %v4686_v26  ;;  %v4996_v20 = vrot.slane %v9316_v40, 2  ;;  %v7406_v63 = vadd.f32 %v13217_v54, %v13221_v28 }
 0x6b4   : > { %7358 = vmatmul.bf16.gmra.mxu1 %v13054_v34  ;;  %v7466_v42 = vadd.f32 %v7399_v36, %v13003_v24  ;;  %v7467_v43 = vadd.f32 %v7401_v12, %v13021_v29  ;;  %v7468_v33 = vadd.f32 %v7404_v60, %v13030_v23 }
 0x6b5   : > { %7823 = vst.msk [vmem:[%s13176_s7 + $0x38] sm:$0xff] %vm7815_vm12, %v7790_v62 }
 0x6b7   : > { %v13245_v30 = vpop.f32.mrf.mxu3  ;;  %v7723_v7 = vpop.f32.mrf.mxu2 }
 0x6b8   : > { %v7634_v56 = vpop.f32.mrf.mxu0 }
 0x6b9   : > { %v13243_v59 = vpop.f32.mrf.mxu1  ;;  %v7724_v39 = vadd.f32 %v7723_v7, %v7634_v56  ;;  %v4929_v52 = vpop.permute.xlu2 %4928  ;;  %v7469_v7 = vadd.f32 %v7406_v63, %v13043_v35 }
 0x6ba   : > { %v5460_v6 = vsel %vm14021_vm8, %v5395_v10, %v4929_v52  ;;  %v5308_v57 = vpop.permute.xlu1 %5307  ;;  %v4688_v28 = vpop.permute.xlu0 %4687 }
 0x6bb   : > { %v7791_v1 = vadd.f32 %v7724_v39, %v7466_v42  ;;  %v7409_v39 = vadd.f32 %v13228_v0, %v13230_v50  ;;  %v7411_v0 = vadd.f32 %v13245_v30, %v13243_v59 }
 0x6bc   : > { %9007 = vmatmul.msk.bf16.gmra.mxu3 %vm13973_vm0, %v5572_v51 }
 0x6bd   : > { %7824 = vst.msk [vmem:[%s13176_s7 + $0x40] sm:$0xff] %vm7815_vm12, %v7791_v1  ;;  %v7470_v10 = vadd.f32 %v7409_v39, %v13050_v55  ;;  %v7471_v55 = vadd.f32 %v7411_v0, %v13062_v4  ;;  %v14030_v4 = vld [vmem:[#allocation40_spill] sm:$0xff] }
 0x6bf   : > { %v7725_v24 = vpop.f32.mrf.mxu2  ;;  %v7413_v13 = vpop.f32.mrf.mxu3 }
 0x6c0   : > { %v7636_v2 = vpop.f32.mrf.mxu0 }
 0x6c1   : > { %7678 = vmatmul.bf16.gmra.mxu0 %v13054_v34  ;;  %v7324_v15 = vpop.f32.mrf.mxu1  ;;  %v7726_v25 = vadd.f32 %v7725_v24, %v7636_v2  ;;  %v14022_v34 = vld [vmem:[#allocation31_spill] sm:$0xff]  ;;  %v4578_v54 = vpop.permute.xlu2 %4577 }
 0x6c2   : > { %9106 = vmatmul.msk.bf16.gmra.mxu2 %vm14020_vm6, %v5572_v51  ;;  %v4997_v11 = vrot.slane %v14022_v34, 2  ;;  %v5353_v12 = vsel %vm14027_vm9, %v9316_v40, %v4578_v54  ;;  %v4931_v2 = vpop.permute.xlu1 %4930 }
 0x6c3   : > { %v7792_v31 = vadd.f32 %v7726_v25, %v7467_v43  ;;  %v5397_v35 = vsel %vm14028_vm11, %v5353_v12, %v4688_v28 }
 0x6c4   : > { %7363 = vmatmul.bf16.gmra.mxu1 %v5460_v6  ;;  %v4998_v62 = vsel %vm14023_vm15, %v4996_v20, %v4997_v11  ;;  %v7414_v11 = vadd.f32 %v7413_v13, %v7324_v15 }
 0x6c5   : > { %7825 = vst.msk [vmem:[%s13176_s7 + $0x48] sm:$0xff] %vm7815_vm12, %v7792_v31  ;;  %v5530_v58 = vsel %vm14024_vm14, %v4998_v62, %v5197_v53 }
 0x6c6   : > { %v5574_v36 = vsel %vm14025_vm13, %v5530_v58, %v5308_v57  ;;  %v7472_v30 = vadd.f32 %v7414_v11, %v13068_v47 }
 0x6c7   : > { %v7728_v27 = vpop.f32.mrf.mxu2  ;;  %v7415_v49 = vpop.f32.mrf.mxu3 }
 0x6c8   : > { %v7639_v22 = vpop.f32.mrf.mxu0 }
 0x6c9   : > { %v7326_v29 = vpop.f32.mrf.mxu1  ;;  %v7729_v9 = vadd.f32 %v7728_v27, %v7639_v22 }
 0x6cb   : > { %v7793_v32 = vadd.f32 %v7729_v9, %v7468_v33  ;;  %v7416_v33 = vadd.f32 %v7415_v49, %v7326_v29 }
 0x6cd   : > { %7826 = vst.msk [vmem:[%s13176_s7 + $0x50] sm:$0xff] %vm7815_vm12, %v7793_v32  ;;  %v7473_v58 = vadd.f32 %v7416_v33, %v14030_v4 }
 0x6cf   : > { %v7730_v23 = vpop.f32.mrf.mxu2  ;;  %v7418_v17 = vpop.f32.mrf.mxu3 }
 0x6d0   : > { %v7641_v41 = vpop.f32.mrf.mxu0 }
 0x6d1   : > { %7683 = vmatmul.bf16.gmra.mxu0 %v5460_v6  ;;  %v7731_v56 = vadd.f32 %v7730_v23, %v7641_v41  ;;  %v7329_v51 = vpop.f32.mrf.mxu1  ;;  %v5463_v6 = vsel %vm14029_vm10, %v5397_v35, %v4931_v2  ;;  %v14031_v23 = vld [vmem:[#allocation39_spill] sm:$0xff] }
 0x6d2   : > { %9107 = vmatmul.msk.bf16.gmra.mxu2 %vm14026_vm7, %v5574_v36  ;;  %v7419_v63 = vadd.f32 %v7418_v17, %v7329_v51 }
 0x6d3   : > { %v7794_v42 = vadd.f32 %v7731_v56, %v7469_v7 }
 0x6d4   : > { %v7474_v41 = vadd.f32 %v7419_v63, %v14031_v23 }
 0x6d5   : > { %7827 = vst.msk [vmem:[%s13176_s7 + $0x58] sm:$0xff] %vm7815_vm12, %v7794_v42 }
 0x6d7   : > { %v7733_v1 = vpop.f32.mrf.mxu2  ;;  %v7420_v43 = vpop.f32.mrf.mxu3 }
 0x6d8   : > { %v7644_v26 = vpop.f32.mrf.mxu0 }
 0x6d9   : > { %v7734_v52 = vadd.f32 %v7733_v1, %v7644_v26  ;;  %v7331_v50 = vpop.f32.mrf.mxu1 }
 0x6da   : > { %v7421_v56 = vadd.f32 %v7420_v43, %v7331_v50 }
 0x6db   : > { %v7795_v24 = vadd.f32 %v7734_v52, %v7470_v10 }
 0x6dc   : > { %v7475_v28 = vadd.f32 %v7421_v56, %v13088_v14 }
 0x6dd   : > { %7828 = vst.msk [vmem:[%s13176_s7 + $0x60] sm:$0xff] %vm7815_vm12, %v7795_v24 }
 0x6df   : > { %v7735_v25 = vpop.f32.mrf.mxu2  ;;  %v7423_v20 = vpop.f32.mrf.mxu3 }
 0x6e0   : > { %v7646_v31 = vpop.f32.mrf.mxu0 }
 0x6e1   : > { %7688 = vmatmul.bf16.gmra.mxu0 %v5463_v6  ;;  %v7736_v60 = vadd.f32 %v7735_v25, %v7646_v31  ;;  %v7334_v53 = vpop.f32.mrf.mxu1 }
 0x6e2   : > { %v7424_v1 = vadd.f32 %v7423_v20, %v7334_v53 }
 0x6e3   : > { %v7796_v34 = vadd.f32 %v7736_v60, %v7471_v55 }
 0x6e4   : > { %v7476_v35 = vadd.f32 %v7424_v1, %v13093_v61 }
 0x6e5   : > { %7829 = vst.msk [vmem:[%s13176_s7 + $0x68] sm:$0xff] %vm7815_vm12, %v7796_v34 }
 0x6e7   : > { %v7738_v40 = vpop.f32.mrf.mxu2  ;;  %v7425_v32 = vpop.f32.mrf.mxu3 }
 0x6e8   : > { %v7649_v59 = vpop.f32.mrf.mxu0 }
 0x6e9   : > { %v7739_v27 = vadd.f32 %v7738_v40, %v7649_v59  ;;  %v7336_v15 = vpop.f32.mrf.mxu1 }
 0x6ea   : > { %v7426_v0 = vadd.f32 %v7425_v32, %v7336_v15 }
 0x6eb   : > { %v7797_v22 = vadd.f32 %v7739_v27, %v7472_v30 }
 0x6ec   : > { %v7477_v43 = vadd.f32 %v7426_v0, %v13100_v18 }
 0x6ed   : > { %7830 = vst.msk [vmem:[%s13176_s7 + $0x70] sm:$0xff] %vm7815_vm12, %v7797_v22 }
 0x6ef   : > { %v7740_v9 = vpop.f32.mrf.mxu2  ;;  %v7428_v42 = vpop.f32.mrf.mxu3 }
 0x6f0   : > { %v7651_v62 = vpop.f32.mrf.mxu0 }
 0x6f1   : > { %v7741_v13 = vadd.f32 %v7740_v9, %v7651_v62  ;;  %v7339_v49 = vpop.f32.mrf.mxu1 }
 0x6f2   : > { %v7429_v60 = vadd.f32 %v7428_v42, %v7339_v49 }
 0x6f3   : > { %v7798_v57 = vadd.f32 %v7741_v13, %v7473_v58 }
 0x6f4   : > { %v7478_v61 = vadd.f32 %v7429_v60, %v13105_v8 }
 0x6f5   : > { %7831 = vst.msk [vmem:[%s13176_s7 + $0x78] sm:$0xff] %vm7815_vm12, %v7798_v57 }
 0x6f7   : > { %v7743_v36 = vpop.f32.mrf.mxu2  ;;  %v7430_v12 = vpop.f32.mrf.mxu3 }
 0x6f8   : > { %v7654_v47 = vpop.f32.mrf.mxu0 }
 0x6f9   : > { %v7744_v29 = vadd.f32 %v7743_v36, %v7654_v47  ;;  %v7341_v26 = vpop.f32.mrf.mxu1 }
 0x6fa   : > { %v7431_v20 = vadd.f32 %v7430_v12, %v7341_v26 }
 0x6fb   : > { %v7799_v7 = vadd.f32 %v7744_v29, %v7474_v41 }
 0x6fc   : > { %v7479_v22 = vadd.f32 %v7431_v20, %v13112_v3 }
 0x6fd   : > { %7832 = vst.msk [vmem:[%s13176_s7 + $0x80] sm:$0xff] %vm7815_vm12, %v7799_v7 }
 0x6ff   : > { %v7745_v39 = vpop.f32.mrf.mxu2  ;;  %v7433_v25 = vpop.f32.mrf.mxu3 }
 0x700   : > { %v7656_v54 = vpop.f32.mrf.mxu0 }
 0x701   : > { %v7746_v51 = vadd.f32 %v7745_v39, %v7656_v54  ;;  %v7344_v50 = vpop.f32.mrf.mxu1 }
 0x702   : > { %v7434_v4 = vadd.f32 %v7433_v25, %v7344_v50 }
 0x703   : > { %v7800_v17 = vadd.f32 %v7746_v51, %v7475_v28 }
 0x704   : > { %v7480_v13 = vadd.f32 %v7434_v4, %v13117_v21 }
 0x705   : > { %7833 = vst.msk [vmem:[%s13176_s7 + $0x88] sm:$0xff] %vm7815_vm12, %v7800_v17 }
 0x707   : > { %v7748_v10 = vpop.f32.mrf.mxu2  ;;  %v7435_v59 = vpop.f32.mrf.mxu3 }
 0x708   : > { %v7659_v52 = vpop.f32.mrf.mxu0 }
 0x709   : > { %v7749_v24 = vadd.f32 %v7748_v10, %v7659_v52  ;;  %v7346_v53 = vpop.f32.mrf.mxu1 }
 0x70a   : > { %v7436_v63 = vadd.f32 %v7435_v59, %v7346_v53 }
 0x70b   : > { %v7801_v2 = vadd.f32 %v7749_v24, %v7476_v35 }
 0x70c   : > { %v7481_v41 = vadd.f32 %v7436_v63, %v13124_v45 }
 0x70d   : > { %7834 = vst.msk [vmem:[%s13176_s7 + $0x90] sm:$0xff] %vm7815_vm12, %v7801_v2 }
 0x70f   : > { %v7750_v6 = vpop.f32.mrf.mxu2  ;;  %v7438_v58 = vpop.f32.mrf.mxu3 }
 0x710   : > { %v7661_v14 = vpop.f32.mrf.mxu0 }
 0x711   : > { %v7751_v31 = vadd.f32 %v7750_v6, %v7661_v14  ;;  %v7349_v9 = vpop.f32.mrf.mxu1 }
 0x712   : > { %v7439_v7 = vadd.f32 %v7438_v58, %v7349_v9 }
 0x713   : > { %v7802_v55 = vadd.f32 %v7751_v31, %v7477_v43 }
 0x714   : > { %v7482_v39 = vadd.f32 %v7439_v7, %v13129_v46 }
 0x715   : > { %7835 = vst.msk [vmem:[%s13176_s7 + $0x98] sm:$0xff] %vm7815_vm12, %v7802_v55 }
 0x717   : > { %v7753_v34 = vpop.f32.mrf.mxu2  ;;  %v7440_v47 = vpop.f32.mrf.mxu3 }
 0x718   : > { %v7664_v11 = vpop.f32.mrf.mxu0 }
 0x719   : > { %v7754_v40 = vadd.f32 %v7753_v34, %v7664_v11  ;;  %v7351_v36 = vpop.f32.mrf.mxu1 }
 0x71a   : > { %v7441_v17 = vadd.f32 %v7440_v47, %v7351_v36 }
 0x71b   : > { %v7803_v30 = vadd.f32 %v7754_v40, %v7478_v61 }
 0x71c   : > { %v7483_v45 = vadd.f32 %v7441_v17, %v13136_v5 }
 0x71d   : > { %7836 = vst.msk [vmem:[%s13176_s7 + $0xa0] sm:$0xff] %vm7815_vm12, %v7803_v30 }
 0x71f   : > { %v7755_v27 = vpop.f32.mrf.mxu2  ;;  %v7443_v54 = vpop.f32.mrf.mxu3 }
 0x720   : > { %v7666_v18 = vpop.f32.mrf.mxu0 }
 0x721   : > { %v7756_v33 = vadd.f32 %v7755_v27, %v7666_v18  ;;  %v7354_v56 = vpop.f32.mrf.mxu1 }
 0x722   : > { %v7444_v24 = vadd.f32 %v7443_v54, %v7354_v56 }
 0x723   : > { %v7804_v62 = vadd.f32 %v7756_v33, %v7479_v22 }
 0x724   : > { %v7484_v0 = vadd.f32 %v7444_v24, %v13141_v16 }
 0x725   : > { %7837 = vst.msk [vmem:[%s13176_s7 + $0xa8] sm:$0xff] %vm7815_vm12, %v7804_v62 }
 0x727   : > { %v7758_v8 = vpop.f32.mrf.mxu2  ;;  %v7445_v52 = vpop.f32.mrf.mxu3 }
 0x728   : > { %v7669_v15 = vpop.f32.mrf.mxu0 }
 0x729   : > { %v7759_v32 = vadd.f32 %v7758_v8, %v7669_v15  ;;  %v7356_v12 = vpop.f32.mrf.mxu1 }
 0x72a   : > { %v7446_v43 = vadd.f32 %v7445_v52, %v7356_v12 }
 0x72b   : > { %v7805_v57 = vadd.f32 %v7759_v32, %v7480_v13 }
 0x72c   : > { %v7485_v55 = vadd.f32 %v7446_v43, %v13147_v38 }
 0x72d   : > { %7838 = vst.msk [vmem:[%s13176_s7 + $0xb0] sm:$0xff] %vm7815_vm12, %v7805_v57 }
 0x72f   : > { %v7760_v3 = vpop.f32.mrf.mxu2  ;;  %v7448_v25 = vpop.f32.mrf.mxu3 }
 0x730   : > { %v7671_v23 = vpop.f32.mrf.mxu0 }
 0x731   : > { %v7761_v29 = vadd.f32 %v7760_v3, %v7671_v23  ;;  %v7359_v6 = vpop.f32.mrf.mxu1 }
 0x732   : > { %v7449_v11 = vadd.f32 %v7448_v25, %v7359_v6 }
 0x733   : > { %v7806_v49 = vadd.f32 %v7761_v29, %v7481_v41 }
 0x734   : > { %v7486_v59 = vadd.f32 %v7449_v11, %v13151_v44 }
 0x735   : > { %7839 = vst.msk [vmem:[%s13176_s7 + $0xb8] sm:$0xff] %vm7815_vm12, %v7806_v49 }
 0x737   : > { %v7763_v42 = vpop.f32.mrf.mxu2  ;;  %v7450_v53 = vpop.f32.mrf.mxu3 }
 0x738   : > { %v7674_v21 = vpop.f32.mrf.mxu0 }
 0x739   : > { %v7764_v28 = vadd.f32 %v7763_v42, %v7674_v21  ;;  %v7361_v61 = vpop.f32.mrf.mxu1 }
 0x73a   : > { %v7451_v27 = vadd.f32 %v7450_v53, %v7361_v61 }
 0x73b   : > { %v7807_v51 = vadd.f32 %v7764_v28, %v7482_v39 }
 0x73c   : > { %v7487_v33 = vadd.f32 %v7451_v27, %v13157_v37 }
 0x73d   : > { %7840 = vst.msk [vmem:[%s13176_s7 + $0xc0] sm:$0xff] %vm7815_vm12, %v7807_v51 }
 0x73f   : > { %v7765_v1 = vpop.f32.mrf.mxu2  ;;  %v7453_v62 = vpop.f32.mrf.mxu3 }
 0x740   : > { %v7676_v26 = vpop.f32.mrf.mxu0 }
 0x741   : > { %v7766_v10 = vadd.f32 %v7765_v1, %v7676_v26  ;;  %v7364_v18 = vpop.f32.mrf.mxu1 }
 0x742   : > { %v7454_v58 = vadd.f32 %v7453_v62, %v7364_v18 }
 0x743   : > { %v7808_v35 = vadd.f32 %v7766_v10, %v7483_v45 }
 0x744   : > { %v7488_v15 = vadd.f32 %v7454_v58, %v13161_v48 }
 0x745   : > { %7841 = vst.msk [vmem:[%s13176_s7 + $0xc8] sm:$0xff] %vm7815_vm12, %v7808_v35 }
 0x747   : > { %v7768_v2 = vpop.f32.mrf.mxu2  ;;  %v7455_v63 = vpop.f32.mrf.mxu3 }
 0x748   : > { %v7679_v46 = vpop.f32.mrf.mxu0 }
 0x749   : > { %v7769_v50 = vadd.f32 %v7768_v2, %v7679_v46  ;;  %v7366_v32 = vpop.f32.mrf.mxu1 }
 0x74a   : > { %v7456_v36 = vadd.f32 %v7455_v63, %v7366_v32 }
 0x74b   : > { %v7809_v14 = vadd.f32 %v7769_v50, %v7484_v0 }
 0x74c   : > { %v7489_v3 = vadd.f32 %v7456_v36, %v13167_v19 }
 0x74d   : > { %7842 = vst.msk [vmem:[%s13176_s7 + $0xd0] sm:$0xff] %vm7815_vm12, %v7809_v14 }
 0x74f   : > { %v7770_v5 = vpop.f32.mrf.mxu2 }
 0x750   : > { %v7681_v31 = vpop.f32.mrf.mxu0 }
 0x751   : > { %v7771_v60 = vadd.f32 %v7770_v5, %v7681_v31 }
 0x753   : > { %v7810_v34 = vadd.f32 %v7771_v60, %v7485_v55 }
 0x755   : > { %7843 = vst.msk [vmem:[%s13176_s7 + $0xd8] sm:$0xff] %vm7815_vm12, %v7810_v34 }
 0x757   : > { %v7773_v16 = vpop.f32.mrf.mxu2 }
 0x758   : > { %v7684_v40 = vpop.f32.mrf.mxu0 }
 0x759   : > { %v7774_v30 = vadd.f32 %v7773_v16, %v7684_v40 }
 0x75b   : > { %v7811_v20 = vadd.f32 %v7774_v30, %v7486_v59 }
 0x75d   : > { %7844 = vst.msk [vmem:[%s13176_s7 + $0xe0] sm:$0xff] %vm7815_vm12, %v7811_v20 }
 0x75f   : > { %v7775_v22 = vpop.f32.mrf.mxu2 }
 0x760   : > { %v7686_v38 = vpop.f32.mrf.mxu0 }
 0x761   : > { %v7776_v9 = vadd.f32 %v7775_v22, %v7686_v38 }
 0x763   : > { %v7812_v4 = vadd.f32 %v7776_v9, %v7487_v33 }
 0x765   : > { %7845 = vst.msk [vmem:[%s13176_s7 + $0xe8] sm:$0xff] %vm7815_vm12, %v7812_v4 }
 0x767   : > { %v7778_v8 = vpop.f32.mrf.mxu2 }
 0x768   : > { %v7689_v44 = vpop.f32.mrf.mxu0 }
 0x769   : > { %v7779_v13 = vadd.f32 %v7778_v8, %v7689_v44 }
 0x76b   : > { %v7813_v57 = vadd.f32 %v7779_v13, %v7488_v15 }
 0x76d   : > { %7846 = vst.msk [vmem:[%s13176_s7 + $0xf0] sm:$0xff] %vm7815_vm12, %v7813_v57 }
 0x76f   : > { %v7780_v47 = vpop.f32.mrf.mxu2 }
 0x770   : > { %v7691_v37 = vpop.f32.mrf.mxu0 }
 0x771   : > { %v7781_v23 = vadd.f32 %v7780_v47, %v7691_v37 }
 0x773   : > { %v7814_v41 = vadd.f32 %v7781_v23, %v7489_v3 }
 0x775   : > { %7847 = vst.msk [vmem:[%s13176_s7 + $0xf8] sm:$0xff] %vm7815_vm12, %v7814_v41 }
 0x776 PF: > { %s13_s12 = sadd.s32 1, %s9323_s12  }
 0x777   : > { %p10_p4 = scmp.ge.s32.totalorder %s13_s12, 4  }
 0x779   :  { %12 = sbr.rel (!%p10_p4) target bundleno = 1 (0x1), region = 78 }

</bundles_post_ra>
